<compile_context>
chip_gen: v7x
topology: tpu7x:2x2x1
jax: 0.10.0
libtpu: 0.0.40
codegen_flags: <defaults>
</compile_context>

<pallas_src>
import functools
import math

import numpy as np
import jax
import jax.numpy as jnp
from jax.experimental import pallas as pl
from jax.experimental.pallas import tpu as pltpu


# ----------------------------------------------------------------------------
# In-kernel building blocks (values are in (C, L) layout, L = images * H*W)
# ----------------------------------------------------------------------------
def _conv3x3_bn_tanh(x, w, b, tap_masks, width, chunk):
    """x: (Cin_p, L).  w: (Cout_p, 9*Cin_p) with BN scale folded in.
    tap_masks: (9, chunk) zero-padding masks (periodic per image).
    The lane axis is processed in `chunk`-wide pieces (whole images, multiple
    of 128) so the (9*Cin_p, chunk) patches slab stays ~vreg-sized."""
    _, L = x.shape
    rows = [tap_masks[i:i + 1, :] for i in range(9)]     # hoisted out of chunk loop
    cols = []
    for c0 in range(0, L, chunk):
        xs = x[:, c0:c0 + chunk]
        taps = []
        for idx in range(9):
            dy, dx = idx // 3 - 1, idx % 3 - 1
            d = dy * width + dx
            if d == 0:
                taps.append(xs)                          # centre tap: mask is all ones
            else:
                t = pltpu.roll(xs, shift=(-d) % chunk, axis=1)
                taps.append(t * rows[idx])               # zero out-of-bounds taps
        patches = jnp.concatenate(taps, axis=0)          # (9*Cin_p, chunk)
        cols.append(jnp.dot(w, patches, preferred_element_type=jnp.float32))
    acc = cols[0] if len(cols) == 1 else jnp.concatenate(cols, axis=1)
    return jnp.tanh(acc + b)


def _l2norm_mask_tanh_pool(m, att, pool, chunk):
    """F.normalize(att) over channels (eps=1e-12), masked = tanh(m*norm), then
    AvgPool2d(2,2) as a chunked matmul against a small block-diagonal
    (chunk, chunk/4) 0.25-matrix (one block per image inside the chunk)."""
    sumsq = jnp.sum(att * att, axis=0, keepdims=True)        # (1, L) sublane reduce
    inv = jax.lax.rsqrt(jnp.maximum(sumsq, 1e-24))           # == 1 / max(||a||, 1e-12)
    masked = jnp.tanh(m * (att * inv))
    _, L = m.shape
    cols = [jnp.dot(masked[:, c0:c0 + chunk], pool, preferred_element_type=jnp.float32)
            for c0 in range(0, L, chunk)]
    return cols[0] if len(cols) == 1 else jnp.concatenate(cols, axis=1)


def _fused_kernel(x_ref, a1_ref, a2_ref,
                  w1_ref, b1_ref, w2_ref, b2_ref,
                  w3_ref, b3_ref, w4_ref, b4_ref,
                  pmf_ref, pmh_ref, poolf_ref, poolh_ref, o_ref,
                  *, width_full, width_half, chunk_full, chunk_half):
    pmf, pmh = pmf_ref[...], pmh_ref[...]
    m1 = _conv3x3_bn_tanh(x_ref[...], w1_ref[...], b1_ref[...], pmf, width_full, chunk_full)
    m2 = _conv3x3_bn_tanh(m1, w2_ref[...], b2_ref[...], pmf, width_full, chunk_full)
    # TODO(synk): Dropout2d(p=0.5) is identity at inference; training-mode channel dropout not implemented.
    m4 = _l2norm_mask_tanh_pool(m2, a1_ref[...], poolf_ref[...], chunk_full)
    m5 = _conv3x3_bn_tanh(m4, w3_ref[...], b3_ref[...], pmh, width_half, chunk_half)
    m6 = _conv3x3_bn_tanh(m5, w4_ref[...], b4_ref[...], pmh, width_half, chunk_half)
    o_ref[...] = _l2norm_mask_tanh_pool(m6, a2_ref[...], poolh_ref[...], chunk_half)


# ----------------------------------------------------------------------------
# Host-side constant builders (compile-time constants, no data files)
# ----------------------------------------------------------------------------
def _tap_masks(h, w, images):
    """(9, images*h*w) zero-padding masks, one row per 3x3 tap, tiled per image."""
    hw = h * w
    m = np.zeros((9, images * hw), np.float32)
    for idx in range(9):
        dy, dx = idx // 3 - 1, idx % 3 - 1
        ys, xs = np.arange(h) + dy, np.arange(w) + dx
        valid = (((ys >= 0) & (ys < h))[:, None]
                 & ((xs >= 0) & (xs < w))[None, :]).astype(np.float32)
        m[idx] = np.tile(valid.reshape(hw), images)
    return jnp.asarray(m)


def _pool_matrix(h, w, images):
    """(images*h*w, images*(h//2)*(w//2)) block-diagonal AvgPool2d(2,2) matrix."""
    hw, ho, wo = h * w, h // 2, w // 2
    hwo = ho * wo
    p = np.zeros((images * hw, images * hwo), np.float32)
    for b in range(images):
        for y in range(h):
            for x in range(w):
                p[b * hw + y * w + x, b * hwo + (y // 2) * wo + x // 2] = 0.25
    return jnp.asarray(p)


def _round_up8(c):
    return -(-c // 8) * 8


def _pick_chunk(l_total, hw, k_rows, budget_bytes=160 * 1024):
    """Largest lane chunk that (a) is a multiple of hw (roll wrap == image
    boundary) and of 128 (aligned slices / lane-dense matmul N), (b) divides
    l_total, (c) keeps the (k_rows, chunk) f32 patches slab under budget."""
    chunk = (hw * 128) // math.gcd(hw, 128)          # lcm(hw, 128)
    if chunk > l_total or l_total % chunk != 0:
        return l_total
    while (chunk * 2 <= l_total and l_total % (chunk * 2) == 0
           and k_rows * (chunk * 2) * 4 <= budget_bytes):
        chunk *= 2
    return chunk


def _const_spec(arr, single_buffer):
    imap = lambda g: (0, 0)
    if single_buffer:
        try:   # constant index_map -> double-buffering buys nothing; halve its VMEM
            return pl.BlockSpec(arr.shape, imap, pipeline_mode=pl.Buffered(1))
        except (AttributeError, TypeError):
            pass
    return pl.BlockSpec(arr.shape, imap)


# ----------------------------------------------------------------------------
# Full forward (NCHW in / NCHW out, like the PyTorch module)
# ----------------------------------------------------------------------------
def motion_model_2d_forward(inputs_nchw, att1_nchw, att2_nchw, params, *,
                            single_buffer_consts=True):
    x = inputs_nchw.astype(jnp.float32)
    a1 = att1_nchw.astype(jnp.float32)
    a2 = att2_nchw.astype(jnp.float32)

    B, Cin, H, W = x.shape
    C1 = params["w1"].shape[0]              # out_channels
    C2 = params["w3"].shape[0]              # 2 * out_channels
    assert H % 4 == 0 and W % 4 == 0
    H2, W2, H4, W4 = H // 2, W // 2, H // 4, W // 4
    HW1, HW2, HW4 = H * W, H2 * W2, H4 * W4
    Cin_p, C1p, C2p = _round_up8(Cin), _round_up8(C1), _round_up8(C2)

    # ---- batch-into-lanes packing: images per grid block --------------------
    if B % 2 == 0 and (B // 2) * HW4 >= 128:
        b_blk = B // 2      # grid of 2 (both v7x TCs busy) AND >=128-lane final store
    else:
        b_blk = B           # fall back to one lane-dense block
    n_blk = B // b_blk

    # ---- lane chunks (keep (9*Cin, chunk) patches slab ~vreg-sized) ---------
    chunk_full = _pick_chunk(b_blk * HW1, HW1, 9 * max(Cin_p, C1p))
    chunk_half = _pick_chunk(b_blk * HW2, HW2, 9 * max(C1p, C2p))

    # ---- fold BN scale into conv weights; pad channels to sublane multiples --
    def prep(w, scale, bias, cin_p, cout_p):
        wf = w * scale[:, None, None, None]
        wf = jnp.pad(wf, ((0, cout_p - w.shape[0]), (0, cin_p - w.shape[1]),
                          (0, 0), (0, 0)))
        wf = jnp.transpose(wf, (0, 2, 3, 1)).reshape(cout_p, 9 * cin_p)  # tap-major
        bf = jnp.pad(bias, (0, cout_p - bias.shape[0])).reshape(cout_p, 1)
        return wf, bf

    w1f, b1f = prep(params["w1"], params["s1"], params["b1"], Cin_p, C1p)
    w2f, b2f = prep(params["w2"], params["s2"], params["b2"], C1p, C1p)
    w3f, b3f = prep(params["w3"], params["s3"], params["b3"], C1p, C2p)
    w4f, b4f = prep(params["w4"], params["s4"], params["b4"], C2p, C2p)

    # ---- activations: NCHW -> (C, B*HW), one wrapper transpose, lane-dense ---
    def pack(t, c, c_p, hw):
        t = t.reshape(B, c, hw).transpose(1, 0, 2).reshape(c, B * hw)
        return jnp.pad(t, ((0, c_p - c), (0, 0)))

    x_f = pack(x, Cin, Cin_p, HW1)
    a1_f = pack(a1, C1, C1p, HW1)
    a2_f = pack(a2, C2, C2p, HW2)

    # ---- small constants: per-tap border masks + per-chunk pool matrices -----
    pm_full = _tap_masks(H, W, chunk_full // HW1)
    pm_half = _tap_masks(H2, W2, chunk_half // HW2)
    pool_full = _pool_matrix(H, W, chunk_full // HW1)
    pool_half = _pool_matrix(H2, W2, chunk_half // HW2)

    consts = (w1f, b1f, w2f, b2f, w3f, b3f, w4f, b4f,
              pm_full, pm_half, pool_full, pool_half)

    # ---- VMEM limit sized from actual usage + cost estimate ------------------
    const_bytes = sum(int(np.prod(c.shape)) * 4 for c in consts)
    blk_bytes = 4 * b_blk * ((Cin_p + C1p) * HW1 + C2p * HW2 + C2p * HW4)
    vmem_limit = int(min(64 << 20, const_bytes + 2 * blk_bytes + (16 << 20)))

    flops = 2 * B * (HW1 * 9 * Cin_p * C1p + HW1 * 9 * C1p * C1p
                     + HW2 * 9 * C1p * C2p + HW2 * 9 * C2p * C2p
                     + HW1 * C1p * (chunk_full // 4) + HW2 * C2p * (chunk_half // 4))
    trans = B * (3 * HW1 * C1p + 3 * HW2 * C2p + HW1 + HW2)
    bytes_acc = 4 * (x_f.size + a1_f.size + a2_f.size + C2p * B * HW4) + const_bytes

    block = lambda c_p, lanes: pl.BlockSpec((c_p, lanes), lambda g: (0, g))

    out = pl.pallas_call(
        functools.partial(_fused_kernel, width_full=W, width_half=W2,
                          chunk_full=chunk_full, chunk_half=chunk_half),
        out_shape=jax.ShapeDtypeStruct((C2p, B * HW4), jnp.float32),
        grid=(n_blk,),
        in_specs=[block(Cin_p, b_blk * HW1), block(C1p, b_blk * HW1),
                  block(C2p, b_blk * HW2)]
                 + [_const_spec(c, single_buffer_consts) for c in consts],
        out_specs=block(C2p, b_blk * HW4),
        compiler_params=pltpu.CompilerParams(
            dimension_semantics=("parallel",), vmem_limit_bytes=vmem_limit),
        cost_estimate=pl.CostEstimate(flops=int(flops), transcendentals=int(trans),
                                      bytes_accessed=int(bytes_acc)),
    )(x_f, a1_f, a2_f, *consts)

    out = out[:C2].reshape(C2, B, HW4).transpose(1, 0, 2)
    return out.reshape(B, C2, H4, W4)


# ----------------------------------------------------------------------------
# Deterministic parameter init (conv weights/bias + eval-mode BN, pre-folded)
# ----------------------------------------------------------------------------
def init_params(key, in_ch, out_ch):
    def conv_bn(k, cin, cout):
        kw, kb, kg, kbe, km, kv = jax.random.split(k, 6)
        w = 0.1 * jax.random.normal(kw, (cout, cin, 3, 3), jnp.float32)
        conv_b = 0.1 * jax.random.normal(kb, (cout,), jnp.float32)
        gamma = 1.0 + 0.1 * jax.random.normal(kg, (cout,), jnp.float32)
        beta = 0.1 * jax.random.normal(kbe, (cout,), jnp.float32)
        mean = 0.1 * jax.random.normal(km, (cout,), jnp.float32)
        var = 1.0 + 0.1 * jnp.abs(jax.random.normal(kv, (cout,), jnp.float32))
        scale = gamma / jnp.sqrt(var + 1e-5)
        bias = (conv_b - mean) * scale + beta
        return w, scale, bias

    k1, k2, k3, k4 = jax.random.split(key, 4)
    w1, s1, b1 = conv_bn(k1, in_ch, out_ch)
    w2, s2, b2 = conv_bn(k2, out_ch, out_ch)
    w3, s3, b3 = conv_bn(k3, out_ch, 2 * out_ch)
    w4, s4, b4 = conv_bn(k4, 2 * out_ch, 2 * out_ch)
    return dict(w1=w1, s1=s1, b1=b1, w2=w2, s2=s2, b2=b2,
                w3=w3, s3=s3, b3=b3, w4=w4, s4=s4, b4=b4)


# ----------------------------------------------------------------------------
# Pure-JAX reference for correctness check
# ----------------------------------------------------------------------------
def ref_forward(x_nchw, att1_nchw, att2_nchw, params):
    x = x_nchw.astype(jnp.float32)
    a1 = att1_nchw.astype(jnp.float32)
    a2 = att2_nchw.astype(jnp.float32)

    def conv_ref(xi, w, scale, bias):
        y = jax.lax.conv_general_dilated(
            xi, w, window_strides=(1, 1), padding=((1, 1), (1, 1)),
            dimension_numbers=("NCHW", "OIHW", "NCHW"))
        return jnp.tanh(y * scale[None, :, None, None]
                        + bias[None, :, None, None])

    def mp_ref(m, a):
        n = jnp.sqrt(jnp.sum(a * a, axis=1, keepdims=True))
        masked = jnp.tanh(m * (a / jnp.maximum(n, 1e-12)))
        B, C, H, W = masked.shape
        return masked.reshape(B, C, H // 2, 2, W // 2, 2).mean(axis=(3, 5))

    m1 = conv_ref(x, params["w1"], params["s1"], params["b1"])
    m2 = conv_ref(m1, params["w2"], params["s2"], params["b2"])
    m4 = mp_ref(m2, a1)
    m5 = conv_ref(m4, params["w3"], params["s3"], params["b3"])
    m6 = conv_ref(m5, params["w4"], params["s4"], params["b4"])
    return mp_ref(m6, a2)


if __name__ == "__main__":
    # B=16 so the batch-in-lanes packing gives two 8-image blocks
    # (128-lane final stores + both v7x TensorCores busy).
    B, Cin, Cout, H, W = 16, 4, 8, 16, 16
    key = jax.random.PRNGKey(0)
    kx, ka1, ka2, kp = jax.random.split(key, 4)
    x = jax.random.normal(kx, (B, Cin, H, W), jnp.float32)
    att1 = jax.random.normal(ka1, (B, Cout, H, W), jnp.float32)
    att2 = jax.random.normal(ka2, (B, 2 * Cout, H // 2, W // 2), jnp.float32)
    params = init_params(kp, Cin, Cout)

    try:
        fwd = jax.jit(motion_model_2d_forward)
        out = jax.block_until_ready(fwd(x, att1, att2, params))
    except Exception:
        # Fallback: drop single-buffering of constants if this JAX version
        # rejects pipeline_mode=pl.Buffered(1); everything else unchanged.
        fwd = jax.jit(functools.partial(motion_model_2d_forward,
                                        single_buffer_consts=False))
        out = jax.block_until_ready(fwd(x, att1, att2, params))

    ref = jax.block_until_ready(ref_forward(x, att1, att2, params))

    assert out.shape == (B, 2 * Cout, H // 4, W // 4), out.shape
    max_err = float(jnp.max(jnp.abs(out - ref)))
    assert max_err < 5e-4, f"max_err={max_err}"
    print("KERNEL_OK")
</pallas_src>

<mosaic_0001>
module attributes {stable_mosaic.version = 11 : i64} {
  func.func @_fused_kernel(%arg0: i32, %arg1: memref<8x2048xf32, #tpu.memory_space<vmem>>, %arg2: memref<8x2048xf32, #tpu.memory_space<vmem>>, %arg3: memref<16x512xf32, #tpu.memory_space<vmem>>, %arg4: memref<8x72xf32, #tpu.memory_space<vmem>>, %arg5: memref<8x1xf32, #tpu.memory_space<vmem>>, %arg6: memref<8x72xf32, #tpu.memory_space<vmem>>, %arg7: memref<8x1xf32, #tpu.memory_space<vmem>>, %arg8: memref<16x72xf32, #tpu.memory_space<vmem>>, %arg9: memref<16x1xf32, #tpu.memory_space<vmem>>, %arg10: memref<16x144xf32, #tpu.memory_space<vmem>>, %arg11: memref<16x1xf32, #tpu.memory_space<vmem>>, %arg12: memref<9x512xf32, #tpu.memory_space<vmem>>, %arg13: memref<9x256xf32, #tpu.memory_space<vmem>>, %arg14: memref<512x128xf32, #tpu.memory_space<vmem>>, %arg15: memref<256x64xf32, #tpu.memory_space<vmem>>, %arg16: memref<16x128xf32, #tpu.memory_space<vmem>>) attributes {dimension_semantics = [#tpu.dimension_semantics<parallel>], iteration_bounds = array<i64: 2>, scalar_prefetch = 0 : i64, scratch_operands = 0 : i64, tpu.core_type = #tpu.core_type<tc>, window_params = [{transform_indices = @transform_0, window_bounds = array<i64: 8, 2048>}, {transform_indices = @transform_1, window_bounds = array<i64: 8, 2048>}, {transform_indices = @transform_2, window_bounds = array<i64: 16, 512>}, {pipeline_mode = #tpu.pipeline_mode<synchronous>, transform_indices = @transform_3, window_bounds = array<i64: 8, 72>}, {pipeline_mode = #tpu.pipeline_mode<synchronous>, transform_indices = @transform_4, window_bounds = array<i64: 8, 1>}, {pipeline_mode = #tpu.pipeline_mode<synchronous>, transform_indices = @transform_5, window_bounds = array<i64: 8, 72>}, {pipeline_mode = #tpu.pipeline_mode<synchronous>, transform_indices = @transform_6, window_bounds = array<i64: 8, 1>}, {pipeline_mode = #tpu.pipeline_mode<synchronous>, transform_indices = @transform_7, window_bounds = array<i64: 16, 72>}, {pipeline_mode = #tpu.pipeline_mode<synchronous>, transform_indices = @transform_8, window_bounds = array<i64: 16, 1>}, {pipeline_mode = #tpu.pipeline_mode<synchronous>, transform_indices = @transform_9, window_bounds = array<i64: 16, 144>}, {pipeline_mode = #tpu.pipeline_mode<synchronous>, transform_indices = @transform_10, window_bounds = array<i64: 16, 1>}, {pipeline_mode = #tpu.pipeline_mode<synchronous>, transform_indices = @transform_11, window_bounds = array<i64: 9, 512>}, {pipeline_mode = #tpu.pipeline_mode<synchronous>, transform_indices = @transform_12, window_bounds = array<i64: 9, 256>}, {pipeline_mode = #tpu.pipeline_mode<synchronous>, transform_indices = @transform_13, window_bounds = array<i64: 512, 128>}, {pipeline_mode = #tpu.pipeline_mode<synchronous>, transform_indices = @transform_14, window_bounds = array<i64: 256, 64>}, {transform_indices = @transform_15, window_bounds = array<i64: 16, 128>}]} {
    %c0 = arith.constant 0 : index
    %c0_0 = arith.constant 0 : index
    %0 = vector.load %arg12[%c0, %c0_0] : memref<9x512xf32, #tpu.memory_space<vmem>>, vector<9x512xf32>
    %c0_1 = arith.constant 0 : index
    %c0_2 = arith.constant 0 : index
    %1 = vector.load %arg13[%c0_1, %c0_2] : memref<9x256xf32, #tpu.memory_space<vmem>>, vector<9x256xf32>
    %c0_3 = arith.constant 0 : index
    %c0_4 = arith.constant 0 : index
    %2 = vector.load %arg1[%c0_3, %c0_4] : memref<8x2048xf32, #tpu.memory_space<vmem>>, vector<8x2048xf32>
    %c0_5 = arith.constant 0 : index
    %c0_6 = arith.constant 0 : index
    %3 = vector.load %arg4[%c0_5, %c0_6] : memref<8x72xf32, #tpu.memory_space<vmem>>, vector<8x72xf32>
    %c0_7 = arith.constant 0 : index
    %c0_8 = arith.constant 0 : index
    %4 = vector.load %arg5[%c0_7, %c0_8] : memref<8x1xf32, #tpu.memory_space<vmem>>, vector<8x1xf32>
    %5 = vector.extract_strided_slice %0 {offsets = [0, 0], sizes = [1, 512], strides = [1, 1]} : vector<9x512xf32> to vector<1x512xf32>
    %6 = vector.extract_strided_slice %0 {offsets = [1, 0], sizes = [1, 512], strides = [1, 1]} : vector<9x512xf32> to vector<1x512xf32>
    %7 = vector.extract_strided_slice %0 {offsets = [2, 0], sizes = [1, 512], strides = [1, 1]} : vector<9x512xf32> to vector<1x512xf32>
    %8 = vector.extract_strided_slice %0 {offsets = [3, 0], sizes = [1, 512], strides = [1, 1]} : vector<9x512xf32> to vector<1x512xf32>
    %9 = vector.extract_strided_slice %0 {offsets = [5, 0], sizes = [1, 512], strides = [1, 1]} : vector<9x512xf32> to vector<1x512xf32>
    %10 = vector.extract_strided_slice %0 {offsets = [6, 0], sizes = [1, 512], strides = [1, 1]} : vector<9x512xf32> to vector<1x512xf32>
    %11 = vector.extract_strided_slice %0 {offsets = [7, 0], sizes = [1, 512], strides = [1, 1]} : vector<9x512xf32> to vector<1x512xf32>
    %12 = vector.extract_strided_slice %0 {offsets = [8, 0], sizes = [1, 512], strides = [1, 1]} : vector<9x512xf32> to vector<1x512xf32>
    %13 = vector.extract_strided_slice %2 {offsets = [0, 0], sizes = [8, 512], strides = [1, 1]} : vector<8x2048xf32> to vector<8x512xf32>
    %c17_i32 = arith.constant 17 : i32
    %14 = tpu.dynamic_rotate %13 by %c17_i32 dim 1 : vector<8x512xf32>, i32 -> vector<8x512xf32>
    %15 = vector.broadcast %5 : vector<1x512xf32> to vector<8x512xf32>
    %16 = arith.mulf %14, %15 : vector<8x512xf32>
    %c16_i32 = arith.constant 16 : i32
    %17 = tpu.dynamic_rotate %13 by %c16_i32 dim 1 : vector<8x512xf32>, i32 -> vector<8x512xf32>
    %18 = vector.broadcast %6 : vector<1x512xf32> to vector<8x512xf32>
    %19 = arith.mulf %17, %18 : vector<8x512xf32>
    %c15_i32 = arith.constant 15 : i32
    %20 = tpu.dynamic_rotate %13 by %c15_i32 dim 1 : vector<8x512xf32>, i32 -> vector<8x512xf32>
    %21 = vector.broadcast %7 : vector<1x512xf32> to vector<8x512xf32>
    %22 = arith.mulf %20, %21 : vector<8x512xf32>
    %c1_i32 = arith.constant 1 : i32
    %23 = tpu.dynamic_rotate %13 by %c1_i32 dim 1 : vector<8x512xf32>, i32 -> vector<8x512xf32>
    %24 = vector.broadcast %8 : vector<1x512xf32> to vector<8x512xf32>
    %25 = arith.mulf %23, %24 : vector<8x512xf32>
    %c511_i32 = arith.constant 511 : i32
    %26 = tpu.dynamic_rotate %13 by %c511_i32 dim 1 : vector<8x512xf32>, i32 -> vector<8x512xf32>
    %27 = vector.broadcast %9 : vector<1x512xf32> to vector<8x512xf32>
    %28 = arith.mulf %26, %27 : vector<8x512xf32>
    %c497_i32 = arith.constant 497 : i32
    %29 = tpu.dynamic_rotate %13 by %c497_i32 dim 1 : vector<8x512xf32>, i32 -> vector<8x512xf32>
    %30 = vector.broadcast %10 : vector<1x512xf32> to vector<8x512xf32>
    %31 = arith.mulf %29, %30 : vector<8x512xf32>
    %c496_i32 = arith.constant 496 : i32
    %32 = tpu.dynamic_rotate %13 by %c496_i32 dim 1 : vector<8x512xf32>, i32 -> vector<8x512xf32>
    %33 = vector.broadcast %11 : vector<1x512xf32> to vector<8x512xf32>
    %34 = arith.mulf %32, %33 : vector<8x512xf32>
    %c495_i32 = arith.constant 495 : i32
    %35 = tpu.dynamic_rotate %13 by %c495_i32 dim 1 : vector<8x512xf32>, i32 -> vector<8x512xf32>
    %36 = vector.broadcast %12 : vector<1x512xf32> to vector<8x512xf32>
    %37 = arith.mulf %35, %36 : vector<8x512xf32>
    %38 = tpu.concatenate %16, %19, %22, %25, %13, %28, %31, %34, %37 in 0 : vector<8x512xf32>, vector<8x512xf32>, vector<8x512xf32>, vector<8x512xf32>, vector<8x512xf32>, vector<8x512xf32>, vector<8x512xf32>, vector<8x512xf32>, vector<8x512xf32> -> vector<72x512xf32>
    %cst = arith.constant dense<0.000000e+00> : vector<8x512xf32>
    %39 = tpu.matmul %3, %38, %cst {dimension_numbers = #tpu.dot_dimension_numbers<[1], [0], [0], [1], [0, 0, 1, 1], [], []>} : vector<8x72xf32>, vector<72x512xf32>, vector<8x512xf32> -> vector<8x512xf32>
    %40 = vector.extract_strided_slice %2 {offsets = [0, 512], sizes = [8, 512], strides = [1, 1]} : vector<8x2048xf32> to vector<8x512xf32>
    %c17_i32_9 = arith.constant 17 : i32
    %41 = tpu.dynamic_rotate %40 by %c17_i32_9 dim 1 : vector<8x512xf32>, i32 -> vector<8x512xf32>
    %42 = vector.broadcast %5 : vector<1x512xf32> to vector<8x512xf32>
    %43 = arith.mulf %41, %42 : vector<8x512xf32>
    %c16_i32_10 = arith.constant 16 : i32
    %44 = tpu.dynamic_rotate %40 by %c16_i32_10 dim 1 : vector<8x512xf32>, i32 -> vector<8x512xf32>
    %45 = vector.broadcast %6 : vector<1x512xf32> to vector<8x512xf32>
    %46 = arith.mulf %44, %45 : vector<8x512xf32>
    %c15_i32_11 = arith.constant 15 : i32
    %47 = tpu.dynamic_rotate %40 by %c15_i32_11 dim 1 : vector<8x512xf32>, i32 -> vector<8x512xf32>
    %48 = vector.broadcast %7 : vector<1x512xf32> to vector<8x512xf32>
    %49 = arith.mulf %47, %48 : vector<8x512xf32>
    %c1_i32_12 = arith.constant 1 : i32
    %50 = tpu.dynamic_rotate %40 by %c1_i32_12 dim 1 : vector<8x512xf32>, i32 -> vector<8x512xf32>
    %51 = vector.broadcast %8 : vector<1x512xf32> to vector<8x512xf32>
    %52 = arith.mulf %50, %51 : vector<8x512xf32>
    %c511_i32_13 = arith.constant 511 : i32
    %53 = tpu.dynamic_rotate %40 by %c511_i32_13 dim 1 : vector<8x512xf32>, i32 -> vector<8x512xf32>
    %54 = vector.broadcast %9 : vector<1x512xf32> to vector<8x512xf32>
    %55 = arith.mulf %53, %54 : vector<8x512xf32>
    %c497_i32_14 = arith.constant 497 : i32
    %56 = tpu.dynamic_rotate %40 by %c497_i32_14 dim 1 : vector<8x512xf32>, i32 -> vector<8x512xf32>
    %57 = vector.broadcast %10 : vector<1x512xf32> to vector<8x512xf32>
    %58 = arith.mulf %56, %57 : vector<8x512xf32>
    %c496_i32_15 = arith.constant 496 : i32
    %59 = tpu.dynamic_rotate %40 by %c496_i32_15 dim 1 : vector<8x512xf32>, i32 -> vector<8x512xf32>
    %60 = vector.broadcast %11 : vector<1x512xf32> to vector<8x512xf32>
    %61 = arith.mulf %59, %60 : vector<8x512xf32>
    %c495_i32_16 = arith.constant 495 : i32
    %62 = tpu.dynamic_rotate %40 by %c495_i32_16 dim 1 : vector<8x512xf32>, i32 -> vector<8x512xf32>
    %63 = vector.broadcast %12 : vector<1x512xf32> to vector<8x512xf32>
    %64 = arith.mulf %62, %63 : vector<8x512xf32>
    %65 = tpu.concatenate %43, %46, %49, %52, %40, %55, %58, %61, %64 in 0 : vector<8x512xf32>, vector<8x512xf32>, vector<8x512xf32>, vector<8x512xf32>, vector<8x512xf32>, vector<8x512xf32>, vector<8x512xf32>, vector<8x512xf32>, vector<8x512xf32> -> vector<72x512xf32>
    %cst_17 = arith.constant dense<0.000000e+00> : vector<8x512xf32>
    %66 = tpu.matmul %3, %65, %cst_17 {dimension_numbers = #tpu.dot_dimension_numbers<[1], [0], [0], [1], [0, 0, 1, 1], [], []>} : vector<8x72xf32>, vector<72x512xf32>, vector<8x512xf32> -> vector<8x512xf32>
    %67 = vector.extract_strided_slice %2 {offsets = [0, 1024], sizes = [8, 512], strides = [1, 1]} : vector<8x2048xf32> to vector<8x512xf32>
    %c17_i32_18 = arith.constant 17 : i32
    %68 = tpu.dynamic_rotate %67 by %c17_i32_18 dim 1 : vector<8x512xf32>, i32 -> vector<8x512xf32>
    %69 = vector.broadcast %5 : vector<1x512xf32> to vector<8x512xf32>
    %70 = arith.mulf %68, %69 : vector<8x512xf32>
    %c16_i32_19 = arith.constant 16 : i32
    %71 = tpu.dynamic_rotate %67 by %c16_i32_19 dim 1 : vector<8x512xf32>, i32 -> vector<8x512xf32>
    %72 = vector.broadcast %6 : vector<1x512xf32> to vector<8x512xf32>
    %73 = arith.mulf %71, %72 : vector<8x512xf32>
    %c15_i32_20 = arith.constant 15 : i32
    %74 = tpu.dynamic_rotate %67 by %c15_i32_20 dim 1 : vector<8x512xf32>, i32 -> vector<8x512xf32>
    %75 = vector.broadcast %7 : vector<1x512xf32> to vector<8x512xf32>
    %76 = arith.mulf %74, %75 : vector<8x512xf32>
    %c1_i32_21 = arith.constant 1 : i32
    %77 = tpu.dynamic_rotate %67 by %c1_i32_21 dim 1 : vector<8x512xf32>, i32 -> vector<8x512xf32>
    %78 = vector.broadcast %8 : vector<1x512xf32> to vector<8x512xf32>
    %79 = arith.mulf %77, %78 : vector<8x512xf32>
    %c511_i32_22 = arith.constant 511 : i32
    %80 = tpu.dynamic_rotate %67 by %c511_i32_22 dim 1 : vector<8x512xf32>, i32 -> vector<8x512xf32>
    %81 = vector.broadcast %9 : vector<1x512xf32> to vector<8x512xf32>
    %82 = arith.mulf %80, %81 : vector<8x512xf32>
    %c497_i32_23 = arith.constant 497 : i32
    %83 = tpu.dynamic_rotate %67 by %c497_i32_23 dim 1 : vector<8x512xf32>, i32 -> vector<8x512xf32>
    %84 = vector.broadcast %10 : vector<1x512xf32> to vector<8x512xf32>
    %85 = arith.mulf %83, %84 : vector<8x512xf32>
    %c496_i32_24 = arith.constant 496 : i32
    %86 = tpu.dynamic_rotate %67 by %c496_i32_24 dim 1 : vector<8x512xf32>, i32 -> vector<8x512xf32>
    %87 = vector.broadcast %11 : vector<1x512xf32> to vector<8x512xf32>
    %88 = arith.mulf %86, %87 : vector<8x512xf32>
    %c495_i32_25 = arith.constant 495 : i32
    %89 = tpu.dynamic_rotate %67 by %c495_i32_25 dim 1 : vector<8x512xf32>, i32 -> vector<8x512xf32>
    %90 = vector.broadcast %12 : vector<1x512xf32> to vector<8x512xf32>
    %91 = arith.mulf %89, %90 : vector<8x512xf32>
    %92 = tpu.concatenate %70, %73, %76, %79, %67, %82, %85, %88, %91 in 0 : vector<8x512xf32>, vector<8x512xf32>, vector<8x512xf32>, vector<8x512xf32>, vector<8x512xf32>, vector<8x512xf32>, vector<8x512xf32>, vector<8x512xf32>, vector<8x512xf32> -> vector<72x512xf32>
    %cst_26 = arith.constant dense<0.000000e+00> : vector<8x512xf32>
    %93 = tpu.matmul %3, %92, %cst_26 {dimension_numbers = #tpu.dot_dimension_numbers<[1], [0], [0], [1], [0, 0, 1, 1], [], []>} : vector<8x72xf32>, vector<72x512xf32>, vector<8x512xf32> -> vector<8x512xf32>
    %94 = vector.extract_strided_slice %2 {offsets = [0, 1536], sizes = [8, 512], strides = [1, 1]} : vector<8x2048xf32> to vector<8x512xf32>
    %c17_i32_27 = arith.constant 17 : i32
    %95 = tpu.dynamic_rotate %94 by %c17_i32_27 dim 1 : vector<8x512xf32>, i32 -> vector<8x512xf32>
    %96 = vector.broadcast %5 : vector<1x512xf32> to vector<8x512xf32>
    %97 = arith.mulf %95, %96 : vector<8x512xf32>
    %c16_i32_28 = arith.constant 16 : i32
    %98 = tpu.dynamic_rotate %94 by %c16_i32_28 dim 1 : vector<8x512xf32>, i32 -> vector<8x512xf32>
    %99 = vector.broadcast %6 : vector<1x512xf32> to vector<8x512xf32>
    %100 = arith.mulf %98, %99 : vector<8x512xf32>
    %c15_i32_29 = arith.constant 15 : i32
    %101 = tpu.dynamic_rotate %94 by %c15_i32_29 dim 1 : vector<8x512xf32>, i32 -> vector<8x512xf32>
    %102 = vector.broadcast %7 : vector<1x512xf32> to vector<8x512xf32>
    %103 = arith.mulf %101, %102 : vector<8x512xf32>
    %c1_i32_30 = arith.constant 1 : i32
    %104 = tpu.dynamic_rotate %94 by %c1_i32_30 dim 1 : vector<8x512xf32>, i32 -> vector<8x512xf32>
    %105 = vector.broadcast %8 : vector<1x512xf32> to vector<8x512xf32>
    %106 = arith.mulf %104, %105 : vector<8x512xf32>
    %c511_i32_31 = arith.constant 511 : i32
    %107 = tpu.dynamic_rotate %94 by %c511_i32_31 dim 1 : vector<8x512xf32>, i32 -> vector<8x512xf32>
    %108 = vector.broadcast %9 : vector<1x512xf32> to vector<8x512xf32>
    %109 = arith.mulf %107, %108 : vector<8x512xf32>
    %c497_i32_32 = arith.constant 497 : i32
    %110 = tpu.dynamic_rotate %94 by %c497_i32_32 dim 1 : vector<8x512xf32>, i32 -> vector<8x512xf32>
    %111 = vector.broadcast %10 : vector<1x512xf32> to vector<8x512xf32>
    %112 = arith.mulf %110, %111 : vector<8x512xf32>
    %c496_i32_33 = arith.constant 496 : i32
    %113 = tpu.dynamic_rotate %94 by %c496_i32_33 dim 1 : vector<8x512xf32>, i32 -> vector<8x512xf32>
    %114 = vector.broadcast %11 : vector<1x512xf32> to vector<8x512xf32>
    %115 = arith.mulf %113, %114 : vector<8x512xf32>
    %c495_i32_34 = arith.constant 495 : i32
    %116 = tpu.dynamic_rotate %94 by %c495_i32_34 dim 1 : vector<8x512xf32>, i32 -> vector<8x512xf32>
    %117 = vector.broadcast %12 : vector<1x512xf32> to vector<8x512xf32>
    %118 = arith.mulf %116, %117 : vector<8x512xf32>
    %119 = tpu.concatenate %97, %100, %103, %106, %94, %109, %112, %115, %118 in 0 : vector<8x512xf32>, vector<8x512xf32>, vector<8x512xf32>, vector<8x512xf32>, vector<8x512xf32>, vector<8x512xf32>, vector<8x512xf32>, vector<8x512xf32>, vector<8x512xf32> -> vector<72x512xf32>
    %cst_35 = arith.constant dense<0.000000e+00> : vector<8x512xf32>
    %120 = tpu.matmul %3, %119, %cst_35 {dimension_numbers = #tpu.dot_dimension_numbers<[1], [0], [0], [1], [0, 0, 1, 1], [], []>} : vector<8x72xf32>, vector<72x512xf32>, vector<8x512xf32> -> vector<8x512xf32>
    %121 = tpu.concatenate %39, %66, %93, %120 in 1 : vector<8x512xf32>, vector<8x512xf32>, vector<8x512xf32>, vector<8x512xf32> -> vector<8x2048xf32>
    %122 = vector.broadcast %4 : vector<8x1xf32> to vector<8x2048xf32>
    %123 = arith.addf %121, %122 : vector<8x2048xf32>
    %124 = math.tanh %123 : vector<8x2048xf32>
    %c0_36 = arith.constant 0 : index
    %c0_37 = arith.constant 0 : index
    %125 = vector.load %arg6[%c0_36, %c0_37] : memref<8x72xf32, #tpu.memory_space<vmem>>, vector<8x72xf32>
    %c0_38 = arith.constant 0 : index
    %c0_39 = arith.constant 0 : index
    %126 = vector.load %arg7[%c0_38, %c0_39] : memref<8x1xf32, #tpu.memory_space<vmem>>, vector<8x1xf32>
    %127 = vector.extract_strided_slice %0 {offsets = [0, 0], sizes = [1, 512], strides = [1, 1]} : vector<9x512xf32> to vector<1x512xf32>
    %128 = vector.extract_strided_slice %0 {offsets = [1, 0], sizes = [1, 512], strides = [1, 1]} : vector<9x512xf32> to vector<1x512xf32>
    %129 = vector.extract_strided_slice %0 {offsets = [2, 0], sizes = [1, 512], strides = [1, 1]} : vector<9x512xf32> to vector<1x512xf32>
    %130 = vector.extract_strided_slice %0 {offsets = [3, 0], sizes = [1, 512], strides = [1, 1]} : vector<9x512xf32> to vector<1x512xf32>
    %131 = vector.extract_strided_slice %0 {offsets = [5, 0], sizes = [1, 512], strides = [1, 1]} : vector<9x512xf32> to vector<1x512xf32>
    %132 = vector.extract_strided_slice %0 {offsets = [6, 0], sizes = [1, 512], strides = [1, 1]} : vector<9x512xf32> to vector<1x512xf32>
    %133 = vector.extract_strided_slice %0 {offsets = [7, 0], sizes = [1, 512], strides = [1, 1]} : vector<9x512xf32> to vector<1x512xf32>
    %134 = vector.extract_strided_slice %0 {offsets = [8, 0], sizes = [1, 512], strides = [1, 1]} : vector<9x512xf32> to vector<1x512xf32>
    %135 = vector.extract_strided_slice %124 {offsets = [0, 0], sizes = [8, 512], strides = [1, 1]} : vector<8x2048xf32> to vector<8x512xf32>
    %c17_i32_40 = arith.constant 17 : i32
    %136 = tpu.dynamic_rotate %135 by %c17_i32_40 dim 1 : vector<8x512xf32>, i32 -> vector<8x512xf32>
    %137 = vector.broadcast %127 : vector<1x512xf32> to vector<8x512xf32>
    %138 = arith.mulf %136, %137 : vector<8x512xf32>
    %c16_i32_41 = arith.constant 16 : i32
    %139 = tpu.dynamic_rotate %135 by %c16_i32_41 dim 1 : vector<8x512xf32>, i32 -> vector<8x512xf32>
    %140 = vector.broadcast %128 : vector<1x512xf32> to vector<8x512xf32>
    %141 = arith.mulf %139, %140 : vector<8x512xf32>
    %c15_i32_42 = arith.constant 15 : i32
    %142 = tpu.dynamic_rotate %135 by %c15_i32_42 dim 1 : vector<8x512xf32>, i32 -> vector<8x512xf32>
    %143 = vector.broadcast %129 : vector<1x512xf32> to vector<8x512xf32>
    %144 = arith.mulf %142, %143 : vector<8x512xf32>
    %c1_i32_43 = arith.constant 1 : i32
    %145 = tpu.dynamic_rotate %135 by %c1_i32_43 dim 1 : vector<8x512xf32>, i32 -> vector<8x512xf32>
    %146 = vector.broadcast %130 : vector<1x512xf32> to vector<8x512xf32>
    %147 = arith.mulf %145, %146 : vector<8x512xf32>
    %c511_i32_44 = arith.constant 511 : i32
    %148 = tpu.dynamic_rotate %135 by %c511_i32_44 dim 1 : vector<8x512xf32>, i32 -> vector<8x512xf32>
    %149 = vector.broadcast %131 : vector<1x512xf32> to vector<8x512xf32>
    %150 = arith.mulf %148, %149 : vector<8x512xf32>
    %c497_i32_45 = arith.constant 497 : i32
    %151 = tpu.dynamic_rotate %135 by %c497_i32_45 dim 1 : vector<8x512xf32>, i32 -> vector<8x512xf32>
    %152 = vector.broadcast %132 : vector<1x512xf32> to vector<8x512xf32>
    %153 = arith.mulf %151, %152 : vector<8x512xf32>
    %c496_i32_46 = arith.constant 496 : i32
    %154 = tpu.dynamic_rotate %135 by %c496_i32_46 dim 1 : vector<8x512xf32>, i32 -> vector<8x512xf32>
    %155 = vector.broadcast %133 : vector<1x512xf32> to vector<8x512xf32>
    %156 = arith.mulf %154, %155 : vector<8x512xf32>
    %c495_i32_47 = arith.constant 495 : i32
    %157 = tpu.dynamic_rotate %135 by %c495_i32_47 dim 1 : vector<8x512xf32>, i32 -> vector<8x512xf32>
    %158 = vector.broadcast %134 : vector<1x512xf32> to vector<8x512xf32>
    %159 = arith.mulf %157, %158 : vector<8x512xf32>
    %160 = tpu.concatenate %138, %141, %144, %147, %135, %150, %153, %156, %159 in 0 : vector<8x512xf32>, vector<8x512xf32>, vector<8x512xf32>, vector<8x512xf32>, vector<8x512xf32>, vector<8x512xf32>, vector<8x512xf32>, vector<8x512xf32>, vector<8x512xf32> -> vector<72x512xf32>
    %cst_48 = arith.constant dense<0.000000e+00> : vector<8x512xf32>
    %161 = tpu.matmul %125, %160, %cst_48 {dimension_numbers = #tpu.dot_dimension_numbers<[1], [0], [0], [1], [0, 0, 1, 1], [], []>} : vector<8x72xf32>, vector<72x512xf32>, vector<8x512xf32> -> vector<8x512xf32>
    %162 = vector.extract_strided_slice %124 {offsets = [0, 512], sizes = [8, 512], strides = [1, 1]} : vector<8x2048xf32> to vector<8x512xf32>
    %c17_i32_49 = arith.constant 17 : i32
    %163 = tpu.dynamic_rotate %162 by %c17_i32_49 dim 1 : vector<8x512xf32>, i32 -> vector<8x512xf32>
    %164 = vector.broadcast %127 : vector<1x512xf32> to vector<8x512xf32>
    %165 = arith.mulf %163, %164 : vector<8x512xf32>
    %c16_i32_50 = arith.constant 16 : i32
    %166 = tpu.dynamic_rotate %162 by %c16_i32_50 dim 1 : vector<8x512xf32>, i32 -> vector<8x512xf32>
    %167 = vector.broadcast %128 : vector<1x512xf32> to vector<8x512xf32>
    %168 = arith.mulf %166, %167 : vector<8x512xf32>
    %c15_i32_51 = arith.constant 15 : i32
    %169 = tpu.dynamic_rotate %162 by %c15_i32_51 dim 1 : vector<8x512xf32>, i32 -> vector<8x512xf32>
    %170 = vector.broadcast %129 : vector<1x512xf32> to vector<8x512xf32>
    %171 = arith.mulf %169, %170 : vector<8x512xf32>
    %c1_i32_52 = arith.constant 1 : i32
    %172 = tpu.dynamic_rotate %162 by %c1_i32_52 dim 1 : vector<8x512xf32>, i32 -> vector<8x512xf32>
    %173 = vector.broadcast %130 : vector<1x512xf32> to vector<8x512xf32>
    %174 = arith.mulf %172, %173 : vector<8x512xf32>
    %c511_i32_53 = arith.constant 511 : i32
    %175 = tpu.dynamic_rotate %162 by %c511_i32_53 dim 1 : vector<8x512xf32>, i32 -> vector<8x512xf32>
    %176 = vector.broadcast %131 : vector<1x512xf32> to vector<8x512xf32>
    %177 = arith.mulf %175, %176 : vector<8x512xf32>
    %c497_i32_54 = arith.constant 497 : i32
    %178 = tpu.dynamic_rotate %162 by %c497_i32_54 dim 1 : vector<8x512xf32>, i32 -> vector<8x512xf32>
    %179 = vector.broadcast %132 : vector<1x512xf32> to vector<8x512xf32>
    %180 = arith.mulf %178, %179 : vector<8x512xf32>
    %c496_i32_55 = arith.constant 496 : i32
    %181 = tpu.dynamic_rotate %162 by %c496_i32_55 dim 1 : vector<8x512xf32>, i32 -> vector<8x512xf32>
    %182 = vector.broadcast %133 : vector<1x512xf32> to vector<8x512xf32>
    %183 = arith.mulf %181, %182 : vector<8x512xf32>
    %c495_i32_56 = arith.constant 495 : i32
    %184 = tpu.dynamic_rotate %162 by %c495_i32_56 dim 1 : vector<8x512xf32>, i32 -> vector<8x512xf32>
    %185 = vector.broadcast %134 : vector<1x512xf32> to vector<8x512xf32>
    %186 = arith.mulf %184, %185 : vector<8x512xf32>
    %187 = tpu.concatenate %165, %168, %171, %174, %162, %177, %180, %183, %186 in 0 : vector<8x512xf32>, vector<8x512xf32>, vector<8x512xf32>, vector<8x512xf32>, vector<8x512xf32>, vector<8x512xf32>, vector<8x512xf32>, vector<8x512xf32>, vector<8x512xf32> -> vector<72x512xf32>
    %cst_57 = arith.constant dense<0.000000e+00> : vector<8x512xf32>
    %188 = tpu.matmul %125, %187, %cst_57 {dimension_numbers = #tpu.dot_dimension_numbers<[1], [0], [0], [1], [0, 0, 1, 1], [], []>} : vector<8x72xf32>, vector<72x512xf32>, vector<8x512xf32> -> vector<8x512xf32>
    %189 = vector.extract_strided_slice %124 {offsets = [0, 1024], sizes = [8, 512], strides = [1, 1]} : vector<8x2048xf32> to vector<8x512xf32>
    %c17_i32_58 = arith.constant 17 : i32
    %190 = tpu.dynamic_rotate %189 by %c17_i32_58 dim 1 : vector<8x512xf32>, i32 -> vector<8x512xf32>
    %191 = vector.broadcast %127 : vector<1x512xf32> to vector<8x512xf32>
    %192 = arith.mulf %190, %191 : vector<8x512xf32>
    %c16_i32_59 = arith.constant 16 : i32
    %193 = tpu.dynamic_rotate %189 by %c16_i32_59 dim 1 : vector<8x512xf32>, i32 -> vector<8x512xf32>
    %194 = vector.broadcast %128 : vector<1x512xf32> to vector<8x512xf32>
    %195 = arith.mulf %193, %194 : vector<8x512xf32>
    %c15_i32_60 = arith.constant 15 : i32
    %196 = tpu.dynamic_rotate %189 by %c15_i32_60 dim 1 : vector<8x512xf32>, i32 -> vector<8x512xf32>
    %197 = vector.broadcast %129 : vector<1x512xf32> to vector<8x512xf32>
    %198 = arith.mulf %196, %197 : vector<8x512xf32>
    %c1_i32_61 = arith.constant 1 : i32
    %199 = tpu.dynamic_rotate %189 by %c1_i32_61 dim 1 : vector<8x512xf32>, i32 -> vector<8x512xf32>
    %200 = vector.broadcast %130 : vector<1x512xf32> to vector<8x512xf32>
    %201 = arith.mulf %199, %200 : vector<8x512xf32>
    %c511_i32_62 = arith.constant 511 : i32
    %202 = tpu.dynamic_rotate %189 by %c511_i32_62 dim 1 : vector<8x512xf32>, i32 -> vector<8x512xf32>
    %203 = vector.broadcast %131 : vector<1x512xf32> to vector<8x512xf32>
    %204 = arith.mulf %202, %203 : vector<8x512xf32>
    %c497_i32_63 = arith.constant 497 : i32
    %205 = tpu.dynamic_rotate %189 by %c497_i32_63 dim 1 : vector<8x512xf32>, i32 -> vector<8x512xf32>
    %206 = vector.broadcast %132 : vector<1x512xf32> to vector<8x512xf32>
    %207 = arith.mulf %205, %206 : vector<8x512xf32>
    %c496_i32_64 = arith.constant 496 : i32
    %208 = tpu.dynamic_rotate %189 by %c496_i32_64 dim 1 : vector<8x512xf32>, i32 -> vector<8x512xf32>
    %209 = vector.broadcast %133 : vector<1x512xf32> to vector<8x512xf32>
    %210 = arith.mulf %208, %209 : vector<8x512xf32>
    %c495_i32_65 = arith.constant 495 : i32
    %211 = tpu.dynamic_rotate %189 by %c495_i32_65 dim 1 : vector<8x512xf32>, i32 -> vector<8x512xf32>
    %212 = vector.broadcast %134 : vector<1x512xf32> to vector<8x512xf32>
    %213 = arith.mulf %211, %212 : vector<8x512xf32>
    %214 = tpu.concatenate %192, %195, %198, %201, %189, %204, %207, %210, %213 in 0 : vector<8x512xf32>, vector<8x512xf32>, vector<8x512xf32>, vector<8x512xf32>, vector<8x512xf32>, vector<8x512xf32>, vector<8x512xf32>, vector<8x512xf32>, vector<8x512xf32> -> vector<72x512xf32>
    %cst_66 = arith.constant dense<0.000000e+00> : vector<8x512xf32>
    %215 = tpu.matmul %125, %214, %cst_66 {dimension_numbers = #tpu.dot_dimension_numbers<[1], [0], [0], [1], [0, 0, 1, 1], [], []>} : vector<8x72xf32>, vector<72x512xf32>, vector<8x512xf32> -> vector<8x512xf32>
    %216 = vector.extract_strided_slice %124 {offsets = [0, 1536], sizes = [8, 512], strides = [1, 1]} : vector<8x2048xf32> to vector<8x512xf32>
    %c17_i32_67 = arith.constant 17 : i32
    %217 = tpu.dynamic_rotate %216 by %c17_i32_67 dim 1 : vector<8x512xf32>, i32 -> vector<8x512xf32>
    %218 = vector.broadcast %127 : vector<1x512xf32> to vector<8x512xf32>
    %219 = arith.mulf %217, %218 : vector<8x512xf32>
    %c16_i32_68 = arith.constant 16 : i32
    %220 = tpu.dynamic_rotate %216 by %c16_i32_68 dim 1 : vector<8x512xf32>, i32 -> vector<8x512xf32>
    %221 = vector.broadcast %128 : vector<1x512xf32> to vector<8x512xf32>
    %222 = arith.mulf %220, %221 : vector<8x512xf32>
    %c15_i32_69 = arith.constant 15 : i32
    %223 = tpu.dynamic_rotate %216 by %c15_i32_69 dim 1 : vector<8x512xf32>, i32 -> vector<8x512xf32>
    %224 = vector.broadcast %129 : vector<1x512xf32> to vector<8x512xf32>
    %225 = arith.mulf %223, %224 : vector<8x512xf32>
    %c1_i32_70 = arith.constant 1 : i32
    %226 = tpu.dynamic_rotate %216 by %c1_i32_70 dim 1 : vector<8x512xf32>, i32 -> vector<8x512xf32>
    %227 = vector.broadcast %130 : vector<1x512xf32> to vector<8x512xf32>
    %228 = arith.mulf %226, %227 : vector<8x512xf32>
    %c511_i32_71 = arith.constant 511 : i32
    %229 = tpu.dynamic_rotate %216 by %c511_i32_71 dim 1 : vector<8x512xf32>, i32 -> vector<8x512xf32>
    %230 = vector.broadcast %131 : vector<1x512xf32> to vector<8x512xf32>
    %231 = arith.mulf %229, %230 : vector<8x512xf32>
    %c497_i32_72 = arith.constant 497 : i32
    %232 = tpu.dynamic_rotate %216 by %c497_i32_72 dim 1 : vector<8x512xf32>, i32 -> vector<8x512xf32>
    %233 = vector.broadcast %132 : vector<1x512xf32> to vector<8x512xf32>
    %234 = arith.mulf %232, %233 : vector<8x512xf32>
    %c496_i32_73 = arith.constant 496 : i32
    %235 = tpu.dynamic_rotate %216 by %c496_i32_73 dim 1 : vector<8x512xf32>, i32 -> vector<8x512xf32>
    %236 = vector.broadcast %133 : vector<1x512xf32> to vector<8x512xf32>
    %237 = arith.mulf %235, %236 : vector<8x512xf32>
    %c495_i32_74 = arith.constant 495 : i32
    %238 = tpu.dynamic_rotate %216 by %c495_i32_74 dim 1 : vector<8x512xf32>, i32 -> vector<8x512xf32>
    %239 = vector.broadcast %134 : vector<1x512xf32> to vector<8x512xf32>
    %240 = arith.mulf %238, %239 : vector<8x512xf32>
    %241 = tpu.concatenate %219, %222, %225, %228, %216, %231, %234, %237, %240 in 0 : vector<8x512xf32>, vector<8x512xf32>, vector<8x512xf32>, vector<8x512xf32>, vector<8x512xf32>, vector<8x512xf32>, vector<8x512xf32>, vector<8x512xf32>, vector<8x512xf32> -> vector<72x512xf32>
    %cst_75 = arith.constant dense<0.000000e+00> : vector<8x512xf32>
    %242 = tpu.matmul %125, %241, %cst_75 {dimension_numbers = #tpu.dot_dimension_numbers<[1], [0], [0], [1], [0, 0, 1, 1], [], []>} : vector<8x72xf32>, vector<72x512xf32>, vector<8x512xf32> -> vector<8x512xf32>
    %243 = tpu.concatenate %161, %188, %215, %242 in 1 : vector<8x512xf32>, vector<8x512xf32>, vector<8x512xf32>, vector<8x512xf32> -> vector<8x2048xf32>
    %244 = vector.broadcast %126 : vector<8x1xf32> to vector<8x2048xf32>
    %245 = arith.addf %243, %244 : vector<8x2048xf32>
    %246 = math.tanh %245 : vector<8x2048xf32>
    %c0_76 = arith.constant 0 : index
    %c0_77 = arith.constant 0 : index
    %247 = vector.load %arg2[%c0_76, %c0_77] : memref<8x2048xf32, #tpu.memory_space<vmem>>, vector<8x2048xf32>
    %c0_78 = arith.constant 0 : index
    %c0_79 = arith.constant 0 : index
    %248 = vector.load %arg14[%c0_78, %c0_79] : memref<512x128xf32, #tpu.memory_space<vmem>>, vector<512x128xf32>
    %249 = arith.mulf %247, %247 : vector<8x2048xf32>
    %cst_80 = arith.constant dense<0.000000e+00> : vector<2048xf32>
    %250 = vector.multi_reduction <add>, %249, %cst_80 [0] : vector<8x2048xf32> to vector<2048xf32>
    %251 = vector.shape_cast %250 : vector<2048xf32> to vector<1x2048xf32>
    %cst_81 = arith.constant 1.000000e-24 : f32
    %252 = vector.broadcast %cst_81 : f32 to vector<1x2048xf32>
    %253 = arith.maximumf %251, %252 : vector<1x2048xf32>
    %254 = math.rsqrt %253 : vector<1x2048xf32>
    %255 = vector.broadcast %254 : vector<1x2048xf32> to vector<8x2048xf32>
    %256 = arith.mulf %247, %255 : vector<8x2048xf32>
    %257 = arith.mulf %246, %256 : vector<8x2048xf32>
    %258 = math.tanh %257 : vector<8x2048xf32>
    %259 = vector.extract_strided_slice %258 {offsets = [0, 0], sizes = [8, 512], strides = [1, 1]} : vector<8x2048xf32> to vector<8x512xf32>
    %cst_82 = arith.constant dense<0.000000e+00> : vector<8x128xf32>
    %260 = tpu.matmul %259, %248, %cst_82 {dimension_numbers = #tpu.dot_dimension_numbers<[1], [0], [0], [1], [0, 0, 1, 1], [], []>} : vector<8x512xf32>, vector<512x128xf32>, vector<8x128xf32> -> vector<8x128xf32>
    %261 = vector.extract_strided_slice %258 {offsets = [0, 512], sizes = [8, 512], strides = [1, 1]} : vector<8x2048xf32> to vector<8x512xf32>
    %cst_83 = arith.constant dense<0.000000e+00> : vector<8x128xf32>
    %262 = tpu.matmul %261, %248, %cst_83 {dimension_numbers = #tpu.dot_dimension_numbers<[1], [0], [0], [1], [0, 0, 1, 1], [], []>} : vector<8x512xf32>, vector<512x128xf32>, vector<8x128xf32> -> vector<8x128xf32>
    %263 = vector.extract_strided_slice %258 {offsets = [0, 1024], sizes = [8, 512], strides = [1, 1]} : vector<8x2048xf32> to vector<8x512xf32>
    %cst_84 = arith.constant dense<0.000000e+00> : vector<8x128xf32>
    %264 = tpu.matmul %263, %248, %cst_84 {dimension_numbers = #tpu.dot_dimension_numbers<[1], [0], [0], [1], [0, 0, 1, 1], [], []>} : vector<8x512xf32>, vector<512x128xf32>, vector<8x128xf32> -> vector<8x128xf32>
    %265 = vector.extract_strided_slice %258 {offsets = [0, 1536], sizes = [8, 512], strides = [1, 1]} : vector<8x2048xf32> to vector<8x512xf32>
    %cst_85 = arith.constant dense<0.000000e+00> : vector<8x128xf32>
    %266 = tpu.matmul %265, %248, %cst_85 {dimension_numbers = #tpu.dot_dimension_numbers<[1], [0], [0], [1], [0, 0, 1, 1], [], []>} : vector<8x512xf32>, vector<512x128xf32>, vector<8x128xf32> -> vector<8x128xf32>
    %267 = tpu.concatenate %260, %262, %264, %266 in 1 : vector<8x128xf32>, vector<8x128xf32>, vector<8x128xf32>, vector<8x128xf32> -> vector<8x512xf32>
    %c0_86 = arith.constant 0 : index
    %c0_87 = arith.constant 0 : index
    %268 = vector.load %arg8[%c0_86, %c0_87] : memref<16x72xf32, #tpu.memory_space<vmem>>, vector<16x72xf32>
    %c0_88 = arith.constant 0 : index
    %c0_89 = arith.constant 0 : index
    %269 = vector.load %arg9[%c0_88, %c0_89] : memref<16x1xf32, #tpu.memory_space<vmem>>, vector<16x1xf32>
    %270 = vector.extract_strided_slice %1 {offsets = [0, 0], sizes = [1, 256], strides = [1, 1]} : vector<9x256xf32> to vector<1x256xf32>
    %271 = vector.extract_strided_slice %1 {offsets = [1, 0], sizes = [1, 256], strides = [1, 1]} : vector<9x256xf32> to vector<1x256xf32>
    %272 = vector.extract_strided_slice %1 {offsets = [2, 0], sizes = [1, 256], strides = [1, 1]} : vector<9x256xf32> to vector<1x256xf32>
    %273 = vector.extract_strided_slice %1 {offsets = [3, 0], sizes = [1, 256], strides = [1, 1]} : vector<9x256xf32> to vector<1x256xf32>
    %274 = vector.extract_strided_slice %1 {offsets = [5, 0], sizes = [1, 256], strides = [1, 1]} : vector<9x256xf32> to vector<1x256xf32>
    %275 = vector.extract_strided_slice %1 {offsets = [6, 0], sizes = [1, 256], strides = [1, 1]} : vector<9x256xf32> to vector<1x256xf32>
    %276 = vector.extract_strided_slice %1 {offsets = [7, 0], sizes = [1, 256], strides = [1, 1]} : vector<9x256xf32> to vector<1x256xf32>
    %277 = vector.extract_strided_slice %1 {offsets = [8, 0], sizes = [1, 256], strides = [1, 1]} : vector<9x256xf32> to vector<1x256xf32>
    %278 = vector.extract_strided_slice %267 {offsets = [0, 0], sizes = [8, 256], strides = [1, 1]} : vector<8x512xf32> to vector<8x256xf32>
    %c9_i32 = arith.constant 9 : i32
    %279 = tpu.dynamic_rotate %278 by %c9_i32 dim 1 : vector<8x256xf32>, i32 -> vector<8x256xf32>
    %280 = vector.broadcast %270 : vector<1x256xf32> to vector<8x256xf32>
    %281 = arith.mulf %279, %280 : vector<8x256xf32>
    %c8_i32 = arith.constant 8 : i32
    %282 = tpu.dynamic_rotate %278 by %c8_i32 dim 1 : vector<8x256xf32>, i32 -> vector<8x256xf32>
    %283 = vector.broadcast %271 : vector<1x256xf32> to vector<8x256xf32>
    %284 = arith.mulf %282, %283 : vector<8x256xf32>
    %c7_i32 = arith.constant 7 : i32
    %285 = tpu.dynamic_rotate %278 by %c7_i32 dim 1 : vector<8x256xf32>, i32 -> vector<8x256xf32>
    %286 = vector.broadcast %272 : vector<1x256xf32> to vector<8x256xf32>
    %287 = arith.mulf %285, %286 : vector<8x256xf32>
    %c1_i32_90 = arith.constant 1 : i32
    %288 = tpu.dynamic_rotate %278 by %c1_i32_90 dim 1 : vector<8x256xf32>, i32 -> vector<8x256xf32>
    %289 = vector.broadcast %273 : vector<1x256xf32> to vector<8x256xf32>
    %290 = arith.mulf %288, %289 : vector<8x256xf32>
    %c255_i32 = arith.constant 255 : i32
    %291 = tpu.dynamic_rotate %278 by %c255_i32 dim 1 : vector<8x256xf32>, i32 -> vector<8x256xf32>
    %292 = vector.broadcast %274 : vector<1x256xf32> to vector<8x256xf32>
    %293 = arith.mulf %291, %292 : vector<8x256xf32>
    %c249_i32 = arith.constant 249 : i32
    %294 = tpu.dynamic_rotate %278 by %c249_i32 dim 1 : vector<8x256xf32>, i32 -> vector<8x256xf32>
    %295 = vector.broadcast %275 : vector<1x256xf32> to vector<8x256xf32>
    %296 = arith.mulf %294, %295 : vector<8x256xf32>
    %c248_i32 = arith.constant 248 : i32
    %297 = tpu.dynamic_rotate %278 by %c248_i32 dim 1 : vector<8x256xf32>, i32 -> vector<8x256xf32>
    %298 = vector.broadcast %276 : vector<1x256xf32> to vector<8x256xf32>
    %299 = arith.mulf %297, %298 : vector<8x256xf32>
    %c247_i32 = arith.constant 247 : i32
    %300 = tpu.dynamic_rotate %278 by %c247_i32 dim 1 : vector<8x256xf32>, i32 -> vector<8x256xf32>
    %301 = vector.broadcast %277 : vector<1x256xf32> to vector<8x256xf32>
    %302 = arith.mulf %300, %301 : vector<8x256xf32>
    %303 = tpu.concatenate %281, %284, %287, %290, %278, %293, %296, %299, %302 in 0 : vector<8x256xf32>, vector<8x256xf32>, vector<8x256xf32>, vector<8x256xf32>, vector<8x256xf32>, vector<8x256xf32>, vector<8x256xf32>, vector<8x256xf32>, vector<8x256xf32> -> vector<72x256xf32>
    %cst_91 = arith.constant dense<0.000000e+00> : vector<16x256xf32>
    %304 = tpu.matmul %268, %303, %cst_91 {dimension_numbers = #tpu.dot_dimension_numbers<[1], [0], [0], [1], [0, 0, 1, 1], [], []>} : vector<16x72xf32>, vector<72x256xf32>, vector<16x256xf32> -> vector<16x256xf32>
    %305 = vector.extract_strided_slice %267 {offsets = [0, 256], sizes = [8, 256], strides = [1, 1]} : vector<8x512xf32> to vector<8x256xf32>
    %c9_i32_92 = arith.constant 9 : i32
    %306 = tpu.dynamic_rotate %305 by %c9_i32_92 dim 1 : vector<8x256xf32>, i32 -> vector<8x256xf32>
    %307 = vector.broadcast %270 : vector<1x256xf32> to vector<8x256xf32>
    %308 = arith.mulf %306, %307 : vector<8x256xf32>
    %c8_i32_93 = arith.constant 8 : i32
    %309 = tpu.dynamic_rotate %305 by %c8_i32_93 dim 1 : vector<8x256xf32>, i32 -> vector<8x256xf32>
    %310 = vector.broadcast %271 : vector<1x256xf32> to vector<8x256xf32>
    %311 = arith.mulf %309, %310 : vector<8x256xf32>
    %c7_i32_94 = arith.constant 7 : i32
    %312 = tpu.dynamic_rotate %305 by %c7_i32_94 dim 1 : vector<8x256xf32>, i32 -> vector<8x256xf32>
    %313 = vector.broadcast %272 : vector<1x256xf32> to vector<8x256xf32>
    %314 = arith.mulf %312, %313 : vector<8x256xf32>
    %c1_i32_95 = arith.constant 1 : i32
    %315 = tpu.dynamic_rotate %305 by %c1_i32_95 dim 1 : vector<8x256xf32>, i32 -> vector<8x256xf32>
    %316 = vector.broadcast %273 : vector<1x256xf32> to vector<8x256xf32>
    %317 = arith.mulf %315, %316 : vector<8x256xf32>
    %c255_i32_96 = arith.constant 255 : i32
    %318 = tpu.dynamic_rotate %305 by %c255_i32_96 dim 1 : vector<8x256xf32>, i32 -> vector<8x256xf32>
    %319 = vector.broadcast %274 : vector<1x256xf32> to vector<8x256xf32>
    %320 = arith.mulf %318, %319 : vector<8x256xf32>
    %c249_i32_97 = arith.constant 249 : i32
    %321 = tpu.dynamic_rotate %305 by %c249_i32_97 dim 1 : vector<8x256xf32>, i32 -> vector<8x256xf32>
    %322 = vector.broadcast %275 : vector<1x256xf32> to vector<8x256xf32>
    %323 = arith.mulf %321, %322 : vector<8x256xf32>
    %c248_i32_98 = arith.constant 248 : i32
    %324 = tpu.dynamic_rotate %305 by %c248_i32_98 dim 1 : vector<8x256xf32>, i32 -> vector<8x256xf32>
    %325 = vector.broadcast %276 : vector<1x256xf32> to vector<8x256xf32>
    %326 = arith.mulf %324, %325 : vector<8x256xf32>
    %c247_i32_99 = arith.constant 247 : i32
    %327 = tpu.dynamic_rotate %305 by %c247_i32_99 dim 1 : vector<8x256xf32>, i32 -> vector<8x256xf32>
    %328 = vector.broadcast %277 : vector<1x256xf32> to vector<8x256xf32>
    %329 = arith.mulf %327, %328 : vector<8x256xf32>
    %330 = tpu.concatenate %308, %311, %314, %317, %305, %320, %323, %326, %329 in 0 : vector<8x256xf32>, vector<8x256xf32>, vector<8x256xf32>, vector<8x256xf32>, vector<8x256xf32>, vector<8x256xf32>, vector<8x256xf32>, vector<8x256xf32>, vector<8x256xf32> -> vector<72x256xf32>
    %cst_100 = arith.constant dense<0.000000e+00> : vector<16x256xf32>
    %331 = tpu.matmul %268, %330, %cst_100 {dimension_numbers = #tpu.dot_dimension_numbers<[1], [0], [0], [1], [0, 0, 1, 1], [], []>} : vector<16x72xf32>, vector<72x256xf32>, vector<16x256xf32> -> vector<16x256xf32>
    %332 = tpu.concatenate %304, %331 in 1 : vector<16x256xf32>, vector<16x256xf32> -> vector<16x512xf32>
    %333 = vector.broadcast %269 : vector<16x1xf32> to vector<16x512xf32>
    %334 = arith.addf %332, %333 : vector<16x512xf32>
    %335 = math.tanh %334 : vector<16x512xf32>
    %c0_101 = arith.constant 0 : index
    %c0_102 = arith.constant 0 : index
    %336 = vector.load %arg10[%c0_101, %c0_102] : memref<16x144xf32, #tpu.memory_space<vmem>>, vector<16x144xf32>
    %c0_103 = arith.constant 0 : index
    %c0_104 = arith.constant 0 : index
    %337 = vector.load %arg11[%c0_103, %c0_104] : memref<16x1xf32, #tpu.memory_space<vmem>>, vector<16x1xf32>
    %338 = vector.extract_strided_slice %1 {offsets = [0, 0], sizes = [1, 256], strides = [1, 1]} : vector<9x256xf32> to vector<1x256xf32>
    %339 = vector.extract_strided_slice %1 {offsets = [1, 0], sizes = [1, 256], strides = [1, 1]} : vector<9x256xf32> to vector<1x256xf32>
    %340 = vector.extract_strided_slice %1 {offsets = [2, 0], sizes = [1, 256], strides = [1, 1]} : vector<9x256xf32> to vector<1x256xf32>
    %341 = vector.extract_strided_slice %1 {offsets = [3, 0], sizes = [1, 256], strides = [1, 1]} : vector<9x256xf32> to vector<1x256xf32>
    %342 = vector.extract_strided_slice %1 {offsets = [5, 0], sizes = [1, 256], strides = [1, 1]} : vector<9x256xf32> to vector<1x256xf32>
    %343 = vector.extract_strided_slice %1 {offsets = [6, 0], sizes = [1, 256], strides = [1, 1]} : vector<9x256xf32> to vector<1x256xf32>
    %344 = vector.extract_strided_slice %1 {offsets = [7, 0], sizes = [1, 256], strides = [1, 1]} : vector<9x256xf32> to vector<1x256xf32>
    %345 = vector.extract_strided_slice %1 {offsets = [8, 0], sizes = [1, 256], strides = [1, 1]} : vector<9x256xf32> to vector<1x256xf32>
    %346 = vector.extract_strided_slice %335 {offsets = [0, 0], sizes = [16, 256], strides = [1, 1]} : vector<16x512xf32> to vector<16x256xf32>
    %c9_i32_105 = arith.constant 9 : i32
    %347 = tpu.dynamic_rotate %346 by %c9_i32_105 dim 1 : vector<16x256xf32>, i32 -> vector<16x256xf32>
    %348 = vector.broadcast %338 : vector<1x256xf32> to vector<16x256xf32>
    %349 = arith.mulf %347, %348 : vector<16x256xf32>
    %c8_i32_106 = arith.constant 8 : i32
    %350 = tpu.dynamic_rotate %346 by %c8_i32_106 dim 1 : vector<16x256xf32>, i32 -> vector<16x256xf32>
    %351 = vector.broadcast %339 : vector<1x256xf32> to vector<16x256xf32>
    %352 = arith.mulf %350, %351 : vector<16x256xf32>
    %c7_i32_107 = arith.constant 7 : i32
    %353 = tpu.dynamic_rotate %346 by %c7_i32_107 dim 1 : vector<16x256xf32>, i32 -> vector<16x256xf32>
    %354 = vector.broadcast %340 : vector<1x256xf32> to vector<16x256xf32>
    %355 = arith.mulf %353, %354 : vector<16x256xf32>
    %c1_i32_108 = arith.constant 1 : i32
    %356 = tpu.dynamic_rotate %346 by %c1_i32_108 dim 1 : vector<16x256xf32>, i32 -> vector<16x256xf32>
    %357 = vector.broadcast %341 : vector<1x256xf32> to vector<16x256xf32>
    %358 = arith.mulf %356, %357 : vector<16x256xf32>
    %c255_i32_109 = arith.constant 255 : i32
    %359 = tpu.dynamic_rotate %346 by %c255_i32_109 dim 1 : vector<16x256xf32>, i32 -> vector<16x256xf32>
    %360 = vector.broadcast %342 : vector<1x256xf32> to vector<16x256xf32>
    %361 = arith.mulf %359, %360 : vector<16x256xf32>
    %c249_i32_110 = arith.constant 249 : i32
    %362 = tpu.dynamic_rotate %346 by %c249_i32_110 dim 1 : vector<16x256xf32>, i32 -> vector<16x256xf32>
    %363 = vector.broadcast %343 : vector<1x256xf32> to vector<16x256xf32>
    %364 = arith.mulf %362, %363 : vector<16x256xf32>
    %c248_i32_111 = arith.constant 248 : i32
    %365 = tpu.dynamic_rotate %346 by %c248_i32_111 dim 1 : vector<16x256xf32>, i32 -> vector<16x256xf32>
    %366 = vector.broadcast %344 : vector<1x256xf32> to vector<16x256xf32>
    %367 = arith.mulf %365, %366 : vector<16x256xf32>
    %c247_i32_112 = arith.constant 247 : i32
    %368 = tpu.dynamic_rotate %346 by %c247_i32_112 dim 1 : vector<16x256xf32>, i32 -> vector<16x256xf32>
    %369 = vector.broadcast %345 : vector<1x256xf32> to vector<16x256xf32>
    %370 = arith.mulf %368, %369 : vector<16x256xf32>
    %371 = tpu.concatenate %349, %352, %355, %358, %346, %361, %364, %367, %370 in 0 : vector<16x256xf32>, vector<16x256xf32>, vector<16x256xf32>, vector<16x256xf32>, vector<16x256xf32>, vector<16x256xf32>, vector<16x256xf32>, vector<16x256xf32>, vector<16x256xf32> -> vector<144x256xf32>
    %cst_113 = arith.constant dense<0.000000e+00> : vector<16x256xf32>
    %372 = tpu.matmul %336, %371, %cst_113 {dimension_numbers = #tpu.dot_dimension_numbers<[1], [0], [0], [1], [0, 0, 1, 1], [], []>} : vector<16x144xf32>, vector<144x256xf32>, vector<16x256xf32> -> vector<16x256xf32>
    %373 = vector.extract_strided_slice %335 {offsets = [0, 256], sizes = [16, 256], strides = [1, 1]} : vector<16x512xf32> to vector<16x256xf32>
    %c9_i32_114 = arith.constant 9 : i32
    %374 = tpu.dynamic_rotate %373 by %c9_i32_114 dim 1 : vector<16x256xf32>, i32 -> vector<16x256xf32>
    %375 = vector.broadcast %338 : vector<1x256xf32> to vector<16x256xf32>
    %376 = arith.mulf %374, %375 : vector<16x256xf32>
    %c8_i32_115 = arith.constant 8 : i32
    %377 = tpu.dynamic_rotate %373 by %c8_i32_115 dim 1 : vector<16x256xf32>, i32 -> vector<16x256xf32>
    %378 = vector.broadcast %339 : vector<1x256xf32> to vector<16x256xf32>
    %379 = arith.mulf %377, %378 : vector<16x256xf32>
    %c7_i32_116 = arith.constant 7 : i32
    %380 = tpu.dynamic_rotate %373 by %c7_i32_116 dim 1 : vector<16x256xf32>, i32 -> vector<16x256xf32>
    %381 = vector.broadcast %340 : vector<1x256xf32> to vector<16x256xf32>
    %382 = arith.mulf %380, %381 : vector<16x256xf32>
    %c1_i32_117 = arith.constant 1 : i32
    %383 = tpu.dynamic_rotate %373 by %c1_i32_117 dim 1 : vector<16x256xf32>, i32 -> vector<16x256xf32>
    %384 = vector.broadcast %341 : vector<1x256xf32> to vector<16x256xf32>
    %385 = arith.mulf %383, %384 : vector<16x256xf32>
    %c255_i32_118 = arith.constant 255 : i32
    %386 = tpu.dynamic_rotate %373 by %c255_i32_118 dim 1 : vector<16x256xf32>, i32 -> vector<16x256xf32>
    %387 = vector.broadcast %342 : vector<1x256xf32> to vector<16x256xf32>
    %388 = arith.mulf %386, %387 : vector<16x256xf32>
    %c249_i32_119 = arith.constant 249 : i32
    %389 = tpu.dynamic_rotate %373 by %c249_i32_119 dim 1 : vector<16x256xf32>, i32 -> vector<16x256xf32>
    %390 = vector.broadcast %343 : vector<1x256xf32> to vector<16x256xf32>
    %391 = arith.mulf %389, %390 : vector<16x256xf32>
    %c248_i32_120 = arith.constant 248 : i32
    %392 = tpu.dynamic_rotate %373 by %c248_i32_120 dim 1 : vector<16x256xf32>, i32 -> vector<16x256xf32>
    %393 = vector.broadcast %344 : vector<1x256xf32> to vector<16x256xf32>
    %394 = arith.mulf %392, %393 : vector<16x256xf32>
    %c247_i32_121 = arith.constant 247 : i32
    %395 = tpu.dynamic_rotate %373 by %c247_i32_121 dim 1 : vector<16x256xf32>, i32 -> vector<16x256xf32>
    %396 = vector.broadcast %345 : vector<1x256xf32> to vector<16x256xf32>
    %397 = arith.mulf %395, %396 : vector<16x256xf32>
    %398 = tpu.concatenate %376, %379, %382, %385, %373, %388, %391, %394, %397 in 0 : vector<16x256xf32>, vector<16x256xf32>, vector<16x256xf32>, vector<16x256xf32>, vector<16x256xf32>, vector<16x256xf32>, vector<16x256xf32>, vector<16x256xf32>, vector<16x256xf32> -> vector<144x256xf32>
    %cst_122 = arith.constant dense<0.000000e+00> : vector<16x256xf32>
    %399 = tpu.matmul %336, %398, %cst_122 {dimension_numbers = #tpu.dot_dimension_numbers<[1], [0], [0], [1], [0, 0, 1, 1], [], []>} : vector<16x144xf32>, vector<144x256xf32>, vector<16x256xf32> -> vector<16x256xf32>
    %400 = tpu.concatenate %372, %399 in 1 : vector<16x256xf32>, vector<16x256xf32> -> vector<16x512xf32>
    %401 = vector.broadcast %337 : vector<16x1xf32> to vector<16x512xf32>
    %402 = arith.addf %400, %401 : vector<16x512xf32>
    %403 = math.tanh %402 : vector<16x512xf32>
    %c0_123 = arith.constant 0 : index
    %c0_124 = arith.constant 0 : index
    %404 = vector.load %arg3[%c0_123, %c0_124] : memref<16x512xf32, #tpu.memory_space<vmem>>, vector<16x512xf32>
    %c0_125 = arith.constant 0 : index
    %c0_126 = arith.constant 0 : index
    %405 = vector.load %arg15[%c0_125, %c0_126] : memref<256x64xf32, #tpu.memory_space<vmem>>, vector<256x64xf32>
    %406 = arith.mulf %404, %404 : vector<16x512xf32>
    %cst_127 = arith.constant dense<0.000000e+00> : vector<512xf32>
    %407 = vector.multi_reduction <add>, %406, %cst_127 [0] : vector<16x512xf32> to vector<512xf32>
    %408 = vector.shape_cast %407 : vector<512xf32> to vector<1x512xf32>
    %cst_128 = arith.constant 1.000000e-24 : f32
    %409 = vector.broadcast %cst_128 : f32 to vector<1x512xf32>
    %410 = arith.maximumf %408, %409 : vector<1x512xf32>
    %411 = math.rsqrt %410 : vector<1x512xf32>
    %412 = vector.broadcast %411 : vector<1x512xf32> to vector<16x512xf32>
    %413 = arith.mulf %404, %412 : vector<16x512xf32>
    %414 = arith.mulf %403, %413 : vector<16x512xf32>
    %415 = math.tanh %414 : vector<16x512xf32>
    %416 = vector.extract_strided_slice %415 {offsets = [0, 0], sizes = [16, 256], strides = [1, 1]} : vector<16x512xf32> to vector<16x256xf32>
    %cst_129 = arith.constant dense<0.000000e+00> : vector<16x64xf32>
    %417 = tpu.matmul %416, %405, %cst_129 {dimension_numbers = #tpu.dot_dimension_numbers<[1], [0], [0], [1], [0, 0, 1, 1], [], []>} : vector<16x256xf32>, vector<256x64xf32>, vector<16x64xf32> -> vector<16x64xf32>
    %418 = vector.extract_strided_slice %415 {offsets = [0, 256], sizes = [16, 256], strides = [1, 1]} : vector<16x512xf32> to vector<16x256xf32>
    %cst_130 = arith.constant dense<0.000000e+00> : vector<16x64xf32>
    %419 = tpu.matmul %418, %405, %cst_130 {dimension_numbers = #tpu.dot_dimension_numbers<[1], [0], [0], [1], [0, 0, 1, 1], [], []>} : vector<16x256xf32>, vector<256x64xf32>, vector<16x64xf32> -> vector<16x64xf32>
    %420 = tpu.concatenate %417, %419 in 1 : vector<16x64xf32>, vector<16x64xf32> -> vector<16x128xf32>
    %c0_131 = arith.constant 0 : index
    %c0_132 = arith.constant 0 : index
    %421 = vector.load %arg16[%c0_131, %c0_132] : memref<16x128xf32, #tpu.memory_space<vmem>>, vector<16x128xf32>
    tpu.vector_store %arg16[%c0_131, %c0_132], %420 {strides = array<i32>} : memref<16x128xf32, #tpu.memory_space<vmem>>, vector<16x128xf32>,
    return
  }
  func.func @transform_0(%arg0: i32) -> (i32, i32) {
    %c0_i32 = arith.constant 0 : i32
    %c0_i32_0 = arith.constant 0 : i32
    return %c0_i32, %arg0 : i32, i32
  }
  func.func @transform_1(%arg0: i32) -> (i32, i32) {
    %c0_i32 = arith.constant 0 : i32
    %c0_i32_0 = arith.constant 0 : i32
    return %c0_i32, %arg0 : i32, i32
  }
  func.func @transform_2(%arg0: i32) -> (i32, i32) {
    %c0_i32 = arith.constant 0 : i32
    %c0_i32_0 = arith.constant 0 : i32
    return %c0_i32, %arg0 : i32, i32
  }
  func.func @transform_3(%arg0: i32) -> (i32, i32) {
    %c0_i32 = arith.constant 0 : i32
    %c0_i32_0 = arith.constant 0 : i32
    %c0_i32_1 = arith.constant 0 : i32
    return %c0_i32, %c0_i32_0 : i32, i32
  }
  func.func @transform_4(%arg0: i32) -> (i32, i32) {
    %c0_i32 = arith.constant 0 : i32
    %c0_i32_0 = arith.constant 0 : i32
    %c0_i32_1 = arith.constant 0 : i32
    return %c0_i32, %c0_i32_0 : i32, i32
  }
  func.func @transform_5(%arg0: i32) -> (i32, i32) {
    %c0_i32 = arith.constant 0 : i32
    %c0_i32_0 = arith.constant 0 : i32
    %c0_i32_1 = arith.constant 0 : i32
    return %c0_i32, %c0_i32_0 : i32, i32
  }
  func.func @transform_6(%arg0: i32) -> (i32, i32) {
    %c0_i32 = arith.constant 0 : i32
    %c0_i32_0 = arith.constant 0 : i32
    %c0_i32_1 = arith.constant 0 : i32
    return %c0_i32, %c0_i32_0 : i32, i32
  }
  func.func @transform_7(%arg0: i32) -> (i32, i32) {
    %c0_i32 = arith.constant 0 : i32
    %c0_i32_0 = arith.constant 0 : i32
    %c0_i32_1 = arith.constant 0 : i32
    return %c0_i32, %c0_i32_0 : i32, i32
  }
  func.func @transform_8(%arg0: i32) -> (i32, i32) {
    %c0_i32 = arith.constant 0 : i32
    %c0_i32_0 = arith.constant 0 : i32
    %c0_i32_1 = arith.constant 0 : i32
    return %c0_i32, %c0_i32_0 : i32, i32
  }
  func.func @transform_9(%arg0: i32) -> (i32, i32) {
    %c0_i32 = arith.constant 0 : i32
    %c0_i32_0 = arith.constant 0 : i32
    %c0_i32_1 = arith.constant 0 : i32
    return %c0_i32, %c0_i32_0 : i32, i32
  }
  func.func @transform_10(%arg0: i32) -> (i32, i32) {
    %c0_i32 = arith.constant 0 : i32
    %c0_i32_0 = arith.constant 0 : i32
    %c0_i32_1 = arith.constant 0 : i32
    return %c0_i32, %c0_i32_0 : i32, i32
  }
  func.func @transform_11(%arg0: i32) -> (i32, i32) {
    %c0_i32 = arith.constant 0 : i32
    %c0_i32_0 = arith.constant 0 : i32
    %c0_i32_1 = arith.constant 0 : i32
    return %c0_i32, %c0_i32_0 : i32, i32
  }
  func.func @transform_12(%arg0: i32) -> (i32, i32) {
    %c0_i32 = arith.constant 0 : i32
    %c0_i32_0 = arith.constant 0 : i32
    %c0_i32_1 = arith.constant 0 : i32
    return %c0_i32, %c0_i32_0 : i32, i32
  }
  func.func @transform_13(%arg0: i32) -> (i32, i32) {
    %c0_i32 = arith.constant 0 : i32
    %c0_i32_0 = arith.constant 0 : i32
    %c0_i32_1 = arith.constant 0 : i32
    return %c0_i32, %c0_i32_0 : i32, i32
  }
  func.func @transform_14(%arg0: i32) -> (i32, i32) {
    %c0_i32 = arith.constant 0 : i32
    %c0_i32_0 = arith.constant 0 : i32
    %c0_i32_1 = arith.constant 0 : i32
    return %c0_i32, %c0_i32_0 : i32, i32
  }
  func.func @transform_15(%arg0: i32) -> (i32, i32) {
    %c0_i32 = arith.constant 0 : i32
    %c0_i32_0 = arith.constant 0 : i32
    return %c0_i32, %arg0 : i32, i32
  }
}

module attributes {stable_mosaic.version = 11 : i64} {
  func.func @_fused_kernel(%arg0: i32, %arg1: memref<8x2048xf32, #tpu.memory_space<vmem>>, %arg2: memref<8x2048xf32, #tpu.memory_space<vmem>>, %arg3: memref<16x512xf32, #tpu.memory_space<vmem>>, %arg4: memref<8x72xf32, #tpu.memory_space<vmem>>, %arg5: memref<8x1xf32, #tpu.memory_space<vmem>>, %arg6: memref<8x72xf32, #tpu.memory_space<vmem>>, %arg7: memref<8x1xf32, #tpu.memory_space<vmem>>, %arg8: memref<16x72xf32, #tpu.memory_space<vmem>>, %arg9: memref<16x1xf32, #tpu.memory_space<vmem>>, %arg10: memref<16x144xf32, #tpu.memory_space<vmem>>, %arg11: memref<16x1xf32, #tpu.memory_space<vmem>>, %arg12: memref<9x512xf32, #tpu.memory_space<vmem>>, %arg13: memref<9x256xf32, #tpu.memory_space<vmem>>, %arg14: memref<512x128xf32, #tpu.memory_space<vmem>>, %arg15: memref<256x64xf32, #tpu.memory_space<vmem>>, %arg16: memref<16x128xf32, #tpu.memory_space<vmem>>) attributes {dimension_semantics = [#tpu.dimension_semantics<parallel>], iteration_bounds = array<i64: 2>, scalar_prefetch = 0 : i64, scratch_operands = 0 : i64, tpu.core_type = #tpu.core_type<tc>, window_params = [{transform_indices = @transform_0, window_bounds = array<i64: 8, 2048>}, {transform_indices = @transform_1, window_bounds = array<i64: 8, 2048>}, {transform_indices = @transform_2, window_bounds = array<i64: 16, 512>}, {pipeline_mode = #tpu.pipeline_mode<synchronous>, transform_indices = @transform_3, window_bounds = array<i64: 8, 72>}, {pipeline_mode = #tpu.pipeline_mode<synchronous>, transform_indices = @transform_4, window_bounds = array<i64: 8, 1>}, {pipeline_mode = #tpu.pipeline_mode<synchronous>, transform_indices = @transform_5, window_bounds = array<i64: 8, 72>}, {pipeline_mode = #tpu.pipeline_mode<synchronous>, transform_indices = @transform_6, window_bounds = array<i64: 8, 1>}, {pipeline_mode = #tpu.pipeline_mode<synchronous>, transform_indices = @transform_7, window_bounds = array<i64: 16, 72>}, {pipeline_mode = #tpu.pipeline_mode<synchronous>, transform_indices = @transform_8, window_bounds = array<i64: 16, 1>}, {pipeline_mode = #tpu.pipeline_mode<synchronous>, transform_indices = @transform_9, window_bounds = array<i64: 16, 144>}, {pipeline_mode = #tpu.pipeline_mode<synchronous>, transform_indices = @transform_10, window_bounds = array<i64: 16, 1>}, {pipeline_mode = #tpu.pipeline_mode<synchronous>, transform_indices = @transform_11, window_bounds = array<i64: 9, 512>}, {pipeline_mode = #tpu.pipeline_mode<synchronous>, transform_indices = @transform_12, window_bounds = array<i64: 9, 256>}, {pipeline_mode = #tpu.pipeline_mode<synchronous>, transform_indices = @transform_13, window_bounds = array<i64: 512, 128>}, {pipeline_mode = #tpu.pipeline_mode<synchronous>, transform_indices = @transform_14, window_bounds = array<i64: 256, 64>}, {transform_indices = @transform_15, window_bounds = array<i64: 16, 128>}]} {
    %c0 = arith.constant 0 : index
    %c0_0 = arith.constant 0 : index
    %0 = vector.load %arg12[%c0, %c0_0] : memref<9x512xf32, #tpu.memory_space<vmem>>, vector<9x512xf32>
    %c0_1 = arith.constant 0 : index
    %c0_2 = arith.constant 0 : index
    %1 = vector.load %arg13[%c0_1, %c0_2] : memref<9x256xf32, #tpu.memory_space<vmem>>, vector<9x256xf32>
    %c0_3 = arith.constant 0 : index
    %c0_4 = arith.constant 0 : index
    %2 = vector.load %arg1[%c0_3, %c0_4] : memref<8x2048xf32, #tpu.memory_space<vmem>>, vector<8x2048xf32>
    %c0_5 = arith.constant 0 : index
    %c0_6 = arith.constant 0 : index
    %3 = vector.load %arg4[%c0_5, %c0_6] : memref<8x72xf32, #tpu.memory_space<vmem>>, vector<8x72xf32>
    %c0_7 = arith.constant 0 : index
    %c0_8 = arith.constant 0 : index
    %4 = vector.load %arg5[%c0_7, %c0_8] : memref<8x1xf32, #tpu.memory_space<vmem>>, vector<8x1xf32>
    %5 = vector.extract_strided_slice %0 {offsets = [0, 0], sizes = [1, 512], strides = [1, 1]} : vector<9x512xf32> to vector<1x512xf32>
    %6 = vector.extract_strided_slice %0 {offsets = [1, 0], sizes = [1, 512], strides = [1, 1]} : vector<9x512xf32> to vector<1x512xf32>
    %7 = vector.extract_strided_slice %0 {offsets = [2, 0], sizes = [1, 512], strides = [1, 1]} : vector<9x512xf32> to vector<1x512xf32>
    %8 = vector.extract_strided_slice %0 {offsets = [3, 0], sizes = [1, 512], strides = [1, 1]} : vector<9x512xf32> to vector<1x512xf32>
    %9 = vector.extract_strided_slice %0 {offsets = [5, 0], sizes = [1, 512], strides = [1, 1]} : vector<9x512xf32> to vector<1x512xf32>
    %10 = vector.extract_strided_slice %0 {offsets = [6, 0], sizes = [1, 512], strides = [1, 1]} : vector<9x512xf32> to vector<1x512xf32>
    %11 = vector.extract_strided_slice %0 {offsets = [7, 0], sizes = [1, 512], strides = [1, 1]} : vector<9x512xf32> to vector<1x512xf32>
    %12 = vector.extract_strided_slice %0 {offsets = [8, 0], sizes = [1, 512], strides = [1, 1]} : vector<9x512xf32> to vector<1x512xf32>
    %13 = vector.extract_strided_slice %2 {offsets = [0, 0], sizes = [8, 512], strides = [1, 1]} : vector<8x2048xf32> to vector<8x512xf32>
    %c17_i32 = arith.constant 17 : i32
    %14 = tpu.dynamic_rotate %13 by %c17_i32 dim 1 : vector<8x512xf32>, i32 -> vector<8x512xf32>
    %15 = vector.broadcast %5 : vector<1x512xf32> to vector<8x512xf32>
    %16 = arith.mulf %14, %15 : vector<8x512xf32>
    %c16_i32 = arith.constant 16 : i32
    %17 = tpu.dynamic_rotate %13 by %c16_i32 dim 1 : vector<8x512xf32>, i32 -> vector<8x512xf32>
    %18 = vector.broadcast %6 : vector<1x512xf32> to vector<8x512xf32>
    %19 = arith.mulf %17, %18 : vector<8x512xf32>
    %c15_i32 = arith.constant 15 : i32
    %20 = tpu.dynamic_rotate %13 by %c15_i32 dim 1 : vector<8x512xf32>, i32 -> vector<8x512xf32>
    %21 = vector.broadcast %7 : vector<1x512xf32> to vector<8x512xf32>
    %22 = arith.mulf %20, %21 : vector<8x512xf32>
    %c1_i32 = arith.constant 1 : i32
    %23 = tpu.dynamic_rotate %13 by %c1_i32 dim 1 : vector<8x512xf32>, i32 -> vector<8x512xf32>
    %24 = vector.broadcast %8 : vector<1x512xf32> to vector<8x512xf32>
    %25 = arith.mulf %23, %24 : vector<8x512xf32>
    %c511_i32 = arith.constant 511 : i32
    %26 = tpu.dynamic_rotate %13 by %c511_i32 dim 1 : vector<8x512xf32>, i32 -> vector<8x512xf32>
    %27 = vector.broadcast %9 : vector<1x512xf32> to vector<8x512xf32>
    %28 = arith.mulf %26, %27 : vector<8x512xf32>
    %c497_i32 = arith.constant 497 : i32
    %29 = tpu.dynamic_rotate %13 by %c497_i32 dim 1 : vector<8x512xf32>, i32 -> vector<8x512xf32>
    %30 = vector.broadcast %10 : vector<1x512xf32> to vector<8x512xf32>
    %31 = arith.mulf %29, %30 : vector<8x512xf32>
    %c496_i32 = arith.constant 496 : i32
    %32 = tpu.dynamic_rotate %13 by %c496_i32 dim 1 : vector<8x512xf32>, i32 -> vector<8x512xf32>
    %33 = vector.broadcast %11 : vector<1x512xf32> to vector<8x512xf32>
    %34 = arith.mulf %32, %33 : vector<8x512xf32>
    %c495_i32 = arith.constant 495 : i32
    %35 = tpu.dynamic_rotate %13 by %c495_i32 dim 1 : vector<8x512xf32>, i32 -> vector<8x512xf32>
    %36 = vector.broadcast %12 : vector<1x512xf32> to vector<8x512xf32>
    %37 = arith.mulf %35, %36 : vector<8x512xf32>
    %38 = tpu.concatenate %16, %19, %22, %25, %13, %28, %31, %34, %37 in 0 : vector<8x512xf32>, vector<8x512xf32>, vector<8x512xf32>, vector<8x512xf32>, vector<8x512xf32>, vector<8x512xf32>, vector<8x512xf32>, vector<8x512xf32>, vector<8x512xf32> -> vector<72x512xf32>
    %cst = arith.constant dense<0.000000e+00> : vector<8x512xf32>
    %39 = tpu.matmul %3, %38, %cst {dimension_numbers = #tpu.dot_dimension_numbers<[1], [0], [0], [1], [0, 0, 1, 1], [], []>} : vector<8x72xf32>, vector<72x512xf32>, vector<8x512xf32> -> vector<8x512xf32>
    %40 = vector.extract_strided_slice %2 {offsets = [0, 512], sizes = [8, 512], strides = [1, 1]} : vector<8x2048xf32> to vector<8x512xf32>
    %c17_i32_9 = arith.constant 17 : i32
    %41 = tpu.dynamic_rotate %40 by %c17_i32_9 dim 1 : vector<8x512xf32>, i32 -> vector<8x512xf32>
    %42 = vector.broadcast %5 : vector<1x512xf32> to vector<8x512xf32>
    %43 = arith.mulf %41, %42 : vector<8x512xf32>
    %c16_i32_10 = arith.constant 16 : i32
    %44 = tpu.dynamic_rotate %40 by %c16_i32_10 dim 1 : vector<8x512xf32>, i32 -> vector<8x512xf32>
    %45 = vector.broadcast %6 : vector<1x512xf32> to vector<8x512xf32>
    %46 = arith.mulf %44, %45 : vector<8x512xf32>
    %c15_i32_11 = arith.constant 15 : i32
    %47 = tpu.dynamic_rotate %40 by %c15_i32_11 dim 1 : vector<8x512xf32>, i32 -> vector<8x512xf32>
    %48 = vector.broadcast %7 : vector<1x512xf32> to vector<8x512xf32>
    %49 = arith.mulf %47, %48 : vector<8x512xf32>
    %c1_i32_12 = arith.constant 1 : i32
    %50 = tpu.dynamic_rotate %40 by %c1_i32_12 dim 1 : vector<8x512xf32>, i32 -> vector<8x512xf32>
    %51 = vector.broadcast %8 : vector<1x512xf32> to vector<8x512xf32>
    %52 = arith.mulf %50, %51 : vector<8x512xf32>
    %c511_i32_13 = arith.constant 511 : i32
    %53 = tpu.dynamic_rotate %40 by %c511_i32_13 dim 1 : vector<8x512xf32>, i32 -> vector<8x512xf32>
    %54 = vector.broadcast %9 : vector<1x512xf32> to vector<8x512xf32>
    %55 = arith.mulf %53, %54 : vector<8x512xf32>
    %c497_i32_14 = arith.constant 497 : i32
    %56 = tpu.dynamic_rotate %40 by %c497_i32_14 dim 1 : vector<8x512xf32>, i32 -> vector<8x512xf32>
    %57 = vector.broadcast %10 : vector<1x512xf32> to vector<8x512xf32>
    %58 = arith.mulf %56, %57 : vector<8x512xf32>
    %c496_i32_15 = arith.constant 496 : i32
    %59 = tpu.dynamic_rotate %40 by %c496_i32_15 dim 1 : vector<8x512xf32>, i32 -> vector<8x512xf32>
    %60 = vector.broadcast %11 : vector<1x512xf32> to vector<8x512xf32>
    %61 = arith.mulf %59, %60 : vector<8x512xf32>
    %c495_i32_16 = arith.constant 495 : i32
    %62 = tpu.dynamic_rotate %40 by %c495_i32_16 dim 1 : vector<8x512xf32>, i32 -> vector<8x512xf32>
    %63 = vector.broadcast %12 : vector<1x512xf32> to vector<8x512xf32>
    %64 = arith.mulf %62, %63 : vector<8x512xf32>
    %65 = tpu.concatenate %43, %46, %49, %52, %40, %55, %58, %61, %64 in 0 : vector<8x512xf32>, vector<8x512xf32>, vector<8x512xf32>, vector<8x512xf32>, vector<8x512xf32>, vector<8x512xf32>, vector<8x512xf32>, vector<8x512xf32>, vector<8x512xf32> -> vector<72x512xf32>
    %cst_17 = arith.constant dense<0.000000e+00> : vector<8x512xf32>
    %66 = tpu.matmul %3, %65, %cst_17 {dimension_numbers = #tpu.dot_dimension_numbers<[1], [0], [0], [1], [0, 0, 1, 1], [], []>} : vector<8x72xf32>, vector<72x512xf32>, vector<8x512xf32> -> vector<8x512xf32>
    %67 = vector.extract_strided_slice %2 {offsets = [0, 1024], sizes = [8, 512], strides = [1, 1]} : vector<8x2048xf32> to vector<8x512xf32>
    %c17_i32_18 = arith.constant 17 : i32
    %68 = tpu.dynamic_rotate %67 by %c17_i32_18 dim 1 : vector<8x512xf32>, i32 -> vector<8x512xf32>
    %69 = vector.broadcast %5 : vector<1x512xf32> to vector<8x512xf32>
    %70 = arith.mulf %68, %69 : vector<8x512xf32>
    %c16_i32_19 = arith.constant 16 : i32
    %71 = tpu.dynamic_rotate %67 by %c16_i32_19 dim 1 : vector<8x512xf32>, i32 -> vector<8x512xf32>
    %72 = vector.broadcast %6 : vector<1x512xf32> to vector<8x512xf32>
    %73 = arith.mulf %71, %72 : vector<8x512xf32>
    %c15_i32_20 = arith.constant 15 : i32
    %74 = tpu.dynamic_rotate %67 by %c15_i32_20 dim 1 : vector<8x512xf32>, i32 -> vector<8x512xf32>
    %75 = vector.broadcast %7 : vector<1x512xf32> to vector<8x512xf32>
    %76 = arith.mulf %74, %75 : vector<8x512xf32>
    %c1_i32_21 = arith.constant 1 : i32
    %77 = tpu.dynamic_rotate %67 by %c1_i32_21 dim 1 : vector<8x512xf32>, i32 -> vector<8x512xf32>
    %78 = vector.broadcast %8 : vector<1x512xf32> to vector<8x512xf32>
    %79 = arith.mulf %77, %78 : vector<8x512xf32>
    %c511_i32_22 = arith.constant 511 : i32
    %80 = tpu.dynamic_rotate %67 by %c511_i32_22 dim 1 : vector<8x512xf32>, i32 -> vector<8x512xf32>
    %81 = vector.broadcast %9 : vector<1x512xf32> to vector<8x512xf32>
    %82 = arith.mulf %80, %81 : vector<8x512xf32>
    %c497_i32_23 = arith.constant 497 : i32
    %83 = tpu.dynamic_rotate %67 by %c497_i32_23 dim 1 : vector<8x512xf32>, i32 -> vector<8x512xf32>
    %84 = vector.broadcast %10 : vector<1x512xf32> to vector<8x512xf32>
    %85 = arith.mulf %83, %84 : vector<8x512xf32>
    %c496_i32_24 = arith.constant 496 : i32
    %86 = tpu.dynamic_rotate %67 by %c496_i32_24 dim 1 : vector<8x512xf32>, i32 -> vector<8x512xf32>
    %87 = vector.broadcast %11 : vector<1x512xf32> to vector<8x512xf32>
    %88 = arith.mulf %86, %87 : vector<8x512xf32>
    %c495_i32_25 = arith.constant 495 : i32
    %89 = tpu.dynamic_rotate %67 by %c495_i32_25 dim 1 : vector<8x512xf32>, i32 -> vector<8x512xf32>
    %90 = vector.broadcast %12 : vector<1x512xf32> to vector<8x512xf32>
    %91 = arith.mulf %89, %90 : vector<8x512xf32>
    %92 = tpu.concatenate %70, %73, %76, %79, %67, %82, %85, %88, %91 in 0 : vector<8x512xf32>, vector<8x512xf32>, vector<8x512xf32>, vector<8x512xf32>, vector<8x512xf32>, vector<8x512xf32>, vector<8x512xf32>, vector<8x512xf32>, vector<8x512xf32> -> vector<72x512xf32>
    %cst_26 = arith.constant dense<0.000000e+00> : vector<8x512xf32>
    %93 = tpu.matmul %3, %92, %cst_26 {dimension_numbers = #tpu.dot_dimension_numbers<[1], [0], [0], [1], [0, 0, 1, 1], [], []>} : vector<8x72xf32>, vector<72x512xf32>, vector<8x512xf32> -> vector<8x512xf32>
    %94 = vector.extract_strided_slice %2 {offsets = [0, 1536], sizes = [8, 512], strides = [1, 1]} : vector<8x2048xf32> to vector<8x512xf32>
    %c17_i32_27 = arith.constant 17 : i32
    %95 = tpu.dynamic_rotate %94 by %c17_i32_27 dim 1 : vector<8x512xf32>, i32 -> vector<8x512xf32>
    %96 = vector.broadcast %5 : vector<1x512xf32> to vector<8x512xf32>
    %97 = arith.mulf %95, %96 : vector<8x512xf32>
    %c16_i32_28 = arith.constant 16 : i32
    %98 = tpu.dynamic_rotate %94 by %c16_i32_28 dim 1 : vector<8x512xf32>, i32 -> vector<8x512xf32>
    %99 = vector.broadcast %6 : vector<1x512xf32> to vector<8x512xf32>
    %100 = arith.mulf %98, %99 : vector<8x512xf32>
    %c15_i32_29 = arith.constant 15 : i32
    %101 = tpu.dynamic_rotate %94 by %c15_i32_29 dim 1 : vector<8x512xf32>, i32 -> vector<8x512xf32>
    %102 = vector.broadcast %7 : vector<1x512xf32> to vector<8x512xf32>
    %103 = arith.mulf %101, %102 : vector<8x512xf32>
    %c1_i32_30 = arith.constant 1 : i32
    %104 = tpu.dynamic_rotate %94 by %c1_i32_30 dim 1 : vector<8x512xf32>, i32 -> vector<8x512xf32>
    %105 = vector.broadcast %8 : vector<1x512xf32> to vector<8x512xf32>
    %106 = arith.mulf %104, %105 : vector<8x512xf32>
    %c511_i32_31 = arith.constant 511 : i32
    %107 = tpu.dynamic_rotate %94 by %c511_i32_31 dim 1 : vector<8x512xf32>, i32 -> vector<8x512xf32>
    %108 = vector.broadcast %9 : vector<1x512xf32> to vector<8x512xf32>
    %109 = arith.mulf %107, %108 : vector<8x512xf32>
    %c497_i32_32 = arith.constant 497 : i32
    %110 = tpu.dynamic_rotate %94 by %c497_i32_32 dim 1 : vector<8x512xf32>, i32 -> vector<8x512xf32>
    %111 = vector.broadcast %10 : vector<1x512xf32> to vector<8x512xf32>
    %112 = arith.mulf %110, %111 : vector<8x512xf32>
    %c496_i32_33 = arith.constant 496 : i32
    %113 = tpu.dynamic_rotate %94 by %c496_i32_33 dim 1 : vector<8x512xf32>, i32 -> vector<8x512xf32>
    %114 = vector.broadcast %11 : vector<1x512xf32> to vector<8x512xf32>
    %115 = arith.mulf %113, %114 : vector<8x512xf32>
    %c495_i32_34 = arith.constant 495 : i32
    %116 = tpu.dynamic_rotate %94 by %c495_i32_34 dim 1 : vector<8x512xf32>, i32 -> vector<8x512xf32>
    %117 = vector.broadcast %12 : vector<1x512xf32> to vector<8x512xf32>
    %118 = arith.mulf %116, %117 : vector<8x512xf32>
    %119 = tpu.concatenate %97, %100, %103, %106, %94, %109, %112, %115, %118 in 0 : vector<8x512xf32>, vector<8x512xf32>, vector<8x512xf32>, vector<8x512xf32>, vector<8x512xf32>, vector<8x512xf32>, vector<8x512xf32>, vector<8x512xf32>, vector<8x512xf32> -> vector<72x512xf32>
    %cst_35 = arith.constant dense<0.000000e+00> : vector<8x512xf32>
    %120 = tpu.matmul %3, %119, %cst_35 {dimension_numbers = #tpu.dot_dimension_numbers<[1], [0], [0], [1], [0, 0, 1, 1], [], []>} : vector<8x72xf32>, vector<72x512xf32>, vector<8x512xf32> -> vector<8x512xf32>
    %121 = tpu.concatenate %39, %66, %93, %120 in 1 : vector<8x512xf32>, vector<8x512xf32>, vector<8x512xf32>, vector<8x512xf32> -> vector<8x2048xf32>
    %122 = vector.broadcast %4 : vector<8x1xf32> to vector<8x2048xf32>
    %123 = arith.addf %121, %122 : vector<8x2048xf32>
    %124 = math.tanh %123 : vector<8x2048xf32>
    %c0_36 = arith.constant 0 : index
    %c0_37 = arith.constant 0 : index
    %125 = vector.load %arg6[%c0_36, %c0_37] : memref<8x72xf32, #tpu.memory_space<vmem>>, vector<8x72xf32>
    %c0_38 = arith.constant 0 : index
    %c0_39 = arith.constant 0 : index
    %126 = vector.load %arg7[%c0_38, %c0_39] : memref<8x1xf32, #tpu.memory_space<vmem>>, vector<8x1xf32>
    %127 = vector.extract_strided_slice %0 {offsets = [0, 0], sizes = [1, 512], strides = [1, 1]} : vector<9x512xf32> to vector<1x512xf32>
    %128 = vector.extract_strided_slice %0 {offsets = [1, 0], sizes = [1, 512], strides = [1, 1]} : vector<9x512xf32> to vector<1x512xf32>
    %129 = vector.extract_strided_slice %0 {offsets = [2, 0], sizes = [1, 512], strides = [1, 1]} : vector<9x512xf32> to vector<1x512xf32>
    %130 = vector.extract_strided_slice %0 {offsets = [3, 0], sizes = [1, 512], strides = [1, 1]} : vector<9x512xf32> to vector<1x512xf32>
    %131 = vector.extract_strided_slice %0 {offsets = [5, 0], sizes = [1, 512], strides = [1, 1]} : vector<9x512xf32> to vector<1x512xf32>
    %132 = vector.extract_strided_slice %0 {offsets = [6, 0], sizes = [1, 512], strides = [1, 1]} : vector<9x512xf32> to vector<1x512xf32>
    %133 = vector.extract_strided_slice %0 {offsets = [7, 0], sizes = [1, 512], strides = [1, 1]} : vector<9x512xf32> to vector<1x512xf32>
    %134 = vector.extract_strided_slice %0 {offsets = [8, 0], sizes = [1, 512], strides = [1, 1]} : vector<9x512xf32> to vector<1x512xf32>
    %135 = vector.extract_strided_slice %124 {offsets = [0, 0], sizes = [8, 512], strides = [1, 1]} : vector<8x2048xf32> to vector<8x512xf32>
    %c17_i32_40 = arith.constant 17 : i32
    %136 = tpu.dynamic_rotate %135 by %c17_i32_40 dim 1 : vector<8x512xf32>, i32 -> vector<8x512xf32>
    %137 = vector.broadcast %127 : vector<1x512xf32> to vector<8x512xf32>
    %138 = arith.mulf %136, %137 : vector<8x512xf32>
    %c16_i32_41 = arith.constant 16 : i32
    %139 = tpu.dynamic_rotate %135 by %c16_i32_41 dim 1 : vector<8x512xf32>, i32 -> vector<8x512xf32>
    %140 = vector.broadcast %128 : vector<1x512xf32> to vector<8x512xf32>
    %141 = arith.mulf %139, %140 : vector<8x512xf32>
    %c15_i32_42 = arith.constant 15 : i32
    %142 = tpu.dynamic_rotate %135 by %c15_i32_42 dim 1 : vector<8x512xf32>, i32 -> vector<8x512xf32>
    %143 = vector.broadcast %129 : vector<1x512xf32> to vector<8x512xf32>
    %144 = arith.mulf %142, %143 : vector<8x512xf32>
    %c1_i32_43 = arith.constant 1 : i32
    %145 = tpu.dynamic_rotate %135 by %c1_i32_43 dim 1 : vector<8x512xf32>, i32 -> vector<8x512xf32>
    %146 = vector.broadcast %130 : vector<1x512xf32> to vector<8x512xf32>
    %147 = arith.mulf %145, %146 : vector<8x512xf32>
    %c511_i32_44 = arith.constant 511 : i32
    %148 = tpu.dynamic_rotate %135 by %c511_i32_44 dim 1 : vector<8x512xf32>, i32 -> vector<8x512xf32>
    %149 = vector.broadcast %131 : vector<1x512xf32> to vector<8x512xf32>
    %150 = arith.mulf %148, %149 : vector<8x512xf32>
    %c497_i32_45 = arith.constant 497 : i32
    %151 = tpu.dynamic_rotate %135 by %c497_i32_45 dim 1 : vector<8x512xf32>, i32 -> vector<8x512xf32>
    %152 = vector.broadcast %132 : vector<1x512xf32> to vector<8x512xf32>
    %153 = arith.mulf %151, %152 : vector<8x512xf32>
    %c496_i32_46 = arith.constant 496 : i32
    %154 = tpu.dynamic_rotate %135 by %c496_i32_46 dim 1 : vector<8x512xf32>, i32 -> vector<8x512xf32>
    %155 = vector.broadcast %133 : vector<1x512xf32> to vector<8x512xf32>
    %156 = arith.mulf %154, %155 : vector<8x512xf32>
    %c495_i32_47 = arith.constant 495 : i32
    %157 = tpu.dynamic_rotate %135 by %c495_i32_47 dim 1 : vector<8x512xf32>, i32 -> vector<8x512xf32>
    %158 = vector.broadcast %134 : vector<1x512xf32> to vector<8x512xf32>
    %159 = arith.mulf %157, %158 : vector<8x512xf32>
    %160 = tpu.concatenate %138, %141, %144, %147, %135, %150, %153, %156, %159 in 0 : vector<8x512xf32>, vector<8x512xf32>, vector<8x512xf32>, vector<8x512xf32>, vector<8x512xf32>, vector<8x512xf32>, vector<8x512xf32>, vector<8x512xf32>, vector<8x512xf32> -> vector<72x512xf32>
    %cst_48 = arith.constant dense<0.000000e+00> : vector<8x512xf32>
    %161 = tpu.matmul %125, %160, %cst_48 {dimension_numbers = #tpu.dot_dimension_numbers<[1], [0], [0], [1], [0, 0, 1, 1], [], []>} : vector<8x72xf32>, vector<72x512xf32>, vector<8x512xf32> -> vector<8x512xf32>
    %162 = vector.extract_strided_slice %124 {offsets = [0, 512], sizes = [8, 512], strides = [1, 1]} : vector<8x2048xf32> to vector<8x512xf32>
    %c17_i32_49 = arith.constant 17 : i32
    %163 = tpu.dynamic_rotate %162 by %c17_i32_49 dim 1 : vector<8x512xf32>, i32 -> vector<8x512xf32>
    %164 = vector.broadcast %127 : vector<1x512xf32> to vector<8x512xf32>
    %165 = arith.mulf %163, %164 : vector<8x512xf32>
    %c16_i32_50 = arith.constant 16 : i32
    %166 = tpu.dynamic_rotate %162 by %c16_i32_50 dim 1 : vector<8x512xf32>, i32 -> vector<8x512xf32>
    %167 = vector.broadcast %128 : vector<1x512xf32> to vector<8x512xf32>
    %168 = arith.mulf %166, %167 : vector<8x512xf32>
    %c15_i32_51 = arith.constant 15 : i32
    %169 = tpu.dynamic_rotate %162 by %c15_i32_51 dim 1 : vector<8x512xf32>, i32 -> vector<8x512xf32>
    %170 = vector.broadcast %129 : vector<1x512xf32> to vector<8x512xf32>
    %171 = arith.mulf %169, %170 : vector<8x512xf32>
    %c1_i32_52 = arith.constant 1 : i32
    %172 = tpu.dynamic_rotate %162 by %c1_i32_52 dim 1 : vector<8x512xf32>, i32 -> vector<8x512xf32>
    %173 = vector.broadcast %130 : vector<1x512xf32> to vector<8x512xf32>
    %174 = arith.mulf %172, %173 : vector<8x512xf32>
    %c511_i32_53 = arith.constant 511 : i32
    %175 = tpu.dynamic_rotate %162 by %c511_i32_53 dim 1 : vector<8x512xf32>, i32 -> vector<8x512xf32>
    %176 = vector.broadcast %131 : vector<1x512xf32> to vector<8x512xf32>
    %177 = arith.mulf %175, %176 : vector<8x512xf32>
    %c497_i32_54 = arith.constant 497 : i32
    %178 = tpu.dynamic_rotate %162 by %c497_i32_54 dim 1 : vector<8x512xf32>, i32 -> vector<8x512xf32>
    %179 = vector.broadcast %132 : vector<1x512xf32> to vector<8x512xf32>
    %180 = arith.mulf %178, %179 : vector<8x512xf32>
    %c496_i32_55 = arith.constant 496 : i32
    %181 = tpu.dynamic_rotate %162 by %c496_i32_55 dim 1 : vector<8x512xf32>, i32 -> vector<8x512xf32>
    %182 = vector.broadcast %133 : vector<1x512xf32> to vector<8x512xf32>
    %183 = arith.mulf %181, %182 : vector<8x512xf32>
    %c495_i32_56 = arith.constant 495 : i32
    %184 = tpu.dynamic_rotate %162 by %c495_i32_56 dim 1 : vector<8x512xf32>, i32 -> vector<8x512xf32>
    %185 = vector.broadcast %134 : vector<1x512xf32> to vector<8x512xf32>
    %186 = arith.mulf %184, %185 : vector<8x512xf32>
    %187 = tpu.concatenate %165, %168, %171, %174, %162, %177, %180, %183, %186 in 0 : vector<8x512xf32>, vector<8x512xf32>, vector<8x512xf32>, vector<8x512xf32>, vector<8x512xf32>, vector<8x512xf32>, vector<8x512xf32>, vector<8x512xf32>, vector<8x512xf32> -> vector<72x512xf32>
    %cst_57 = arith.constant dense<0.000000e+00> : vector<8x512xf32>
    %188 = tpu.matmul %125, %187, %cst_57 {dimension_numbers = #tpu.dot_dimension_numbers<[1], [0], [0], [1], [0, 0, 1, 1], [], []>} : vector<8x72xf32>, vector<72x512xf32>, vector<8x512xf32> -> vector<8x512xf32>
    %189 = vector.extract_strided_slice %124 {offsets = [0, 1024], sizes = [8, 512], strides = [1, 1]} : vector<8x2048xf32> to vector<8x512xf32>
    %c17_i32_58 = arith.constant 17 : i32
    %190 = tpu.dynamic_rotate %189 by %c17_i32_58 dim 1 : vector<8x512xf32>, i32 -> vector<8x512xf32>
    %191 = vector.broadcast %127 : vector<1x512xf32> to vector<8x512xf32>
    %192 = arith.mulf %190, %191 : vector<8x512xf32>
    %c16_i32_59 = arith.constant 16 : i32
    %193 = tpu.dynamic_rotate %189 by %c16_i32_59 dim 1 : vector<8x512xf32>, i32 -> vector<8x512xf32>
    %194 = vector.broadcast %128 : vector<1x512xf32> to vector<8x512xf32>
    %195 = arith.mulf %193, %194 : vector<8x512xf32>
    %c15_i32_60 = arith.constant 15 : i32
    %196 = tpu.dynamic_rotate %189 by %c15_i32_60 dim 1 : vector<8x512xf32>, i32 -> vector<8x512xf32>
    %197 = vector.broadcast %129 : vector<1x512xf32> to vector<8x512xf32>
    %198 = arith.mulf %196, %197 : vector<8x512xf32>
    %c1_i32_61 = arith.constant 1 : i32
    %199 = tpu.dynamic_rotate %189 by %c1_i32_61 dim 1 : vector<8x512xf32>, i32 -> vector<8x512xf32>
    %200 = vector.broadcast %130 : vector<1x512xf32> to vector<8x512xf32>
    %201 = arith.mulf %199, %200 : vector<8x512xf32>
    %c511_i32_62 = arith.constant 511 : i32
    %202 = tpu.dynamic_rotate %189 by %c511_i32_62 dim 1 : vector<8x512xf32>, i32 -> vector<8x512xf32>
    %203 = vector.broadcast %131 : vector<1x512xf32> to vector<8x512xf32>
    %204 = arith.mulf %202, %203 : vector<8x512xf32>
    %c497_i32_63 = arith.constant 497 : i32
    %205 = tpu.dynamic_rotate %189 by %c497_i32_63 dim 1 : vector<8x512xf32>, i32 -> vector<8x512xf32>
    %206 = vector.broadcast %132 : vector<1x512xf32> to vector<8x512xf32>
    %207 = arith.mulf %205, %206 : vector<8x512xf32>
    %c496_i32_64 = arith.constant 496 : i32
    %208 = tpu.dynamic_rotate %189 by %c496_i32_64 dim 1 : vector<8x512xf32>, i32 -> vector<8x512xf32>
    %209 = vector.broadcast %133 : vector<1x512xf32> to vector<8x512xf32>
    %210 = arith.mulf %208, %209 : vector<8x512xf32>
    %c495_i32_65 = arith.constant 495 : i32
    %211 = tpu.dynamic_rotate %189 by %c495_i32_65 dim 1 : vector<8x512xf32>, i32 -> vector<8x512xf32>
    %212 = vector.broadcast %134 : vector<1x512xf32> to vector<8x512xf32>
    %213 = arith.mulf %211, %212 : vector<8x512xf32>
    %214 = tpu.concatenate %192, %195, %198, %201, %189, %204, %207, %210, %213 in 0 : vector<8x512xf32>, vector<8x512xf32>, vector<8x512xf32>, vector<8x512xf32>, vector<8x512xf32>, vector<8x512xf32>, vector<8x512xf32>, vector<8x512xf32>, vector<8x512xf32> -> vector<72x512xf32>
    %cst_66 = arith.constant dense<0.000000e+00> : vector<8x512xf32>
    %215 = tpu.matmul %125, %214, %cst_66 {dimension_numbers = #tpu.dot_dimension_numbers<[1], [0], [0], [1], [0, 0, 1, 1], [], []>} : vector<8x72xf32>, vector<72x512xf32>, vector<8x512xf32> -> vector<8x512xf32>
    %216 = vector.extract_strided_slice %124 {offsets = [0, 1536], sizes = [8, 512], strides = [1, 1]} : vector<8x2048xf32> to vector<8x512xf32>
    %c17_i32_67 = arith.constant 17 : i32
    %217 = tpu.dynamic_rotate %216 by %c17_i32_67 dim 1 : vector<8x512xf32>, i32 -> vector<8x512xf32>
    %218 = vector.broadcast %127 : vector<1x512xf32> to vector<8x512xf32>
    %219 = arith.mulf %217, %218 : vector<8x512xf32>
    %c16_i32_68 = arith.constant 16 : i32
    %220 = tpu.dynamic_rotate %216 by %c16_i32_68 dim 1 : vector<8x512xf32>, i32 -> vector<8x512xf32>
    %221 = vector.broadcast %128 : vector<1x512xf32> to vector<8x512xf32>
    %222 = arith.mulf %220, %221 : vector<8x512xf32>
    %c15_i32_69 = arith.constant 15 : i32
    %223 = tpu.dynamic_rotate %216 by %c15_i32_69 dim 1 : vector<8x512xf32>, i32 -> vector<8x512xf32>
    %224 = vector.broadcast %129 : vector<1x512xf32> to vector<8x512xf32>
    %225 = arith.mulf %223, %224 : vector<8x512xf32>
    %c1_i32_70 = arith.constant 1 : i32
    %226 = tpu.dynamic_rotate %216 by %c1_i32_70 dim 1 : vector<8x512xf32>, i32 -> vector<8x512xf32>
    %227 = vector.broadcast %130 : vector<1x512xf32> to vector<8x512xf32>
    %228 = arith.mulf %226, %227 : vector<8x512xf32>
    %c511_i32_71 = arith.constant 511 : i32
    %229 = tpu.dynamic_rotate %216 by %c511_i32_71 dim 1 : vector<8x512xf32>, i32 -> vector<8x512xf32>
    %230 = vector.broadcast %131 : vector<1x512xf32> to vector<8x512xf32>
    %231 = arith.mulf %229, %230 : vector<8x512xf32>
    %c497_i32_72 = arith.constant 497 : i32
    %232 = tpu.dynamic_rotate %216 by %c497_i32_72 dim 1 : vector<8x512xf32>, i32 -> vector<8x512xf32>
    %233 = vector.broadcast %132 : vector<1x512xf32> to vector<8x512xf32>
    %234 = arith.mulf %232, %233 : vector<8x512xf32>
    %c496_i32_73 = arith.constant 496 : i32
    %235 = tpu.dynamic_rotate %216 by %c496_i32_73 dim 1 : vector<8x512xf32>, i32 -> vector<8x512xf32>
    %236 = vector.broadcast %133 : vector<1x512xf32> to vector<8x512xf32>
    %237 = arith.mulf %235, %236 : vector<8x512xf32>
    %c495_i32_74 = arith.constant 495 : i32
    %238 = tpu.dynamic_rotate %216 by %c495_i32_74 dim 1 : vector<8x512xf32>, i32 -> vector<8x512xf32>
    %239 = vector.broadcast %134 : vector<1x512xf32> to vector<8x512xf32>
    %240 = arith.mulf %238, %239 : vector<8x512xf32>
    %241 = tpu.concatenate %219, %222, %225, %228, %216, %231, %234, %237, %240 in 0 : vector<8x512xf32>, vector<8x512xf32>, vector<8x512xf32>, vector<8x512xf32>, vector<8x512xf32>, vector<8x512xf32>, vector<8x512xf32>, vector<8x512xf32>, vector<8x512xf32> -> vector<72x512xf32>
    %cst_75 = arith.constant dense<0.000000e+00> : vector<8x512xf32>
    %242 = tpu.matmul %125, %241, %cst_75 {dimension_numbers = #tpu.dot_dimension_numbers<[1], [0], [0], [1], [0, 0, 1, 1], [], []>} : vector<8x72xf32>, vector<72x512xf32>, vector<8x512xf32> -> vector<8x512xf32>
    %243 = tpu.concatenate %161, %188, %215, %242 in 1 : vector<8x512xf32>, vector<8x512xf32>, vector<8x512xf32>, vector<8x512xf32> -> vector<8x2048xf32>
    %244 = vector.broadcast %126 : vector<8x1xf32> to vector<8x2048xf32>
    %245 = arith.addf %243, %244 : vector<8x2048xf32>
    %246 = math.tanh %245 : vector<8x2048xf32>
    %c0_76 = arith.constant 0 : index
    %c0_77 = arith.constant 0 : index
    %247 = vector.load %arg2[%c0_76, %c0_77] : memref<8x2048xf32, #tpu.memory_space<vmem>>, vector<8x2048xf32>
    %c0_78 = arith.constant 0 : index
    %c0_79 = arith.constant 0 : index
    %248 = vector.load %arg14[%c0_78, %c0_79] : memref<512x128xf32, #tpu.memory_space<vmem>>, vector<512x128xf32>
    %249 = arith.mulf %247, %247 : vector<8x2048xf32>
    %cst_80 = arith.constant dense<0.000000e+00> : vector<2048xf32>
    %250 = vector.multi_reduction <add>, %249, %cst_80 [0] : vector<8x2048xf32> to vector<2048xf32>
    %251 = vector.shape_cast %250 : vector<2048xf32> to vector<1x2048xf32>
    %cst_81 = arith.constant 1.000000e-24 : f32
    %252 = vector.broadcast %cst_81 : f32 to vector<1x2048xf32>
    %253 = arith.maximumf %251, %252 : vector<1x2048xf32>
    %254 = math.rsqrt %253 : vector<1x2048xf32>
    %255 = vector.broadcast %254 : vector<1x2048xf32> to vector<8x2048xf32>
    %256 = arith.mulf %247, %255 : vector<8x2048xf32>
    %257 = arith.mulf %246, %256 : vector<8x2048xf32>
    %258 = math.tanh %257 : vector<8x2048xf32>
    %259 = vector.extract_strided_slice %258 {offsets = [0, 0], sizes = [8, 512], strides = [1, 1]} : vector<8x2048xf32> to vector<8x512xf32>
    %cst_82 = arith.constant dense<0.000000e+00> : vector<8x128xf32>
    %260 = tpu.matmul %259, %248, %cst_82 {dimension_numbers = #tpu.dot_dimension_numbers<[1], [0], [0], [1], [0, 0, 1, 1], [], []>} : vector<8x512xf32>, vector<512x128xf32>, vector<8x128xf32> -> vector<8x128xf32>
    %261 = vector.extract_strided_slice %258 {offsets = [0, 512], sizes = [8, 512], strides = [1, 1]} : vector<8x2048xf32> to vector<8x512xf32>
    %cst_83 = arith.constant dense<0.000000e+00> : vector<8x128xf32>
    %262 = tpu.matmul %261, %248, %cst_83 {dimension_numbers = #tpu.dot_dimension_numbers<[1], [0], [0], [1], [0, 0, 1, 1], [], []>} : vector<8x512xf32>, vector<512x128xf32>, vector<8x128xf32> -> vector<8x128xf32>
    %263 = vector.extract_strided_slice %258 {offsets = [0, 1024], sizes = [8, 512], strides = [1, 1]} : vector<8x2048xf32> to vector<8x512xf32>
    %cst_84 = arith.constant dense<0.000000e+00> : vector<8x128xf32>
    %264 = tpu.matmul %263, %248, %cst_84 {dimension_numbers = #tpu.dot_dimension_numbers<[1], [0], [0], [1], [0, 0, 1, 1], [], []>} : vector<8x512xf32>, vector<512x128xf32>, vector<8x128xf32> -> vector<8x128xf32>
    %265 = vector.extract_strided_slice %258 {offsets = [0, 1536], sizes = [8, 512], strides = [1, 1]} : vector<8x2048xf32> to vector<8x512xf32>
    %cst_85 = arith.constant dense<0.000000e+00> : vector<8x128xf32>
    %266 = tpu.matmul %265, %248, %cst_85 {dimension_numbers = #tpu.dot_dimension_numbers<[1], [0], [0], [1], [0, 0, 1, 1], [], []>} : vector<8x512xf32>, vector<512x128xf32>, vector<8x128xf32> -> vector<8x128xf32>
    %267 = tpu.concatenate %260, %262, %264, %266 in 1 : vector<8x128xf32>, vector<8x128xf32>, vector<8x128xf32>, vector<8x128xf32> -> vector<8x512xf32>
    %c0_86 = arith.constant 0 : index
    %c0_87 = arith.constant 0 : index
    %268 = vector.load %arg8[%c0_86, %c0_87] : memref<16x72xf32, #tpu.memory_space<vmem>>, vector<16x72xf32>
    %c0_88 = arith.constant 0 : index
    %c0_89 = arith.constant 0 : index
    %269 = vector.load %arg9[%c0_88, %c0_89] : memref<16x1xf32, #tpu.memory_space<vmem>>, vector<16x1xf32>
    %270 = vector.extract_strided_slice %1 {offsets = [0, 0], sizes = [1, 256], strides = [1, 1]} : vector<9x256xf32> to vector<1x256xf32>
    %271 = vector.extract_strided_slice %1 {offsets = [1, 0], sizes = [1, 256], strides = [1, 1]} : vector<9x256xf32> to vector<1x256xf32>
    %272 = vector.extract_strided_slice %1 {offsets = [2, 0], sizes = [1, 256], strides = [1, 1]} : vector<9x256xf32> to vector<1x256xf32>
    %273 = vector.extract_strided_slice %1 {offsets = [3, 0], sizes = [1, 256], strides = [1, 1]} : vector<9x256xf32> to vector<1x256xf32>
    %274 = vector.extract_strided_slice %1 {offsets = [5, 0], sizes = [1, 256], strides = [1, 1]} : vector<9x256xf32> to vector<1x256xf32>
    %275 = vector.extract_strided_slice %1 {offsets = [6, 0], sizes = [1, 256], strides = [1, 1]} : vector<9x256xf32> to vector<1x256xf32>
    %276 = vector.extract_strided_slice %1 {offsets = [7, 0], sizes = [1, 256], strides = [1, 1]} : vector<9x256xf32> to vector<1x256xf32>
    %277 = vector.extract_strided_slice %1 {offsets = [8, 0], sizes = [1, 256], strides = [1, 1]} : vector<9x256xf32> to vector<1x256xf32>
    %278 = vector.extract_strided_slice %267 {offsets = [0, 0], sizes = [8, 256], strides = [1, 1]} : vector<8x512xf32> to vector<8x256xf32>
    %c9_i32 = arith.constant 9 : i32
    %279 = tpu.dynamic_rotate %278 by %c9_i32 dim 1 : vector<8x256xf32>, i32 -> vector<8x256xf32>
    %280 = vector.broadcast %270 : vector<1x256xf32> to vector<8x256xf32>
    %281 = arith.mulf %279, %280 : vector<8x256xf32>
    %c8_i32 = arith.constant 8 : i32
    %282 = tpu.dynamic_rotate %278 by %c8_i32 dim 1 : vector<8x256xf32>, i32 -> vector<8x256xf32>
    %283 = vector.broadcast %271 : vector<1x256xf32> to vector<8x256xf32>
    %284 = arith.mulf %282, %283 : vector<8x256xf32>
    %c7_i32 = arith.constant 7 : i32
    %285 = tpu.dynamic_rotate %278 by %c7_i32 dim 1 : vector<8x256xf32>, i32 -> vector<8x256xf32>
    %286 = vector.broadcast %272 : vector<1x256xf32> to vector<8x256xf32>
    %287 = arith.mulf %285, %286 : vector<8x256xf32>
    %c1_i32_90 = arith.constant 1 : i32
    %288 = tpu.dynamic_rotate %278 by %c1_i32_90 dim 1 : vector<8x256xf32>, i32 -> vector<8x256xf32>
    %289 = vector.broadcast %273 : vector<1x256xf32> to vector<8x256xf32>
    %290 = arith.mulf %288, %289 : vector<8x256xf32>
    %c255_i32 = arith.constant 255 : i32
    %291 = tpu.dynamic_rotate %278 by %c255_i32 dim 1 : vector<8x256xf32>, i32 -> vector<8x256xf32>
    %292 = vector.broadcast %274 : vector<1x256xf32> to vector<8x256xf32>
    %293 = arith.mulf %291, %292 : vector<8x256xf32>
    %c249_i32 = arith.constant 249 : i32
    %294 = tpu.dynamic_rotate %278 by %c249_i32 dim 1 : vector<8x256xf32>, i32 -> vector<8x256xf32>
    %295 = vector.broadcast %275 : vector<1x256xf32> to vector<8x256xf32>
    %296 = arith.mulf %294, %295 : vector<8x256xf32>
    %c248_i32 = arith.constant 248 : i32
    %297 = tpu.dynamic_rotate %278 by %c248_i32 dim 1 : vector<8x256xf32>, i32 -> vector<8x256xf32>
    %298 = vector.broadcast %276 : vector<1x256xf32> to vector<8x256xf32>
    %299 = arith.mulf %297, %298 : vector<8x256xf32>
    %c247_i32 = arith.constant 247 : i32
    %300 = tpu.dynamic_rotate %278 by %c247_i32 dim 1 : vector<8x256xf32>, i32 -> vector<8x256xf32>
    %301 = vector.broadcast %277 : vector<1x256xf32> to vector<8x256xf32>
    %302 = arith.mulf %300, %301 : vector<8x256xf32>
    %303 = tpu.concatenate %281, %284, %287, %290, %278, %293, %296, %299, %302 in 0 : vector<8x256xf32>, vector<8x256xf32>, vector<8x256xf32>, vector<8x256xf32>, vector<8x256xf32>, vector<8x256xf32>, vector<8x256xf32>, vector<8x256xf32>, vector<8x256xf32> -> vector<72x256xf32>
    %cst_91 = arith.constant dense<0.000000e+00> : vector<16x256xf32>
    %304 = tpu.matmul %268, %303, %cst_91 {dimension_numbers = #tpu.dot_dimension_numbers<[1], [0], [0], [1], [0, 0, 1, 1], [], []>} : vector<16x72xf32>, vector<72x256xf32>, vector<16x256xf32> -> vector<16x256xf32>
    %305 = vector.extract_strided_slice %267 {offsets = [0, 256], sizes = [8, 256], strides = [1, 1]} : vector<8x512xf32> to vector<8x256xf32>
    %c9_i32_92 = arith.constant 9 : i32
    %306 = tpu.dynamic_rotate %305 by %c9_i32_92 dim 1 : vector<8x256xf32>, i32 -> vector<8x256xf32>
    %307 = vector.broadcast %270 : vector<1x256xf32> to vector<8x256xf32>
    %308 = arith.mulf %306, %307 : vector<8x256xf32>
    %c8_i32_93 = arith.constant 8 : i32
    %309 = tpu.dynamic_rotate %305 by %c8_i32_93 dim 1 : vector<8x256xf32>, i32 -> vector<8x256xf32>
    %310 = vector.broadcast %271 : vector<1x256xf32> to vector<8x256xf32>
    %311 = arith.mulf %309, %310 : vector<8x256xf32>
    %c7_i32_94 = arith.constant 7 : i32
    %312 = tpu.dynamic_rotate %305 by %c7_i32_94 dim 1 : vector<8x256xf32>, i32 -> vector<8x256xf32>
    %313 = vector.broadcast %272 : vector<1x256xf32> to vector<8x256xf32>
    %314 = arith.mulf %312, %313 : vector<8x256xf32>
    %c1_i32_95 = arith.constant 1 : i32
    %315 = tpu.dynamic_rotate %305 by %c1_i32_95 dim 1 : vector<8x256xf32>, i32 -> vector<8x256xf32>
    %316 = vector.broadcast %273 : vector<1x256xf32> to vector<8x256xf32>
    %317 = arith.mulf %315, %316 : vector<8x256xf32>
    %c255_i32_96 = arith.constant 255 : i32
    %318 = tpu.dynamic_rotate %305 by %c255_i32_96 dim 1 : vector<8x256xf32>, i32 -> vector<8x256xf32>
    %319 = vector.broadcast %274 : vector<1x256xf32> to vector<8x256xf32>
    %320 = arith.mulf %318, %319 : vector<8x256xf32>
    %c249_i32_97 = arith.constant 249 : i32
    %321 = tpu.dynamic_rotate %305 by %c249_i32_97 dim 1 : vector<8x256xf32>, i32 -> vector<8x256xf32>
    %322 = vector.broadcast %275 : vector<1x256xf32> to vector<8x256xf32>
    %323 = arith.mulf %321, %322 : vector<8x256xf32>
    %c248_i32_98 = arith.constant 248 : i32
    %324 = tpu.dynamic_rotate %305 by %c248_i32_98 dim 1 : vector<8x256xf32>, i32 -> vector<8x256xf32>
    %325 = vector.broadcast %276 : vector<1x256xf32> to vector<8x256xf32>
    %326 = arith.mulf %324, %325 : vector<8x256xf32>
    %c247_i32_99 = arith.constant 247 : i32
    %327 = tpu.dynamic_rotate %305 by %c247_i32_99 dim 1 : vector<8x256xf32>, i32 -> vector<8x256xf32>
    %328 = vector.broadcast %277 : vector<1x256xf32> to vector<8x256xf32>
    %329 = arith.mulf %327, %328 : vector<8x256xf32>
    %330 = tpu.concatenate %308, %311, %314, %317, %305, %320, %323, %326, %329 in 0 : vector<8x256xf32>, vector<8x256xf32>, vector<8x256xf32>, vector<8x256xf32>, vector<8x256xf32>, vector<8x256xf32>, vector<8x256xf32>, vector<8x256xf32>, vector<8x256xf32> -> vector<72x256xf32>
    %cst_100 = arith.constant dense<0.000000e+00> : vector<16x256xf32>
    %331 = tpu.matmul %268, %330, %cst_100 {dimension_numbers = #tpu.dot_dimension_numbers<[1], [0], [0], [1], [0, 0, 1, 1], [], []>} : vector<16x72xf32>, vector<72x256xf32>, vector<16x256xf32> -> vector<16x256xf32>
    %332 = tpu.concatenate %304, %331 in 1 : vector<16x256xf32>, vector<16x256xf32> -> vector<16x512xf32>
    %333 = vector.broadcast %269 : vector<16x1xf32> to vector<16x512xf32>
    %334 = arith.addf %332, %333 : vector<16x512xf32>
    %335 = math.tanh %334 : vector<16x512xf32>
    %c0_101 = arith.constant 0 : index
    %c0_102 = arith.constant 0 : index
    %336 = vector.load %arg10[%c0_101, %c0_102] : memref<16x144xf32, #tpu.memory_space<vmem>>, vector<16x144xf32>
    %c0_103 = arith.constant 0 : index
    %c0_104 = arith.constant 0 : index
    %337 = vector.load %arg11[%c0_103, %c0_104] : memref<16x1xf32, #tpu.memory_space<vmem>>, vector<16x1xf32>
    %338 = vector.extract_strided_slice %1 {offsets = [0, 0], sizes = [1, 256], strides = [1, 1]} : vector<9x256xf32> to vector<1x256xf32>
    %339 = vector.extract_strided_slice %1 {offsets = [1, 0], sizes = [1, 256], strides = [1, 1]} : vector<9x256xf32> to vector<1x256xf32>
    %340 = vector.extract_strided_slice %1 {offsets = [2, 0], sizes = [1, 256], strides = [1, 1]} : vector<9x256xf32> to vector<1x256xf32>
    %341 = vector.extract_strided_slice %1 {offsets = [3, 0], sizes = [1, 256], strides = [1, 1]} : vector<9x256xf32> to vector<1x256xf32>
    %342 = vector.extract_strided_slice %1 {offsets = [5, 0], sizes = [1, 256], strides = [1, 1]} : vector<9x256xf32> to vector<1x256xf32>
    %343 = vector.extract_strided_slice %1 {offsets = [6, 0], sizes = [1, 256], strides = [1, 1]} : vector<9x256xf32> to vector<1x256xf32>
    %344 = vector.extract_strided_slice %1 {offsets = [7, 0], sizes = [1, 256], strides = [1, 1]} : vector<9x256xf32> to vector<1x256xf32>
    %345 = vector.extract_strided_slice %1 {offsets = [8, 0], sizes = [1, 256], strides = [1, 1]} : vector<9x256xf32> to vector<1x256xf32>
    %346 = vector.extract_strided_slice %335 {offsets = [0, 0], sizes = [16, 256], strides = [1, 1]} : vector<16x512xf32> to vector<16x256xf32>
    %c9_i32_105 = arith.constant 9 : i32
    %347 = tpu.dynamic_rotate %346 by %c9_i32_105 dim 1 : vector<16x256xf32>, i32 -> vector<16x256xf32>
    %348 = vector.broadcast %338 : vector<1x256xf32> to vector<16x256xf32>
    %349 = arith.mulf %347, %348 : vector<16x256xf32>
    %c8_i32_106 = arith.constant 8 : i32
    %350 = tpu.dynamic_rotate %346 by %c8_i32_106 dim 1 : vector<16x256xf32>, i32 -> vector<16x256xf32>
    %351 = vector.broadcast %339 : vector<1x256xf32> to vector<16x256xf32>
    %352 = arith.mulf %350, %351 : vector<16x256xf32>
    %c7_i32_107 = arith.constant 7 : i32
    %353 = tpu.dynamic_rotate %346 by %c7_i32_107 dim 1 : vector<16x256xf32>, i32 -> vector<16x256xf32>
    %354 = vector.broadcast %340 : vector<1x256xf32> to vector<16x256xf32>
    %355 = arith.mulf %353, %354 : vector<16x256xf32>
    %c1_i32_108 = arith.constant 1 : i32
    %356 = tpu.dynamic_rotate %346 by %c1_i32_108 dim 1 : vector<16x256xf32>, i32 -> vector<16x256xf32>
    %357 = vector.broadcast %341 : vector<1x256xf32> to vector<16x256xf32>
    %358 = arith.mulf %356, %357 : vector<16x256xf32>
    %c255_i32_109 = arith.constant 255 : i32
    %359 = tpu.dynamic_rotate %346 by %c255_i32_109 dim 1 : vector<16x256xf32>, i32 -> vector<16x256xf32>
    %360 = vector.broadcast %342 : vector<1x256xf32> to vector<16x256xf32>
    %361 = arith.mulf %359, %360 : vector<16x256xf32>
    %c249_i32_110 = arith.constant 249 : i32
    %362 = tpu.dynamic_rotate %346 by %c249_i32_110 dim 1 : vector<16x256xf32>, i32 -> vector<16x256xf32>
    %363 = vector.broadcast %343 : vector<1x256xf32> to vector<16x256xf32>
    %364 = arith.mulf %362, %363 : vector<16x256xf32>
    %c248_i32_111 = arith.constant 248 : i32
    %365 = tpu.dynamic_rotate %346 by %c248_i32_111 dim 1 : vector<16x256xf32>, i32 -> vector<16x256xf32>
    %366 = vector.broadcast %344 : vector<1x256xf32> to vector<16x256xf32>
    %367 = arith.mulf %365, %366 : vector<16x256xf32>
    %c247_i32_112 = arith.constant 247 : i32
    %368 = tpu.dynamic_rotate %346 by %c247_i32_112 dim 1 : vector<16x256xf32>, i32 -> vector<16x256xf32>
    %369 = vector.broadcast %345 : vector<1x256xf32> to vector<16x256xf32>
    %370 = arith.mulf %368, %369 : vector<16x256xf32>
    %371 = tpu.concatenate %349, %352, %355, %358, %346, %361, %364, %367, %370 in 0 : vector<16x256xf32>, vector<16x256xf32>, vector<16x256xf32>, vector<16x256xf32>, vector<16x256xf32>, vector<16x256xf32>, vector<16x256xf32>, vector<16x256xf32>, vector<16x256xf32> -> vector<144x256xf32>
    %cst_113 = arith.constant dense<0.000000e+00> : vector<16x256xf32>
    %372 = tpu.matmul %336, %371, %cst_113 {dimension_numbers = #tpu.dot_dimension_numbers<[1], [0], [0], [1], [0, 0, 1, 1], [], []>} : vector<16x144xf32>, vector<144x256xf32>, vector<16x256xf32> -> vector<16x256xf32>
    %373 = vector.extract_strided_slice %335 {offsets = [0, 256], sizes = [16, 256], strides = [1, 1]} : vector<16x512xf32> to vector<16x256xf32>
    %c9_i32_114 = arith.constant 9 : i32
    %374 = tpu.dynamic_rotate %373 by %c9_i32_114 dim 1 : vector<16x256xf32>, i32 -> vector<16x256xf32>
    %375 = vector.broadcast %338 : vector<1x256xf32> to vector<16x256xf32>
    %376 = arith.mulf %374, %375 : vector<16x256xf32>
    %c8_i32_115 = arith.constant 8 : i32
    %377 = tpu.dynamic_rotate %373 by %c8_i32_115 dim 1 : vector<16x256xf32>, i32 -> vector<16x256xf32>
    %378 = vector.broadcast %339 : vector<1x256xf32> to vector<16x256xf32>
    %379 = arith.mulf %377, %378 : vector<16x256xf32>
    %c7_i32_116 = arith.constant 7 : i32
    %380 = tpu.dynamic_rotate %373 by %c7_i32_116 dim 1 : vector<16x256xf32>, i32 -> vector<16x256xf32>
    %381 = vector.broadcast %340 : vector<1x256xf32> to vector<16x256xf32>
    %382 = arith.mulf %380, %381 : vector<16x256xf32>
    %c1_i32_117 = arith.constant 1 : i32
    %383 = tpu.dynamic_rotate %373 by %c1_i32_117 dim 1 : vector<16x256xf32>, i32 -> vector<16x256xf32>
    %384 = vector.broadcast %341 : vector<1x256xf32> to vector<16x256xf32>
    %385 = arith.mulf %383, %384 : vector<16x256xf32>
    %c255_i32_118 = arith.constant 255 : i32
    %386 = tpu.dynamic_rotate %373 by %c255_i32_118 dim 1 : vector<16x256xf32>, i32 -> vector<16x256xf32>
    %387 = vector.broadcast %342 : vector<1x256xf32> to vector<16x256xf32>
    %388 = arith.mulf %386, %387 : vector<16x256xf32>
    %c249_i32_119 = arith.constant 249 : i32
    %389 = tpu.dynamic_rotate %373 by %c249_i32_119 dim 1 : vector<16x256xf32>, i32 -> vector<16x256xf32>
    %390 = vector.broadcast %343 : vector<1x256xf32> to vector<16x256xf32>
    %391 = arith.mulf %389, %390 : vector<16x256xf32>
    %c248_i32_120 = arith.constant 248 : i32
    %392 = tpu.dynamic_rotate %373 by %c248_i32_120 dim 1 : vector<16x256xf32>, i32 -> vector<16x256xf32>
    %393 = vector.broadcast %344 : vector<1x256xf32> to vector<16x256xf32>
    %394 = arith.mulf %392, %393 : vector<16x256xf32>
    %c247_i32_121 = arith.constant 247 : i32
    %395 = tpu.dynamic_rotate %373 by %c247_i32_121 dim 1 : vector<16x256xf32>, i32 -> vector<16x256xf32>
    %396 = vector.broadcast %345 : vector<1x256xf32> to vector<16x256xf32>
    %397 = arith.mulf %395, %396 : vector<16x256xf32>
    %398 = tpu.concatenate %376, %379, %382, %385, %373, %388, %391, %394, %397 in 0 : vector<16x256xf32>, vector<16x256xf32>, vector<16x256xf32>, vector<16x256xf32>, vector<16x256xf32>, vector<16x256xf32>, vector<16x256xf32>, vector<16x256xf32>, vector<16x256xf32> -> vector<144x256xf32>
    %cst_122 = arith.constant dense<0.000000e+00> : vector<16x256xf32>
    %399 = tpu.matmul %336, %398, %cst_122 {dimension_numbers = #tpu.dot_dimension_numbers<[1], [0], [0], [1], [0, 0, 1, 1], [], []>} : vector<16x144xf32>, vector<144x256xf32>, vector<16x256xf32> -> vector<16x256xf32>
    %400 = tpu.concatenate %372, %399 in 1 : vector<16x256xf32>, vector<16x256xf32> -> vector<16x512xf32>
    %401 = vector.broadcast %337 : vector<16x1xf32> to vector<16x512xf32>
    %402 = arith.addf %400, %401 : vector<16x512xf32>
    %403 = math.tanh %402 : vector<16x512xf32>
    %c0_123 = arith.constant 0 : index
    %c0_124 = arith.constant 0 : index
    %404 = vector.load %arg3[%c0_123, %c0_124] : memref<16x512xf32, #tpu.memory_space<vmem>>, vector<16x512xf32>
    %c0_125 = arith.constant 0 : index
    %c0_126 = arith.constant 0 : index
    %405 = vector.load %arg15[%c0_125, %c0_126] : memref<256x64xf32, #tpu.memory_space<vmem>>, vector<256x64xf32>
    %406 = arith.mulf %404, %404 : vector<16x512xf32>
    %cst_127 = arith.constant dense<0.000000e+00> : vector<512xf32>
    %407 = vector.multi_reduction <add>, %406, %cst_127 [0] : vector<16x512xf32> to vector<512xf32>
    %408 = vector.shape_cast %407 : vector<512xf32> to vector<1x512xf32>
    %cst_128 = arith.constant 1.000000e-24 : f32
    %409 = vector.broadcast %cst_128 : f32 to vector<1x512xf32>
    %410 = arith.maximumf %408, %409 : vector<1x512xf32>
    %411 = math.rsqrt %410 : vector<1x512xf32>
    %412 = vector.broadcast %411 : vector<1x512xf32> to vector<16x512xf32>
    %413 = arith.mulf %404, %412 : vector<16x512xf32>
    %414 = arith.mulf %403, %413 : vector<16x512xf32>
    %415 = math.tanh %414 : vector<16x512xf32>
    %416 = vector.extract_strided_slice %415 {offsets = [0, 0], sizes = [16, 256], strides = [1, 1]} : vector<16x512xf32> to vector<16x256xf32>
    %cst_129 = arith.constant dense<0.000000e+00> : vector<16x64xf32>
    %417 = tpu.matmul %416, %405, %cst_129 {dimension_numbers = #tpu.dot_dimension_numbers<[1], [0], [0], [1], [0, 0, 1, 1], [], []>} : vector<16x256xf32>, vector<256x64xf32>, vector<16x64xf32> -> vector<16x64xf32>
    %418 = vector.extract_strided_slice %415 {offsets = [0, 256], sizes = [16, 256], strides = [1, 1]} : vector<16x512xf32> to vector<16x256xf32>
    %cst_130 = arith.constant dense<0.000000e+00> : vector<16x64xf32>
    %419 = tpu.matmul %418, %405, %cst_130 {dimension_numbers = #tpu.dot_dimension_numbers<[1], [0], [0], [1], [0, 0, 1, 1], [], []>} : vector<16x256xf32>, vector<256x64xf32>, vector<16x64xf32> -> vector<16x64xf32>
    %420 = tpu.concatenate %417, %419 in 1 : vector<16x64xf32>, vector<16x64xf32> -> vector<16x128xf32>
    %c0_131 = arith.constant 0 : index
    %c0_132 = arith.constant 0 : index
    %421 = vector.load %arg16[%c0_131, %c0_132] : memref<16x128xf32, #tpu.memory_space<vmem>>, vector<16x128xf32>
    tpu.vector_store %arg16[%c0_131, %c0_132], %420 {strides = array<i32>} : memref<16x128xf32, #tpu.memory_space<vmem>>, vector<16x128xf32>,
    return
  }
  func.func @transform_0(%arg0: i32) -> (i32, i32) {
    %c0_i32 = arith.constant 0 : i32
    %c0_i32_0 = arith.constant 0 : i32
    return %c0_i32, %arg0 : i32, i32
  }
  func.func @transform_1(%arg0: i32) -> (i32, i32) {
    %c0_i32 = arith.constant 0 : i32
    %c0_i32_0 = arith.constant 0 : i32
    return %c0_i32, %arg0 : i32, i32
  }
  func.func @transform_2(%arg0: i32) -> (i32, i32) {
    %c0_i32 = arith.constant 0 : i32
    %c0_i32_0 = arith.constant 0 : i32
    return %c0_i32, %arg0 : i32, i32
  }
  func.func @transform_3(%arg0: i32) -> (i32, i32) {
    %c0_i32 = arith.constant 0 : i32
    %c0_i32_0 = arith.constant 0 : i32
    %c0_i32_1 = arith.constant 0 : i32
    return %c0_i32, %c0_i32_0 : i32, i32
  }
  func.func @transform_4(%arg0: i32) -> (i32, i32) {
    %c0_i32 = arith.constant 0 : i32
    %c0_i32_0 = arith.constant 0 : i32
    %c0_i32_1 = arith.constant 0 : i32
    return %c0_i32, %c0_i32_0 : i32, i32
  }
  func.func @transform_5(%arg0: i32) -> (i32, i32) {
    %c0_i32 = arith.constant 0 : i32
    %c0_i32_0 = arith.constant 0 : i32
    %c0_i32_1 = arith.constant 0 : i32
    return %c0_i32, %c0_i32_0 : i32, i32
  }
  func.func @transform_6(%arg0: i32) -> (i32, i32) {
    %c0_i32 = arith.constant 0 : i32
    %c0_i32_0 = arith.constant 0 : i32
    %c0_i32_1 = arith.constant 0 : i32
    return %c0_i32, %c0_i32_0 : i32, i32
  }
  func.func @transform_7(%arg0: i32) -> (i32, i32) {
    %c0_i32 = arith.constant 0 : i32
    %c0_i32_0 = arith.constant 0 : i32
    %c0_i32_1 = arith.constant 0 : i32
    return %c0_i32, %c0_i32_0 : i32, i32
  }
  func.func @transform_8(%arg0: i32) -> (i32, i32) {
    %c0_i32 = arith.constant 0 : i32
    %c0_i32_0 = arith.constant 0 : i32
    %c0_i32_1 = arith.constant 0 : i32
    return %c0_i32, %c0_i32_0 : i32, i32
  }
  func.func @transform_9(%arg0: i32) -> (i32, i32) {
    %c0_i32 = arith.constant 0 : i32
    %c0_i32_0 = arith.constant 0 : i32
    %c0_i32_1 = arith.constant 0 : i32
    return %c0_i32, %c0_i32_0 : i32, i32
  }
  func.func @transform_10(%arg0: i32) -> (i32, i32) {
    %c0_i32 = arith.constant 0 : i32
    %c0_i32_0 = arith.constant 0 : i32
    %c0_i32_1 = arith.constant 0 : i32
    return %c0_i32, %c0_i32_0 : i32, i32
  }
  func.func @transform_11(%arg0: i32) -> (i32, i32) {
    %c0_i32 = arith.constant 0 : i32
    %c0_i32_0 = arith.constant 0 : i32
    %c0_i32_1 = arith.constant 0 : i32
    return %c0_i32, %c0_i32_0 : i32, i32
  }
  func.func @transform_12(%arg0: i32) -> (i32, i32) {
    %c0_i32 = arith.constant 0 : i32
    %c0_i32_0 = arith.constant 0 : i32
    %c0_i32_1 = arith.constant 0 : i32
    return %c0_i32, %c0_i32_0 : i32, i32
  }
  func.func @transform_13(%arg0: i32) -> (i32, i32) {
    %c0_i32 = arith.constant 0 : i32
    %c0_i32_0 = arith.constant 0 : i32
    %c0_i32_1 = arith.constant 0 : i32
    return %c0_i32, %c0_i32_0 : i32, i32
  }
  func.func @transform_14(%arg0: i32) -> (i32, i32) {
    %c0_i32 = arith.constant 0 : i32
    %c0_i32_0 = arith.constant 0 : i32
    %c0_i32_1 = arith.constant 0 : i32
    return %c0_i32, %c0_i32_0 : i32, i32
  }
  func.func @transform_15(%arg0: i32) -> (i32, i32) {
    %c0_i32 = arith.constant 0 : i32
    %c0_i32_0 = arith.constant 0 : i32
    return %c0_i32, %arg0 : i32, i32
  }
}

</mosaic_0001>

<bundles_post_ra>
// kernel: motion_model_2d_forward.1
= control target key start
LH: loop header
LB: loop body
LE: loop exit
PB: predicated region body
PF: predicated region fallthrough
CT: control target
= control target key end

     0   :  { %s9553_s0 = inlined_call_operand.vmem [shape: f32[8,4096], index: 0, kind: input, shape index: {}]   ;;  %s9554_s1 = inlined_call_operand.vmem [shape: f32[8,4096], index: 1, kind: input, shape index: {}]   ;;  %s9555_s2 = inlined_call_operand.vmem [shape: f32[16,1024], index: 2, kind: input, shape index: {}]   ;;  %s9556_s3 = inlined_call_operand.vmem [shape: f32[8,72], index: 3, kind: input, shape index: {}]   ;;  %s9557_s4 = inlined_call_operand.vmem [shape: f32[8,1], index: 4, kind: input, shape index: {}]   ;;  %s9558_s5 = inlined_call_operand.vmem [shape: f32[8,72], index: 5, kind: input, shape index: {}]   ;;  %s9559_s6 = inlined_call_operand.vmem [shape: f32[8,1], index: 6, kind: input, shape index: {}]   ;;  %s9560_s7 = inlined_call_operand.vmem [shape: f32[16,72], index: 7, kind: input, shape index: {}]   ;;  %s9561_s8 = inlined_call_operand.vmem [shape: f32[16,1], index: 8, kind: input, shape index: {}]   ;;  %s9562_s9 = inlined_call_operand.vmem [shape: f32[16,144], index: 9, kind: input, shape index: {}]   ;;  %s9563_s10 = inlined_call_operand.vmem [shape: f32[16,1], index: 10, kind: input, shape index: {}]   ;;  %s9564_s11 = inlined_call_operand.vmem [shape: f32[9,512], index: 11, kind: input, shape index: {}]   ;;  %s9565_s12 = inlined_call_operand.vmem [shape: f32[9,256], index: 12, kind: input, shape index: {}]   ;;  %s9566_s13 = inlined_call_operand.vmem [shape: f32[512,128], index: 13, kind: input, shape index: {}]   ;;  %s9567_s14 = inlined_call_operand.vmem [shape: f32[256,64], index: 14, kind: input, shape index: {}]   ;;  %s9568_s15 = inlined_call_operand.vmem [shape: f32[16,256], index: 15, kind: output, shape index: {}]  }
   0x1   :  { %9610 = sst [smem:[#allocation17_spill]] %s9553_s0 }
   0x2   :  { %9611 = sst [smem:[#allocation18_spill]] %s9555_s2 }
   0x3   :  { %9612 = sst [smem:[#allocation19_spill]] %s9568_s15 }
   0x4   :  { %s6482_s18 = smov 0   ;;  %s6484_s19 = smov 0  }
   0x5   :  { %s6486_s20 = smov 0  }
   0x6 LB: > { %9613 = sst [smem:[#allocation4_spill]] %s6379_s19  ;;  %s6498_s21 = sadd.s32 4294967295, %s6383_s20   ;;  %s6383_s20 = sphi %s6486_s20, %s9651_s20   ;;  %s6379_s19 = sphi %s6484_s19, %s9653_s19   ;;  %s6375_s18 = sphi %s6482_s18, %s9652_s18  }
   0x7   : > { %s6501_s22 = sadd.s32 1, %s6383_s20   ;;  %s84_s24 = sadd.s32 1, %s6379_s19 }
   0x8   : > { %9614 = sst [smem:[#allocation5_spill]] %s6501_s22  ;;  %s81_s23 = ssub.s32 %s6383_s20, %s6501_s22 }
   0x9   : > { %p82_p0 = scmp.eq.s32.totalorder %s81_s23, 0  ;;  %p91_p1 = scmp.ne.s32.totalorder %s6379_s19, %s6375_s18 }
   0xa   : > { %p92_p2 = scmp.eq.s32.totalorder %s6383_s20, 0  ;;  %p373_p3 = scmp.eq.s32.totalorder %s6498_s21, 1 }
   0xb   : > { %s6511_s25 = scalar_select %p82_p0, %s6379_s19, %s84_s24  }
   0xc   : > { %p93_p4 = por %p92_p2, %p91_p1  ;;  %p6513_p5 = por %p373_p3, %p91_p1 }
   0xd   : > { %9615 = sst [smem:[#allocation6_spill]] %s6511_s25  ;;  %p5047_p6 = scmp.ge.s32.totalorder %s6383_s20, 2 }
   0xf   : > { %431 = sbr.rel (%p5047_p6) target bundleno = 36 (0x24), region = 64 }
  0x16   : > { %452 = sbr.rel (!%p93_p4) target bundleno = 36 (0x24), region = 76  ;;  %s454_s27 = sand.u32 (%p93_p4), 1, %s6379_s19  }
  0x17   : > { %s5092_s28 = sshll.u32 (%p93_p4), %s6383_s20, 5  ;;  %s5048_s29 = sshll.u32 (%p93_p4), %s454_s27, 6 }
  0x18   : > { %s9617_s2 = sld [smem:[#allocation18_spill]] (%p93_p4)  ;;  %s456_s23 = scalar_lea.vmem (%p93_p4), [#allocation2], %s5048_s29 }
  0x1e   : > { %s459_s17 = scalar_lea.vmem %s9617_s2, %s5092_s28 }
  0x1f   : > { %v472_v0 = vld [vmem:[%s459_s17] sm:$0xff]  ;;  %v474_v1 = vld [vmem:[%s459_s17 + $0x8] sm:$0xff]  ;;  %v476_v2 = vld [vmem:[%s459_s17 + $0x10] sm:$0xff] }
  0x20   : > { %473 = vst [vmem:[%s456_s23] sm:$0xff] %v472_v0  ;;  %475 = vst [vmem:[%s456_s23 + $0x8] sm:$0xff] %v474_v1  ;;  %v478_v3 = vld [vmem:[%s459_s17 + $0x18] sm:$0xff]  ;;  %v480_v4 = vld [vmem:[%s459_s17 + $0x40] sm:$0xff] }
  0x21   : > { %477 = vst [vmem:[%s456_s23 + $0x10] sm:$0xff] %v476_v2  ;;  %v482_v5 = vld [vmem:[%s459_s17 + $0x48] sm:$0xff]  ;;  %479 = vst [vmem:[%s456_s23 + $0x18] sm:$0xff] %v478_v3  ;;  %v484_v6 = vld [vmem:[%s459_s17 + $0x50] sm:$0xff] }
  0x22   : > { %481 = vst [vmem:[%s456_s23 + $0x20] sm:$0xff] %v480_v4  ;;  %483 = vst [vmem:[%s456_s23 + $0x28] sm:$0xff] %v482_v5  ;;  %v486_v7 = vld [vmem:[%s459_s17 + $0x58] sm:$0xff] }
  0x23   : > { %485 = vst [vmem:[%s456_s23 + $0x30] sm:$0xff] %v484_v6  ;;  %487 = vst [vmem:[%s456_s23 + $0x38] sm:$0xff] %v486_v7 }
  0x24 PF: > { %p5051_p7 = scmp.ge.s32.totalorder %s6383_s20, 1  ;;  %p492_p8 = scmp.lt.s32.totalorder %s6383_s20, 3 }
  0x26   : > { %p493_p9 = pnand %p5051_p7, %p492_p8 }
  0x28   : > { %496 = sbr.rel (%p493_p9) target bundleno = 2446 (0x98e), region = 99 }
  0x2f   : > { %s5054_s24 = sshll.u32 %s6498_s21, 4  ;;  %s9618_s0 = sld [smem:[#allocation17_spill]]  ;;  %v9589_v12 = vmov 0.0   ;;  %v606_v17 = vlaneseq  ;;  %v6695_v24 = vld [vmem:[%s9564_s11 + $0x8] sm:$0xff]  ;;  %v6701_v27 = vld [vmem:[%s9564_s11] sm:$0xff]  ;;  %v6706_v28 = vld [vmem:[%s9564_s11 + $0x18] sm:$0xff] }
  0x30   : > { %p556_p10 = scmp.lt.s32.totalorder %s5054_s24, 31  ;;  %s9580_s20 = smov 17   ;;  %932 = vmatprep.mubr.f32.mxu0 %v9589_v12  ;;  %1003 = vmatprep.mubr.f32.mxu1 %v9589_v12  ;;  %v6711_v29 = vld [vmem:[%s9564_s11 + $0x10] sm:$0xff]  ;;  %vm864_vm8 = vcmask 588800   ;;  %vm4333_vm15 = vcmask 130048  }
  0x31   : > { %s9578_s16 = smov 16   ;;  %s9572_s17 = smov 15   ;;  %v6678_v18 = vshrl.u32 %v606_v17, 7  ;;  %v6680_v21 = vand.u32 127, %v606_v17 }
  0x32   : > { %s9655_s24 = smov (!%p556_p10, %s5054_s24), 31  ;;  %s9576_s23 = smov 1  }
  0x33   : > { %s9569_s27 = sshll.u32 %s9655_s24, 3  ;;  %s9574_s28 = smov 127   ;;  %v6687_v22 = vsub.s32 0, %v6678_v18  ;;  %v6690_v23 = vsub.s32 1, %v6678_v18  ;;  %vm608_vm0 = vcmp.lt.s32.totalorder %v6680_v21, 17  ;;  %vm641_vm1 = vcmp.lt.s32.totalorder %v6680_v21, 16 }
  0x34   : > { %s9570_s29 = smov 113   ;;  %v6795_v4 = vsub.s32 2, %v6678_v18  ;;  %v6802_v5 = vsub.s32 3, %v6678_v18  ;;  %vm674_vm2 = vcmp.lt.s32.totalorder %v6680_v21, 15  ;;  %vm707_vm3 = vcmp.lt.s32.totalorder %v6680_v21, 1  ;;  %s9626_s2 = smov 16  }
  0x35   : > { %s6534_s30 = scalar_lea.vmem %s9618_s0, %s9569_s27  ;;  %s9582_s27 = smov 112   ;;  %9620 = vst [vmem:[#allocation7_spill] sm:$0xff] %v6687_v22  ;;  %9621 = vst [vmem:[#allocation8_spill] sm:$0xff] %v6690_v23  ;;  %v6720_v30 = vrot.slane %v6695_v24, %v6687_v22  ;;  %v6724_v31 = vrot.slane %v6695_v24, %v6690_v23  ;;  %v6730_v33 = vrot.slane %v6701_v27, %v6687_v22  ;;  %vm740_vm4 = vcmp.lt.s32.totalorder %v6680_v21, 127 }
  0x36   : > { %v6537_v8 = vld [vmem:[%s6534_s30 + $0x10] sm:$0xff]  ;;  %v6540_v9 = vld [vmem:[%s6534_s30] sm:$0xff]  ;;  %v6547_v10 = vld [vmem:[%s6534_s30 + $0x18] sm:$0xff]  ;;  %v6734_v36 = vrot.slane %v6701_v27, %v6690_v23  ;;  %v6738_v37 = vrot.slane %v6706_v28, %v6687_v22  ;;  %v6742_v38 = vrot.slane %v6706_v28, %v6690_v23  ;;  %v6746_v39 = vrot.slane %v6711_v29, %v6687_v22  ;;  %s9623_s0 = smov 17   ;;  %9624 = vst [vmem:[#allocation9_spill] sm:$0xff] %v6795_v4  ;;  %s9633_s15 = smov 112  }
  0x37   : > { %602 = vrot.lane.b32.xlu1 %v6537_v8, %s9580_s20  ;;  %598 = vrot.lane.b32.xlu0 %v6540_v9, %s9580_s20  ;;  %v6550_v11 = vld [vmem:[%s6534_s30 + $0x8] sm:$0xff]  ;;  %v6618_v14 = vld [vmem:[%s6534_s30 + $0x20] sm:$0xff]  ;;  %v6756_v43 = vrot.slane %v6711_v29, %v6690_v23  ;;  %9625 = vst [vmem:[#allocation10_spill] sm:$0xff] %v6802_v5  ;;  %v6808_v17 = vrot.slane %v6695_v24, %v6795_v4  ;;  %vm773_vm5 = vcmp.lt.s32.totalorder %v6680_v21, 113  ;;  %vm806_vm6 = vcmp.lt.s32.totalorder %v6680_v21, 112  ;;  %s6399_s25 = smov 120  }
  0x38   : > { %v6615_v13 = vld [vmem:[%s6534_s30 + $0x28] sm:$0xff]  ;;  %v6625_v15 = vld [vmem:[%s6534_s30 + $0x38] sm:$0xff]  ;;  %v6628_v16 = vld [vmem:[%s6534_s30 + $0x30] sm:$0xff]  ;;  %vm839_vm7 = vcmp.lt.s32.totalorder %v6680_v21, 111  ;;  %vm3819_vm9 = vcmp.lt.s32.totalorder %v6680_v21, 9  ;;  %vm3836_vm10 = vcmp.lt.s32.totalorder %v6680_v21, 8 }
  0x39   : > { %v6767_v47 = vld [vmem:[%s6534_s30 + $0x48] sm:$0xff]  ;;  %v6770_v48 = vld [vmem:[%s6534_s30 + $0x40] sm:$0xff]  ;;  %v6789_v61 = vld [vmem:[%s6534_s30 + $0x58] sm:$0xff]  ;;  %vm3853_vm11 = vcmp.lt.s32.totalorder %v6680_v21, 7  ;;  %vm3902_vm12 = vcmp.lt.s32.totalorder %v6680_v21, 121  ;;  %vm3919_vm13 = vcmp.lt.s32.totalorder %v6680_v21, 120 }
  0x3a   : > { %v6792_v62 = vld [vmem:[%s6534_s30 + $0x50] sm:$0xff]  ;;  %vm3936_vm14 = vcmp.lt.s32.totalorder %v6680_v21, 119  ;;  %s9650_s22 = sld [smem:[#allocation19_spill]] (%p6513_p5) }
  0x3b   : > { %604 = vrot.lane.b32.xlu1 %v6547_v10, %s9580_s20  ;;  %600 = vrot.lane.b32.xlu0 %v6550_v11, %s9580_s20  ;;  %v4674_v21 = vld [vmem:[%s9567_s14 + $0x90] sm:$0xff] }
  0x3f   : > { %635 = vrot.lane.b32.xlu1 %v6550_v11, %s9578_s16  ;;  %633 = vrot.lane.b32.xlu0 %v6540_v9, %s9578_s16 }
  0x43   : > { %639 = vrot.lane.b32.xlu1 %v6547_v10, %s9578_s16  ;;  %637 = vrot.lane.b32.xlu0 %v6537_v8, %s9578_s16 }
  0x47   : > { %668 = vrot.lane.b32.xlu1 %v6550_v11, %s9572_s17  ;;  %666 = vrot.lane.b32.xlu0 %v6540_v9, %s9572_s17 }
  0x4b   : > { %672 = vrot.lane.b32.xlu1 %v6547_v10, %s9572_s17  ;;  %670 = vrot.lane.b32.xlu0 %v6537_v8, %s9572_s17 }
  0x4f   : > { %701 = vrot.lane.b32.xlu1 %v6550_v11, %s9576_s23  ;;  %699 = vrot.lane.b32.xlu0 %v6540_v9, %s9576_s23 }
  0x53   : > { %705 = vrot.lane.b32.xlu1 %v6547_v10, %s9576_s23  ;;  %703 = vrot.lane.b32.xlu0 %v6537_v8, %s9576_s23 }
  0x57   : > { %734 = vrot.lane.b32.xlu1 %v6550_v11, %s9574_s28  ;;  %732 = vrot.lane.b32.xlu0 %v6540_v9, %s9574_s28 }
  0x5b   : > { %738 = vrot.lane.b32.xlu1 %v6547_v10, %s9574_s28  ;;  %736 = vrot.lane.b32.xlu0 %v6537_v8, %s9574_s28 }
  0x5f   : > { %767 = vrot.lane.b32.xlu1 %v6550_v11, %s9570_s29  ;;  %765 = vrot.lane.b32.xlu0 %v6540_v9, %s9570_s29 }
  0x63   : > { %771 = vrot.lane.b32.xlu1 %v6547_v10, %s9570_s29  ;;  %769 = vrot.lane.b32.xlu0 %v6537_v8, %s9570_s29  ;;  %s9584_s29 = smov 111  }
  0x67   : > { %800 = vrot.lane.b32.xlu1 %v6550_v11, %s9582_s27  ;;  %798 = vrot.lane.b32.xlu0 %v6540_v9, %s9582_s27 }
  0x6b   : > { %804 = vrot.lane.b32.xlu1 %v6547_v10, %s9582_s27  ;;  %802 = vrot.lane.b32.xlu0 %v6537_v8, %s9582_s27 }
  0x6f   : > { %833 = vrot.lane.b32.xlu1 %v6550_v11, %s9584_s29  ;;  %831 = vrot.lane.b32.xlu0 %v6540_v9, %s9584_s29 }
  0x73   : > { %837 = vrot.lane.b32.xlu1 %v6547_v10, %s9584_s29  ;;  %835 = vrot.lane.b32.xlu0 %v6537_v8, %s9584_s29  ;;  %s499_s29 = sand.u32 1, %s6375_s18  }
  0x77   : > { %1012 = vrot.lane.b32.xlu1 %v6615_v13, %s9580_s20  ;;  %1010 = vrot.lane.b32.xlu0 %v6618_v14, %s9580_s20 }
  0x7b   : > { %1016 = vrot.lane.b32.xlu1 %v6625_v15, %s9580_s20  ;;  %1014 = vrot.lane.b32.xlu0 %v6628_v16, %s9580_s20  ;;  %s9629_s20 = smov 1  }
  0x7f   : > { %1028 = vrot.lane.b32.xlu1 %v6615_v13, %s9578_s16  ;;  %1026 = vrot.lane.b32.xlu0 %v6618_v14, %s9578_s16 }
  0x83   : > { %1032 = vrot.lane.b32.xlu1 %v6625_v15, %s9578_s16  ;;  %1030 = vrot.lane.b32.xlu0 %v6628_v16, %s9578_s16  ;;  %s9632_s16 = smov 127  }
  0x87   : > { %1044 = vrot.lane.b32.xlu1 %v6615_v13, %s9572_s17  ;;  %1042 = vrot.lane.b32.xlu0 %v6618_v14, %s9572_s17 }
  0x8b   : > { %1048 = vrot.lane.b32.xlu1 %v6625_v15, %s9572_s17  ;;  %1046 = vrot.lane.b32.xlu0 %v6628_v16, %s9572_s17  ;;  %s9619_s17 = smov 113  }
  0x8f   : > { %1060 = vrot.lane.b32.xlu1 %v6615_v13, %s9576_s23  ;;  %1058 = vrot.lane.b32.xlu0 %v6618_v14, %s9576_s23 }
  0x93   : > { %1064 = vrot.lane.b32.xlu1 %v6625_v15, %s9576_s23  ;;  %1062 = vrot.lane.b32.xlu0 %v6628_v16, %s9576_s23  ;;  %s9622_s23 = smov 111  }
  0x97   : > { %1076 = vrot.lane.b32.xlu1 %v6615_v13, %s9574_s28  ;;  %1074 = vrot.lane.b32.xlu0 %v6618_v14, %s9574_s28 }
  0x9b   : > { %1080 = vrot.lane.b32.xlu1 %v6625_v15, %s9574_s28  ;;  %1078 = vrot.lane.b32.xlu0 %v6628_v16, %s9574_s28 }
  0x9f   : > { %1092 = vrot.lane.b32.xlu1 %v6615_v13, %s9619_s17  ;;  %1090 = vrot.lane.b32.xlu0 %v6618_v14, %s9619_s17 }
  0xa3   : > { %1096 = vrot.lane.b32.xlu1 %v6625_v15, %s9619_s17  ;;  %1094 = vrot.lane.b32.xlu0 %v6628_v16, %s9619_s17 }
  0xa7   : > { %1108 = vrot.lane.b32.xlu1 %v6615_v13, %s9582_s27  ;;  %1106 = vrot.lane.b32.xlu0 %v6618_v14, %s9582_s27 }
  0xa9   : > { %v603_v19 = vpop.permute.xlu1 %602  ;;  %v599_v20 = vpop.permute.xlu0 %598 }
  0xab   : > { %1112 = vrot.lane.b32.xlu1 %v6625_v15, %s9582_s27  ;;  %1110 = vrot.lane.b32.xlu0 %v6628_v16, %s9582_s27  ;;  %s9628_s27 = smov 15  }
  0xad   : > { %v605_v25 = vpop.permute.xlu1 %604  ;;  %v601_v26 = vpop.permute.xlu0 %600 }
  0xae   : > { %v611_v32 = vsel %vm608_vm0, %v599_v20, %v601_v26  ;;  %v612_v40 = vsel %vm608_vm0, %v605_v25, %v599_v20  ;;  %v609_v42 = vsel %vm608_vm0, %v603_v19, %v605_v25  ;;  %v610_v44 = vsel %vm608_vm0, %v601_v26, %v603_v19 }
  0xaf   : > { %1124 = vrot.lane.b32.xlu1 %v6615_v13, %s9622_s23  ;;  %1122 = vrot.lane.b32.xlu0 %v6618_v14, %s9622_s23  ;;  %v630_v45 = vmul.f32 %v6720_v30, %v611_v32  ;;  %v629_v52 = vmul.f32 %v6730_v33, %v612_v40  ;;  %v632_v53 = vmul.f32 %v6738_v37, %v609_v42  ;;  %v6394_v26 = vmov 0  }
  0xb0   : > { %v631_v57 = vmul.f32 %v6746_v39, %v610_v44  ;;  %v6816_v19 = vrot.slane %v6695_v24, %v6802_v5  ;;  %v6822_v25 = vrot.slane %v6701_v27, %v6795_v4  ;;  %6170 = vset.pattern.permute.xlu0 %v6394_v26  ;;  %6171 = vset.pattern.permute.xlu1 %v6394_v26 }
  0xb1   : > { %v636_v34 = vpop.permute.xlu1 %635  ;;  %v634_v35 = vpop.permute.xlu0 %633  ;;  %v6826_v32 = vrot.slane %v6711_v29, %v6795_v4  ;;  %v6838_v42 = vrot.slane %v6711_v29, %v6802_v5 }
  0xb2   : > { %v644_v41 = vsel %vm641_vm1, %v634_v35, %v636_v34 }
  0xb3   : > { %1128 = vrot.lane.b32.xlu1 %v6625_v15, %s9622_s23  ;;  %1126 = vrot.lane.b32.xlu0 %v6628_v16, %s9622_s23  ;;  %v663_v46 = vmul.f32 %v6724_v31, %v644_v41  ;;  %v6834_v41 = vrot.slane %v6701_v27, %v6802_v5 }
  0xb5   : > { %v640_v49 = vpop.permute.xlu1 %639  ;;  %v638_v50 = vpop.permute.xlu0 %637  ;;  %v5449_v51 = vpack.c.bf16 %v663_v46, %v630_v45 }
  0xb6   : > { %v645_v54 = vsel %vm641_vm1, %v640_v49, %v634_v35  ;;  %v643_v55 = vsel %vm641_vm1, %v636_v34, %v638_v50  ;;  %v642_v56 = vsel %vm641_vm1, %v638_v50, %v640_v49  ;;  %v6830_v34 = vrot.slane %v6706_v28, %v6795_v4 }
  0xb7   : > { %1282 = vrot.lane.b32.xlu1 %v6767_v47, %s9623_s0  ;;  %1280 = vrot.lane.b32.xlu0 %v6770_v48, %s9623_s0  ;;  %v662_v58 = vmul.f32 %v6734_v36, %v645_v54  ;;  %v665_v59 = vmul.f32 %v6742_v38, %v642_v56  ;;  %v664_v60 = vmul.f32 %v6756_v43, %v643_v55 }
  0xb8   : > { %5450 = vmatprep.subr.bf16.mxu0 %v5449_v51  ;;  %v6848_v49 = vrot.slane %v6706_v28, %v6802_v5 }
  0xb9   : > { %v669_v63 = vpop.permute.xlu1 %668  ;;  %v667_v0 = vpop.permute.xlu0 %666  ;;  %v5451_v1 = vpack.c.bf16 %v662_v58, %v629_v52  ;;  %v5465_v2 = vpack.c.bf16 %v665_v59, %v632_v53  ;;  %v5467_v3 = vpack.c.bf16 %v664_v60, %v631_v57  ;;  %v6861_v58 = vsub.s32 5, %v6678_v18 }
  0xba   : > { %v677_v20 = vsel %vm674_vm2, %v667_v0, %v669_v63 }
  0xbb   : > { %1286 = vrot.lane.b32.xlu1 %v6789_v61, %s9623_s0  ;;  %1284 = vrot.lane.b32.xlu0 %v6792_v62, %s9623_s0  ;;  %v696_v50 = vmul.f32 %v6808_v17, %v677_v20  ;;  %9627 = vst [vmem:[#allocation11_spill] sm:$0xff] %v6861_v58 }
  0xbc   : > { %5452 = vmatpush1.bf16.msra.mxu0 %v5451_v1  ;;  %5466 = vmatprep.subr.bf16.mxu1 %v5465_v2 }
  0xbd   : > { %5468 = vmatpush1.bf16.msra.mxu1 %v5467_v3  ;;  %v673_v6 = vpop.permute.xlu1 %672  ;;  %v671_v7 = vpop.permute.xlu0 %670 }
  0xbe   : > { %v678_v44 = vsel %vm674_vm2, %v673_v6, %v667_v0  ;;  %v676_v45 = vsel %vm674_vm2, %v669_v63, %v671_v7  ;;  %v675_v51 = vsel %vm674_vm2, %v671_v7, %v673_v6 }
  0xbf   : > { %1298 = vrot.lane.b32.xlu1 %v6767_v47, %s9626_s2  ;;  %1296 = vrot.lane.b32.xlu0 %v6770_v48, %s9626_s2  ;;  %v695_v53 = vmul.f32 %v6822_v25, %v678_v44  ;;  %v697_v54 = vmul.f32 %v6826_v32, %v676_v45  ;;  %v698_v59 = vmul.f32 %v6830_v34, %v675_v51 }
  0xc0   : > { %v6884_v44 = vrot.slane %v6706_v28, %v6861_v58 }
  0xc1   : > { %v702_v35 = vpop.permute.xlu1 %701  ;;  %v700_v40 = vpop.permute.xlu0 %699 }
  0xc2   : > { %v710_v46 = vsel %vm707_vm3, %v700_v40, %v702_v35 }
  0xc3   : > { %v729_v52 = vmul.f32 %v6816_v19, %v710_v46  ;;  %1302 = vrot.lane.b32.xlu1 %v6789_v61, %s9626_s2  ;;  %1300 = vrot.lane.b32.xlu0 %v6792_v62, %s9626_s2  ;;  %v6894_v46 = vrot.slane %v6695_v24, %v6861_v58 }
  0xc5   : > { %v706_v55 = vpop.permute.xlu1 %705  ;;  %v704_v56 = vpop.permute.xlu0 %703  ;;  %v5453_v57 = vpack.c.bf16 %v729_v52, %v696_v50  ;;  %v6898_v50 = vrot.slane %v6711_v29, %v6861_v58 }
  0xc6   : > { %v711_v60 = vsel %vm707_vm3, %v706_v55, %v700_v40  ;;  %v708_v63 = vsel %vm707_vm3, %v704_v56, %v706_v55  ;;  %v709_v0 = vsel %vm707_vm3, %v702_v35, %v704_v56  ;;  %v6880_v40 = vrot.slane %v6701_v27, %v6861_v58 }
  0xc7   : > { %v728_v1 = vmul.f32 %v6834_v41, %v711_v60  ;;  %v730_v2 = vmul.f32 %v6838_v42, %v709_v0  ;;  %v731_v3 = vmul.f32 %v6848_v49, %v708_v63  ;;  %1314 = vrot.lane.b32.xlu1 %v6767_v47, %s9628_s27  ;;  %1312 = vrot.lane.b32.xlu0 %v6770_v48, %s9628_s27 }
  0xc8   : > { %5454 = vmatprep.subr.bf16.mxu0 %v5453_v57 }
  0xc9   : > { %v735_v6 = vpop.permute.xlu1 %734  ;;  %v733_v7 = vpop.permute.xlu0 %732  ;;  %v5455_v20 = vpack.c.bf16 %v728_v1, %v695_v53  ;;  %v5469_v26 = vpack.c.bf16 %v731_v3, %v698_v59  ;;  %v5471_v35 = vpack.c.bf16 %v730_v2, %v697_v54 }
  0xca   : > { %v743_v45 = vsel %vm740_vm4, %v733_v7, %v735_v6 }
  0xcb   : > { %1318 = vrot.lane.b32.xlu1 %v6789_v61, %s9628_s27  ;;  %1316 = vrot.lane.b32.xlu0 %v6792_v62, %s9628_s27  ;;  %v761_v53 = vmul.f32 %v6880_v40, %v743_v45 }
  0xcc   : > { %5456 = vmatpush1.bf16.msra.mxu0 %v5455_v20  ;;  %5470 = vmatprep.subr.bf16.mxu1 %v5469_v26 }
  0xcd   : > { %5472 = vmatpush1.bf16.msra.mxu1 %v5471_v35  ;;  %v739_v51 = vpop.permute.xlu1 %738  ;;  %v737_v52 = vpop.permute.xlu0 %736 }
  0xce   : > { %v744_v54 = vsel %vm740_vm4, %v739_v51, %v733_v7  ;;  %v741_v55 = vsel %vm740_vm4, %v737_v52, %v739_v51  ;;  %v742_v56 = vsel %vm740_vm4, %v735_v6, %v737_v52  ;;  %v5459_v6 = vpack.c.bf16 %v761_v53, %v6540_v9 }
  0xcf   : > { %v764_v57 = vmul.f32 %v6884_v44, %v744_v54  ;;  %v762_v59 = vmul.f32 %v6894_v46, %v742_v56  ;;  %v763_v60 = vmul.f32 %v6898_v50, %v741_v55  ;;  %1330 = vrot.lane.b32.xlu1 %v6767_v47, %s9629_s20  ;;  %1328 = vrot.lane.b32.xlu0 %v6770_v48, %s9629_s20 }
  0xd1   : > { %v768_v63 = vpop.permute.xlu1 %767  ;;  %v766_v0 = vpop.permute.xlu0 %765  ;;  %v5457_v1 = vpack.c.bf16 %v762_v59, %v6550_v11  ;;  %v5473_v2 = vpack.c.bf16 %v764_v57, %v6547_v10  ;;  %v5475_v3 = vpack.c.bf16 %v763_v60, %v6537_v8  ;;  %v6923_v11 = vsub.s32 7, %v6678_v18 }
  0xd2   : > { %v6926_v10 = vsub.s32 6, %v6678_v18  ;;  %v776_v59 = vsel %vm773_vm5, %v766_v0, %v768_v63 }
  0xd3   : > { %1334 = vrot.lane.b32.xlu1 %v6789_v61, %s9629_s20  ;;  %1332 = vrot.lane.b32.xlu0 %v6792_v62, %s9629_s20  ;;  %9630 = vst [vmem:[#allocation12_spill] sm:$0xff] %v6923_v11  ;;  %v6948_v35 = vrot.slane %v6701_v27, %v6923_v11  ;;  %v6958_v54 = vrot.slane %v6706_v28, %v6923_v11 }
  0xd4   : > { %5458 = vmatprep.subr.bf16.mxu0 %v5457_v1  ;;  %5474 = vmatprep.subr.bf16.mxu1 %v5473_v2  ;;  %9631 = vst [vmem:[#allocation13_spill] sm:$0xff] %v6926_v10  ;;  %v6936_v8 = vrot.slane %v6706_v28, %v6926_v10  ;;  %v6940_v9 = vrot.slane %v6695_v24, %v6926_v10 }
  0xd5   : > { %5460 = vmatpush1.bf16.msra.mxu0 %v5459_v6  ;;  %5476 = vmatpush1.bf16.msra.mxu1 %v5475_v3  ;;  %v772_v7 = vpop.permute.xlu1 %771  ;;  %v770_v20 = vpop.permute.xlu0 %769  ;;  %v6944_v18 = vrot.slane %v6711_v29, %v6926_v10  ;;  %v6968_v56 = vrot.slane %v6695_v24, %v6923_v11  ;;  %v6972_v57 = vrot.slane %v6711_v29, %v6923_v11 }
  0xd6   : > { %v777_v51 = vsel %vm773_vm5, %v772_v7, %v766_v0  ;;  %v774_v52 = vsel %vm773_vm5, %v770_v20, %v772_v7  ;;  %v775_v53 = vsel %vm773_vm5, %v768_v63, %v770_v20  ;;  %v6976_v28 = vrot.slane %v6701_v27, %v6926_v10 }
  0xd7   : > { %1346 = vrot.lane.b32.xlu1 %v6767_v47, %s9632_s16  ;;  %1344 = vrot.lane.b32.xlu0 %v6770_v48, %s9632_s16  ;;  %v797_v60 = vmul.f32 %v6936_v8, %v777_v51  ;;  %v795_v1 = vmul.f32 %v6940_v9, %v775_v53  ;;  %v796_v2 = vmul.f32 %v6944_v18, %v774_v52 }
  0xd9   : > { %v801_v26 = vpop.permute.xlu1 %800  ;;  %v799_v45 = vpop.permute.xlu0 %798 }
  0xda   : > { %v809_v55 = vsel %vm806_vm6, %v799_v45, %v801_v26 }
  0xdb   : > { %1350 = vrot.lane.b32.xlu1 %v6789_v61, %s9632_s16  ;;  %1348 = vrot.lane.b32.xlu0 %v6792_v62, %s9632_s16  ;;  %v827_v6 = vmul.f32 %v6948_v35, %v809_v55 }
  0xdd   : > { %v805_v3 = vpop.permute.xlu1 %804  ;;  %v803_v24 = vpop.permute.xlu0 %802 }
  0xde   : > { %v810_v29 = vsel %vm806_vm6, %v805_v3, %v799_v45  ;;  %v807_v27 = vsel %vm806_vm6, %v803_v24, %v805_v3  ;;  %v808_v7 = vsel %vm806_vm6, %v801_v26, %v803_v24  ;;  %v794_v45 = vmul.f32 %v6976_v28, %v776_v59  ;;  %v7006_v59 = vld [vmem:[%s9564_s11 + $0x28] ss:$0 sm:$0xff] }
  0xdf   : > { %v830_v63 = vmul.f32 %v6958_v54, %v810_v29  ;;  %v828_v0 = vmul.f32 %v6968_v56, %v808_v7  ;;  %v829_v20 = vmul.f32 %v6972_v57, %v807_v27  ;;  %1362 = vrot.lane.b32.xlu1 %v6767_v47, %s9619_s17  ;;  %1360 = vrot.lane.b32.xlu0 %v6770_v48, %s9619_s17  ;;  %v7023_v29 = vld [vmem:[%s9564_s11 + $0x20] ss:$0 sm:$0xff] }
  0xe0   : > { %v5463_v26 = vpack.c.bf16 %v827_v6, %v794_v45 }
  0xe1   : > { %v834_v51 = vpop.permute.xlu1 %833  ;;  %v832_v52 = vpop.permute.xlu0 %831  ;;  %v5461_v53 = vpack.c.bf16 %v828_v0, %v795_v1  ;;  %v5477_v55 = vpack.c.bf16 %v830_v63, %v797_v60  ;;  %v5479_v3 = vpack.c.bf16 %v829_v20, %v796_v2  ;;  %v7011_v60 = vld [vmem:[%s9564_s11 + $0x38] ss:$0 sm:$0xff]  ;;  %v7016_v1 = vld [vmem:[%s9564_s11 + $0x30] ss:$0 sm:$0xff] }
  0xe2   : > { %v842_v2 = vsel %vm839_vm7, %v832_v52, %v834_v51 }
  0xe3   : > { %1366 = vrot.lane.b32.xlu1 %v6789_v61, %s9619_s17  ;;  %1364 = vrot.lane.b32.xlu0 %v6792_v62, %s9619_s17 }
  0xe4   : > { %5462 = vmatprep.subr.bf16.mxu0 %v5461_v53  ;;  %5478 = vmatprep.subr.bf16.mxu1 %v5477_v55 }
  0xe5   : > { %5464 = vmatpush1.bf16.msra.mxu0 %v5463_v26  ;;  %5480 = vmatpush1.bf16.msra.mxu1 %v5479_v3  ;;  %v838_v24 = vpop.permute.xlu1 %837  ;;  %v836_v6 = vpop.permute.xlu0 %835 }
  0xe6   : > { %v843_v27 = vsel %vm839_vm7, %v838_v24, %v832_v52  ;;  %v840_v7 = vsel %vm839_vm7, %v836_v6, %v838_v24  ;;  %v841_v63 = vsel %vm839_vm7, %v834_v51, %v836_v6  ;;  %v860_v52 = vmul.f32 %v7023_v29, %v842_v2  ;;  %v7042_v51 = vld [vmem:[%s9556_s3] sm:$0xff] }
  0xe7   : > { %1378 = vrot.lane.b32.xlu1 %v6767_v47, %s9633_s15  ;;  %1376 = vrot.lane.b32.xlu0 %v6770_v48, %s9633_s15  ;;  %v861_v0 = vmul.f32 %v7006_v59, %v841_v63  ;;  %v863_v20 = vmul.f32 %v7011_v60, %v843_v27  ;;  %v862_v45 = vmul.f32 %v7016_v1, %v840_v7 }
  0xe9   : > { %v1013_v53 = vpop.permute.xlu1 %1012  ;;  %884 = vmatprep.subr.mxu0 %v861_v0  ;;  %955 = vmatprep.subr.mxu1 %v863_v20  ;;  %v1011_v55 = vpop.permute.xlu0 %1010 }
  0xea   : > { %885 = vmatpush1.msra.mxu0 %v860_v52  ;;  %956 = vmatpush1.msra.mxu1 %v862_v45  ;;  %v1020_v2 = vsel %vm608_vm0, %v1011_v55, %v1013_v53  ;;  %v7075_v52 = vld [vmem:[%s6534_s30 + $0x68] sm:$0xff] }
  0xeb   : > { %1382 = vrot.lane.b32.xlu1 %v6789_v61, %s9633_s15  ;;  %1380 = vrot.lane.b32.xlu0 %v6792_v62, %s9633_s15  ;;  %v1023_v0 = vmul.f32 %v1020_v2, %v6720_v30 }
  0xec   : > { %5062 = vmatmul.mubr.msk.f32.vlgmr.msra.gmra.mrb[0].mxu0 %vm864_vm8, %v7042_v51  ;;  %5063 = vmatmul.mubr.msk.f32.vlgmr.msra.gmra.mrb[0].mxu1 %vm864_vm8, %v7042_v51 }
  0xed   : > { %v1017_v3 = vpop.permute.xlu1 %1016  ;;  %v1015_v26 = vpop.permute.xlu0 %1014  ;;  %1202 = vmatprep.mubr.f32.mxu0 %v9589_v12  ;;  %1273 = vmatprep.mubr.f32.mxu1 %v9589_v12 }
  0xee   : > { %v1021_v27 = vsel %vm608_vm0, %v1017_v3, %v1011_v55  ;;  %v1019_v7 = vsel %vm608_vm0, %v1013_v53, %v1015_v26  ;;  %v1018_v20 = vsel %vm608_vm0, %v1015_v26, %v1017_v3  ;;  %v7078_v55 = vld [vmem:[%s6534_s30 + $0x60] sm:$0xff] }
  0xef   : > { %1394 = vrot.lane.b32.xlu1 %v6767_v47, %s9622_s23  ;;  %1392 = vrot.lane.b32.xlu0 %v6770_v48, %s9622_s23  ;;  %v1022_v53 = vmul.f32 %v1021_v27, %v6730_v33  ;;  %v1024_v2 = vmul.f32 %v1019_v7, %v6746_v39 }
  0xf1   : > { %v1029_v24 = vpop.permute.xlu1 %1028  ;;  %v1027_v6 = vpop.permute.xlu0 %1026 }
  0xf2   : > { %v1036_v63 = vsel %vm641_vm1, %v1027_v6, %v1029_v24 }
  0xf3   : > { %v1039_v45 = vmul.f32 %v1036_v63, %v6724_v31  ;;  %1398 = vrot.lane.b32.xlu1 %v6789_v61, %s9622_s23  ;;  %1396 = vrot.lane.b32.xlu0 %v6792_v62, %s9622_s23  ;;  %v1025_v63 = vmul.f32 %v1018_v20, %v6738_v37 }
  0xf5   : > { %v1033_v12 = vpop.permute.xlu1 %1032  ;;  %v1031_v3 = vpop.permute.xlu0 %1030  ;;  %v5481_v26 = vpack.c.bf16 %v1039_v45, %v1023_v0  ;;  %v7100_v0 = vld [vmem:[%s6534_s30 + $0x70] sm:$0xff] }
  0xf6   : > { %v1037_v11 = vsel %vm641_vm1, %v1033_v12, %v1027_v6  ;;  %v1034_v10 = vsel %vm641_vm1, %v1031_v3, %v1033_v12  ;;  %v1035_v58 = vsel %vm641_vm1, %v1029_v24, %v1031_v3  ;;  %v7097_v6 = vld [vmem:[%s6534_s30 + $0x78] sm:$0xff]  ;;  %s9608_s30 = smov 119  }
  0xf7   : > { %v1038_v5 = vmul.f32 %v1037_v11, %v6734_v36  ;;  %v1040_v27 = vmul.f32 %v1035_v58, %v6756_v43  ;;  %v1041_v7 = vmul.f32 %v1034_v10, %v6742_v38  ;;  %1552 = vrot.lane.b32.xlu1 %v7075_v52, %s9623_s0  ;;  %1550 = vrot.lane.b32.xlu0 %v7078_v55, %s9623_s0 }
  0xf8   : > { %5482 = vmatprep.subr.bf16.mxu0 %v5481_v26 }
  0xf9   : > { %v5483_v12 = vpack.c.bf16 %v1038_v5, %v1022_v53  ;;  %v5499_v20 = vpack.c.bf16 %v1040_v27, %v1024_v2  ;;  %v1045_v24 = vpop.permute.xlu1 %1044  ;;  %v1043_v45 = vpop.permute.xlu0 %1042  ;;  %v5497_v11 = vpack.c.bf16 %v1041_v7, %v1025_v63 }
  0xfa   : > { %v1052_v5 = vsel %vm674_vm2, %v1043_v45, %v1045_v24 }
  0xfb   : > { %1556 = vrot.lane.b32.xlu1 %v7097_v6, %s9623_s0  ;;  %1554 = vrot.lane.b32.xlu0 %v7100_v0, %s9623_s0  ;;  %v1055_v27 = vmul.f32 %v1052_v5, %v6808_v17 }
  0xfc   : > { %5484 = vmatpush1.bf16.msra.mxu0 %v5483_v12  ;;  %5498 = vmatprep.subr.bf16.mxu1 %v5497_v11 }
  0xfd   : > { %5500 = vmatpush1.bf16.msra.mxu1 %v5499_v20  ;;  %v1049_v58 = vpop.permute.xlu1 %1048  ;;  %v1047_v10 = vpop.permute.xlu0 %1046 }
  0xfe   : > { %v1053_v3 = vsel %vm674_vm2, %v1049_v58, %v1043_v45  ;;  %v1051_v26 = vsel %vm674_vm2, %v1045_v24, %v1047_v10  ;;  %v1050_v7 = vsel %vm674_vm2, %v1047_v10, %v1049_v58 }
  0xff   : > { %1568 = vrot.lane.b32.xlu1 %v7075_v52, %s9626_s2  ;;  %1566 = vrot.lane.b32.xlu0 %v7078_v55, %s9626_s2  ;;  %v1054_v20 = vmul.f32 %v1053_v3, %v6822_v25  ;;  %v1056_v24 = vmul.f32 %v1051_v26, %v6826_v32  ;;  %v1057_v5 = vmul.f32 %v1050_v7, %v6830_v34 }
 0x101   : > { %v1061_v53 = vpop.permute.xlu1 %1060  ;;  %v1059_v2 = vpop.permute.xlu0 %1058 }
 0x102   : > { %v1068_v63 = vsel %vm707_vm3, %v1059_v2, %v1061_v53 }
 0x103   : > { %v1071_v12 = vmul.f32 %v1068_v63, %v6816_v19  ;;  %1572 = vrot.lane.b32.xlu1 %v7097_v6, %s9626_s2  ;;  %1570 = vrot.lane.b32.xlu0 %v7100_v0, %s9626_s2 }
 0x105   : > { %v1065_v45 = vpop.permute.xlu1 %1064  ;;  %v1063_v11 = vpop.permute.xlu0 %1062  ;;  %v5485_v4 = vpack.c.bf16 %v1071_v12, %v1055_v27 }
 0x106   : > { %v1069_v58 = vsel %vm707_vm3, %v1065_v45, %v1059_v2  ;;  %v1066_v10 = vsel %vm707_vm3, %v1063_v11, %v1065_v45  ;;  %v1067_v63 = vsel %vm707_vm3, %v1061_v53, %v1063_v11 }
 0x107   : > { %v1070_v23 = vmul.f32 %v1069_v58, %v6834_v41  ;;  %v1072_v3 = vmul.f32 %v1067_v63, %v6838_v42  ;;  %v1073_v26 = vmul.f32 %v1066_v10, %v6848_v49  ;;  %1584 = vrot.lane.b32.xlu1 %v7075_v52, %s9628_s27  ;;  %1582 = vrot.lane.b32.xlu0 %v7078_v55, %s9628_s27 }
 0x108   : > { %5486 = vmatprep.subr.bf16.mxu0 %v5485_v4 }
 0x109   : > { %v5487_v2 = vpack.c.bf16 %v1070_v23, %v1054_v20  ;;  %v5503_v27 = vpack.c.bf16 %v1072_v3, %v1056_v24  ;;  %v1077_v7 = vpop.permute.xlu1 %1076  ;;  %v1075_v12 = vpop.permute.xlu0 %1074  ;;  %v5501_v45 = vpack.c.bf16 %v1073_v26, %v1057_v5 }
 0x10a   : > { %v1084_v53 = vsel %vm740_vm4, %v1075_v12, %v1077_v7 }
 0x10b   : > { %1588 = vrot.lane.b32.xlu1 %v7097_v6, %s9628_s27  ;;  %1586 = vrot.lane.b32.xlu0 %v7100_v0, %s9628_s27  ;;  %v1086_v23 = vmul.f32 %v1084_v53, %v6880_v40 }
 0x10c   : > { %5488 = vmatpush1.bf16.msra.mxu0 %v5487_v2  ;;  %5502 = vmatprep.subr.bf16.mxu1 %v5501_v45 }
 0x10d   : > { %5504 = vmatpush1.bf16.msra.mxu1 %v5503_v27  ;;  %v1081_v11 = vpop.permute.xlu1 %1080  ;;  %v1079_v58 = vpop.permute.xlu0 %1078 }
 0x10e   : > { %v1085_v4 = vsel %vm740_vm4, %v1081_v11, %v1075_v12  ;;  %v1082_v20 = vsel %vm740_vm4, %v1079_v58, %v1081_v11  ;;  %v1083_v24 = vsel %vm740_vm4, %v1077_v7, %v1079_v58  ;;  %v5491_v12 = vpack.c.bf16 %v1086_v23, %v6618_v14 }
 0x10f   : > { %v1089_v5 = vmul.f32 %v1085_v4, %v6884_v44  ;;  %v1087_v10 = vmul.f32 %v1083_v24, %v6894_v46  ;;  %v1088_v63 = vmul.f32 %v1082_v20, %v6898_v50  ;;  %1600 = vrot.lane.b32.xlu1 %v7075_v52, %s9629_s20  ;;  %1598 = vrot.lane.b32.xlu0 %v7078_v55, %s9629_s20 }
 0x111   : > { %v5507_v3 = vpack.c.bf16 %v1088_v63, %v6628_v16  ;;  %v1093_v26 = vpop.permute.xlu1 %1092  ;;  %v1091_v2 = vpop.permute.xlu0 %1090  ;;  %v5489_v27 = vpack.c.bf16 %v1087_v10, %v6615_v13  ;;  %v5505_v7 = vpack.c.bf16 %v1089_v5, %v6625_v15 }
 0x112   : > { %v1100_v23 = vsel %vm773_vm5, %v1091_v2, %v1093_v26 }
 0x113   : > { %1604 = vrot.lane.b32.xlu1 %v7097_v6, %s9629_s20  ;;  %1602 = vrot.lane.b32.xlu0 %v7100_v0, %s9629_s20 }
 0x114   : > { %5490 = vmatprep.subr.bf16.mxu0 %v5489_v27  ;;  %5506 = vmatprep.subr.bf16.mxu1 %v5505_v7 }
 0x115   : > { %5492 = vmatpush1.bf16.msra.mxu0 %v5491_v12  ;;  %v1097_v45 = vpop.permute.xlu1 %1096  ;;  %v1095_v53 = vpop.permute.xlu0 %1094  ;;  %5508 = vmatpush1.bf16.msra.mxu1 %v5507_v3 }
 0x116   : > { %v1101_v15 = vsel %vm773_vm5, %v1097_v45, %v1091_v2  ;;  %v1098_v16 = vsel %vm773_vm5, %v1095_v53, %v1097_v45  ;;  %v1099_v11 = vsel %vm773_vm5, %v1093_v26, %v1095_v53  ;;  %v1102_v45 = vmul.f32 %v1100_v23, %v6976_v28 }
 0x117   : > { %1616 = vrot.lane.b32.xlu1 %v7075_v52, %s9632_s16  ;;  %1614 = vrot.lane.b32.xlu0 %v7078_v55, %s9632_s16  ;;  %v1105_v4 = vmul.f32 %v1101_v15, %v6936_v8  ;;  %v1103_v20 = vmul.f32 %v1099_v11, %v6940_v9  ;;  %v1104_v24 = vmul.f32 %v1098_v16, %v6944_v18 }
 0x119   : > { %v1109_v13 = vpop.permute.xlu1 %1108  ;;  %v1107_v14 = vpop.permute.xlu0 %1106 }
 0x11a   : > { %v1116_v58 = vsel %vm806_vm6, %v1107_v14, %v1109_v13 }
 0x11b   : > { %1620 = vrot.lane.b32.xlu1 %v7097_v6, %s9632_s16  ;;  %1618 = vrot.lane.b32.xlu0 %v7100_v0, %s9632_s16  ;;  %v1118_v63 = vmul.f32 %v1116_v58, %v6948_v35 }
 0x11d   : > { %v1113_v5 = vpop.permute.xlu1 %1112  ;;  %v1111_v10 = vpop.permute.xlu0 %1110 }
 0x11e   : > { %v1117_v3 = vsel %vm806_vm6, %v1113_v5, %v1107_v14  ;;  %v1114_v27 = vsel %vm806_vm6, %v1111_v10, %v1113_v5  ;;  %v1115_v7 = vsel %vm806_vm6, %v1109_v13, %v1111_v10  ;;  %v5495_v13 = vpack.c.bf16 %v1118_v63, %v1102_v45 }
 0x11f   : > { %v1121_v26 = vmul.f32 %v1117_v3, %v6958_v54  ;;  %v1119_v2 = vmul.f32 %v1115_v7, %v6968_v56  ;;  %v1120_v12 = vmul.f32 %v1114_v27, %v6972_v57  ;;  %1632 = vrot.lane.b32.xlu1 %v7075_v52, %s9619_s17  ;;  %1630 = vrot.lane.b32.xlu0 %v7078_v55, %s9619_s17  ;;  %v9634_v45 = vmov 0.0  }
 0x121   : > { %v5511_v53 = vpack.c.bf16 %v1120_v12, %v1104_v24  ;;  %v1125_v14 = vpop.permute.xlu1 %1124  ;;  %v1123_v15 = vpop.permute.xlu0 %1122  ;;  %v5493_v16 = vpack.c.bf16 %v1119_v2, %v1103_v20  ;;  %v5509_v11 = vpack.c.bf16 %v1121_v26, %v1105_v4 }
 0x122   : > { %v1132_v58 = vsel %vm839_vm7, %v1123_v15, %v1125_v14 }
 0x123   : > { %1636 = vrot.lane.b32.xlu1 %v7097_v6, %s9619_s17  ;;  %1634 = vrot.lane.b32.xlu0 %v7100_v0, %s9619_s17  ;;  %v1134_v27 = vmul.f32 %v7023_v29, %v1132_v58 }
 0x124   : > { %5494 = vmatprep.subr.bf16.mxu0 %v5493_v16  ;;  %5510 = vmatprep.subr.bf16.mxu1 %v5509_v11 }
 0x125   : > { %5496 = vmatpush1.bf16.msra.mxu0 %v5495_v13  ;;  %5512 = vmatpush1.bf16.msra.mxu1 %v5511_v53  ;;  %v1129_v23 = vpop.permute.xlu1 %1128  ;;  %v1127_v24 = vpop.permute.xlu0 %1126 }
 0x126   : > { %v1133_v20 = vsel %vm839_vm7, %v1129_v23, %v1123_v15  ;;  %v1130_v4 = vsel %vm839_vm7, %v1127_v24, %v1129_v23  ;;  %v1131_v5 = vsel %vm839_vm7, %v1125_v14, %v1127_v24 }
 0x127   : > { %v1136_v10 = vmul.f32 %v7016_v1, %v1130_v4  ;;  %1648 = vrot.lane.b32.xlu1 %v7075_v52, %s9633_s15  ;;  %1646 = vrot.lane.b32.xlu0 %v7078_v55, %s9633_s15  ;;  %v1135_v63 = vmul.f32 %v7006_v59, %v1131_v5  ;;  %v1137_v3 = vmul.f32 %v7011_v60, %v1133_v20  ;;  %v597_v20 = vld [vmem:[%s9557_s4] sm:$0xff] }
 0x129   : > { %v1283_v7 = vpop.permute.xlu1 %1282  ;;  %1154 = vmatprep.subr.mxu0 %v1135_v63  ;;  %1225 = vmatprep.subr.mxu1 %v1137_v3  ;;  %v1281_v26 = vpop.permute.xlu0 %1280 }
 0x12a   : > { %1155 = vmatpush1.msra.mxu0 %v1134_v27  ;;  %1226 = vmatpush1.msra.mxu1 %v1136_v10  ;;  %v1290_v53 = vsel %vm608_vm0, %v1281_v26, %v1283_v7 }
 0x12b   : > { %1652 = vrot.lane.b32.xlu1 %v7097_v6, %s9633_s15  ;;  %1650 = vrot.lane.b32.xlu0 %v7100_v0, %s9633_s15  ;;  %v1293_v58 = vmul.f32 %v1290_v53, %v6720_v30 }
 0x12c   : > { %5064 = vmatmul.mubr.msk.f32.vlgmr.msra.gmra.mrb[2].mxu0 %vm864_vm8, %v7042_v51  ;;  %5065 = vmatmul.mubr.msk.f32.vlgmr.msra.gmra.mrb[2].mxu1 %vm864_vm8, %v7042_v51 }
 0x12d   : > { %v1287_v2 = vpop.permute.xlu1 %1286  ;;  %v1285_v12 = vpop.permute.xlu0 %1284  ;;  %1472 = vmatprep.mubr.f32.mxu0 %v9634_v45  ;;  %1543 = vmatprep.mubr.f32.mxu1 %v9634_v45 }
 0x12e   : > { %v1291_v16 = vsel %vm608_vm0, %v1287_v2, %v1281_v26  ;;  %v1289_v11 = vsel %vm608_vm0, %v1283_v7, %v1285_v12  ;;  %v1288_v23 = vsel %vm608_vm0, %v1285_v12, %v1287_v2 }
 0x12f   : > { %1664 = vrot.lane.b32.xlu1 %v7075_v52, %s9622_s23  ;;  %1662 = vrot.lane.b32.xlu0 %v7078_v55, %s9622_s23  ;;  %v1292_v4 = vmul.f32 %v1291_v16, %v6730_v33  ;;  %v1294_v5 = vmul.f32 %v1289_v11, %v6746_v39  ;;  %v1295_v27 = vmul.f32 %v1288_v23, %v6738_v37 }
 0x131   : > { %v1299_v14 = vpop.permute.xlu1 %1298  ;;  %v1297_v15 = vpop.permute.xlu0 %1296 }
 0x132   : > { %v1306_v13 = vsel %vm641_vm1, %v1297_v15, %v1299_v14 }
 0x133   : > { %v1309_v24 = vmul.f32 %v1306_v13, %v6724_v31  ;;  %1668 = vrot.lane.b32.xlu1 %v7097_v6, %s9622_s23  ;;  %1666 = vrot.lane.b32.xlu0 %v7100_v0, %s9622_s23 }
 0x135   : > { %v1303_v10 = vpop.permute.xlu1 %1302  ;;  %v1301_v63 = vpop.permute.xlu0 %1300  ;;  %v5513_v3 = vpack.c.bf16 %v1309_v24, %v1293_v58 }
 0x136   : > { %v1307_v7 = vsel %vm641_vm1, %v1303_v10, %v1297_v15  ;;  %v1304_v26 = vsel %vm641_vm1, %v1301_v63, %v1303_v10  ;;  %v1305_v2 = vsel %vm641_vm1, %v1299_v14, %v1301_v63 }
 0x137   : > { %v1308_v12 = vmul.f32 %v1307_v7, %v6734_v36  ;;  %v1310_v53 = vmul.f32 %v1305_v2, %v6756_v43  ;;  %v1311_v16 = vmul.f32 %v1304_v26, %v6742_v38  ;;  %5514 = vmatprep.subr.bf16.mxu0 %v5513_v3  ;;  %1822 = vperm.xlu0 %6170, %v597_v20  }
 0x139   : > { %v5515_v11 = vpack.c.bf16 %v1308_v12, %v1292_v4  ;;  %v5531_v13 = vpack.c.bf16 %v1310_v53, %v1294_v5  ;;  %v1315_v58 = vpop.permute.xlu1 %1314  ;;  %v1313_v23 = vpop.permute.xlu0 %1312  ;;  %v5529_v24 = vpack.c.bf16 %v1311_v16, %v1295_v27 }
 0x13a   : > { %v1322_v14 = vsel %vm674_vm2, %v1313_v23, %v1315_v58 }
 0x13b   : > { %5516 = vmatpush1.bf16.msra.mxu0 %v5515_v11  ;;  %5530 = vmatprep.subr.bf16.mxu1 %v5529_v24  ;;  %v1325_v4 = vmul.f32 %v1322_v14, %v6808_v17 }
 0x13c   : > { %5532 = vmatpush1.bf16.msra.mxu1 %v5531_v13 }
 0x13d   : > { %v1319_v15 = vpop.permute.xlu1 %1318  ;;  %v1317_v10 = vpop.permute.xlu0 %1316 }
 0x13e   : > { %v1323_v26 = vsel %vm674_vm2, %v1319_v15, %v1313_v23  ;;  %v1321_v5 = vsel %vm674_vm2, %v1315_v58, %v1317_v10  ;;  %v1320_v27 = vsel %vm674_vm2, %v1317_v10, %v1319_v15 }
 0x13f   : > { %v1324_v2 = vmul.f32 %v1323_v26, %v6822_v25  ;;  %v1326_v11 = vmul.f32 %v1321_v5, %v6826_v32  ;;  %v1327_v24 = vmul.f32 %v1320_v27, %v6830_v34 }
 0x141   : > { %v1331_v63 = vpop.permute.xlu1 %1330  ;;  %v1329_v7 = vpop.permute.xlu0 %1328 }
 0x142   : > { %v1338_v20 = vsel %vm707_vm3, %v1329_v7, %v1331_v63 }
 0x143   : > { %v1341_v3 = vmul.f32 %v1338_v20, %v6816_v19 }
 0x145   : > { %v1335_v12 = vpop.permute.xlu1 %1334  ;;  %v1333_v53 = vpop.permute.xlu0 %1332  ;;  %v5517_v16 = vpack.c.bf16 %v1341_v3, %v1325_v4 }
 0x146   : > { %v1339_v13 = vsel %vm707_vm3, %v1335_v12, %v1329_v7  ;;  %v1336_v23 = vsel %vm707_vm3, %v1333_v53, %v1335_v12  ;;  %v1337_v58 = vsel %vm707_vm3, %v1331_v63, %v1333_v53 }
 0x147   : > { %v1340_v15 = vmul.f32 %v1339_v13, %v6834_v41  ;;  %v1342_v10 = vmul.f32 %v1337_v58, %v6838_v42  ;;  %v1343_v14 = vmul.f32 %v1336_v23, %v6848_v49  ;;  %5518 = vmatprep.subr.bf16.mxu0 %v5517_v16 }
 0x149   : > { %v5519_v26 = vpack.c.bf16 %v1340_v15, %v1324_v2  ;;  %v5535_v20 = vpack.c.bf16 %v1342_v10, %v1326_v11  ;;  %v1347_v4 = vpop.permute.xlu1 %1346  ;;  %v1345_v5 = vpop.permute.xlu0 %1344  ;;  %v5533_v7 = vpack.c.bf16 %v1343_v14, %v1327_v24 }
 0x14a   : > { %v1354_v3 = vsel %vm740_vm4, %v1345_v5, %v1347_v4 }
 0x14b   : > { %5520 = vmatpush1.bf16.msra.mxu0 %v5519_v26  ;;  %5534 = vmatprep.subr.bf16.mxu1 %v5533_v7  ;;  %v1356_v12 = vmul.f32 %v1354_v3, %v6880_v40 }
 0x14c   : > { %5536 = vmatpush1.bf16.msra.mxu1 %v5535_v20 }
 0x14d   : > { %v1351_v63 = vpop.permute.xlu1 %1350  ;;  %v1349_v27 = vpop.permute.xlu0 %1348  ;;  %v5523_v26 = vpack.c.bf16 %v1356_v12, %v6770_v48 }
 0x14e   : > { %v1355_v53 = vsel %vm740_vm4, %v1351_v63, %v1345_v5  ;;  %v1352_v2 = vsel %vm740_vm4, %v1349_v27, %v1351_v63  ;;  %v1353_v16 = vsel %vm740_vm4, %v1347_v4, %v1349_v27 }
 0x14f   : > { %v1359_v11 = vmul.f32 %v1355_v53, %v6884_v44  ;;  %v1357_v13 = vmul.f32 %v1353_v16, %v6894_v46  ;;  %v1358_v23 = vmul.f32 %v1352_v2, %v6898_v50 }
 0x151   : > { %v5539_v58 = vpack.c.bf16 %v1358_v23, %v6792_v62  ;;  %v1363_v24 = vpop.permute.xlu1 %1362  ;;  %v1361_v15 = vpop.permute.xlu0 %1360  ;;  %v5521_v10 = vpack.c.bf16 %v1357_v13, %v6767_v47  ;;  %v5537_v14 = vpack.c.bf16 %v1359_v11, %v6789_v61 }
 0x152   : > { %v1370_v61 = vsel %vm773_vm5, %v1361_v15, %v1363_v24 }
 0x153   : > { %5522 = vmatprep.subr.bf16.mxu0 %v5521_v10  ;;  %5538 = vmatprep.subr.bf16.mxu1 %v5537_v14  ;;  %v1372_v10 = vmul.f32 %v1370_v61, %v6976_v28 }
 0x154   : > { %5524 = vmatpush1.bf16.msra.mxu0 %v5523_v26  ;;  %5540 = vmatpush1.bf16.msra.mxu1 %v5539_v58 }
 0x155   : > { %v1367_v20 = vpop.permute.xlu1 %1366  ;;  %v1365_v4 = vpop.permute.xlu0 %1364 }
 0x156   : > { %v1371_v3 = vsel %vm773_vm5, %v1367_v20, %v1361_v15  ;;  %v1369_v62 = vsel %vm773_vm5, %v1363_v24, %v1365_v4  ;;  %v1368_v48 = vsel %vm773_vm5, %v1365_v4, %v1367_v20 }
 0x157   : > { %v1375_v63 = vmul.f32 %v1371_v3, %v6936_v8  ;;  %v1373_v27 = vmul.f32 %v1369_v62, %v6940_v9  ;;  %v1374_v23 = vmul.f32 %v1368_v48, %v6944_v18 }
 0x159   : > { %v1379_v5 = vpop.permute.xlu1 %1378  ;;  %v1377_v7 = vpop.permute.xlu0 %1376 }
 0x15a   : > { %v1386_v47 = vsel %vm806_vm6, %v1377_v7, %v1379_v5 }
 0x15b   : > { %v1388_v2 = vmul.f32 %v1386_v47, %v6948_v35 }
 0x15d   : > { %v1383_v12 = vpop.permute.xlu1 %1382  ;;  %v1381_v53 = vpop.permute.xlu0 %1380  ;;  %v5527_v3 = vpack.c.bf16 %v1388_v2, %v1372_v10 }
 0x15e   : > { %v1387_v16 = vsel %vm806_vm6, %v1383_v12, %v1377_v7  ;;  %v1384_v11 = vsel %vm806_vm6, %v1381_v53, %v1383_v12  ;;  %v1385_v13 = vsel %vm806_vm6, %v1379_v5, %v1381_v53 }
 0x15f   : > { %v1391_v58 = vmul.f32 %v1387_v16, %v6958_v54  ;;  %v1389_v24 = vmul.f32 %v1385_v13, %v6968_v56  ;;  %v1390_v15 = vmul.f32 %v1384_v11, %v6972_v57 }
 0x161   : > { %v5543_v14 = vpack.c.bf16 %v1390_v15, %v1374_v23  ;;  %v1395_v26 = vpop.permute.xlu1 %1394  ;;  %v1393_v20 = vpop.permute.xlu0 %1392  ;;  %v5525_v4 = vpack.c.bf16 %v1389_v24, %v1373_v27  ;;  %v5541_v7 = vpack.c.bf16 %v1391_v58, %v1375_v63 }
 0x162   : > { %v1402_v5 = vsel %vm839_vm7, %v1393_v20, %v1395_v26 }
 0x163   : > { %5526 = vmatprep.subr.bf16.mxu0 %v5525_v4  ;;  %5542 = vmatprep.subr.bf16.mxu1 %v5541_v7  ;;  %v1404_v2 = vmul.f32 %v7023_v29, %v1402_v5 }
 0x164   : > { %5528 = vmatpush1.bf16.msra.mxu0 %v5527_v3  ;;  %5544 = vmatpush1.bf16.msra.mxu1 %v5543_v14 }
 0x165   : > { %v1399_v62 = vpop.permute.xlu1 %1398  ;;  %v1397_v47 = vpop.permute.xlu0 %1396 }
 0x166   : > { %v1403_v48 = vsel %vm839_vm7, %v1399_v62, %v1393_v20  ;;  %v1400_v61 = vsel %vm839_vm7, %v1397_v47, %v1399_v62  ;;  %v1401_v27 = vsel %vm839_vm7, %v1395_v26, %v1397_v47 }
 0x167   : > { %v1406_v63 = vmul.f32 %v7016_v1, %v1400_v61  ;;  %v1405_v12 = vmul.f32 %v7006_v59, %v1401_v27  ;;  %v1407_v53 = vmul.f32 %v7011_v60, %v1403_v48 }
 0x169   : > { %v1553_v16 = vpop.permute.xlu1 %1552  ;;  %1424 = vmatprep.subr.mxu0 %v1405_v12  ;;  %1495 = vmatprep.subr.mxu1 %v1407_v53  ;;  %v1551_v11 = vpop.permute.xlu0 %1550 }
 0x16a   : > { %1425 = vmatpush1.msra.mxu0 %v1404_v2  ;;  %1496 = vmatpush1.msra.mxu1 %v1406_v63  ;;  %v1560_v58 = vsel %vm608_vm0, %v1551_v11, %v1553_v16 }
 0x16b   : > { %5066 = vmatmul.mubr.msk.f32.vlgmr.msra.gmra.mrb[4].mxu0 %vm864_vm8, %v7042_v51  ;;  %5067 = vmatmul.mubr.msk.f32.vlgmr.msra.gmra.mrb[4].mxu1 %vm864_vm8, %v7042_v51  ;;  %v1563_v26 = vmul.f32 %v1560_v58, %v6720_v30 }
 0x16c   : > { %1742 = vmatprep.mubr.f32.mxu0 %v9634_v45  ;;  %1813 = vmatprep.mubr.f32.mxu1 %v9634_v45 }
 0x16d   : > { %v1557_v13 = vpop.permute.xlu1 %1556  ;;  %v1555_v23 = vpop.permute.xlu0 %1554 }
 0x16e   : > { %v1561_v10 = vsel %vm608_vm0, %v1557_v13, %v1551_v11  ;;  %v1559_v20 = vsel %vm608_vm0, %v1553_v16, %v1555_v23  ;;  %v1558_v7 = vsel %vm608_vm0, %v1555_v23, %v1557_v13 }
 0x16f   : > { %v1562_v3 = vmul.f32 %v1561_v10, %v6730_v33  ;;  %v1564_v48 = vmul.f32 %v1559_v20, %v6746_v39  ;;  %v1565_v12 = vmul.f32 %v1558_v7, %v6738_v37 }
 0x171   : > { %v1569_v24 = vpop.permute.xlu1 %1568  ;;  %v1567_v15 = vpop.permute.xlu0 %1566 }
 0x172   : > { %v1576_v14 = vsel %vm641_vm1, %v1567_v15, %v1569_v24 }
 0x173   : > { %v1579_v4 = vmul.f32 %v1576_v14, %v6724_v31 }
 0x175   : > { %v1573_v5 = vpop.permute.xlu1 %1572  ;;  %v1571_v62 = vpop.permute.xlu0 %1570  ;;  %v5545_v47 = vpack.c.bf16 %v1579_v4, %v1563_v26 }
 0x176   : > { %v1577_v61 = vsel %vm641_vm1, %v1573_v5, %v1567_v15  ;;  %v1574_v27 = vsel %vm641_vm1, %v1571_v62, %v1573_v5  ;;  %v1575_v63 = vsel %vm641_vm1, %v1569_v24, %v1571_v62 }
 0x177   : > { %v1578_v53 = vmul.f32 %v1577_v61, %v6734_v36  ;;  %v1580_v2 = vmul.f32 %v1575_v63, %v6756_v43  ;;  %v1581_v16 = vmul.f32 %v1574_v27, %v6742_v38  ;;  %5546 = vmatprep.subr.bf16.mxu0 %v5545_v47 }
 0x179   : > { %v5547_v11 = vpack.c.bf16 %v1578_v53, %v1562_v3  ;;  %v5563_v13 = vpack.c.bf16 %v1580_v2, %v1564_v48  ;;  %v1585_v23 = vpop.permute.xlu1 %1584  ;;  %v1583_v58 = vpop.permute.xlu0 %1582  ;;  %v5561_v15 = vpack.c.bf16 %v1581_v16, %v1565_v12 }
 0x17a   : > { %v1592_v24 = vsel %vm674_vm2, %v1583_v58, %v1585_v23 }
 0x17b   : > { %5548 = vmatpush1.bf16.msra.mxu0 %v5547_v11  ;;  %5562 = vmatprep.subr.bf16.mxu1 %v5561_v15  ;;  %v1595_v3 = vmul.f32 %v1592_v24, %v6808_v17 }
 0x17c   : > { %5564 = vmatpush1.bf16.msra.mxu1 %v5563_v13 }
 0x17d   : > { %v1589_v10 = vpop.permute.xlu1 %1588  ;;  %v1587_v14 = vpop.permute.xlu0 %1586 }
 0x17e   : > { %v1593_v4 = vsel %vm674_vm2, %v1589_v10, %v1583_v58  ;;  %v1591_v5 = vsel %vm674_vm2, %v1585_v23, %v1587_v14  ;;  %v1590_v47 = vsel %vm674_vm2, %v1587_v14, %v1589_v10 }
 0x17f   : > { %v1594_v48 = vmul.f32 %v1593_v4, %v6822_v25  ;;  %v1596_v12 = vmul.f32 %v1591_v5, %v6826_v32  ;;  %v1597_v11 = vmul.f32 %v1590_v47, %v6830_v34 }
 0x181   : > { %v1601_v26 = vpop.permute.xlu1 %1600  ;;  %v1599_v20 = vpop.permute.xlu0 %1598 }
 0x182   : > { %v1608_v7 = vsel %vm707_vm3, %v1599_v20, %v1601_v26 }
 0x183   : > { %v1611_v62 = vmul.f32 %v1608_v7, %v6816_v19 }
 0x185   : > { %v1605_v61 = vpop.permute.xlu1 %1604  ;;  %v1603_v27 = vpop.permute.xlu0 %1602  ;;  %v5549_v63 = vpack.c.bf16 %v1611_v62, %v1595_v3 }
 0x186   : > { %v1609_v53 = vsel %vm707_vm3, %v1605_v61, %v1599_v20  ;;  %v1606_v2 = vsel %vm707_vm3, %v1603_v27, %v1605_v61  ;;  %v1607_v16 = vsel %vm707_vm3, %v1601_v26, %v1603_v27 }
 0x187   : > { %v1610_v13 = vmul.f32 %v1609_v53, %v6834_v41  ;;  %v1612_v23 = vmul.f32 %v1607_v16, %v6838_v42  ;;  %v1613_v58 = vmul.f32 %v1606_v2, %v6848_v49  ;;  %5550 = vmatprep.subr.bf16.mxu0 %v5549_v63 }
 0x189   : > { %v5551_v15 = vpack.c.bf16 %v1610_v13, %v1594_v48  ;;  %v5567_v10 = vpack.c.bf16 %v1612_v23, %v1596_v12  ;;  %v1617_v14 = vpop.permute.xlu1 %1616  ;;  %v1615_v24 = vpop.permute.xlu0 %1614  ;;  %v5565_v20 = vpack.c.bf16 %v1613_v58, %v1597_v11 }
 0x18a   : > { %v1624_v4 = vsel %vm740_vm4, %v1615_v24, %v1617_v14 }
 0x18b   : > { %5552 = vmatpush1.bf16.msra.mxu0 %v5551_v15  ;;  %5566 = vmatprep.subr.bf16.mxu1 %v5565_v20  ;;  %v1626_v3 = vmul.f32 %v1624_v4, %v6880_v40 }
 0x18c   : > { %5568 = vmatpush1.bf16.msra.mxu1 %v5567_v10 }
 0x18d   : > { %v1621_v26 = vpop.permute.xlu1 %1620  ;;  %v1619_v7 = vpop.permute.xlu0 %1618  ;;  %v5555_v11 = vpack.c.bf16 %v1626_v3, %v7078_v55 }
 0x18e   : > { %v1625_v5 = vsel %vm740_vm4, %v1621_v26, %v1615_v24  ;;  %v1622_v62 = vsel %vm740_vm4, %v1619_v7, %v1621_v26  ;;  %v1623_v47 = vsel %vm740_vm4, %v1617_v14, %v1619_v7 }
 0x18f   : > { %v1629_v48 = vmul.f32 %v1625_v5, %v6884_v44  ;;  %v1627_v61 = vmul.f32 %v1623_v47, %v6894_v46  ;;  %v1628_v27 = vmul.f32 %v1622_v62, %v6898_v50 }
 0x191   : > { %v5571_v63 = vpack.c.bf16 %v1628_v27, %v7100_v0  ;;  %v1633_v12 = vpop.permute.xlu1 %1632  ;;  %v1631_v53 = vpop.permute.xlu0 %1630  ;;  %v5553_v2 = vpack.c.bf16 %v1627_v61, %v7075_v52  ;;  %v5569_v16 = vpack.c.bf16 %v1629_v48, %v7097_v6 }
 0x192   : > { %v1640_v6 = vsel %vm773_vm5, %v1631_v53, %v1633_v12 }
 0x193   : > { %5554 = vmatprep.subr.bf16.mxu0 %v5553_v2  ;;  %5570 = vmatprep.subr.bf16.mxu1 %v5569_v16  ;;  %v1642_v27 = vmul.f32 %v1640_v6, %v6976_v28 }
 0x194   : > { %5556 = vmatpush1.bf16.msra.mxu0 %v5555_v11  ;;  %5572 = vmatpush1.bf16.msra.mxu1 %v5571_v63 }
 0x195   : > { %v1637_v13 = vpop.permute.xlu1 %1636  ;;  %v1635_v23 = vpop.permute.xlu0 %1634 }
 0x196   : > { %v1641_v10 = vsel %vm773_vm5, %v1637_v13, %v1631_v53  ;;  %v1639_v0 = vsel %vm773_vm5, %v1633_v12, %v1635_v23  ;;  %v1638_v55 = vsel %vm773_vm5, %v1635_v23, %v1637_v13 }
 0x197   : > { %v1645_v14 = vmul.f32 %v1641_v10, %v6936_v8  ;;  %v1643_v24 = vmul.f32 %v1639_v0, %v6940_v9  ;;  %v1644_v62 = vmul.f32 %v1638_v55, %v6944_v18 }
 0x199   : > { %v1649_v58 = vpop.permute.xlu1 %1648  ;;  %v1647_v15 = vpop.permute.xlu0 %1646 }
 0x19a   : > { %v1656_v52 = vsel %vm806_vm6, %v1647_v15, %v1649_v58 }
 0x19b   : > { %v1658_v26 = vmul.f32 %v1656_v52, %v6948_v35 }
 0x19d   : > { %v1653_v20 = vpop.permute.xlu1 %1652  ;;  %v1651_v4 = vpop.permute.xlu0 %1650  ;;  %v5559_v11 = vpack.c.bf16 %v1658_v26, %v1642_v27 }
 0x19e   : > { %v1657_v7 = vsel %vm806_vm6, %v1653_v20, %v1647_v15  ;;  %v1654_v3 = vsel %vm806_vm6, %v1651_v4, %v1653_v20  ;;  %v1655_v5 = vsel %vm806_vm6, %v1649_v58, %v1651_v4 }
 0x19f   : > { %v1661_v47 = vmul.f32 %v1657_v7, %v6958_v54  ;;  %v1659_v48 = vmul.f32 %v1655_v5, %v6968_v56  ;;  %v1660_v61 = vmul.f32 %v1654_v3, %v6972_v57 }
 0x1a1   : > { %v5575_v63 = vpack.c.bf16 %v1660_v61, %v1644_v62  ;;  %v1665_v12 = vpop.permute.xlu1 %1664  ;;  %v1663_v53 = vpop.permute.xlu0 %1662  ;;  %v5557_v2 = vpack.c.bf16 %v1659_v48, %v1643_v24  ;;  %v5573_v16 = vpack.c.bf16 %v1661_v47, %v1645_v14 }
 0x1a2   : > { %v1672_v13 = vsel %vm839_vm7, %v1663_v53, %v1665_v12 }
 0x1a3   : > { %5558 = vmatprep.subr.bf16.mxu0 %v5557_v2  ;;  %5574 = vmatprep.subr.bf16.mxu1 %v5573_v16  ;;  %v1674_v14 = vmul.f32 %v7023_v29, %v1672_v13 }
 0x1a4   : > { %5560 = vmatpush1.bf16.msra.mxu0 %v5559_v11  ;;  %5576 = vmatpush1.bf16.msra.mxu1 %v5575_v63 }
 0x1a5   : > { %v1669_v23 = vpop.permute.xlu1 %1668  ;;  %v1667_v58 = vpop.permute.xlu0 %1666 }
 0x1a6   : > { %v1673_v15 = vsel %vm839_vm7, %v1669_v23, %v1663_v53  ;;  %v1670_v10 = vsel %vm839_vm7, %v1667_v58, %v1669_v23  ;;  %v1671_v0 = vsel %vm839_vm7, %v1665_v12, %v1667_v58 }
 0x1a7   : > { %v1676_v52 = vmul.f32 %v7016_v1, %v1670_v10  ;;  %v1675_v55 = vmul.f32 %v7006_v59, %v1671_v0  ;;  %v1677_v6 = vmul.f32 %v7011_v60, %v1673_v15 }
 0x1a9   : > { %1694 = vmatprep.subr.mxu0 %v1675_v55  ;;  %1765 = vmatprep.subr.mxu1 %v1677_v6 }
 0x1aa   : > { %1695 = vmatpush1.msra.mxu0 %v1674_v14  ;;  %1766 = vmatpush1.msra.mxu1 %v1676_v52 }
 0x1ab   : > { %5068 = vmatmul.mubr.msk.f32.vlgmr.msra.gmra.mrb[6].mxu0 %vm864_vm8, %v7042_v51  ;;  %5069 = vmatmul.mubr.msk.f32.vlgmr.msra.gmra.mrb[6].mxu1 %vm864_vm8, %v7042_v51 }
 0x1ac   : > { %2054 = vmatprep.mubr.f32.mxu0 %v9634_v45  ;;  %2125 = vmatprep.mubr.f32.mxu1 %v9634_v45 }
 0x1b6   : > { %v7459_v1 = vpop.permute.xlu0 %1822 }
 0x1bf   : > { %v934_v59 = vpop.f32.mrb[0].mxu0  ;;  %v1005_v60 = vpop.f32.mrb[0].mxu1 }
 0x1c0   : > { %v1825_v29 = vadd.f32 %v7459_v1, %v934_v59  ;;  %v1827_v24 = vadd.f32 %v7459_v1, %v1005_v60  ;;  %v936_v20 = vpop.f32.mrb[1].mxu0  ;;  %v1007_v4 = vpop.f32.mrb[1].mxu1 }
 0x1c1   : > { %v1826_v26 = vadd.f32 %v7459_v1, %v936_v20  ;;  %v1828_v51 = vadd.f32 %v7459_v1, %v1007_v4 }
 0x1c2   : > { %6172 = vtanh.f32 %v1825_v29 }
 0x1c3   : > { %6174 = vtanh.f32 %v1827_v24 }
 0x1c4   : > { %6176 = vtanh.f32 %v1826_v26 }
 0x1c5   : > { %6178 = vtanh.f32 %v1828_v51 }
 0x1cc   : > { %v7465_v7 = vpop.eup %6172 }
 0x1cd   : > { %v7467_v3 = vpop.eup %6174  ;;  %1859 = vrot.lane.b32.xlu1 %v7465_v7, %s9623_s0 }
 0x1ce   : > { %1863 = vrot.lane.b32.xlu0 %v7467_v3, %s9623_s0  ;;  %v7473_v5 = vpop.eup %6176 }
 0x1cf   : > { %v7479_v62 = vpop.eup %6178 }
 0x1d1   : > { %1861 = vrot.lane.b32.xlu1 %v7473_v5, %s9623_s0 }
 0x1d2   : > { %1875 = vrot.lane.b32.xlu0 %v7465_v7, %s9626_s2 }
 0x1d5   : > { %1865 = vrot.lane.b32.xlu1 %v7479_v62, %s9623_s0 }
 0x1d6   : > { %1879 = vrot.lane.b32.xlu0 %v7467_v3, %s9626_s2 }
 0x1d9   : > { %1877 = vrot.lane.b32.xlu1 %v7473_v5, %s9626_s2 }
 0x1da   : > { %1891 = vrot.lane.b32.xlu0 %v7465_v7, %s9628_s27 }
 0x1dd   : > { %1881 = vrot.lane.b32.xlu1 %v7479_v62, %s9626_s2 }
 0x1de   : > { %1895 = vrot.lane.b32.xlu0 %v7467_v3, %s9628_s27 }
 0x1e1   : > { %1893 = vrot.lane.b32.xlu1 %v7473_v5, %s9628_s27 }
 0x1e2   : > { %1907 = vrot.lane.b32.xlu0 %v7465_v7, %s9629_s20 }
 0x1e5   : > { %1897 = vrot.lane.b32.xlu1 %v7479_v62, %s9628_s27 }
 0x1e6   : > { %1911 = vrot.lane.b32.xlu0 %v7467_v3, %s9629_s20 }
 0x1e9   : > { %1909 = vrot.lane.b32.xlu1 %v7473_v5, %s9629_s20 }
 0x1ea   : > { %1923 = vrot.lane.b32.xlu0 %v7465_v7, %s9632_s16 }
 0x1ed   : > { %1913 = vrot.lane.b32.xlu1 %v7479_v62, %s9629_s20 }
 0x1ee   : > { %1927 = vrot.lane.b32.xlu0 %v7467_v3, %s9632_s16 }
 0x1f1   : > { %1925 = vrot.lane.b32.xlu1 %v7473_v5, %s9632_s16 }
 0x1f2   : > { %1939 = vrot.lane.b32.xlu0 %v7465_v7, %s9619_s17 }
 0x1f5   : > { %1929 = vrot.lane.b32.xlu1 %v7479_v62, %s9632_s16 }
 0x1f6   : > { %1943 = vrot.lane.b32.xlu0 %v7467_v3, %s9619_s17 }
 0x1f9   : > { %1941 = vrot.lane.b32.xlu1 %v7473_v5, %s9619_s17 }
 0x1fa   : > { %1955 = vrot.lane.b32.xlu0 %v7465_v7, %s9633_s15 }
 0x1fd   : > { %1945 = vrot.lane.b32.xlu1 %v7479_v62, %s9619_s17 }
 0x1fe   : > { %1959 = vrot.lane.b32.xlu0 %v7467_v3, %s9633_s15 }
 0x1ff   : > { %v1204_v47 = vpop.f32.mrb[2].mxu0  ;;  %v1275_v48 = vpop.f32.mrb[2].mxu1 }
 0x200   : > { %v1829_v61 = vadd.f32 %v7459_v1, %v1204_v47  ;;  %v1206_v27 = vpop.f32.mrb[3].mxu0  ;;  %v1277_v63 = vpop.f32.mrb[3].mxu1  ;;  %v1831_v12 = vadd.f32 %v7459_v1, %v1275_v48 }
 0x201   : > { %1957 = vrot.lane.b32.xlu1 %v7473_v5, %s9633_s15  ;;  %v1830_v53 = vadd.f32 %v7459_v1, %v1206_v27  ;;  %v1832_v2 = vadd.f32 %v7459_v1, %v1277_v63 }
 0x202   : > { %6180 = vtanh.f32 %v1829_v61  ;;  %1971 = vrot.lane.b32.xlu0 %v7465_v7, %s9622_s23 }
 0x203   : > { %6182 = vtanh.f32 %v1831_v12 }
 0x204   : > { %6184 = vtanh.f32 %v1830_v53 }
 0x205   : > { %1961 = vrot.lane.b32.xlu1 %v7479_v62, %s9633_s15  ;;  %6186 = vtanh.f32 %v1832_v2 }
 0x206   : > { %1975 = vrot.lane.b32.xlu0 %v7467_v3, %s9622_s23 }
 0x209   : > { %1973 = vrot.lane.b32.xlu1 %v7473_v5, %s9622_s23 }
 0x20c   : > { %v7539_v16 = vpop.eup %6180 }
 0x20d   : > { %2132 = vrot.lane.b32.xlu0 %v7539_v16, %s9623_s0  ;;  %1977 = vrot.lane.b32.xlu1 %v7479_v62, %s9622_s23  ;;  %v7545_v11 = vpop.eup %6182 }
 0x20e   : > { %v7547_v13 = vpop.eup %6184 }
 0x20f   : > { %v7553_v23 = vpop.eup %6186 }
 0x211   : > { %2136 = vrot.lane.b32.xlu0 %v7545_v11, %s9623_s0  ;;  %2134 = vrot.lane.b32.xlu1 %v7547_v13, %s9623_s0 }
 0x215   : > { %2148 = vrot.lane.b32.xlu0 %v7539_v16, %s9626_s2  ;;  %2138 = vrot.lane.b32.xlu1 %v7553_v23, %s9623_s0 }
 0x219   : > { %2152 = vrot.lane.b32.xlu0 %v7545_v11, %s9626_s2  ;;  %2150 = vrot.lane.b32.xlu1 %v7547_v13, %s9626_s2 }
 0x21d   : > { %2164 = vrot.lane.b32.xlu0 %v7539_v16, %s9628_s27  ;;  %2154 = vrot.lane.b32.xlu1 %v7553_v23, %s9626_s2 }
 0x221   : > { %2168 = vrot.lane.b32.xlu0 %v7545_v11, %s9628_s27  ;;  %2166 = vrot.lane.b32.xlu1 %v7547_v13, %s9628_s27 }
 0x225   : > { %2180 = vrot.lane.b32.xlu0 %v7539_v16, %s9629_s20  ;;  %2170 = vrot.lane.b32.xlu1 %v7553_v23, %s9628_s27 }
 0x229   : > { %2184 = vrot.lane.b32.xlu0 %v7545_v11, %s9629_s20  ;;  %2182 = vrot.lane.b32.xlu1 %v7547_v13, %s9629_s20 }
 0x22d   : > { %2196 = vrot.lane.b32.xlu0 %v7539_v16, %s9632_s16  ;;  %2186 = vrot.lane.b32.xlu1 %v7553_v23, %s9629_s20 }
 0x231   : > { %2200 = vrot.lane.b32.xlu0 %v7545_v11, %s9632_s16  ;;  %2198 = vrot.lane.b32.xlu1 %v7547_v13, %s9632_s16 }
 0x235   : > { %2212 = vrot.lane.b32.xlu0 %v7539_v16, %s9619_s17  ;;  %2202 = vrot.lane.b32.xlu1 %v7553_v23, %s9632_s16 }
 0x239   : > { %2216 = vrot.lane.b32.xlu0 %v7545_v11, %s9619_s17  ;;  %2214 = vrot.lane.b32.xlu1 %v7547_v13, %s9619_s17 }
 0x23d   : > { %2228 = vrot.lane.b32.xlu0 %v7539_v16, %s9633_s15  ;;  %2218 = vrot.lane.b32.xlu1 %v7553_v23, %s9619_s17 }
 0x23e   : > { %v1474_v58 = vpop.f32.mrb[4].mxu0  ;;  %v1545_v15 = vpop.f32.mrb[4].mxu1 }
 0x23f   : > { %v1833_v10 = vadd.f32 %v7459_v1, %v1474_v58  ;;  %v1860_v0 = vpop.permute.xlu1 %1859  ;;  %v1476_v52 = vpop.f32.mrb[5].mxu0  ;;  %v1835_v14 = vadd.f32 %v7459_v1, %v1545_v15 }
 0x240   : > { %v1864_v55 = vpop.permute.xlu0 %1863  ;;  %v1547_v6 = vpop.f32.mrb[5].mxu1  ;;  %v1834_v59 = vadd.f32 %v7459_v1, %v1476_v52 }
 0x241   : > { %6188 = vtanh.f32 %v1833_v10  ;;  %2232 = vrot.lane.b32.xlu0 %v7545_v11, %s9633_s15  ;;  %2230 = vrot.lane.b32.xlu1 %v7547_v13, %s9633_s15  ;;  %v1836_v24 = vadd.f32 %v7459_v1, %v1547_v6 }
 0x242   : > { %6190 = vtanh.f32 %v1835_v14 }
 0x243   : > { %v1862_v60 = vpop.permute.xlu1 %1861  ;;  %6192 = vtanh.f32 %v1834_v59 }
 0x244   : > { %v1876_v29 = vpop.permute.xlu0 %1875  ;;  %v1869_v26 = vsel %vm608_vm0, %v1860_v0, %v1862_v60  ;;  %6194 = vtanh.f32 %v1836_v24  ;;  %v1868_v15 = vsel %vm608_vm0, %v1862_v60, %v1864_v55 }
 0x245   : > { %2244 = vrot.lane.b32.xlu0 %v7539_v16, %s9622_s23  ;;  %2234 = vrot.lane.b32.xlu1 %v7553_v23, %s9633_s15  ;;  %v1872_v48 = vmul.f32 %v1869_v26, %v6720_v30  ;;  %v1873_v60 = vmul.f32 %v1868_v15, %v6746_v39 }
 0x247   : > { %v1866_v20 = vpop.permute.xlu1 %1865 }
 0x248   : > { %v1880_v4 = vpop.permute.xlu0 %1879  ;;  %v1867_v63 = vsel %vm608_vm0, %v1864_v55, %v1866_v20  ;;  %v1870_v12 = vsel %vm608_vm0, %v1866_v20, %v1860_v0 }
 0x249   : > { %2248 = vrot.lane.b32.xlu0 %v7545_v11, %s9622_s23  ;;  %2246 = vrot.lane.b32.xlu1 %v7547_v13, %s9622_s23  ;;  %v1871_v0 = vmul.f32 %v1870_v12, %v6730_v33  ;;  %v1874_v14 = vmul.f32 %v1867_v63, %v6738_v37 }
 0x24b   : > { %v7617_v51 = vpop.eup %6188  ;;  %v1878_v47 = vpop.permute.xlu1 %1877 }
 0x24c   : > { %v1892_v61 = vpop.permute.xlu0 %1891  ;;  %v1885_v27 = vsel %vm641_vm1, %v1876_v29, %v1878_v47  ;;  %v1884_v2 = vsel %vm641_vm1, %v1878_v47, %v1880_v4  ;;  %v7633_v58 = vpop.eup %6190 }
 0x24d   : > { %v1888_v53 = vmul.f32 %v1885_v27, %v6724_v31  ;;  %2402 = vrot.lane.b32.xlu0 %v7617_v51, %s9623_s0  ;;  %2250 = vrot.lane.b32.xlu1 %v7553_v23, %s9622_s23  ;;  %9635 = vst [vmem:[#allocation14_spill] sm:$0xff] %v7633_v58  ;;  %v7637_v6 = vpop.eup %6192  ;;  %v1889_v26 = vmul.f32 %v1884_v2, %v6756_v43 }
 0x24e   : > { %9636 = vst [vmem:[#allocation15_spill] sm:$0xff] %v7637_v6  ;;  %v7653_v63 = vpop.eup %6194 }
 0x24f   : > { %v1882_v10 = vpop.permute.xlu1 %1881  ;;  %v5577_v52 = vpack.c.bf16 %v1888_v53, %v1872_v48  ;;  %9637 = vst [vmem:[#allocation16_spill] sm:$0xff] %v7653_v63  ;;  %v5595_v12 = vpack.c.bf16 %v1889_v26, %v1873_v60 }
 0x250   : > { %v1896_v59 = vpop.permute.xlu0 %1895  ;;  %v1883_v24 = vsel %vm641_vm1, %v1880_v4, %v1882_v10  ;;  %v1886_v20 = vsel %vm641_vm1, %v1882_v10, %v1876_v29 }
 0x251   : > { %v1887_v47 = vmul.f32 %v1886_v20, %v6734_v36  ;;  %v1890_v55 = vmul.f32 %v1883_v24, %v6742_v38  ;;  %2406 = vrot.lane.b32.xlu0 %v7633_v58, %s9623_s0  ;;  %2404 = vrot.lane.b32.xlu1 %v7637_v6, %s9623_s0 }
 0x252   : > { %5578 = vmatprep.subr.bf16.mxu0 %v5577_v52 }
 0x253   : > { %v5579_v48 = vpack.c.bf16 %v1887_v47, %v1871_v0  ;;  %v1894_v4 = vpop.permute.xlu1 %1893  ;;  %v5593_v27 = vpack.c.bf16 %v1890_v55, %v1874_v14 }
 0x254   : > { %v1908_v29 = vpop.permute.xlu0 %1907  ;;  %v1901_v15 = vsel %vm674_vm2, %v1892_v61, %v1894_v4  ;;  %v1900_v55 = vsel %vm674_vm2, %v1894_v4, %v1896_v59 }
 0x255   : > { %2418 = vrot.lane.b32.xlu0 %v7617_v51, %s9626_s2  ;;  %2408 = vrot.lane.b32.xlu1 %v7653_v63, %s9623_s0  ;;  %v1904_v52 = vmul.f32 %v1901_v15, %v6808_v17 }
 0x256   : > { %5580 = vmatpush1.bf16.msra.mxu0 %v5579_v48  ;;  %5594 = vmatprep.subr.bf16.mxu1 %v5593_v27 }
 0x257   : > { %5596 = vmatpush1.bf16.msra.mxu1 %v5595_v12  ;;  %v1898_v53 = vpop.permute.xlu1 %1897 }
 0x258   : > { %v1912_v2 = vpop.permute.xlu0 %1911  ;;  %v1899_v24 = vsel %vm674_vm2, %v1896_v59, %v1898_v53  ;;  %v1902_v20 = vsel %vm674_vm2, %v1898_v53, %v1892_v61  ;;  %v1905_v59 = vmul.f32 %v1900_v55, %v6826_v32 }
 0x259   : > { %2422 = vrot.lane.b32.xlu0 %v7633_v58, %s9626_s2  ;;  %2420 = vrot.lane.b32.xlu1 %v7637_v6, %s9626_s2  ;;  %v1903_v27 = vmul.f32 %v1902_v20, %v6822_v25  ;;  %v1906_v61 = vmul.f32 %v1899_v24, %v6830_v34 }
 0x25b   : > { %v1910_v10 = vpop.permute.xlu1 %1909 }
 0x25c   : > { %v1924_v0 = vpop.permute.xlu0 %1923  ;;  %v1917_v14 = vsel %vm707_vm3, %v1908_v29, %v1910_v10  ;;  %v1916_v47 = vsel %vm707_vm3, %v1910_v10, %v1912_v2 }
 0x25d   : > { %v1920_v26 = vmul.f32 %v1917_v14, %v6816_v19  ;;  %2434 = vrot.lane.b32.xlu0 %v7617_v51, %s9628_s27  ;;  %2424 = vrot.lane.b32.xlu1 %v7653_v63, %s9626_s2  ;;  %v1921_v14 = vmul.f32 %v1916_v47, %v6838_v42 }
 0x25f   : > { %v1914_v60 = vpop.permute.xlu1 %1913  ;;  %v5581_v48 = vpack.c.bf16 %v1920_v26, %v1904_v52  ;;  %v5599_v26 = vpack.c.bf16 %v1921_v14, %v1905_v59 }
 0x260   : > { %v1928_v12 = vpop.permute.xlu0 %1927  ;;  %v1915_v53 = vsel %vm707_vm3, %v1912_v2, %v1914_v60  ;;  %v1918_v15 = vsel %vm707_vm3, %v1914_v60, %v1908_v29 }
 0x261   : > { %v1919_v10 = vmul.f32 %v1918_v15, %v6834_v41  ;;  %v1922_v22 = vmul.f32 %v1915_v53, %v6848_v49  ;;  %2438 = vrot.lane.b32.xlu0 %v7633_v58, %s9628_s27  ;;  %2436 = vrot.lane.b32.xlu1 %v7637_v6, %s9628_s27 }
 0x262   : > { %5582 = vmatprep.subr.bf16.mxu0 %v5581_v48 }
 0x263   : > { %v5583_v4 = vpack.c.bf16 %v1919_v10, %v1903_v27  ;;  %v1926_v2 = vpop.permute.xlu1 %1925  ;;  %v5597_v52 = vpack.c.bf16 %v1922_v22, %v1906_v61 }
 0x264   : > { %v1940_v24 = vpop.permute.xlu0 %1939  ;;  %v1932_v29 = vsel %vm740_vm4, %v1926_v2, %v1928_v12  ;;  %v1933_v20 = vsel %vm740_vm4, %v1924_v0, %v1926_v2 }
 0x265   : > { %v1935_v47 = vmul.f32 %v1933_v20, %v6880_v40  ;;  %v1936_v60 = vmul.f32 %v1932_v29, %v6894_v46  ;;  %2450 = vrot.lane.b32.xlu0 %v7617_v51, %s9629_s20  ;;  %2440 = vrot.lane.b32.xlu1 %v7653_v63, %s9628_s27 }
 0x266   : > { %5584 = vmatpush1.bf16.msra.mxu0 %v5583_v4  ;;  %5598 = vmatprep.subr.bf16.mxu1 %v5597_v52 }
 0x267   : > { %v5587_v22 = vpack.c.bf16 %v1935_v47, %v7465_v7  ;;  %5600 = vmatpush1.bf16.msra.mxu1 %v5599_v26  ;;  %v1930_v55 = vpop.permute.xlu1 %1929  ;;  %v5585_v48 = vpack.c.bf16 %v1936_v60, %v7473_v5 }
 0x268   : > { %v1944_v27 = vpop.permute.xlu0 %1943  ;;  %v1931_v61 = vsel %vm740_vm4, %v1928_v12, %v1930_v55  ;;  %v1934_v53 = vsel %vm740_vm4, %v1930_v55, %v1924_v0 }
 0x269   : > { %v1937_v15 = vmul.f32 %v1931_v61, %v6898_v50  ;;  %v1938_v14 = vmul.f32 %v1934_v53, %v6884_v44  ;;  %2454 = vrot.lane.b32.xlu0 %v7633_v58, %s9629_s20  ;;  %2452 = vrot.lane.b32.xlu1 %v7637_v6, %s9629_s20 }
 0x26a   : > { %5586 = vmatprep.subr.bf16.mxu0 %v5585_v48 }
 0x26b   : > { %v5603_v7 = vpack.c.bf16 %v1937_v15, %v7467_v3  ;;  %5588 = vmatpush1.bf16.msra.mxu0 %v5587_v22  ;;  %v1942_v5 = vpop.permute.xlu1 %1941  ;;  %v5601_v12 = vpack.c.bf16 %v1938_v14, %v7479_v62 }
 0x26c   : > { %v1956_v10 = vpop.permute.xlu0 %1955  ;;  %v1948_v4 = vsel %vm773_vm5, %v1942_v5, %v1944_v27  ;;  %v1949_v3 = vsel %vm773_vm5, %v1940_v24, %v1942_v5 }
 0x26d   : > { %2466 = vrot.lane.b32.xlu0 %v7617_v51, %s9632_s16  ;;  %2456 = vrot.lane.b32.xlu1 %v7653_v63, %s9629_s20  ;;  %v1951_v2 = vmul.f32 %v1949_v3, %v6976_v28  ;;  %v1952_v52 = vmul.f32 %v1948_v4, %v6940_v9 }
 0x26e   : > { %5602 = vmatprep.subr.bf16.mxu1 %v5601_v12 }
 0x26f   : > { %5604 = vmatpush1.bf16.msra.mxu1 %v5603_v7  ;;  %v1946_v0 = vpop.permute.xlu1 %1945 }
 0x270   : > { %v1960_v59 = vpop.permute.xlu0 %1959  ;;  %v1947_v26 = vsel %vm773_vm5, %v1944_v27, %v1946_v0  ;;  %v1950_v55 = vsel %vm773_vm5, %v1946_v0, %v1940_v24 }
 0x271   : > { %2470 = vrot.lane.b32.xlu0 %v7633_v58, %s9632_s16  ;;  %2468 = vrot.lane.b32.xlu1 %v7637_v6, %s9632_s16  ;;  %v1953_v15 = vmul.f32 %v1947_v26, %v6944_v18  ;;  %v1954_v7 = vmul.f32 %v1950_v55, %v6936_v8 }
 0x273   : > { %v1958_v62 = vpop.permute.xlu1 %1957 }
 0x274   : > { %v1964_v29 = vsel %vm806_vm6, %v1958_v62, %v1960_v59  ;;  %v1965_v20 = vsel %vm806_vm6, %v1956_v10, %v1958_v62  ;;  %v1972_v47 = vpop.permute.xlu0 %1971  ;;  %v7766_v62 = vld [vmem:[%s9564_s11 + $0x20] ss:$0 sm:$0xff] }
 0x275   : > { %v1967_v60 = vmul.f32 %v1965_v20, %v6948_v35  ;;  %v1968_v22 = vmul.f32 %v1964_v29, %v6968_v56  ;;  %2482 = vrot.lane.b32.xlu0 %v7617_v51, %s9619_s17  ;;  %2472 = vrot.lane.b32.xlu1 %v7653_v63, %s9632_s16 }
 0x277   : > { %v5591_v48 = vpack.c.bf16 %v1967_v60, %v1951_v2  ;;  %v1962_v61 = vpop.permute.xlu1 %1961  ;;  %v5589_v53 = vpack.c.bf16 %v1968_v22, %v1952_v52  ;;  %v7776_v52 = vld [vmem:[%s9564_s11 + $0x28] ss:$0 sm:$0xff] }
 0x278   : > { %v1963_v27 = vsel %vm806_vm6, %v1960_v59, %v1962_v61  ;;  %v1966_v14 = vsel %vm806_vm6, %v1962_v61, %v1956_v10  ;;  %v1976_v24 = vpop.permute.xlu0 %1975 }
 0x279   : > { %v1969_v5 = vmul.f32 %v1963_v27, %v6972_v57  ;;  %v1970_v12 = vmul.f32 %v1966_v14, %v6958_v54  ;;  %2486 = vrot.lane.b32.xlu0 %v7633_v58, %s9619_s17  ;;  %2484 = vrot.lane.b32.xlu1 %v7637_v6, %s9619_s17  ;;  %v7792_v14 = vld [vmem:[%s9564_s11 + $0x30] ss:$0 sm:$0xff] }
 0x27a   : > { %5590 = vmatprep.subr.bf16.mxu0 %v5589_v53 }
 0x27b   : > { %v5607_v0 = vpack.c.bf16 %v1969_v5, %v1953_v15  ;;  %5592 = vmatpush1.bf16.msra.mxu0 %v5591_v48  ;;  %v1974_v59 = vpop.permute.xlu1 %1973  ;;  %v5605_v4 = vpack.c.bf16 %v1970_v12, %v1954_v7  ;;  %v7783_v48 = vld [vmem:[%s9558_s5] sm:$0xff] }
 0x27c   : > { %v1980_v10 = vsel %vm839_vm7, %v1974_v59, %v1976_v24  ;;  %v1981_v3 = vsel %vm839_vm7, %v1972_v47, %v1974_v59 }
 0x27d   : > { %v1983_v2 = vmul.f32 %v7766_v62, %v1981_v3  ;;  %2498 = vrot.lane.b32.xlu0 %v7617_v51, %s9633_s15  ;;  %2488 = vrot.lane.b32.xlu1 %v7653_v63, %s9619_s17  ;;  %v1984_v29 = vmul.f32 %v7776_v52, %v1980_v10 }
 0x27e   : > { %5606 = vmatprep.subr.bf16.mxu1 %v5605_v4  ;;  %v1744_v20 = vpop.f32.mrb[6].mxu0  ;;  %v1815_v26 = vpop.f32.mrb[6].mxu1 }
 0x27f   : > { %5608 = vmatpush1.bf16.msra.mxu1 %v5607_v0  ;;  %v1837_v60 = vadd.f32 %v7459_v1, %v1744_v20  ;;  %v2133_v22 = vpop.permute.xlu0 %2132  ;;  %2006 = vmatprep.subr.mxu0 %v1984_v29  ;;  %v1978_v55 = vpop.permute.xlu1 %1977  ;;  %v1839_v5 = vadd.f32 %v7459_v1, %v1815_v26 }
 0x280   : > { %v1979_v61 = vsel %vm839_vm7, %v1976_v24, %v1978_v55  ;;  %v1982_v53 = vsel %vm839_vm7, %v1978_v55, %v1972_v47  ;;  %v1746_v15 = vpop.f32.mrb[7].mxu0  ;;  %v1817_v27 = vpop.f32.mrb[7].mxu1  ;;  %2007 = vmatpush1.msra.mxu0 %v1983_v2  ;;  %v7805_v47 = vld [vmem:[%s9564_s11 + $0x38] ss:$0 sm:$0xff] }
 0x281   : > { %6196 = vtanh.f32 %v1837_v60  ;;  %v1985_v7 = vmul.f32 %v7792_v14, %v1979_v61  ;;  %2502 = vrot.lane.b32.xlu0 %v7633_v58, %s9633_s15  ;;  %2500 = vrot.lane.b32.xlu1 %v7637_v6, %s9633_s15  ;;  %v1986_v12 = vmul.f32 %v7805_v47, %v1982_v53  ;;  %v1838_v24 = vadd.f32 %v7459_v1, %v1746_v15 }
 0x282   : > { %5070 = vmatmul.mubr.msk.f32.vlgmr.msra.gmra.mrb[8].mxu0 %vm864_vm8, %v7783_v48  ;;  %6198 = vtanh.f32 %v1839_v5  ;;  %v1840_v4 = vadd.f32 %v7459_v1, %v1817_v27 }
 0x283   : > { %v2137_v0 = vpop.permute.xlu0 %2136  ;;  %v2135_v59 = vpop.permute.xlu1 %2134  ;;  %2324 = vmatprep.mubr.f32.mxu0 %v9634_v45  ;;  %2077 = vmatprep.subr.mxu1 %v1986_v12  ;;  %6200 = vtanh.f32 %v1838_v24 }
 0x284   : > { %2078 = vmatpush1.msra.mxu1 %v1985_v7  ;;  %v2142_v2 = vsel %vm608_vm0, %v2133_v22, %v2135_v59  ;;  %6202 = vtanh.f32 %v1840_v4  ;;  %v2141_v27 = vsel %vm608_vm0, %v2135_v59, %v2137_v0 }
 0x285   : > { %2514 = vrot.lane.b32.xlu0 %v7617_v51, %s9622_s23  ;;  %2504 = vrot.lane.b32.xlu1 %v7653_v63, %s9633_s15  ;;  %v2145_v60 = vmul.f32 %v2142_v2, %v6720_v30 }
 0x286   : > { %5071 = vmatmul.mubr.msk.f32.vlgmr.msra.gmra.mrb[8].mxu1 %vm864_vm8, %v7783_v48 }
 0x287   : > { %v2149_v10 = vpop.permute.xlu0 %2148  ;;  %v2139_v3 = vpop.permute.xlu1 %2138  ;;  %2395 = vmatprep.mubr.f32.mxu1 %v9634_v45 }
 0x288   : > { %v2140_v55 = vsel %vm608_vm0, %v2137_v0, %v2139_v3  ;;  %v2143_v61 = vsel %vm608_vm0, %v2139_v3, %v2133_v22 }
 0x289   : > { %2518 = vrot.lane.b32.xlu0 %v7633_v58, %s9622_s23  ;;  %2516 = vrot.lane.b32.xlu1 %v7637_v6, %s9622_s23  ;;  %v2144_v22 = vmul.f32 %v2143_v61, %v6730_v33  ;;  %v2147_v4 = vmul.f32 %v2140_v55, %v6738_v37 }
 0x28b   : > { %v7824_v29 = vpop.eup %6196  ;;  %v2153_v20 = vpop.permute.xlu0 %2152 }
 0x28c   : > { %v2151_v26 = vpop.permute.xlu1 %2150  ;;  %v7842_v24 = vpop.eup %6198 }
 0x28d   : > { %v2158_v1 = vsel %vm641_vm1, %v2149_v10, %v2151_v26  ;;  %2672 = vrot.lane.b32.xlu0 %v7824_v29, %s9623_s0  ;;  %v2157_v15 = vsel %vm641_vm1, %v2151_v26, %v2153_v20  ;;  %2520 = vrot.lane.b32.xlu1 %v7653_v63, %s9622_s23  ;;  %v7850_v26 = vpop.eup %6200 }
 0x28e   : > { %v2161_v53 = vmul.f32 %v2158_v1, %v6724_v31  ;;  %v2162_v1 = vmul.f32 %v2157_v15, %v6756_v43 }
 0x28f   : > { %v2165_v7 = vpop.permute.xlu0 %2164 }
 0x290   : > { %v2155_v5 = vpop.permute.xlu1 %2154  ;;  %v5609_v12 = vpack.c.bf16 %v2161_v53, %v2145_v60  ;;  %v7860_v53 = vpop.eup %6202 }
 0x291   : > { %v2156_v3 = vsel %vm641_vm1, %v2153_v20, %v2155_v5  ;;  %v2159_v2 = vsel %vm641_vm1, %v2155_v5, %v2149_v10  ;;  %2676 = vrot.lane.b32.xlu0 %v7842_v24, %s9623_s0  ;;  %2674 = vrot.lane.b32.xlu1 %v7850_v26, %s9623_s0  ;;  %v2146_v20 = vmul.f32 %v2141_v27, %v6746_v39 }
 0x292   : > { %v2160_v0 = vmul.f32 %v2159_v2, %v6734_v36  ;;  %v2163_v59 = vmul.f32 %v2156_v3, %v6742_v38  ;;  %5610 = vmatprep.subr.bf16.mxu0 %v5609_v12 }
 0x293   : > { %v2169_v55 = vpop.permute.xlu0 %2168  ;;  %v5627_v15 = vpack.c.bf16 %v2162_v1, %v2146_v20 }
 0x294   : > { %v5611_v60 = vpack.c.bf16 %v2160_v0, %v2144_v22  ;;  %v2167_v10 = vpop.permute.xlu1 %2166  ;;  %v5625_v61 = vpack.c.bf16 %v2163_v59, %v2147_v4 }
 0x295   : > { %2688 = vrot.lane.b32.xlu0 %v7824_v29, %s9626_s2  ;;  %2678 = vrot.lane.b32.xlu1 %v7860_v53, %s9623_s0  ;;  %v2174_v27 = vsel %vm674_vm2, %v2165_v7, %v2167_v10 }
 0x296   : > { %5612 = vmatpush1.bf16.msra.mxu0 %v5611_v60  ;;  %5626 = vmatprep.subr.bf16.mxu1 %v5625_v61  ;;  %v2177_v2 = vmul.f32 %v2174_v27, %v6808_v17  ;;  %v2173_v60 = vsel %vm674_vm2, %v2167_v10, %v2169_v55 }
 0x297   : > { %5628 = vmatpush1.bf16.msra.mxu1 %v5627_v15  ;;  %v2181_v5 = vpop.permute.xlu0 %2180 }
 0x298   : > { %v2171_v12 = vpop.permute.xlu1 %2170 }
 0x299   : > { %2692 = vrot.lane.b32.xlu0 %v7842_v24, %s9626_s2  ;;  %2690 = vrot.lane.b32.xlu1 %v7850_v26, %s9626_s2  ;;  %v2172_v1 = vsel %vm674_vm2, %v2169_v55, %v2171_v12  ;;  %v2175_v0 = vsel %vm674_vm2, %v2171_v12, %v2165_v7  ;;  %v2178_v55 = vmul.f32 %v2173_v60, %v6826_v32 }
 0x29a   : > { %v2176_v63 = vmul.f32 %v2175_v0, %v6822_v25  ;;  %v2179_v7 = vmul.f32 %v2172_v1, %v6830_v34 }
 0x29b   : > { %v2185_v22 = vpop.permute.xlu0 %2184 }
 0x29c   : > { %v2183_v4 = vpop.permute.xlu1 %2182 }
 0x29d   : > { %v2190_v3 = vsel %vm707_vm3, %v2181_v5, %v2183_v4  ;;  %2704 = vrot.lane.b32.xlu0 %v7824_v29, %s9628_s27  ;;  %v2189_v20 = vsel %vm707_vm3, %v2183_v4, %v2185_v22  ;;  %2694 = vrot.lane.b32.xlu1 %v7860_v53, %s9626_s2  ;;  %s6396_s2 = smov 8  }
 0x29e   : > { %v2193_v59 = vmul.f32 %v2190_v3, %v6816_v19  ;;  %v2194_v4 = vmul.f32 %v2189_v20, %v6838_v42 }
 0x29f   : > { %v2197_v61 = vpop.permute.xlu0 %2196 }
 0x2a0   : > { %v2187_v15 = vpop.permute.xlu1 %2186  ;;  %v5613_v27 = vpack.c.bf16 %v2193_v59, %v2177_v2  ;;  %v5631_v59 = vpack.c.bf16 %v2194_v4, %v2178_v55 }
 0x2a1   : > { %v2188_v12 = vsel %vm707_vm3, %v2185_v22, %v2187_v15  ;;  %v2191_v3 = vsel %vm707_vm3, %v2187_v15, %v2181_v5  ;;  %2708 = vrot.lane.b32.xlu0 %v7842_v24, %s9628_s27  ;;  %2706 = vrot.lane.b32.xlu1 %v7850_v26, %s9628_s27 }
 0x2a2   : > { %v2192_v58 = vmul.f32 %v2191_v3, %v6834_v41  ;;  %v2195_v6 = vmul.f32 %v2188_v12, %v6848_v49  ;;  %5614 = vmatprep.subr.bf16.mxu0 %v5613_v27 }
 0x2a3   : > { %v2201_v22 = vpop.permute.xlu0 %2200 }
 0x2a4   : > { %v5615_v10 = vpack.c.bf16 %v2192_v58, %v2176_v63  ;;  %v2199_v2 = vpop.permute.xlu1 %2198  ;;  %v5629_v1 = vpack.c.bf16 %v2195_v6, %v2179_v7 }
 0x2a5   : > { %v2205_v5 = vsel %vm740_vm4, %v2199_v2, %v2201_v22  ;;  %v2206_v0 = vsel %vm740_vm4, %v2197_v61, %v2199_v2  ;;  %2720 = vrot.lane.b32.xlu0 %v7824_v29, %s9629_s20  ;;  %2710 = vrot.lane.b32.xlu1 %v7860_v53, %s9628_s27  ;;  %s6397_s27 = smov 7  }
 0x2a6   : > { %v2208_v20 = vmul.f32 %v2206_v0, %v6880_v40  ;;  %v2209_v15 = vmul.f32 %v2205_v5, %v6894_v46  ;;  %5616 = vmatpush1.bf16.msra.mxu0 %v5615_v10  ;;  %5630 = vmatprep.subr.bf16.mxu1 %v5629_v1 }
 0x2a7   : > { %5632 = vmatpush1.bf16.msra.mxu1 %v5631_v59  ;;  %v2213_v6 = vpop.permute.xlu0 %2212 }
 0x2a8   : > { %v5619_v58 = vpack.c.bf16 %v2208_v20, %v7539_v16  ;;  %v2203_v63 = vpop.permute.xlu1 %2202  ;;  %v5617_v60 = vpack.c.bf16 %v2209_v15, %v7547_v13 }
 0x2a9   : > { %v2204_v27 = vsel %vm740_vm4, %v2201_v22, %v2203_v63  ;;  %v2207_v7 = vsel %vm740_vm4, %v2203_v63, %v2197_v61  ;;  %2724 = vrot.lane.b32.xlu0 %v7842_v24, %s9629_s20  ;;  %2722 = vrot.lane.b32.xlu1 %v7850_v26, %s9629_s20 }
 0x2aa   : > { %v2210_v12 = vmul.f32 %v2204_v27, %v6898_v50  ;;  %v2211_v3 = vmul.f32 %v2207_v7, %v6884_v44  ;;  %5618 = vmatprep.subr.bf16.mxu0 %v5617_v60 }
 0x2ab   : > { %5620 = vmatpush1.bf16.msra.mxu0 %v5619_v58  ;;  %v2217_v13 = vpop.permute.xlu0 %2216 }
 0x2ac   : > { %v5635_v16 = vpack.c.bf16 %v2210_v12, %v7545_v11  ;;  %v2215_v4 = vpop.permute.xlu1 %2214  ;;  %v5633_v55 = vpack.c.bf16 %v2211_v3, %v7553_v23 }
 0x2ad   : > { %2736 = vrot.lane.b32.xlu0 %v7824_v29, %s9632_s16  ;;  %2726 = vrot.lane.b32.xlu1 %v7860_v53, %s9629_s20  ;;  %v2222_v22 = vsel %vm773_vm5, %v2213_v6, %v2215_v4  ;;  %v2221_v11 = vsel %vm773_vm5, %v2215_v4, %v2217_v13 }
 0x2ae   : > { %5634 = vmatprep.subr.bf16.mxu1 %v5633_v55  ;;  %v2224_v1 = vmul.f32 %v2222_v22, %v6976_v28  ;;  %v2225_v59 = vmul.f32 %v2221_v11, %v6940_v9 }
 0x2af   : > { %5636 = vmatpush1.bf16.msra.mxu1 %v5635_v16  ;;  %v2229_v61 = vpop.permute.xlu0 %2228 }
 0x2b0   : > { %v2219_v10 = vpop.permute.xlu1 %2218 }
 0x2b1   : > { %2740 = vrot.lane.b32.xlu0 %v7842_v24, %s9632_s16  ;;  %2738 = vrot.lane.b32.xlu1 %v7850_v26, %s9632_s16  ;;  %v2220_v20 = vsel %vm773_vm5, %v2217_v13, %v2219_v10  ;;  %v2223_v63 = vsel %vm773_vm5, %v2219_v10, %v2213_v6 }
 0x2b2   : > { %v2226_v3 = vmul.f32 %v2220_v20, %v6944_v18  ;;  %v2227_v4 = vmul.f32 %v2223_v63, %v6936_v8 }
 0x2b3   : > { %v2233_v23 = vpop.permute.xlu0 %2232 }
 0x2b4   : > { %v2231_v2 = vpop.permute.xlu1 %2230 }
 0x2b5   : > { %v2237_v5 = vsel %vm806_vm6, %v2231_v2, %v2233_v23  ;;  %v2238_v0 = vsel %vm806_vm6, %v2229_v61, %v2231_v2  ;;  %2752 = vrot.lane.b32.xlu0 %v7824_v29, %s9619_s17  ;;  %2742 = vrot.lane.b32.xlu1 %v7860_v53, %s9632_s16 }
 0x2b6   : > { %v2240_v15 = vmul.f32 %v2238_v0, %v6948_v35  ;;  %v2241_v58 = vmul.f32 %v2237_v5, %v6968_v56 }
 0x2b7   : > { %v2245_v27 = vpop.permute.xlu0 %2244 }
 0x2b8   : > { %v5623_v60 = vpack.c.bf16 %v2240_v15, %v2224_v1  ;;  %v2235_v7 = vpop.permute.xlu1 %2234  ;;  %v5621_v12 = vpack.c.bf16 %v2241_v58, %v2225_v59 }
 0x2b9   : > { %v2236_v16 = vsel %vm806_vm6, %v2233_v23, %v2235_v7  ;;  %v2239_v13 = vsel %vm806_vm6, %v2235_v7, %v2229_v61  ;;  %2756 = vrot.lane.b32.xlu0 %v7842_v24, %s9619_s17  ;;  %2754 = vrot.lane.b32.xlu1 %v7850_v26, %s9619_s17 }
 0x2ba   : > { %v2242_v55 = vmul.f32 %v2236_v16, %v6972_v57  ;;  %v2243_v6 = vmul.f32 %v2239_v13, %v6958_v54  ;;  %5622 = vmatprep.subr.bf16.mxu0 %v5621_v12  ;;  %v1858_v16 = vld [vmem:[%s9559_s6] sm:$0xff] }
 0x2bb   : > { %5624 = vmatpush1.bf16.msra.mxu0 %v5623_v60  ;;  %v2249_v22 = vpop.permute.xlu0 %2248 }
 0x2bc   : > { %v5639_v10 = vpack.c.bf16 %v2242_v55, %v2226_v3  ;;  %v2247_v11 = vpop.permute.xlu1 %2246  ;;  %v5637_v23 = vpack.c.bf16 %v2243_v6, %v2227_v4 }
 0x2bd   : > { %v2253_v61 = vsel %vm839_vm7, %v2247_v11, %v2249_v22  ;;  %v2254_v2 = vsel %vm839_vm7, %v2245_v27, %v2247_v11  ;;  %2768 = vrot.lane.b32.xlu0 %v7824_v29, %s9633_s15  ;;  %2758 = vrot.lane.b32.xlu1 %v7860_v53, %s9619_s17 }
 0x2be   : > { %v2256_v1 = vmul.f32 %v7766_v62, %v2254_v2  ;;  %5638 = vmatprep.subr.bf16.mxu1 %v5637_v23  ;;  %v2257_v5 = vmul.f32 %v7776_v52, %v2253_v61 }
 0x2bf   : > { %5640 = vmatpush1.bf16.msra.mxu1 %v5639_v10  ;;  %v2403_v0 = vpop.permute.xlu0 %2402 }
 0x2c0   : > { %2276 = vmatprep.subr.mxu0 %v2257_v5  ;;  %v2251_v59 = vpop.permute.xlu1 %2250 }
 0x2c1   : > { %v2252_v20 = vsel %vm839_vm7, %v2249_v22, %v2251_v59  ;;  %v2255_v15 = vsel %vm839_vm7, %v2251_v59, %v2245_v27  ;;  %2277 = vmatpush1.msra.mxu0 %v2256_v1  ;;  %2772 = vrot.lane.b32.xlu0 %v7842_v24, %s9633_s15 }
 0x2c2   : > { %v2258_v58 = vmul.f32 %v7792_v14, %v2252_v20  ;;  %5072 = vmatmul.mubr.msk.f32.vlgmr.msra.gmra.mrb[10].mxu0 %vm864_vm8, %v7783_v48  ;;  %v2259_v63 = vmul.f32 %v7805_v47, %v2255_v15  ;;  %2770 = vrot.lane.b32.xlu1 %v7850_v26, %s9633_s15 }
 0x2c3   : > { %2594 = vmatprep.mubr.f32.mxu0 %v9634_v45  ;;  %v2407_v60 = vpop.permute.xlu0 %2406 }
 0x2c4   : > { %2347 = vmatprep.subr.mxu1 %v2259_v63  ;;  %v2405_v7 = vpop.permute.xlu1 %2404 }
 0x2c5   : > { %2348 = vmatpush1.msra.mxu1 %v2258_v58  ;;  %2784 = vrot.lane.b32.xlu0 %v7824_v29, %s9622_s23  ;;  %v2412_v3 = vsel %vm608_vm0, %v2403_v0, %v2405_v7  ;;  %v2411_v61 = vsel %vm608_vm0, %v2405_v7, %v2407_v60 }
 0x2c6   : > { %5073 = vmatmul.mubr.msk.f32.vlgmr.msra.gmra.mrb[10].mxu1 %vm864_vm8, %v7783_v48  ;;  %2774 = vrot.lane.b32.xlu1 %v7860_v53, %s9633_s15  ;;  %v2415_v6 = vmul.f32 %v2412_v3, %v6720_v30 }
 0x2c7   : > { %2665 = vmatprep.mubr.f32.mxu1 %v9634_v45  ;;  %v2419_v27 = vpop.permute.xlu0 %2418 }
 0x2c8   : > { %v2409_v12 = vpop.permute.xlu1 %2408 }
 0x2c9   : > { %2788 = vrot.lane.b32.xlu0 %v7842_v24, %s9622_s23  ;;  %v2410_v11 = vsel %vm608_vm0, %v2407_v60, %v2409_v12  ;;  %v2413_v23 = vsel %vm608_vm0, %v2409_v12, %v2403_v0  ;;  %v2416_v60 = vmul.f32 %v2411_v61, %v6746_v39 }
 0x2ca   : > { %2786 = vrot.lane.b32.xlu1 %v7850_v26, %s9622_s23  ;;  %v2414_v58 = vmul.f32 %v2413_v23, %v6730_v33  ;;  %v2417_v0 = vmul.f32 %v2410_v11, %v6738_v37 }
 0x2cb   : > { %v2423_v13 = vpop.permute.xlu0 %2422 }
 0x2cc   : > { %v2421_v4 = vpop.permute.xlu1 %2420 }
 0x2cd   : > { %v2428_v55 = vsel %vm641_vm1, %v2419_v27, %v2421_v4  ;;  %v2427_v10 = vsel %vm641_vm1, %v2421_v4, %v2423_v13  ;;  %2944 = vperm.xlu0 %6170, %v1858_v16  }
 0x2ce   : > { %v2431_v22 = vmul.f32 %v2428_v55, %v6724_v31  ;;  %2790 = vrot.lane.b32.xlu1 %v7860_v53, %s9622_s23  ;;  %v2432_v59 = vmul.f32 %v2427_v10, %v6756_v43  ;;  %s9641_s23 = sshll.u32 %s9655_s24, 3  ;;  %s6398_s24 = smov 121  }
 0x2cf   : > { %v2435_v2 = vpop.permute.xlu0 %2434  ;;  %s8178_s15 = scalar_lea.vmem %s9554_s1, %s9641_s23 }
 0x2d0   : > { %v2425_v1 = vpop.permute.xlu1 %2424  ;;  %v5641_v5 = vpack.c.bf16 %v2431_v22, %v2415_v6  ;;  %v5659_v55 = vpack.c.bf16 %v2432_v59, %v2416_v60 }
 0x2d1   : > { %v2426_v20 = vsel %vm641_vm1, %v2423_v13, %v2425_v1  ;;  %v2429_v15 = vsel %vm641_vm1, %v2425_v1, %v2419_v27 }
 0x2d2   : > { %v2430_v63 = vmul.f32 %v2429_v15, %v6734_v36  ;;  %v2433_v12 = vmul.f32 %v2426_v20, %v6742_v38  ;;  %5642 = vmatprep.subr.bf16.mxu0 %v5641_v5 }
 0x2d3   : > { %v2439_v3 = vpop.permute.xlu0 %2438 }
 0x2d4   : > { %v5643_v7 = vpack.c.bf16 %v2430_v63, %v2414_v58  ;;  %v2437_v16 = vpop.permute.xlu1 %2436  ;;  %v5657_v4 = vpack.c.bf16 %v2433_v12, %v2417_v0 }
 0x2d5   : > { %v2444_v6 = vsel %vm674_vm2, %v2435_v2, %v2437_v16  ;;  %v2443_v20 = vsel %vm674_vm2, %v2437_v16, %v2439_v3 }
 0x2d6   : > { %5644 = vmatpush1.bf16.msra.mxu0 %v5643_v7  ;;  %5658 = vmatprep.subr.bf16.mxu1 %v5657_v4  ;;  %v2447_v23 = vmul.f32 %v2444_v6, %v6808_v17 }
 0x2d7   : > { %5660 = vmatpush1.bf16.msra.mxu1 %v5659_v55  ;;  %v2451_v27 = vpop.permute.xlu0 %2450 }
 0x2d8   : > { %v2441_v13 = vpop.permute.xlu1 %2440 }
 0x2d9   : > { %v2442_v5 = vsel %vm674_vm2, %v2439_v3, %v2441_v13  ;;  %v2445_v59 = vsel %vm674_vm2, %v2441_v13, %v2435_v2  ;;  %v2448_v3 = vmul.f32 %v2443_v20, %v6826_v32  ;;  %v9638_v20 = vld [vmem:[#allocation15_spill] sm:$0xff] }
 0x2da   : > { %v2446_v7 = vmul.f32 %v2445_v59, %v6822_v25  ;;  %v2449_v4 = vmul.f32 %v2442_v5, %v6830_v34 }
 0x2db   : > { %v2455_v10 = vpop.permute.xlu0 %2454 }
 0x2dc   : > { %v2453_v22 = vpop.permute.xlu1 %2452 }
 0x2dd   : > { %v2460_v11 = vsel %vm707_vm3, %v2451_v27, %v2453_v22  ;;  %v2459_v61 = vsel %vm707_vm3, %v2453_v22, %v2455_v10 }
 0x2de   : > { %v2463_v1 = vmul.f32 %v2460_v11, %v6816_v19  ;;  %v2464_v63 = vmul.f32 %v2459_v61, %v6838_v42 }
 0x2df   : > { %v2467_v15 = vpop.permute.xlu0 %2466 }
 0x2e0   : > { %v2457_v58 = vpop.permute.xlu1 %2456  ;;  %v5645_v0 = vpack.c.bf16 %v2463_v1, %v2447_v23  ;;  %v5663_v11 = vpack.c.bf16 %v2464_v63, %v2448_v3 }
 0x2e1   : > { %v2458_v12 = vsel %vm707_vm3, %v2455_v10, %v2457_v58  ;;  %v2461_v60 = vsel %vm707_vm3, %v2457_v58, %v2451_v27 }
 0x2e2   : > { %v2462_v2 = vmul.f32 %v2461_v60, %v6834_v41  ;;  %v2465_v55 = vmul.f32 %v2458_v12, %v6848_v49  ;;  %5646 = vmatprep.subr.bf16.mxu0 %v5645_v0 }
 0x2e3   : > { %v2471_v13 = vpop.permute.xlu0 %2470 }
 0x2e4   : > { %v5647_v16 = vpack.c.bf16 %v2462_v2, %v2446_v7  ;;  %v2469_v6 = vpop.permute.xlu1 %2468  ;;  %v5661_v22 = vpack.c.bf16 %v2465_v55, %v2449_v4  ;;  %v9639_v7 = vld [vmem:[#allocation14_spill] sm:$0xff]  ;;  %v9640_v55 = vld [vmem:[#allocation16_spill] sm:$0xff] }
 0x2e5   : > { %v2475_v10 = vsel %vm740_vm4, %v2469_v6, %v2471_v13  ;;  %v2476_v27 = vsel %vm740_vm4, %v2467_v15, %v2469_v6 }
 0x2e6   : > { %v2478_v23 = vmul.f32 %v2476_v27, %v6880_v40  ;;  %v2479_v61 = vmul.f32 %v2475_v10, %v6894_v46  ;;  %5648 = vmatpush1.bf16.msra.mxu0 %v5647_v16  ;;  %5662 = vmatprep.subr.bf16.mxu1 %v5661_v22 }
 0x2e7   : > { %5664 = vmatpush1.bf16.msra.mxu1 %v5663_v11  ;;  %v2483_v5 = vpop.permute.xlu0 %2482 }
 0x2e8   : > { %v5651_v1 = vpack.c.bf16 %v2478_v23, %v7617_v51  ;;  %v2473_v59 = vpop.permute.xlu1 %2472  ;;  %v5649_v58 = vpack.c.bf16 %v2479_v61, %v9638_v20 }
 0x2e9   : > { %v2474_v0 = vsel %vm740_vm4, %v2471_v13, %v2473_v59  ;;  %v2477_v63 = vsel %vm740_vm4, %v2473_v59, %v2467_v15 }
 0x2ea   : > { %v2480_v12 = vmul.f32 %v2474_v0, %v6898_v50  ;;  %v2481_v60 = vmul.f32 %v2477_v63, %v6884_v44  ;;  %5650 = vmatprep.subr.bf16.mxu0 %v5649_v58 }
 0x2eb   : > { %5652 = vmatpush1.bf16.msra.mxu0 %v5651_v1  ;;  %v2487_v2 = vpop.permute.xlu0 %2486 }
 0x2ec   : > { %v5667_v4 = vpack.c.bf16 %v2480_v12, %v9639_v7  ;;  %v2485_v51 = vpop.permute.xlu1 %2484  ;;  %v5665_v3 = vpack.c.bf16 %v2481_v60, %v9640_v55 }
 0x2ed   : > { %v2491_v13 = vsel %vm773_vm5, %v2485_v51, %v2487_v2  ;;  %v2492_v15 = vsel %vm773_vm5, %v2483_v5, %v2485_v51 }
 0x2ee   : > { %5666 = vmatprep.subr.bf16.mxu1 %v5665_v3  ;;  %v2494_v23 = vmul.f32 %v2492_v15, %v6976_v28  ;;  %v2495_v61 = vmul.f32 %v2491_v13, %v6940_v9 }
 0x2ef   : > { %5668 = vmatpush1.bf16.msra.mxu1 %v5667_v4  ;;  %v2499_v16 = vpop.permute.xlu0 %2498 }
 0x2f0   : > { %v2489_v6 = vpop.permute.xlu1 %2488 }
 0x2f1   : > { %v2490_v20 = vsel %vm773_vm5, %v2487_v2, %v2489_v6  ;;  %v2493_v58 = vsel %vm773_vm5, %v2489_v6, %v2483_v5 }
 0x2f2   : > { %v2496_v51 = vmul.f32 %v2490_v20, %v6944_v18  ;;  %v2497_v55 = vmul.f32 %v2493_v58, %v6936_v8 }
 0x2f3   : > { %v2503_v22 = vpop.permute.xlu0 %2502 }
 0x2f4   : > { %v2501_v11 = vpop.permute.xlu1 %2500 }
 0x2f5   : > { %v2507_v10 = vsel %vm806_vm6, %v2501_v11, %v2503_v22  ;;  %v2508_v27 = vsel %vm806_vm6, %v2499_v16, %v2501_v11 }
 0x2f6   : > { %v2510_v1 = vmul.f32 %v2508_v27, %v6948_v35  ;;  %v2511_v59 = vmul.f32 %v2507_v10, %v6968_v56 }
 0x2f7   : > { %v2515_v63 = vpop.permute.xlu0 %2514 }
 0x2f8   : > { %v5655_v0 = vpack.c.bf16 %v2510_v1, %v2494_v23  ;;  %v5653_v12 = vpack.c.bf16 %v2511_v59, %v2495_v61  ;;  %v2505_v60 = vpop.permute.xlu1 %2504 }
 0x2f9   : > { %v2506_v7 = vsel %vm806_vm6, %v2503_v22, %v2505_v60  ;;  %v2509_v4 = vsel %vm806_vm6, %v2505_v60, %v2499_v16 }
 0x2fa   : > { %5654 = vmatprep.subr.bf16.mxu0 %v5653_v12  ;;  %v2512_v2 = vmul.f32 %v2506_v7, %v6972_v57  ;;  %v2513_v3 = vmul.f32 %v2509_v4, %v6958_v54 }
 0x2fb   : > { %5656 = vmatpush1.bf16.msra.mxu0 %v5655_v0  ;;  %v2519_v5 = vpop.permute.xlu0 %2518 }
 0x2fc   : > { %v5671_v6 = vpack.c.bf16 %v2512_v2, %v2496_v51  ;;  %v2517_v13 = vpop.permute.xlu1 %2516  ;;  %v5669_v15 = vpack.c.bf16 %v2513_v3, %v2497_v55 }
 0x2fd   : > { %v2523_v22 = vsel %vm839_vm7, %v2517_v13, %v2519_v5  ;;  %v2524_v16 = vsel %vm839_vm7, %v2515_v63, %v2517_v13 }
 0x2fe   : > { %v2526_v11 = vmul.f32 %v7766_v62, %v2524_v16  ;;  %5670 = vmatprep.subr.bf16.mxu1 %v5669_v15  ;;  %v2527_v10 = vmul.f32 %v7776_v52, %v2523_v22 }
 0x2ff   : > { %5672 = vmatpush1.bf16.msra.mxu1 %v5671_v6  ;;  %v2673_v27 = vpop.permute.xlu0 %2672 }
 0x300   : > { %2546 = vmatprep.subr.mxu0 %v2527_v10  ;;  %v2521_v23 = vpop.permute.xlu1 %2520 }
 0x301   : > { %v2522_v61 = vsel %vm839_vm7, %v2519_v5, %v2521_v23  ;;  %v2525_v1 = vsel %vm839_vm7, %v2521_v23, %v2515_v63  ;;  %2547 = vmatpush1.msra.mxu0 %v2526_v11 }
 0x302   : > { %v2528_v59 = vmul.f32 %v7792_v14, %v2522_v61  ;;  %5074 = vmatmul.mubr.msk.f32.vlgmr.msra.gmra.mrb[12].mxu0 %vm864_vm8, %v7783_v48  ;;  %v2529_v20 = vmul.f32 %v7805_v47, %v2525_v1 }
 0x303   : > { %v2677_v58 = vpop.permute.xlu0 %2676  ;;  %2864 = vmatprep.mubr.f32.mxu0 %v9634_v45 }
 0x304   : > { %2617 = vmatprep.subr.mxu1 %v2529_v20  ;;  %v2675_v0 = vpop.permute.xlu1 %2674 }
 0x305   : > { %2618 = vmatpush1.msra.mxu1 %v2528_v59  ;;  %v2682_v60 = vsel %vm608_vm0, %v2673_v27, %v2675_v0  ;;  %v2681_v15 = vsel %vm608_vm0, %v2675_v0, %v2677_v58 }
 0x306   : > { %5075 = vmatmul.mubr.msk.f32.vlgmr.msra.gmra.mrb[12].mxu1 %vm864_vm8, %v7783_v48  ;;  %v2685_v55 = vmul.f32 %v2682_v60, %v6720_v30  ;;  %v2686_v1 = vmul.f32 %v2681_v15, %v6746_v39 }
 0x307   : > { %v2689_v12 = vpop.permute.xlu0 %2688  ;;  %2935 = vmatprep.mubr.f32.mxu1 %v9634_v45 }
 0x308   : > { %v2679_v63 = vpop.permute.xlu1 %2678 }
 0x309   : > { %v2680_v5 = vsel %vm608_vm0, %v2677_v58, %v2679_v63  ;;  %v2683_v6 = vsel %vm608_vm0, %v2679_v63, %v2673_v27  ;;  %vm4914_vm0 = vcmask 523264  }
 0x30a   : > { %v2684_v10 = vmul.f32 %v2683_v6, %v6730_v33  ;;  %v2687_v23 = vmul.f32 %v2680_v5, %v6738_v37 }
 0x30b   : > { %v2693_v7 = vpop.permute.xlu0 %2692 }
 0x30c   : > { %v2691_v4 = vpop.permute.xlu1 %2690 }
 0x30d   : > { %v2698_v51 = vsel %vm641_vm1, %v2689_v12, %v2691_v4  ;;  %v2697_v2 = vsel %vm641_vm1, %v2691_v4, %v2693_v7 }
 0x30e   : > { %v2701_v3 = vmul.f32 %v2698_v51, %v6724_v31  ;;  %v2702_v11 = vmul.f32 %v2697_v2, %v6756_v43 }
 0x30f   : > { %v2705_v13 = vpop.permute.xlu0 %2704 }
 0x310   : > { %v2695_v22 = vpop.permute.xlu1 %2694  ;;  %v5673_v16 = vpack.c.bf16 %v2701_v3, %v2685_v55  ;;  %v5691_v0 = vpack.c.bf16 %v2702_v11, %v2686_v1 }
 0x311   : > { %v2696_v30 = vsel %vm641_vm1, %v2693_v7, %v2695_v22  ;;  %v2699_v31 = vsel %vm641_vm1, %v2695_v22, %v2689_v12 }
 0x312   : > { %v2700_v27 = vmul.f32 %v2699_v31, %v6734_v36  ;;  %v2703_v61 = vmul.f32 %v2696_v30, %v6742_v38  ;;  %5674 = vmatprep.subr.bf16.mxu0 %v5673_v16 }
 0x313   : > { %v2709_v59 = vpop.permute.xlu0 %2708 }
 0x314   : > { %v5675_v20 = vpack.c.bf16 %v2700_v27, %v2684_v10  ;;  %v2707_v43 = vpop.permute.xlu1 %2706  ;;  %v5689_v58 = vpack.c.bf16 %v2703_v61, %v2687_v23 }
 0x315   : > { %v2714_v33 = vsel %vm674_vm2, %v2705_v13, %v2707_v43  ;;  %v2713_v2 = vsel %vm674_vm2, %v2707_v43, %v2709_v59 }
 0x316   : > { %5676 = vmatpush1.bf16.msra.mxu0 %v5675_v20  ;;  %5690 = vmatprep.subr.bf16.mxu1 %v5689_v58  ;;  %v2717_v39 = vmul.f32 %v2714_v33, %v6808_v17  ;;  %v2718_v11 = vmul.f32 %v2713_v2, %v6826_v32  ;;  %v8191_v33 = vld [vmem:[%s8178_s15 + $0x10] sm:$0xff] }
 0x317   : > { %5692 = vmatpush1.bf16.msra.mxu1 %v5691_v0  ;;  %v2721_v12 = vpop.permute.xlu0 %2720 }
 0x318   : > { %v2711_v63 = vpop.permute.xlu1 %2710 }
 0x319   : > { %v2712_v4 = vsel %vm674_vm2, %v2709_v59, %v2711_v63  ;;  %v2715_v51 = vsel %vm674_vm2, %v2711_v63, %v2705_v13 }
 0x31a   : > { %v2716_v15 = vmul.f32 %v2715_v51, %v6822_v25  ;;  %v2719_v22 = vmul.f32 %v2712_v4, %v6830_v34  ;;  %v3061_v51 = vmul.f32 %v8191_v33, %v8191_v33 }
 0x31b   : > { %v2725_v37 = vpop.permute.xlu0 %2724 }
 0x31c   : > { %v2723_v36 = vpop.permute.xlu1 %2722 }
 0x31d   : > { %v2730_v38 = vsel %vm707_vm3, %v2721_v12, %v2723_v36  ;;  %v2729_v60 = vsel %vm707_vm3, %v2723_v36, %v2725_v37 }
 0x31e   : > { %v2733_v7 = vmul.f32 %v2730_v38, %v6816_v19  ;;  %v2734_v6 = vmul.f32 %v2729_v60, %v6838_v42 }
 0x31f   : > { %v2737_v55 = vpop.permute.xlu0 %2736 }
 0x320   : > { %v2727_v3 = vpop.permute.xlu1 %2726  ;;  %v5677_v5 = vpack.c.bf16 %v2733_v7, %v2717_v39  ;;  %v5695_v23 = vpack.c.bf16 %v2734_v6, %v2718_v11  ;;  %v8200_v39 = vld [vmem:[%s8178_s15 + $0x18] sm:$0xff]  ;;  %v3087_v11 = vrot.slane %v3061_v51, 4 }
 0x321   : > { %v2728_v17 = vsel %vm707_vm3, %v2725_v37, %v2727_v3  ;;  %v2731_v19 = vsel %vm707_vm3, %v2727_v3, %v2721_v12  ;;  %v8186_v12 = vld [vmem:[%s8178_s15 + $0x8] sm:$0xff] }
 0x322   : > { %v2732_v13 = vmul.f32 %v2731_v19, %v6834_v41  ;;  %v2735_v16 = vmul.f32 %v2728_v17, %v6848_v49  ;;  %5678 = vmatprep.subr.bf16.mxu0 %v5677_v5  ;;  %v3060_v36 = vmul.f32 %v8186_v12, %v8186_v12 }
 0x323   : > { %v2741_v30 = vpop.permute.xlu0 %2740 }
 0x324   : > { %v5679_v31 = vpack.c.bf16 %v2732_v13, %v2716_v15  ;;  %v2739_v42 = vpop.permute.xlu1 %2738  ;;  %v5693_v10 = vpack.c.bf16 %v2735_v16, %v2719_v22  ;;  %v3081_v15 = vrot.slane %v3060_v36, 4  ;;  %v3062_v22 = vmul.f32 %v8200_v39, %v8200_v39 }
 0x325   : > { %v2745_v27 = vsel %vm740_vm4, %v2739_v42, %v2741_v30  ;;  %v2746_v25 = vsel %vm740_vm4, %v2737_v55, %v2739_v42 }
 0x326   : > { %v2748_v34 = vmul.f32 %v2746_v25, %v6880_v40  ;;  %v2749_v41 = vmul.f32 %v2745_v27, %v6894_v46  ;;  %5680 = vmatpush1.bf16.msra.mxu0 %v5679_v31  ;;  %5694 = vmatprep.subr.bf16.mxu1 %v5693_v10  ;;  %v3011_v27 = vld [vmem:[%s9566_s13 + $0x80] sm:$0xff]  ;;  %v3012_v25 = vld [vmem:[%s9566_s13 + $0x88] sm:$0xff] }
 0x327   : > { %5696 = vmatpush1.bf16.msra.mxu1 %v5695_v23  ;;  %v2753_v32 = vpop.permute.xlu0 %2752 }
 0x328   : > { %v5683_v49 = vpack.c.bf16 %v2748_v34, %v7824_v29  ;;  %v2743_v61 = vpop.permute.xlu1 %2742  ;;  %v5681_v1 = vpack.c.bf16 %v2749_v41, %v7850_v26  ;;  %v3082_v34 = vadd.f32 %v3081_v15, %v3060_v36  ;;  %v3093_v41 = vrot.slane %v3062_v22, 4  ;;  %v3028_v36 = vld [vmem:[%s9566_s13 + $0x108] sm:$0xff] }
 0x329   : > { %v2744_v59 = vsel %vm740_vm4, %v2741_v30, %v2743_v61  ;;  %v2747_v20 = vsel %vm740_vm4, %v2743_v61, %v2737_v55 }
 0x32a   : > { %v2750_v40 = vmul.f32 %v2744_v59, %v6898_v50  ;;  %v2751_v43 = vmul.f32 %v2747_v20, %v6884_v44  ;;  %5682 = vmatprep.subr.bf16.mxu0 %v5681_v1  ;;  %v8183_v44 = vld [vmem:[%s8178_s15] sm:$0xff]  ;;  %v3013_v59 = vld [vmem:[%s9566_s13 + $0x90] sm:$0xff]  ;;  %v3014_v20 = vld [vmem:[%s9566_s13 + $0x98] sm:$0xff] }
 0x32b   : > { %5684 = vmatpush1.bf16.msra.mxu0 %v5683_v49  ;;  %v2757_v46 = vpop.permute.xlu0 %2756  ;;  %v3059_v63 = vmul.f32 %v8183_v44, %v8183_v44 }
 0x32c   : > { %v5699_v29 = vpack.c.bf16 %v2750_v40, %v7842_v24  ;;  %v2755_v26 = vpop.permute.xlu1 %2754  ;;  %v5697_v50 = vpack.c.bf16 %v2751_v43, %v7860_v53 }
 0x32d   : > { %v2761_v24 = vsel %vm773_vm5, %v2755_v26, %v2757_v46  ;;  %v2762_v37 = vsel %vm773_vm5, %v2753_v32, %v2755_v26  ;;  %v3075_v4 = vrot.slane %v3059_v63, 4  ;;  %v3088_v26 = vadd.f32 %v3087_v11, %v3061_v51  ;;  %v3016_v51 = vld [vmem:[%s9566_s13 + $0xa8] sm:$0xff]  ;;  %v3047_v11 = vld [vmem:[%s9566_s13 + $0x1a0] sm:$0xff] }
 0x32e   : > { %5698 = vmatprep.subr.bf16.mxu1 %v5697_v50  ;;  %v2764_v55 = vmul.f32 %v2762_v37, %v6976_v28  ;;  %v2765_v2 = vmul.f32 %v2761_v24, %v6940_v9  ;;  %v8266_v37 = vpack.c.bf16 %v3014_v20, %v3013_v59  ;;  %v3050_v59 = vld [vmem:[%s9566_s13 + $0x1b8] sm:$0xff] }
 0x32f   : > { %5700 = vmatpush1.bf16.msra.mxu1 %v5699_v29  ;;  %v2769_v58 = vpop.permute.xlu0 %2768  ;;  %v3043_v29 = vld [vmem:[%s9566_s13 + $0x180] sm:$0xff] }
 0x330   : > { %v2759_v0 = vpop.permute.xlu1 %2758 }
 0x331   : > { %v2760_v6 = vsel %vm773_vm5, %v2757_v46, %v2759_v0  ;;  %v2763_v17 = vsel %vm773_vm5, %v2759_v0, %v2753_v32  ;;  %v8250_v46 = vpack.c.bf16 %v3012_v25, %v3011_v27  ;;  %v3044_v0 = vld [vmem:[%s9566_s13 + $0x188] sm:$0xff] }
 0x332   : > { %v2766_v30 = vmul.f32 %v2760_v6, %v6944_v18  ;;  %v2767_v31 = vmul.f32 %v2763_v17, %v6936_v8  ;;  %v8295_v6 = vpack.c.bf16 %v3044_v0, %v3043_v29  ;;  %v3089_v17 = vrot.slane %v3088_v26, 2  ;;  %v3003_v0 = vld [vmem:[%s9566_s13 + $0x40] sm:$0xff] }
 0x333   : > { %v2773_v53 = vpop.permute.xlu0 %2772 }
 0x334   : > { %v2771_v38 = vpop.permute.xlu1 %2770 }
 0x335   : > { %v2777_v60 = vsel %vm806_vm6, %v2771_v38, %v2773_v53  ;;  %v2778_v7 = vsel %vm806_vm6, %v2769_v58, %v2771_v38  ;;  %v3015_v38 = vld [vmem:[%s9566_s13 + $0xa0] sm:$0xff] }
 0x336   : > { %v2780_v3 = vmul.f32 %v2778_v7, %v6948_v35  ;;  %v2781_v5 = vmul.f32 %v2777_v60, %v6968_v56  ;;  %v3076_v56 = vadd.f32 %v3075_v4, %v3059_v63  ;;  %v3094_v63 = vadd.f32 %v3093_v41, %v3062_v22  ;;  %v3001_v41 = vld [vmem:[%s9566_s13 + $0x30] sm:$0xff] }
 0x337   : > { %v2785_v19 = vpop.permute.xlu0 %2784 }
 0x338   : > { %v5687_v13 = vpack.c.bf16 %v2780_v3, %v2764_v55  ;;  %v2775_v16 = vpop.permute.xlu1 %2774  ;;  %v5685_v28 = vpack.c.bf16 %v2781_v5, %v2765_v2  ;;  %v3077_v1 = vrot.slane %v3076_v56, 2  ;;  %v3045_v55 = vld [vmem:[%s9566_s13 + $0x190] sm:$0xff]  ;;  %v3046_v2 = vld [vmem:[%s9566_s13 + $0x198] sm:$0xff] }
 0x339   : > { %v2776_v9 = vsel %vm806_vm6, %v2773_v53, %v2775_v16  ;;  %v2779_v35 = vsel %vm806_vm6, %v2775_v16, %v2769_v58  ;;  %v3083_v58 = vrot.slane %v3082_v34, 2  ;;  %v3027_v53 = vld [vmem:[%s9566_s13 + $0x100] sm:$0xff]  ;;  %v8311_v16 = vpack.c.bf16 %v3046_v2, %v3045_v55 }
 0x33a   : > { %v2782_v42 = vmul.f32 %v2776_v9, %v6972_v57  ;;  %v2783_v10 = vmul.f32 %v2779_v35, %v6958_v54  ;;  %5686 = vmatprep.subr.bf16.mxu0 %v5685_v28  ;;  %v2995_v54 = vld [vmem:[%s9566_s13] sm:$0xff]  ;;  %v2996_v57 = vld [vmem:[%s9566_s13 + $0x8] sm:$0xff]  ;;  %v3078_v4 = vadd.f32 %v3077_v1, %v3076_v56  ;;  %v8300_v22 = vpack.c.bf16 %v3028_v36, %v3027_v53  ;;  %v3029_v28 = vld [vmem:[%s9566_s13 + $0x110] sm:$0xff] }
 0x33b   : > { %5688 = vmatpush1.bf16.msra.mxu0 %v5687_v13  ;;  %v2789_v23 = vpop.permute.xlu0 %2788  ;;  %v8255_v50 = vpack.c.bf16 %v2996_v57, %v2995_v54  ;;  %v3095_v13 = vrot.slane %v3094_v63, 2  ;;  %v3030_v9 = vld [vmem:[%s9566_s13 + $0x118] sm:$0xff]  ;;  %v3017_v35 = vld [vmem:[%s9566_s13 + $0xb0] sm:$0xff]  ;;  %v3031_v54 = vld [vmem:[%s9566_s13 + $0x120] sm:$0xff] }
 0x33c   : > { %v5703_v18 = vpack.c.bf16 %v2782_v42, %v2766_v30  ;;  %v2787_v32 = vpop.permute.xlu1 %2786  ;;  %v5701_v8 = vpack.c.bf16 %v2783_v10, %v2767_v31  ;;  %v3018_v56 = vld [vmem:[%s9566_s13 + $0xb8] sm:$0xff]  ;;  %v3048_v30 = vld [vmem:[%s9566_s13 + $0x1a8] sm:$0xff]  ;;  %v6360_v31 = vld [vmem:[%s9558_s5] sm:$0xff]  ;;  %v3079_v42 = vrot.slane %v3078_v4, 1  ;;  %v3090_v10 = vadd.f32 %v3089_v17, %v3088_v26 }
 0x33d   : > { %v2793_v49 = vsel %vm839_vm7, %v2787_v32, %v2789_v23  ;;  %v2794_v61 = vsel %vm839_vm7, %v2785_v19, %v2787_v32  ;;  %v3096_v27 = vadd.f32 %v3095_v13, %v3094_v63  ;;  %v8350_v32 = vpack.c.bf16 %v3018_v56, %v3017_v35  ;;  %v3032_v57 = vld [vmem:[%s9566_s13 + $0x128] sm:$0xff]  ;;  %v3049_v1 = vld [vmem:[%s9566_s13 + $0x1b0] sm:$0xff]  ;;  %v3034_v53 = vld [vmem:[%s9566_s13 + $0x138] sm:$0xff] }
 0x33e   : > { %v2796_v40 = vmul.f32 %v7766_v62, %v2794_v61  ;;  %5702 = vmatprep.subr.bf16.mxu1 %v5701_v8  ;;  %v2797_v43 = vmul.f32 %v7776_v52, %v2793_v49  ;;  %v2997_v62 = vld [vmem:[%s9566_s13 + $0x10] sm:$0xff]  ;;  %v2998_v52 = vld [vmem:[%s9566_s13 + $0x18] sm:$0xff]  ;;  %v8352_v8 = vpack.c.bf16 %v3048_v30, %v3047_v11  ;;  %v3019_v49 = vld [vmem:[%s9566_s13 + $0xc0] sm:$0xff]  ;;  %v3080_v20 = vadd.f32 %v3079_v42, %v3078_v4 }
 0x33f   : > { %5704 = vmatpush1.bf16.msra.mxu1 %v5703_v18  ;;  %v8298_v15 = vpack.c.bf16 %v2998_v52, %v2997_v62  ;;  %v3002_v18 = vld [vmem:[%s9566_s13 + $0x38] sm:$0xff]  ;;  %v3020_v61 = vld [vmem:[%s9566_s13 + $0xc8] sm:$0xff]  ;;  %v3097_v29 = vrot.slane %v3096_v27, 1  ;;  %v8388_v63 = vpack.c.bf16 %v3050_v59, %v3049_v1  ;;  %v3021_v36 = vld [vmem:[%s9566_s13 + $0xd0] sm:$0xff] }
 0x340   : > { %2816 = vmatprep.subr.mxu0 %v2797_v43  ;;  %v2791_v24 = vpop.permute.xlu1 %2790  ;;  %v8374_v26 = vpack.c.bf16 %v3002_v18, %v3001_v41  ;;  %v3004_v62 = vld [vmem:[%s9566_s13 + $0x48] sm:$0xff]  ;;  %v8386_v52 = vpack.c.bf16 %v3020_v61, %v3019_v49  ;;  %v3171_v4 = vmax.f32 %v3080_v20, 1e-24  ;;  %v3005_v17 = vld [vmem:[%s9566_s13 + $0x50] sm:$0xff]  ;;  %v3054_v11 = vld [vmem:[%s9566_s13 + $0x1d8] sm:$0xff] }
 0x341   : > { %v2792_v60 = vsel %vm839_vm7, %v2789_v23, %v2791_v24  ;;  %v2795_v7 = vsel %vm839_vm7, %v2791_v24, %v2785_v19  ;;  %2817 = vmatpush1.msra.mxu0 %v2796_v40  ;;  %v3084_v19 = vadd.f32 %v3083_v58, %v3082_v34  ;;  %v8340_v34 = vpack.c.bf16 %v3030_v9, %v3029_v28  ;;  %v3033_v24 = vld [vmem:[%s9566_s13 + $0x130] sm:$0xff]  ;;  %v3036_v28 = vld [vmem:[%s9566_s13 + $0x148] sm:$0xff]  ;;  %v3023_v9 = vld [vmem:[%s9566_s13 + $0xe0] sm:$0xff] }
 0x342   : > { %v2798_v3 = vmul.f32 %v7792_v14, %v2792_v60  ;;  %5076 = vmatmul.mubr.msk.f32.vlgmr.msra.gmra.mrb[14].mxu0 %vm864_vm8, %v7783_v48  ;;  %v2799_v5 = vmul.f32 %v7805_v47, %v2795_v7  ;;  %5706 = vmatprep.subr.bf16.mxu0 %v8250_v46  ;;  %v2999_v14 = vld [vmem:[%s9566_s13 + $0x20] sm:$0xff]  ;;  %v3000_v48 = vld [vmem:[%s9566_s13 + $0x28] sm:$0xff]  ;;  %v8309_v47 = vpack.c.bf16 %v3016_v51, %v3015_v38  ;;  %v3091_v40 = vrot.slane %v3090_v10, 1  ;;  %v3022_v38 = vld [vmem:[%s9566_s13 + $0xd8] sm:$0xff] }
 0x343   : > { %5708 = vmatpush3.bf16.msra.mxu0 %v8255_v50  ;;  %v3085_v23 = vrot.slane %v3084_v19, 1  ;;  %v8338_v25 = vpack.c.bf16 %v3000_v48, %v2999_v14  ;;  %v8376_v58 = vpack.c.bf16 %v3032_v57, %v3031_v54  ;;  %v3051_v60 = vld [vmem:[%s9566_s13 + $0x1c0] sm:$0xff]  ;;  %v3052_v7 = vld [vmem:[%s9566_s13 + $0x1c8] sm:$0xff]  ;;  %v3098_v2 = vadd.f32 %v3097_v29, %v3096_v27  ;;  %v3053_v56 = vld [vmem:[%s9566_s13 + $0x1d0] sm:$0xff] }
 0x344   : > { %2887 = vmatprep.subr.mxu1 %v2799_v5  ;;  %5710 = vmatprep.subr.bf16.mxu0 %v8266_v37  ;;  %v3092_v51 = vadd.f32 %v3091_v40, %v3090_v10  ;;  %v8412_v5 = vpack.c.bf16 %v3034_v53, %v3033_v24  ;;  %v8422_v13 = vpack.c.bf16 %v3022_v38, %v3021_v36  ;;  %v3035_v48 = vld [vmem:[%s9566_s13 + $0x140] sm:$0xff]  ;;  %v3024_v35 = vld [vmem:[%s9566_s13 + $0xe8] sm:$0xff]  ;;  %6204 = vrsqrt.f32 %v3171_v4  ;;  %v3037_v54 = vld [vmem:[%s9566_s13 + $0x150] sm:$0xff] }
 0x345   : > { %2888 = vmatpush1.msra.mxu1 %v2798_v3  ;;  %v3086_v43 = vadd.f32 %v3085_v23, %v3084_v19  ;;  %v8410_v3 = vpack.c.bf16 %v3004_v62, %v3003_v0  ;;  %v3006_v19 = vld [vmem:[%s9566_s13 + $0x58] sm:$0xff]  ;;  %v8424_v14 = vpack.c.bf16 %v3052_v7, %v3051_v60  ;;  %v8448_v10 = vpack.c.bf16 %v3036_v28, %v3035_v48  ;;  %v3007_v23 = vld [vmem:[%s9566_s13 + $0x60] sm:$0xff]  ;;  %v3008_v27 = vld [vmem:[%s9566_s13 + $0x68] sm:$0xff] }
 0x346   : > { %5077 = vmatmul.mubr.msk.f32.vlgmr.msra.gmra.mrb[14].mxu1 %vm864_vm8, %v6360_v31  ;;  %5738 = vmatprep.subr.bf16.mxu1 %v8295_v6  ;;  %v3173_v30 = vmax.f32 %v3092_v51, 1e-24  ;;  %v3174_v31 = vmax.f32 %v3098_v2, 1e-24  ;;  %v8446_v42 = vpack.c.bf16 %v3006_v19, %v3005_v17  ;;  %v8458_v41 = vpack.c.bf16 %v3024_v35, %v3023_v9  ;;  %v3038_v57 = vld [vmem:[%s9566_s13 + $0x158] sm:$0xff]  ;;  %v3025_v49 = vld [vmem:[%s9566_s13 + $0xf0] sm:$0xff] }
 0x347   : > { %5712 = vmatpush3.bf16.msra.mxu0 %v8298_v15  ;;  %5740 = vmatpush3.bf16.msra.mxu1 %v8300_v22  ;;  %v3172_v55 = vmax.f32 %v3086_v43, 1e-24  ;;  %v8460_v18 = vpack.c.bf16 %v3054_v11, %v3053_v56  ;;  %v3026_v59 = vld [vmem:[%s9566_s13 + $0xf8] sm:$0xff]  ;;  %v3055_v20 = vld [vmem:[%s9566_s13 + $0x1e0] sm:$0xff]  ;;  %v3056_v40 = vld [vmem:[%s9566_s13 + $0x1e8] sm:$0xff]  ;;  %v8486_v62 = vpack.c.bf16 %v3008_v27, %v3007_v23  ;;  %v8488_v24 = vpack.c.bf16 %v3038_v57, %v3037_v54 }
 0x348   : > { %5714 = vmatprep.subr.bf16.mxu0 %v8309_v47  ;;  %5742 = vmatprep.subr.bf16.mxu1 %v8311_v16  ;;  %v3009_v53 = vld [vmem:[%s9566_s13 + $0x70] sm:$0xff]  ;;  %v8495_v36 = vpack.c.bf16 %v3026_v59, %v3025_v49  ;;  %v8497_v38 = vpack.c.bf16 %v3056_v40, %v3055_v20  ;;  %v3010_v60 = vld [vmem:[%s9566_s13 + $0x78] sm:$0xff]  ;;  %v3039_v7 = vld [vmem:[%s9566_s13 + $0x160] sm:$0xff] }
 0x349   : > { %6206 = vrsqrt.f32 %v3172_v55  ;;  %v3040_v4 = vld [vmem:[%s9566_s13 + $0x168] sm:$0xff]  ;;  %v3057_v55 = vld [vmem:[%s9566_s13 + $0x1f0] sm:$0xff]  ;;  %v3058_v2 = vld [vmem:[%s9566_s13 + $0x1f8] sm:$0xff]  ;;  %v8518_v28 = vpack.c.bf16 %v3010_v60, %v3009_v53 }
 0x34a   : > { %6208 = vrsqrt.f32 %v3173_v30  ;;  %v8520_v9 = vpack.c.bf16 %v3040_v4, %v3039_v7  ;;  %v8524_v56 = vpack.c.bf16 %v3058_v2, %v3057_v55  ;;  %v3041_v11 = vld [vmem:[%s9566_s13 + $0x170] sm:$0xff]  ;;  %v3042_v30 = vld [vmem:[%s9566_s13 + $0x178] sm:$0xff]  ;;  %v8545_v60 = vld [vmem:[%s8178_s15 + $0x20] sm:$0xff] }
 0x34b   : > { %5716 = vmatpush3.bf16.msra.mxu0 %v8338_v25  ;;  %5744 = vmatpush3.bf16.msra.mxu1 %v8340_v34  ;;  %6210 = vrsqrt.f32 %v3174_v31  ;;  %v8535_v27 = vpack.c.bf16 %v3042_v30, %v3041_v11  ;;  %v8555_v55 = vld [vmem:[%s8178_s15 + $0x30] sm:$0xff]  ;;  %v8559_v2 = vld [vmem:[%s8178_s15 + $0x38] sm:$0xff] }
 0x34c   : > { %5718 = vmatprep.subr.bf16.mxu0 %v8350_v32  ;;  %5746 = vmatprep.subr.bf16.mxu1 %v8352_v8  ;;  %v8471_v61 = vpop.permute.xlu0 %2944  ;;  %v3066_v30 = vmul.f32 %v8559_v2, %v8559_v2 }
 0x34e   : > { %v6205_v35 = vpop.eup %6204 }
 0x34f   : > { %5720 = vmatpush3.bf16.msra.mxu0 %v8374_v26  ;;  %5748 = vmatpush3.bf16.msra.mxu1 %v8376_v58  ;;  %v3203_v23 = vmul.f32 %v6205_v35, %v8183_v44  ;;  %v3065_v35 = vmul.f32 %v8555_v55, %v8555_v55 }
 0x350   : > { %5722 = vmatprep.subr.bf16.mxu0 %v8386_v52  ;;  %5750 = vmatprep.subr.bf16.mxu1 %v8388_v63 }
 0x353   : > { %5724 = vmatpush3.bf16.msra.mxu0 %v8410_v3  ;;  %5752 = vmatpush3.bf16.msra.mxu1 %v8412_v5  ;;  %v6207_v31 = vpop.eup %6206 }
 0x354   : > { %5726 = vmatprep.subr.bf16.mxu0 %v8422_v13  ;;  %5754 = vmatprep.subr.bf16.mxu1 %v8424_v14  ;;  %v6209_v54 = vpop.eup %6208  ;;  %v3204_v57 = vmul.f32 %v6207_v31, %v8186_v12 }
 0x355   : > { %v2056_v1 = vpop.f32.mrb[8].mxu0  ;;  %v6211_v49 = vpop.eup %6210  ;;  %v3205_v44 = vmul.f32 %v6209_v54, %v8191_v33  ;;  %v8548_v33 = vld [vmem:[%s8178_s15 + $0x28] sm:$0xff] }
 0x356   : > { %v2947_v43 = vadd.f32 %v8471_v61, %v2056_v1  ;;  %v2058_v29 = vpop.f32.mrb[9].mxu0 }
 0x357   : > { %v2948_v0 = vadd.f32 %v8471_v61, %v2058_v29  ;;  %5728 = vmatpush3.bf16.msra.mxu0 %v8446_v42  ;;  %5756 = vmatpush3.bf16.msra.mxu1 %v8448_v10 }
 0x358   : > { %6212 = vtanh.f32 %v2947_v43  ;;  %5730 = vmatprep.subr.bf16.mxu0 %v8458_v41  ;;  %5758 = vmatprep.subr.bf16.mxu1 %v8460_v18  ;;  %v3206_v43 = vmul.f32 %v6211_v49, %v8200_v39  ;;  %v3063_v39 = vmul.f32 %v8545_v60, %v8545_v60 }
 0x359   : > { %6214 = vtanh.f32 %v2948_v0  ;;  %v2127_v51 = vpop.f32.mrb[8].mxu1 }
 0x35a   : > { %v2949_v17 = vadd.f32 %v8471_v61, %v2127_v51  ;;  %v2129_v19 = vpop.f32.mrb[9].mxu1  ;;  %v3064_v51 = vmul.f32 %v8548_v33, %v8548_v33 }
 0x35b   : > { %v2950_v48 = vadd.f32 %v8471_v61, %v2129_v19  ;;  %5732 = vmatpush3.bf16.msra.mxu0 %v8486_v62  ;;  %5760 = vmatpush3.bf16.msra.mxu1 %v8488_v24 }
 0x35c   : > { %6216 = vtanh.f32 %v2949_v17  ;;  %5734 = vmatprep.subr.bf16.mxu0 %v8495_v36  ;;  %5762 = vmatprep.subr.bf16.mxu1 %v8497_v38  ;;  %v3105_v11 = vrot.slane %v3064_v51, 4 }
 0x35d   : > { %6218 = vtanh.f32 %v2950_v48  ;;  %v3099_v48 = vrot.slane %v3063_v39, 4 }
 0x35e   : > { %v3106_v54 = vadd.f32 %v3105_v11, %v3064_v51 }
 0x35f   : > { %5736 = vmatpush3.bf16.msra.mxu0 %v8518_v28  ;;  %5764 = vmatpush3.bf16.msra.mxu1 %v8520_v9  ;;  %v3100_v31 = vadd.f32 %v3099_v48, %v3063_v39 }
 0x360   : > { %5766 = vmatprep.subr.bf16.mxu1 %v8524_v56  ;;  %5770 = vmatprep.subr.bf16.mxu0 %v8250_v46 }
 0x361   : > { %v3101_v49 = vrot.slane %v3100_v31, 2 }
 0x362   : > { %v6213_v1 = vpop.eup %6212 }
 0x363   : > { %v6215_v59 = vpop.eup %6214  ;;  %v3219_v20 = vmul.f32 %v6213_v1, %v3203_v23  ;;  %5768 = vmatpush3.bf16.msra.mxu1 %v8535_v27  ;;  %v3111_v23 = vrot.slane %v3065_v35, 4 }
 0x364   : > { %v3220_v40 = vmul.f32 %v6215_v59, %v3204_v57  ;;  %5802 = vmatprep.subr.bf16.mxu1 %v8295_v6  ;;  %v3117_v57 = vrot.slane %v3066_v30, 4  ;;  %v3107_v59 = vrot.slane %v3106_v54, 2 }
 0x365   : > { %v3112_v1 = vadd.f32 %v3111_v23, %v3065_v35 }
 0x366   : > { %v6217_v12 = vpop.eup %6216  ;;  %6220 = vtanh.f32 %v3220_v40 }
 0x367   : > { %v6219_v29 = vpop.eup %6218  ;;  %6222 = vtanh.f32 %v3219_v20  ;;  %v3221_v0 = vmul.f32 %v6217_v12, %v3205_v44  ;;  %v3118_v20 = vadd.f32 %v3117_v57, %v3066_v30  ;;  %v3102_v44 = vadd.f32 %v3101_v49, %v3100_v31 }
 0x368   : > { %v3222_v53 = vmul.f32 %v6219_v29, %v3206_v43  ;;  %v3113_v40 = vrot.slane %v3112_v1, 2  ;;  %v3108_v43 = vadd.f32 %v3107_v59, %v3106_v54 }
 0x369   : > { %v3119_v12 = vrot.slane %v3118_v20, 2  ;;  %v3103_v29 = vrot.slane %v3102_v44, 1 }
 0x36a   : > { %6224 = vtanh.f32 %v3222_v53  ;;  %v3109_v53 = vrot.slane %v3108_v43, 1 }
 0x36b   : > { %6226 = vtanh.f32 %v3221_v0  ;;  %v3114_v0 = vadd.f32 %v3113_v40, %v3112_v1 }
 0x36c   : > { %v3110_v51 = vadd.f32 %v3109_v53, %v3108_v43 }
 0x36d   : > { %v3115_v39 = vrot.slane %v3114_v0, 1 }
 0x36e   : > { %v3176_v35 = vmax.f32 %v3110_v51, 1e-24 }
 0x36f   : > { %v3116_v48 = vadd.f32 %v3115_v39, %v3114_v0 }
 0x370   : > { %v6221_v7 = vpop.eup %6220 }
 0x371   : > { %v6223_v4 = vpop.eup %6222  ;;  %3315 = vmatprep.mubr.f32.mxu0 %v6221_v7  ;;  %v3120_v7 = vadd.f32 %v3119_v12, %v3118_v20  ;;  %v3177_v30 = vmax.f32 %v3116_v48, 1e-24 }
 0x372   : > { %3316 = vmatmul.mubr.f32.vlgmr.msra.gmra.mrb[16].mxu0 %v6223_v4  ;;  %v3104_v4 = vadd.f32 %v3103_v29, %v3102_v44 }
 0x373   : > { %5772 = vmatpush3.bf16.msra.mxu0 %v8255_v50 }
 0x374   : > { %v6225_v17 = vpop.eup %6224  ;;  %5774 = vmatprep.subr.bf16.mxu0 %v8266_v37 }
 0x375   : > { %v6227_v19 = vpop.eup %6226  ;;  %3385 = vmatprep.mubr.f32.mxu1 %v6225_v17  ;;  %v3121_v17 = vrot.slane %v3120_v7, 1 }
 0x376   : > { %3386 = vmatmul.mubr.f32.vlgmr.msra.gmra.mrb[16].mxu1 %v6227_v19  ;;  %v3175_v19 = vmax.f32 %v3104_v4, 1e-24 }
 0x377   : > { %5776 = vmatpush3.bf16.msra.mxu0 %v8298_v15  ;;  %5804 = vmatpush3.bf16.msra.mxu1 %v8300_v22  ;;  %v3122_v11 = vadd.f32 %v3121_v17, %v3120_v7 }
 0x378   : > { %5778 = vmatprep.subr.bf16.mxu0 %v8309_v47  ;;  %5806 = vmatprep.subr.bf16.mxu1 %v8311_v16  ;;  %6228 = vrsqrt.f32 %v3175_v19 }
 0x379   : > { %6230 = vrsqrt.f32 %v3176_v35  ;;  %v3178_v31 = vmax.f32 %v3122_v11, 1e-24 }
 0x37a   : > { %6232 = vrsqrt.f32 %v3177_v30  ;;  %v8605_v30 = vld [vmem:[%s8178_s15 + $0x40] sm:$0xff] }
 0x37b   : > { %5780 = vmatpush3.bf16.msra.mxu0 %v8338_v25  ;;  %5808 = vmatpush3.bf16.msra.mxu1 %v8340_v34  ;;  %6234 = vrsqrt.f32 %v3178_v31 }
 0x37c   : > { %5782 = vmatprep.subr.bf16.mxu0 %v8350_v32  ;;  %5810 = vmatprep.subr.bf16.mxu1 %v8352_v8 }
 0x37f   : > { %5784 = vmatpush3.bf16.msra.mxu0 %v8374_v26  ;;  %5812 = vmatpush3.bf16.msra.mxu1 %v8376_v58 }
 0x380   : > { %5786 = vmatprep.subr.bf16.mxu0 %v8386_v52  ;;  %5814 = vmatprep.subr.bf16.mxu1 %v8388_v63 }
 0x382   : > { %v6229_v40 = vpop.eup %6228 }
 0x383   : > { %5788 = vmatpush3.bf16.msra.mxu0 %v8410_v3  ;;  %5816 = vmatpush3.bf16.msra.mxu1 %v8412_v5  ;;  %v6231_v43 = vpop.eup %6230  ;;  %v3207_v12 = vmul.f32 %v6229_v40, %v8545_v60 }
 0x384   : > { %5790 = vmatprep.subr.bf16.mxu0 %v8422_v13  ;;  %5818 = vmatprep.subr.bf16.mxu1 %v8424_v14  ;;  %v6233_v29 = vpop.eup %6232  ;;  %v3208_v0 = vmul.f32 %v6231_v43, %v8548_v33 }
 0x385   : > { %v6235_v53 = vpop.eup %6234  ;;  %v3209_v51 = vmul.f32 %v6233_v29, %v8555_v55  ;;  %v3067_v55 = vmul.f32 %v8605_v30, %v8605_v30 }
 0x386   : > { %v3210_v19 = vmul.f32 %v6235_v53, %v8559_v2 }
 0x387   : > { %5792 = vmatpush3.bf16.msra.mxu0 %v8446_v42  ;;  %5820 = vmatpush3.bf16.msra.mxu1 %v8448_v10 }
 0x388   : > { %5794 = vmatprep.subr.bf16.mxu0 %v8458_v41  ;;  %5822 = vmatprep.subr.bf16.mxu1 %v8460_v18 }
 0x38b   : > { %5796 = vmatpush3.bf16.msra.mxu0 %v8486_v62  ;;  %5824 = vmatpush3.bf16.msra.mxu1 %v8488_v24 }
 0x38c   : > { %5798 = vmatprep.subr.bf16.mxu0 %v8495_v36  ;;  %5826 = vmatprep.subr.bf16.mxu1 %v8497_v38 }
 0x38f   : > { %5800 = vmatpush3.bf16.msra.mxu0 %v8518_v28  ;;  %5828 = vmatpush3.bf16.msra.mxu1 %v8520_v9 }
 0x390   : > { %5830 = vmatprep.subr.bf16.mxu1 %v8524_v56  ;;  %5834 = vmatprep.subr.bf16.mxu0 %v8250_v46 }
 0x393   : > { %5832 = vmatpush3.bf16.msra.mxu1 %v8535_v27 }
 0x394   : > { %5866 = vmatprep.subr.bf16.mxu1 %v8295_v6 }
 0x395   : > { %v2326_v23 = vpop.f32.mrb[10].mxu0 }
 0x396   : > { %v2951_v54 = vadd.f32 %v8471_v61, %v2326_v23  ;;  %v2328_v57 = vpop.f32.mrb[11].mxu0  ;;  %v8608_v23 = vld [vmem:[%s8178_s15 + $0x48] sm:$0xff] }
 0x397   : > { %v2952_v49 = vadd.f32 %v8471_v61, %v2328_v57  ;;  %v8617_v57 = vld [vmem:[%s8178_s15 + $0x50] sm:$0xff] }
 0x398   : > { %6236 = vtanh.f32 %v2951_v54  ;;  %v3068_v54 = vmul.f32 %v8608_v23, %v8608_v23 }
 0x399   : > { %6238 = vtanh.f32 %v2952_v49  ;;  %v2397_v1 = vpop.f32.mrb[10].mxu1 }
 0x39a   : > { %v2953_v59 = vadd.f32 %v8471_v61, %v2397_v1  ;;  %v2399_v20 = vpop.f32.mrb[11].mxu1  ;;  %v8620_v1 = vld [vmem:[%s8178_s15 + $0x58] sm:$0xff] }
 0x39b   : > { %v2954_v44 = vadd.f32 %v8471_v61, %v2399_v20  ;;  %v3069_v20 = vmul.f32 %v8617_v57, %v8617_v57  ;;  %v3070_v40 = vmul.f32 %v8620_v1, %v8620_v1 }
 0x39c   : > { %6240 = vtanh.f32 %v2953_v59  ;;  %v3123_v59 = vrot.slane %v3067_v55, 4 }
 0x39d   : > { %6242 = vtanh.f32 %v2954_v44  ;;  %v3129_v44 = vrot.slane %v3068_v54, 4 }
 0x39e   : > { %v3124_v43 = vadd.f32 %v3123_v59, %v3067_v55 }
 0x39f   : > { %v3130_v29 = vadd.f32 %v3129_v44, %v3068_v54 }
 0x3a0   : > { %v3125_v53 = vrot.slane %v3124_v43, 2 }
 0x3a2   : > { %v6237_v7 = vpop.eup %6236 }
 0x3a3   : > { %v6239_v4 = vpop.eup %6238  ;;  %v3223_v39 = vmul.f32 %v6237_v7, %v3207_v12  ;;  %v3135_v12 = vrot.slane %v3069_v20, 4 }
 0x3a4   : > { %v3224_v17 = vmul.f32 %v6239_v4, %v3208_v0  ;;  %v3141_v0 = vrot.slane %v3070_v40, 4  ;;  %v3131_v4 = vrot.slane %v3130_v29, 2 }
 0x3a5   : > { %v3136_v7 = vadd.f32 %v3135_v12, %v3069_v20 }
 0x3a6   : > { %v6241_v48 = vpop.eup %6240  ;;  %6244 = vtanh.f32 %v3224_v17 }
 0x3a7   : > { %v6243_v35 = vpop.eup %6242  ;;  %6246 = vtanh.f32 %v3223_v39  ;;  %v3225_v60 = vmul.f32 %v6241_v48, %v3209_v51  ;;  %v3142_v39 = vadd.f32 %v3141_v0, %v3070_v40  ;;  %v3126_v51 = vadd.f32 %v3125_v53, %v3124_v43 }
 0x3a8   : > { %v3226_v11 = vmul.f32 %v6243_v35, %v3210_v19  ;;  %v3137_v17 = vrot.slane %v3136_v7, 2  ;;  %v3132_v19 = vadd.f32 %v3131_v4, %v3130_v29 }
 0x3a9   : > { %v3143_v48 = vrot.slane %v3142_v39, 2  ;;  %v3127_v35 = vrot.slane %v3126_v51, 1 }
 0x3aa   : > { %6248 = vtanh.f32 %v3226_v11  ;;  %v3133_v11 = vrot.slane %v3132_v19, 1 }
 0x3ab   : > { %6250 = vtanh.f32 %v3225_v60  ;;  %v3138_v60 = vadd.f32 %v3137_v17, %v3136_v7 }
 0x3ad   : > { %v3139_v55 = vrot.slane %v3138_v60, 1 }
 0x3af   : > { %v3140_v59 = vadd.f32 %v3139_v55, %v3138_v60 }
 0x3b0   : > { %v6245_v33 = vpop.eup %6244 }
 0x3b1   : > { %v6247_v31 = vpop.eup %6246  ;;  %3455 = vmatprep.mubr.f32.mxu0 %v6245_v33  ;;  %v3144_v33 = vadd.f32 %v3143_v48, %v3142_v39  ;;  %v3181_v40 = vmax.f32 %v3140_v59, 1e-24 }
 0x3b2   : > { %3456 = vmatmul.mubr.f32.vlgmr.msra.gmra.mrb[18].mxu0 %v6247_v31  ;;  %v3128_v31 = vadd.f32 %v3127_v35, %v3126_v51 }
 0x3b3   : > { %5836 = vmatpush3.bf16.msra.mxu0 %v8255_v50  ;;  %v3145_v54 = vrot.slane %v3144_v33, 1 }
 0x3b4   : > { %v6249_v2 = vpop.eup %6248  ;;  %5838 = vmatprep.subr.bf16.mxu0 %v8266_v37 }
 0x3b5   : > { %v6251_v49 = vpop.eup %6250  ;;  %3525 = vmatprep.mubr.f32.mxu1 %v6249_v2  ;;  %v3134_v2 = vadd.f32 %v3133_v11, %v3132_v19  ;;  %v3146_v44 = vadd.f32 %v3145_v54, %v3144_v33 }
 0x3b6   : > { %3526 = vmatmul.mubr.f32.vlgmr.msra.gmra.mrb[18].mxu1 %v6251_v49  ;;  %v3179_v49 = vmax.f32 %v3128_v31, 1e-24 }
 0x3b7   : > { %5840 = vmatpush3.bf16.msra.mxu0 %v8298_v15  ;;  %5868 = vmatpush3.bf16.msra.mxu1 %v8300_v22  ;;  %v3180_v20 = vmax.f32 %v3134_v2, 1e-24  ;;  %v3182_v43 = vmax.f32 %v3146_v44, 1e-24  ;;  %v8668_v44 = vld [vmem:[%s8178_s15 + $0x68] sm:$0xff] }
 0x3b8   : > { %5842 = vmatprep.subr.bf16.mxu0 %v8309_v47  ;;  %5870 = vmatprep.subr.bf16.mxu1 %v8311_v16  ;;  %6252 = vrsqrt.f32 %v3179_v49 }
 0x3b9   : > { %6254 = vrsqrt.f32 %v3180_v20 }
 0x3ba   : > { %6256 = vrsqrt.f32 %v3181_v40 }
 0x3bb   : > { %5844 = vmatpush3.bf16.msra.mxu0 %v8338_v25  ;;  %5872 = vmatpush3.bf16.msra.mxu1 %v8340_v34  ;;  %6258 = vrsqrt.f32 %v3182_v43  ;;  %v8676_v43 = vld [vmem:[%s8178_s15 + $0x70] sm:$0xff] }
 0x3bc   : > { %5846 = vmatprep.subr.bf16.mxu0 %v8350_v32  ;;  %5874 = vmatprep.subr.bf16.mxu1 %v8352_v8 }
 0x3bf   : > { %5848 = vmatpush3.bf16.msra.mxu0 %v8374_v26  ;;  %5876 = vmatpush3.bf16.msra.mxu1 %v8376_v58 }
 0x3c0   : > { %5850 = vmatprep.subr.bf16.mxu0 %v8386_v52  ;;  %5878 = vmatprep.subr.bf16.mxu1 %v8388_v63 }
 0x3c2   : > { %v6253_v51 = vpop.eup %6252 }
 0x3c3   : > { %5852 = vmatpush3.bf16.msra.mxu0 %v8410_v3  ;;  %5880 = vmatpush3.bf16.msra.mxu1 %v8412_v5  ;;  %v6255_v17 = vpop.eup %6254 }
 0x3c4   : > { %5854 = vmatprep.subr.bf16.mxu0 %v8422_v13  ;;  %5882 = vmatprep.subr.bf16.mxu1 %v8424_v14  ;;  %v6257_v19 = vpop.eup %6256  ;;  %v3212_v48 = vmul.f32 %v6255_v17, %v8608_v23  ;;  %v8665_v23 = vld [vmem:[%s8178_s15 + $0x60] sm:$0xff] }
 0x3c5   : > { %v6259_v35 = vpop.eup %6258  ;;  %v3213_v31 = vmul.f32 %v6257_v19, %v8617_v57  ;;  %v3071_v57 = vmul.f32 %v8665_v23, %v8665_v23 }
 0x3c6   : > { %v3214_v2 = vmul.f32 %v6259_v35, %v8620_v1  ;;  %v3072_v1 = vmul.f32 %v8668_v44, %v8668_v44 }
 0x3c7   : > { %5856 = vmatpush3.bf16.msra.mxu0 %v8446_v42  ;;  %5884 = vmatpush3.bf16.msra.mxu1 %v8448_v10 }
 0x3c8   : > { %5858 = vmatprep.subr.bf16.mxu0 %v8458_v41  ;;  %5886 = vmatprep.subr.bf16.mxu1 %v8460_v18 }
 0x3cb   : > { %5860 = vmatpush3.bf16.msra.mxu0 %v8486_v62  ;;  %5888 = vmatpush3.bf16.msra.mxu1 %v8488_v24 }
 0x3cc   : > { %5862 = vmatprep.subr.bf16.mxu0 %v8495_v36  ;;  %5890 = vmatprep.subr.bf16.mxu1 %v8497_v38 }
 0x3cf   : > { %5864 = vmatpush3.bf16.msra.mxu0 %v8518_v28  ;;  %5892 = vmatpush3.bf16.msra.mxu1 %v8520_v9 }
 0x3d0   : > { %5894 = vmatprep.subr.bf16.mxu1 %v8524_v56  ;;  %5898 = vmatprep.subr.bf16.mxu0 %v8250_v46 }
 0x3d3   : > { %5896 = vmatpush3.bf16.msra.mxu1 %v8535_v27 }
 0x3d4   : > { %5930 = vmatprep.subr.bf16.mxu1 %v8295_v6  ;;  %v3211_v6 = vmul.f32 %v6253_v51, %v8605_v30 }
 0x3d5   : > { %v2596_v12 = vpop.f32.mrb[12].mxu0 }
 0x3d6   : > { %v2955_v29 = vadd.f32 %v8471_v61, %v2596_v12  ;;  %v2598_v0 = vpop.f32.mrb[13].mxu0 }
 0x3d7   : > { %v2956_v53 = vadd.f32 %v8471_v61, %v2598_v0 }
 0x3d8   : > { %6260 = vtanh.f32 %v2955_v29  ;;  %v8680_v29 = vld [vmem:[%s8178_s15 + $0x78] sm:$0xff]  ;;  %s6395_s15 = smov 9  }
 0x3d9   : > { %6262 = vtanh.f32 %v2956_v53  ;;  %v2667_v7 = vpop.f32.mrb[12].mxu1  ;;  %v3147_v53 = vrot.slane %v3071_v57, 4 }
 0x3da   : > { %v2957_v46 = vadd.f32 %v8471_v61, %v2667_v7  ;;  %v2669_v4 = vpop.f32.mrb[13].mxu1  ;;  %v3073_v7 = vmul.f32 %v8676_v43, %v8676_v43 }
 0x3db   : > { %v2958_v39 = vadd.f32 %v8471_v61, %v2669_v4 }
 0x3dc   : > { %6264 = vtanh.f32 %v2957_v46  ;;  %v3153_v46 = vrot.slane %v3072_v1, 4  ;;  %v3159_v4 = vrot.slane %v3073_v7, 4 }
 0x3dd   : > { %6266 = vtanh.f32 %v2958_v39 }
 0x3de   : > { %v3154_v39 = vadd.f32 %v3153_v46, %v3072_v1 }
 0x3e0   : > { %v3155_v17 = vrot.slane %v3154_v39, 2 }
 0x3e2   : > { %v6261_v60 = vpop.eup %6260 }
 0x3e3   : > { %v6263_v11 = vpop.eup %6262  ;;  %v3227_v33 = vmul.f32 %v6261_v60, %v3211_v6 }
 0x3e4   : > { %v3228_v55 = vmul.f32 %v6263_v11, %v3212_v48 }
 0x3e6   : > { %v6265_v54 = vpop.eup %6264  ;;  %6268 = vtanh.f32 %v3228_v55 }
 0x3e7   : > { %v6267_v49 = vpop.eup %6266  ;;  %6270 = vtanh.f32 %v3227_v33  ;;  %v3229_v30 = vmul.f32 %v6265_v54, %v3213_v31 }
 0x3e8   : > { %v3230_v59 = vmul.f32 %v6267_v49, %v3214_v2 }
 0x3ea   : > { %6272 = vtanh.f32 %v3230_v59 }
 0x3eb   : > { %6274 = vtanh.f32 %v3229_v30 }
 0x3f0   : > { %v6269_v20 = vpop.eup %6268 }
 0x3f1   : > { %v6271_v40 = vpop.eup %6270  ;;  %3595 = vmatprep.mubr.f32.mxu0 %v6269_v20 }
 0x3f2   : > { %3596 = vmatmul.mubr.f32.vlgmr.msra.gmra.mrb[20].mxu0 %v6271_v40 }
 0x3f3   : > { %5900 = vmatpush3.bf16.msra.mxu0 %v8255_v50  ;;  %v3074_v50 = vmul.f32 %v8680_v29, %v8680_v29 }
 0x3f4   : > { %v6273_v12 = vpop.eup %6272  ;;  %5902 = vmatprep.subr.bf16.mxu0 %v8266_v37  ;;  %v3148_v37 = vadd.f32 %v3147_v53, %v3071_v57 }
 0x3f5   : > { %v6275_v0 = vpop.eup %6274  ;;  %3665 = vmatprep.mubr.f32.mxu1 %v6273_v12  ;;  %v3165_v51 = vrot.slane %v3074_v50, 4 }
 0x3f6   : > { %3666 = vmatmul.mubr.f32.vlgmr.msra.gmra.mrb[20].mxu1 %v6275_v0 }
 0x3f7   : > { %5904 = vmatpush3.bf16.msra.mxu0 %v8298_v15  ;;  %5932 = vmatpush3.bf16.msra.mxu1 %v8300_v22  ;;  %v3149_v15 = vrot.slane %v3148_v37, 2  ;;  %v3160_v22 = vadd.f32 %v3159_v4, %v3073_v7  ;;  %v3166_v6 = vadd.f32 %v3165_v51, %v3074_v50 }
 0x3f8   : > { %5906 = vmatprep.subr.bf16.mxu0 %v8309_v47  ;;  %5934 = vmatprep.subr.bf16.mxu1 %v8311_v16 }
 0x3f9   : > { %v3150_v47 = vadd.f32 %v3149_v15, %v3148_v37  ;;  %v3161_v16 = vrot.slane %v3160_v22, 2 }
 0x3fb   : > { %5908 = vmatpush3.bf16.msra.mxu0 %v8338_v25  ;;  %5936 = vmatpush3.bf16.msra.mxu1 %v8340_v34  ;;  %v3156_v25 = vadd.f32 %v3155_v17, %v3154_v39  ;;  %v3167_v34 = vrot.slane %v3166_v6, 2 }
 0x3fc   : > { %5910 = vmatprep.subr.bf16.mxu0 %v8350_v32  ;;  %5938 = vmatprep.subr.bf16.mxu1 %v8352_v8  ;;  %v3151_v32 = vrot.slane %v3150_v47, 1  ;;  %v3162_v8 = vadd.f32 %v3161_v16, %v3160_v22 }
 0x3ff   : > { %5912 = vmatpush3.bf16.msra.mxu0 %v8374_v26  ;;  %5940 = vmatpush3.bf16.msra.mxu1 %v8376_v58  ;;  %v3157_v26 = vrot.slane %v3156_v25, 1  ;;  %v3168_v58 = vadd.f32 %v3167_v34, %v3166_v6 }
 0x400   : > { %5914 = vmatprep.subr.bf16.mxu0 %v8386_v52  ;;  %5942 = vmatprep.subr.bf16.mxu1 %v8388_v63  ;;  %v3152_v52 = vadd.f32 %v3151_v32, %v3150_v47  ;;  %v3163_v63 = vrot.slane %v3162_v8, 1 }
 0x403   : > { %5916 = vmatpush3.bf16.msra.mxu0 %v8410_v3  ;;  %5944 = vmatpush3.bf16.msra.mxu1 %v8412_v5  ;;  %v3158_v3 = vadd.f32 %v3157_v26, %v3156_v25  ;;  %v3169_v5 = vrot.slane %v3168_v58, 1 }
 0x404   : > { %5918 = vmatprep.subr.bf16.mxu0 %v8422_v13  ;;  %5946 = vmatprep.subr.bf16.mxu1 %v8424_v14  ;;  %v3183_v13 = vmax.f32 %v3152_v52, 1e-24  ;;  %v3164_v14 = vadd.f32 %v3163_v63, %v3162_v8 }
 0x406   : > { %6276 = vrsqrt.f32 %v3183_v13  ;;  %v3814_v13 = vld [vmem:[%s9561_s8 + $0x8] sm:$0xff] }
 0x407   : > { %5920 = vmatpush3.bf16.msra.mxu0 %v8446_v42  ;;  %5948 = vmatpush3.bf16.msra.mxu1 %v8448_v10  ;;  %v3184_v42 = vmax.f32 %v3158_v3, 1e-24  ;;  %v3170_v10 = vadd.f32 %v3169_v5, %v3168_v58 }
 0x408   : > { %5922 = vmatprep.subr.bf16.mxu0 %v8458_v41  ;;  %5950 = vmatprep.subr.bf16.mxu1 %v8460_v18  ;;  %v3185_v41 = vmax.f32 %v3164_v14, 1e-24  ;;  %v3813_v14 = vld [vmem:[%s9561_s8] sm:$0xff] }
 0x409   : > { %6278 = vrsqrt.f32 %v3184_v42  ;;  %v3186_v18 = vmax.f32 %v3170_v10, 1e-24 }
 0x40a   : > { %6280 = vrsqrt.f32 %v3185_v41 }
 0x40b   : > { %5924 = vmatpush3.bf16.msra.mxu0 %v8486_v62  ;;  %5952 = vmatpush3.bf16.msra.mxu1 %v8488_v24  ;;  %6282 = vrsqrt.f32 %v3186_v18 }
 0x40c   : > { %5926 = vmatprep.subr.bf16.mxu0 %v8495_v36  ;;  %5954 = vmatprep.subr.bf16.mxu1 %v8497_v38 }
 0x40f   : > { %5928 = vmatpush3.bf16.msra.mxu0 %v8518_v28  ;;  %5956 = vmatpush3.bf16.msra.mxu1 %v8520_v9 }
 0x410   : > { %5958 = vmatprep.subr.bf16.mxu1 %v8524_v56  ;;  %v6277_v48 = vpop.eup %6276 }
 0x413   : > { %5960 = vmatpush3.bf16.msra.mxu1 %v8535_v27  ;;  %v6279_v35 = vpop.eup %6278  ;;  %v3215_v27 = vmul.f32 %v6277_v48, %v8665_v23  ;;  %v9643_v48 = vld [vmem:[#allocation8_spill] sm:$0xff] }
 0x414   : > { %v6281_v60 = vpop.eup %6280  ;;  %v3216_v11 = vmul.f32 %v6279_v35, %v8668_v44 }
 0x415   : > { %v2866_v62 = vpop.f32.mrb[14].mxu0  ;;  %v6283_v33 = vpop.eup %6282  ;;  %v3217_v54 = vmul.f32 %v6281_v60, %v8676_v43 }
 0x416   : > { %v2959_v24 = vadd.f32 %v8471_v61, %v2866_v62  ;;  %v2868_v36 = vpop.f32.mrb[15].mxu0  ;;  %v3218_v30 = vmul.f32 %v6283_v33, %v8680_v29 }
 0x417   : > { %v2960_v38 = vadd.f32 %v8471_v61, %v2868_v36  ;;  %v577_v36 = vld [vmem:[%s9565_s12 + $0x8] sm:$0xff] }
 0x418   : > { %6284 = vtanh.f32 %v2959_v24  ;;  %v576_v24 = vld [vmem:[%s9565_s12] sm:$0xff] }
 0x419   : > { %6286 = vtanh.f32 %v2960_v38  ;;  %v2937_v28 = vpop.f32.mrb[14].mxu1  ;;  %v8817_v35 = vrot.slane %v576_v24, %v9643_v48 }
 0x41a   : > { %v2961_v9 = vadd.f32 %v8471_v61, %v2937_v28  ;;  %v2939_v56 = vpop.f32.mrb[15].mxu1 }
 0x41b   : > { %v2962_v19 = vadd.f32 %v8471_v61, %v2939_v56 }
 0x41c   : > { %6288 = vtanh.f32 %v2961_v9  ;;  %v9642_v9 = vld [vmem:[#allocation7_spill] sm:$0xff] }
 0x41d   : > { %6290 = vtanh.f32 %v2962_v19  ;;  %v8810_v56 = vrot.slane %v576_v24, %v9642_v9  ;;  %v8813_v19 = vrot.slane %v577_v36, %v9642_v9 }
 0x422   : > { %v6285_v31 = vpop.eup %6284 }
 0x423   : > { %v6287_v55 = vpop.eup %6286  ;;  %v3231_v2 = vmul.f32 %v6285_v31, %v3215_v27  ;;  %v8820_v27 = vrot.slane %v577_v36, %v9643_v48 }
 0x424   : > { %v3232_v49 = vmul.f32 %v6287_v55, %v3216_v11 }
 0x426   : > { %v6289_v59 = vpop.eup %6288  ;;  %6292 = vtanh.f32 %v3232_v49 }
 0x427   : > { %v6291_v61 = vpop.eup %6290  ;;  %6294 = vtanh.f32 %v3231_v2  ;;  %v3233_v20 = vmul.f32 %v6289_v59, %v3217_v54 }
 0x428   : > { %v3234_v40 = vmul.f32 %v6291_v61, %v3218_v30 }
 0x42a   : > { %6296 = vtanh.f32 %v3234_v40 }
 0x42b   : > { %6298 = vtanh.f32 %v3233_v20 }
 0x430   : > { %v6293_v23 = vpop.eup %6292 }
 0x431   : > { %v6295_v57 = vpop.eup %6294  ;;  %3735 = vmatprep.mubr.f32.mxu0 %v6293_v23  ;;  %v9644_v23 = vld [vmem:[#allocation9_spill] sm:$0xff] }
 0x432   : > { %3736 = vmatmul.mubr.f32.vlgmr.msra.gmra.mrb[22].mxu0 %v6295_v57  ;;  %v8836_v57 = vrot.slane %v576_v24, %v9644_v23 }
 0x433   : > { %4019 = vmatprep.mubr.f32.mxu0 %v9634_v45 }
 0x434   : > { %v6297_v44 = vpop.eup %6296 }
 0x435   : > { %v6299_v1 = vpop.eup %6298  ;;  %3805 = vmatprep.mubr.f32.mxu1 %v6297_v44  ;;  %v8839_v44 = vrot.slane %v577_v36, %v9644_v23 }
 0x436   : > { %3806 = vmatmul.mubr.f32.vlgmr.msra.gmra.mrb[22].mxu1 %v6299_v1  ;;  %v9645_v1 = vld [vmem:[#allocation10_spill] sm:$0xff] }
 0x437   : > { %4160 = vmatprep.mubr.f32.mxu1 %v9634_v45 }
 0x445   : > { %v5125_v43 = vpop.f32.mrb[16].mxu0 }
 0x446   : > { %v5126_v12 = vpop.f32.mrb[17].mxu0 }
 0x447   : > { %v5127_v29 = vadd.f32 %v5126_v12, %v5125_v43  ;;  %v8842_v43 = vrot.slane %v576_v24, %v9645_v1  ;;  %v8845_v12 = vrot.slane %v577_v36, %v9645_v1  ;;  %v8919_v1 = vld [vmem:[%s9560_s7] sm:$0xff] }
 0x449   : > { %v5160_v0 = vpop.f32.mrb[16].mxu1 }
 0x44a   : > { %v5161_v53 = vpop.f32.mrb[17].mxu1 }
 0x44b   : > { %v5162_v7 = vadd.f32 %v5161_v53, %v5160_v0 }
 0x44d   : > { %v8724_v46 = vadd.f32 %v5162_v7, %v5127_v29 }
 0x485   : > { %v5195_v50 = vpop.f32.mrb[18].mxu0 }
 0x486   : > { %v5196_v37 = vpop.f32.mrb[19].mxu0 }
 0x487   : > { %v5197_v4 = vadd.f32 %v5196_v37, %v5195_v50 }
 0x489   : > { %v5230_v39 = vpop.f32.mrb[18].mxu1 }
 0x48a   : > { %v5231_v51 = vpop.f32.mrb[19].mxu1 }
 0x48b   : > { %v5232_v15 = vadd.f32 %v5231_v51, %v5230_v39 }
 0x48d   : > { %v8726_v22 = vadd.f32 %v5232_v15, %v5197_v4  ;;  %v9646_v4 = vld [vmem:[#allocation11_spill] sm:$0xff] }
 0x48e   : > { %v8856_v39 = vrot.slane %v576_v24, %v9646_v4  ;;  %v8859_v51 = vrot.slane %v577_v36, %v9646_v4  ;;  %v3812_v4 = vld [vmem:[%s9560_s7 + $0x8] sm:$0xff] }
 0x4c5   : > { %v5265_v17 = vpop.f32.mrb[20].mxu0 }
 0x4c6   : > { %v5266_v6 = vpop.f32.mrb[21].mxu0 }
 0x4c7   : > { %v5267_v47 = vadd.f32 %v5266_v6, %v5265_v17 }
 0x4c9   : > { %v5300_v16 = vpop.f32.mrb[20].mxu1 }
 0x4ca   : > { %v5301_v25 = vpop.f32.mrb[21].mxu1 }
 0x4cb   : > { %v5302_v34 = vadd.f32 %v5301_v25, %v5300_v16 }
 0x4cd   : > { %v8728_v32 = vadd.f32 %v5302_v34, %v5267_v47 }
 0x4cf   : > { %4032 = vrot.lane.b32.xlu1 %v8728_v32, %s6395_s15 }
 0x4d3   : > { %4040 = vrot.lane.b32.xlu1 %v8728_v32, %s6396_s2 }
 0x4d7   : > { %4048 = vrot.lane.b32.xlu1 %v8728_v32, %s6397_s27 }
 0x4db   : > { %4056 = vrot.lane.b32.xlu1 %v8728_v32, %s9629_s20 }
 0x4df   : > { %4064 = vrot.lane.b32.xlu1 %v8728_v32, %s9632_s16 }
 0x4e3   : > { %4072 = vrot.lane.b32.xlu1 %v8728_v32, %s6398_s24 }
 0x4e7   : > { %4080 = vrot.lane.b32.xlu1 %v8728_v32, %s6399_s25 }
 0x4eb   : > { %4088 = vrot.lane.b32.xlu1 %v8728_v32, %s9608_s30 }
 0x4ef   : > { %3815 = vrot.lane.b32.xlu1 %v8724_v46, %s6395_s15 }
 0x4f3   : > { %3832 = vrot.lane.b32.xlu1 %v8724_v46, %s6396_s2 }
 0x4f7   : > { %3849 = vrot.lane.b32.xlu1 %v8724_v46, %s6397_s27 }
 0x4fb   : > { %3866 = vrot.lane.b32.xlu1 %v8724_v46, %s9629_s20 }
 0x4ff   : > { %3882 = vrot.lane.b32.xlu1 %v8724_v46, %s9632_s16 }
 0x503   : > { %3898 = vrot.lane.b32.xlu1 %v8724_v46, %s6398_s24 }
 0x505   : > { %v5335_v8 = vpop.f32.mrb[22].mxu0 }
 0x506   : > { %v5336_v26 = vpop.f32.mrb[23].mxu0 }
 0x507   : > { %v5337_v58 = vadd.f32 %v5336_v26, %v5335_v8  ;;  %3915 = vrot.lane.b32.xlu1 %v8724_v46, %s6399_s25 }
 0x509   : > { %v5370_v52 = vpop.f32.mrb[22].mxu1 }
 0x50a   : > { %v5371_v63 = vpop.f32.mrb[23].mxu1 }
 0x50b   : > { %v5372_v3 = vadd.f32 %v5371_v63, %v5370_v52  ;;  %3932 = vrot.lane.b32.xlu1 %v8724_v46, %s9608_s30 }
 0x50d   : > { %v8762_v5 = vadd.f32 %v5372_v3, %v5337_v58 }
 0x50f   : > { %4034 = vrot.lane.b32.xlu0 %v8762_v5, %s6395_s15  ;;  %4175 = vperm.xlu1 %6171, %v3813_v14  }
 0x513   : > { %4042 = vrot.lane.b32.xlu0 %v8762_v5, %s6396_s2 }
 0x517   : > { %4050 = vrot.lane.b32.xlu0 %v8762_v5, %s6397_s27 }
 0x51b   : > { %4058 = vrot.lane.b32.xlu0 %v8762_v5, %s9629_s20 }
 0x51f   : > { %4066 = vrot.lane.b32.xlu0 %v8762_v5, %s9632_s16 }
 0x523   : > { %4074 = vrot.lane.b32.xlu0 %v8762_v5, %s6398_s24 }
 0x527   : > { %4082 = vrot.lane.b32.xlu0 %v8762_v5, %s6399_s25 }
 0x52b   : > { %4090 = vrot.lane.b32.xlu0 %v8762_v5, %s9608_s30 }
 0x52f   : > { %3817 = vrot.lane.b32.xlu0 %v8726_v22, %s6395_s15 }
 0x533   : > { %3834 = vrot.lane.b32.xlu0 %v8726_v22, %s6396_s2 }
 0x537   : > { %3851 = vrot.lane.b32.xlu0 %v8726_v22, %s6397_s27 }
 0x53b   : > { %3868 = vrot.lane.b32.xlu0 %v8726_v22, %s9629_s20 }
 0x53f   : > { %3884 = vrot.lane.b32.xlu0 %v8726_v22, %s9632_s16 }
 0x541   : > { %v4033_v42 = vpop.permute.xlu1 %4032 }
 0x543   : > { %3900 = vrot.lane.b32.xlu0 %v8726_v22, %s6398_s24 }
 0x545   : > { %v4041_v10 = vpop.permute.xlu1 %4040 }
 0x547   : > { %3917 = vrot.lane.b32.xlu0 %v8726_v22, %s6399_s25 }
 0x549   : > { %v4049_v41 = vpop.permute.xlu1 %4048 }
 0x54b   : > { %3934 = vrot.lane.b32.xlu0 %v8726_v22, %s9608_s30  ;;  %s9649_s30 = smov 119  }
 0x54d   : > { %v4057_v18 = vpop.permute.xlu1 %4056 }
 0x54f   : > { %4180 = vperm.xlu0 %6170, %v3814_v13  }
 0x551   : > { %v4065_v62 = vpop.permute.xlu1 %4064 }
 0x555   : > { %v4073_v38 = vpop.permute.xlu1 %4072 }
 0x559   : > { %v4081_v2 = vpop.permute.xlu1 %4080 }
 0x55d   : > { %v4089_v53 = vpop.permute.xlu1 %4088 }
 0x561   : > { %v3816_v58 = vpop.permute.xlu1 %3815 }
 0x565   : > { %v3833_v9 = vpop.permute.xlu1 %3832 }
 0x581   : > { %v4035_v28 = vpop.permute.xlu0 %4034 }
 0x582   : > { %v4036_v60 = vsel %vm3819_vm9, %v4033_v42, %v4035_v28  ;;  %v4037_v11 = vsel %vm3819_vm9, %v4035_v28, %v4033_v42  ;;  %v9647_v42 = vld [vmem:[#allocation13_spill] sm:$0xff] }
 0x583   : > { %v4038_v54 = vmul.f32 %v4037_v11, %v8810_v56  ;;  %v4039_v49 = vmul.f32 %v4036_v60, %v8813_v19 }
 0x585   : > { %v4043_v33 = vpop.permute.xlu0 %4042 }
 0x586   : > { %v4044_v31 = vsel %vm3836_vm10, %v4041_v10, %v4043_v33  ;;  %v4045_v55 = vsel %vm3836_vm10, %v4043_v33, %v4041_v10  ;;  %v8875_v10 = vrot.slane %v576_v24, %v9647_v42 }
 0x587   : > { %v4046_v30 = vmul.f32 %v4045_v55, %v8817_v35  ;;  %v4047_v59 = vmul.f32 %v4044_v31, %v8820_v27 }
 0x589   : > { %v5979_v61 = vpack.c.bf16 %v4046_v30, %v4038_v54  ;;  %v4051_v20 = vpop.permute.xlu0 %4050  ;;  %v5977_v40 = vpack.c.bf16 %v4047_v59, %v4039_v49  ;;  %v3850_v30 = vpop.permute.xlu1 %3849  ;;  %v8910_v59 = vld [vmem:[%s9565_s12 + $0x10] ss:$0 sm:$0xff] }
 0x58a   : > { %v4052_v29 = vsel %vm3853_vm11, %v4049_v41, %v4051_v20  ;;  %v4053_v0 = vsel %vm3853_vm11, %v4051_v20, %v4049_v41  ;;  %v8878_v41 = vrot.slane %v577_v36, %v9647_v42 }
 0x58b   : > { %5978 = vmatprep.subr.bf16.mxu1 %v5977_v40  ;;  %v4054_v15 = vmul.f32 %v4053_v0, %v8836_v57  ;;  %v4055_v17 = vmul.f32 %v4052_v29, %v8839_v44 }
 0x58c   : > { %5980 = vmatpush1.bf16.msra.mxu1 %v5979_v61 }
 0x58d   : > { %v4059_v7 = vpop.permute.xlu0 %4058 }
 0x58e   : > { %v4060_v50 = vsel %vm707_vm3, %v4057_v18, %v4059_v7  ;;  %v4061_v37 = vsel %vm707_vm3, %v4059_v7, %v4057_v18  ;;  %v9648_v18 = vld [vmem:[#allocation12_spill] sm:$0xff] }
 0x58f   : > { %v4062_v6 = vmul.f32 %v4061_v37, %v8842_v43  ;;  %v4063_v47 = vmul.f32 %v4060_v50, %v8845_v12  ;;  %v8885_v28 = vrot.slane %v577_v36, %v9648_v18 }
 0x591   : > { %v5983_v16 = vpack.c.bf16 %v4062_v6, %v4054_v15  ;;  %v4067_v25 = vpop.permute.xlu0 %4066  ;;  %v5981_v34 = vpack.c.bf16 %v4063_v47, %v4055_v17 }
 0x592   : > { %v4068_v8 = vsel %vm740_vm4, %v4065_v62, %v4067_v25  ;;  %v4069_v26 = vsel %vm740_vm4, %v4067_v25, %v4065_v62  ;;  %v8882_v62 = vrot.slane %v576_v24, %v9648_v18 }
 0x593   : > { %v4070_v52 = vmul.f32 %v4068_v8, %v8856_v39  ;;  %v4071_v63 = vmul.f32 %v4069_v26, %v8859_v51  ;;  %5982 = vmatprep.subr.bf16.mxu1 %v5981_v34 }
 0x594   : > { %5984 = vmatpush1.bf16.msra.mxu1 %v5983_v16 }
 0x595   : > { %v5987_v3 = vpack.c.bf16 %v4070_v52, %v8728_v32  ;;  %v4075_v13 = vpop.permute.xlu0 %4074  ;;  %v5985_v14 = vpack.c.bf16 %v4071_v63, %v8762_v5 }
 0x596   : > { %v4076_v32 = vsel %vm3902_vm12, %v4073_v38, %v4075_v13  ;;  %v4077_v5 = vsel %vm3902_vm12, %v4075_v13, %v4073_v38  ;;  %v8903_v38 = vld [vmem:[%s9565_s12 + $0x18] ss:$0 sm:$0xff] }
 0x597   : > { %5986 = vmatprep.subr.bf16.mxu1 %v5985_v14  ;;  %v4078_v24 = vmul.f32 %v4076_v32, %v8875_v10  ;;  %v4079_v36 = vmul.f32 %v4077_v5, %v8878_v41 }
 0x598   : > { %5988 = vmatpush1.bf16.msra.mxu1 %v5987_v3 }
 0x599   : > { %v4083_v48 = vpop.permute.xlu0 %4082 }
 0x59a   : > { %v4084_v60 = vsel %vm3919_vm13, %v4081_v2, %v4083_v48  ;;  %v4085_v11 = vsel %vm3919_vm13, %v4083_v48, %v4081_v2 }
 0x59b   : > { %v4086_v33 = vmul.f32 %v4084_v60, %v8882_v62  ;;  %v4087_v31 = vmul.f32 %v4085_v11, %v8885_v28 }
 0x59d   : > { %v5991_v55 = vpack.c.bf16 %v4086_v33, %v4078_v24  ;;  %v4091_v54 = vpop.permute.xlu0 %4090  ;;  %v5989_v49 = vpack.c.bf16 %v4087_v31, %v4079_v36 }
 0x59e   : > { %v4093_v2 = vsel %vm3936_vm14, %v4091_v54, %v4089_v53  ;;  %v4092_v61 = vsel %vm3936_vm14, %v4089_v53, %v4091_v54  ;;  %v3867_v53 = vpop.permute.xlu1 %3866 }
 0x59f   : > { %v4095_v20 = vmul.f32 %v8903_v38, %v4093_v2  ;;  %5990 = vmatprep.subr.bf16.mxu1 %v5989_v49  ;;  %v4094_v23 = vmul.f32 %v8910_v59, %v4092_v61 }
 0x5a0   : > { %5992 = vmatpush1.bf16.msra.mxu1 %v5991_v55 }
 0x5a1   : > { %4112 = vmatprep.subr.mxu1 %v4095_v20  ;;  %v3818_v40 = vpop.permute.xlu0 %3817 }
 0x5a2   : > { %v3820_v29 = vsel %vm3819_vm9, %v3816_v58, %v3818_v40  ;;  %v3821_v0 = vsel %vm3819_vm9, %v3818_v40, %v3816_v58  ;;  %v3883_v8 = vpop.permute.xlu1 %3882 }
 0x5a3   : > { %v3830_v15 = vmul.f32 %v8810_v56, %v3821_v0  ;;  %v3831_v17 = vmul.f32 %v8813_v19, %v3820_v29 }
 0x5a4   : > { %4113 = vmatpush1.msra.mxu1 %v4094_v23 }
 0x5a5   : > { %5082 = vmatmul.mubr.msk.f32.vlgmr.msra.gmra.mrb[24].mxu1 %vm864_vm8, %v8919_v1  ;;  %v3835_v7 = vpop.permute.xlu0 %3834 }
 0x5a6   : > { %v3837_v50 = vsel %vm3836_vm10, %v3833_v9, %v3835_v7  ;;  %v3838_v37 = vsel %vm3836_vm10, %v3835_v7, %v3833_v9  ;;  %4166 = vmatprep.mubr.f32.mxu1 %v9634_v45  ;;  %v3899_v32 = vpop.permute.xlu1 %3898 }
 0x5a7   : > { %v3847_v6 = vmul.f32 %v8817_v35, %v3838_v37  ;;  %v3848_v47 = vmul.f32 %v8820_v27, %v3837_v50 }
 0x5a9   : > { %v5963_v16 = vpack.c.bf16 %v3847_v6, %v3830_v15  ;;  %5083 = vmatmul.mubr.msk.f32.gmra.mrb[26].mxu1 %vm864_vm8, %v3812_v4  ;;  %v3852_v25 = vpop.permute.xlu0 %3851  ;;  %v5961_v34 = vpack.c.bf16 %v3848_v47, %v3831_v17 }
 0x5aa   : > { %v3854_v26 = vsel %vm3853_vm11, %v3850_v30, %v3852_v25  ;;  %v3855_v58 = vsel %vm3853_vm11, %v3852_v25, %v3850_v30  ;;  %v3916_v54 = vpop.permute.xlu1 %3915 }
 0x5ab   : > { %5962 = vmatprep.subr.bf16.mxu0 %v5961_v34  ;;  %v3864_v13 = vmul.f32 %v8836_v57, %v3855_v58  ;;  %v3865_v14 = vmul.f32 %v8839_v44, %v3854_v26 }
 0x5ac   : > { %5964 = vmatpush1.bf16.msra.mxu0 %v5963_v16 }
 0x5ad   : > { %v3869_v52 = vpop.permute.xlu0 %3868 }
 0x5ae   : > { %v3870_v63 = vsel %vm707_vm3, %v3867_v53, %v3869_v52  ;;  %v3871_v3 = vsel %vm707_vm3, %v3869_v52, %v3867_v53  ;;  %v3933_v29 = vpop.permute.xlu1 %3932 }
 0x5af   : > { %v3880_v42 = vmul.f32 %v8842_v43, %v3871_v3  ;;  %v3881_v18 = vmul.f32 %v8845_v12, %v3870_v63 }
 0x5b1   : > { %v5967_v5 = vpack.c.bf16 %v3880_v42, %v3864_v13  ;;  %v3885_v9 = vpop.permute.xlu0 %3884  ;;  %v5965_v48 = vpack.c.bf16 %v3881_v18, %v3865_v14 }
 0x5b2   : > { %v3886_v60 = vsel %vm740_vm4, %v3883_v8, %v3885_v9  ;;  %v3887_v11 = vsel %vm740_vm4, %v3885_v9, %v3883_v8  ;;  %v4176_v6 = vpop.permute.xlu1 %4175 }
 0x5b3   : > { %v3896_v24 = vmul.f32 %v8856_v39, %v3886_v60  ;;  %v3897_v36 = vmul.f32 %v8859_v51, %v3887_v11  ;;  %5966 = vmatprep.subr.bf16.mxu0 %v5965_v48 }
 0x5b4   : > { %5968 = vmatpush1.bf16.msra.mxu0 %v5967_v5 }
 0x5b5   : > { %v5971_v33 = vpack.c.bf16 %v3896_v24, %v8724_v46  ;;  %v3901_v31 = vpop.permute.xlu0 %3900  ;;  %v5969_v55 = vpack.c.bf16 %v3897_v36, %v8726_v22 }
 0x5b6   : > { %v3903_v49 = vsel %vm3902_vm12, %v3899_v32, %v3901_v31  ;;  %v3904_v2 = vsel %vm3902_vm12, %v3901_v31, %v3899_v32 }
 0x5b7   : > { %5970 = vmatprep.subr.bf16.mxu0 %v5969_v55  ;;  %v3913_v46 = vmul.f32 %v8875_v10, %v3903_v49  ;;  %v3914_v22 = vmul.f32 %v8878_v41, %v3904_v2 }
 0x5b8   : > { %5972 = vmatpush1.bf16.msra.mxu0 %v5971_v33  ;;  %v4200_v33 = vld [vmem:[%s9562_s9 + $0x8] sm:$0xff] }
 0x5b9   : > { %v3918_v30 = vpop.permute.xlu0 %3917  ;;  %5086 = vmatprep.mubr.msk.f32.mxu1 %vm4333_vm15, %v4200_v33 }
 0x5ba   : > { %v3920_v61 = vsel %vm3919_vm13, %v3916_v54, %v3918_v30  ;;  %v3921_v20 = vsel %vm3919_vm13, %v3918_v30, %v3916_v54 }
 0x5bb   : > { %v3930_v40 = vmul.f32 %v8882_v62, %v3920_v61  ;;  %v3931_v23 = vmul.f32 %v8885_v28, %v3921_v20  ;;  %v4203_v20 = vld [vmem:[%s9563_s10] sm:$0xff] }
 0x5bd   : > { %v5975_v0 = vpack.c.bf16 %v3930_v40, %v3913_v46  ;;  %v3935_v53 = vpop.permute.xlu0 %3934  ;;  %v5973_v7 = vpack.c.bf16 %v3931_v23, %v3914_v22  ;;  %v4204_v40 = vld [vmem:[%s9563_s10 + $0x8] sm:$0xff] }
 0x5be   : > { %v3938_v50 = vsel %vm3936_vm14, %v3935_v53, %v3933_v29  ;;  %v3937_v37 = vsel %vm3936_vm14, %v3933_v29, %v3935_v53 }
 0x5bf   : > { %v3948_v15 = vmul.f32 %v8903_v38, %v3938_v50  ;;  %5974 = vmatprep.subr.bf16.mxu0 %v5973_v7  ;;  %v3947_v17 = vmul.f32 %v8910_v59, %v3937_v37 }
 0x5c0   : > { %5976 = vmatpush1.bf16.msra.mxu0 %v5975_v0 }
 0x5c1   : > { %3971 = vmatprep.subr.mxu0 %v3948_v15 }
 0x5c4   : > { %3972 = vmatpush1.msra.mxu0 %v3947_v17 }
 0x5c5   : > { %5080 = vmatmul.mubr.msk.f32.vlgmr.msra.gmra.mrb[24].mxu0 %vm864_vm8, %v8919_v1 }
 0x5c6   : > { %4025 = vmatprep.mubr.f32.mxu0 %v9634_v45 }
 0x5c9   : > { %5081 = vmatmul.mubr.msk.f32.gmra.mrb[26].mxu0 %vm864_vm8, %v3812_v4 }
 0x5ca   : > { %5084 = vmatprep.mubr.msk.f32.mxu0 %vm4333_vm15, %v4200_v33 }
 0x5ce   : > { %v4181_v8 = vpop.permute.xlu0 %4180 }
 0x678   : > { %v4162_v47 = vpop.f32.mrb[24].mxu1 }
 0x679   : > { %v4185_v16 = vadd.f32 %v4176_v6, %v4162_v47  ;;  %v4164_v25 = vpop.f32.mrb[25].mxu1 }
 0x67a   : > { %v4186_v34 = vadd.f32 %v4176_v6, %v4164_v25 }
 0x67b   : > { %6300 = vtanh.f32 %v4185_v16 }
 0x67c   : > { %v4168_v26 = vpop.f32.mrb[26].mxu1  ;;  %6302 = vtanh.f32 %v4186_v34 }
 0x67d   : > { %v4189_v58 = vadd.f32 %v4181_v8, %v4168_v26  ;;  %v4170_v52 = vpop.f32.mrb[27].mxu1 }
 0x67e   : > { %v4190_v63 = vadd.f32 %v4181_v8, %v4170_v52 }
 0x67f   : > { %6304 = vtanh.f32 %v4189_v58 }
 0x680   : > { %6306 = vtanh.f32 %v4190_v63 }
 0x685   : > { %v8982_v3 = vpop.eup %6300 }
 0x686   : > { %4417 = vrot.lane.b32.xlu1 %v8982_v3, %s6395_s15  ;;  %v8986_v45 = vpop.eup %6302 }
 0x689   : > { %v8988_v1 = vpop.eup %6304 }
 0x68a   : > { %v8990_v4 = vpop.eup %6306  ;;  %4433 = vrot.lane.b32.xlu1 %v8982_v3, %s6396_s2  ;;  %4419 = vrot.lane.b32.xlu0 %v8988_v1, %s6395_s15  ;;  %v6047_v13 = vpack.c.bf16 %v8988_v1, %v8982_v3 }
 0x68b   : > { %v6045_v14 = vpack.c.bf16 %v8990_v4, %v8986_v45 }
 0x68e   : > { %4449 = vrot.lane.b32.xlu1 %v8982_v3, %s6397_s27  ;;  %4435 = vrot.lane.b32.xlu0 %v8988_v1, %s6396_s2 }
 0x692   : > { %4465 = vrot.lane.b32.xlu1 %v8982_v3, %s9629_s20  ;;  %4451 = vrot.lane.b32.xlu0 %v8988_v1, %s6397_s27 }
 0x696   : > { %4481 = vrot.lane.b32.xlu1 %v8982_v3, %s9632_s16  ;;  %4467 = vrot.lane.b32.xlu0 %v8988_v1, %s9629_s20 }
 0x698   : > { %v4021_v42 = vpop.f32.mrb[24].mxu0 }
 0x699   : > { %v4023_v18 = vpop.f32.mrb[25].mxu0  ;;  %v4183_v9 = vadd.f32 %v4176_v6, %v4021_v42 }
 0x69a   : > { %4497 = vrot.lane.b32.xlu1 %v8982_v3, %s6398_s24  ;;  %4483 = vrot.lane.b32.xlu0 %v8988_v1, %s9632_s16  ;;  %v4184_v24 = vadd.f32 %v4176_v6, %v4023_v18 }
 0x69b   : > { %6308 = vtanh.f32 %v4183_v9 }
 0x69c   : > { %v4027_v32 = vpop.f32.mrb[26].mxu0 }
 0x69d   : > { %v4029_v5 = vpop.f32.mrb[27].mxu0  ;;  %v4187_v48 = vadd.f32 %v4181_v8, %v4027_v32 }
 0x69e   : > { %4513 = vrot.lane.b32.xlu1 %v8982_v3, %s6399_s25  ;;  %4499 = vrot.lane.b32.xlu0 %v8988_v1, %s6398_s24  ;;  %v4188_v36 = vadd.f32 %v4181_v8, %v4029_v5 }
 0x69f   : > { %6310 = vtanh.f32 %v4187_v48 }
 0x6a0   : > { %6312 = vtanh.f32 %v4184_v24 }
 0x6a1   : > { %6314 = vtanh.f32 %v4188_v36 }
 0x6a2   : > { %4529 = vrot.lane.b32.xlu1 %v8982_v3, %s9649_s30  ;;  %4515 = vrot.lane.b32.xlu0 %v8988_v1, %s6399_s25 }
 0x6a5   : > { %v9040_v60 = vpop.eup %6308 }
 0x6a6   : > { %4421 = vrot.lane.b32.xlu1 %v8986_v45, %s6395_s15  ;;  %4531 = vrot.lane.b32.xlu0 %v8988_v1, %s9649_s30 }
 0x6a9   : > { %v9046_v11 = vpop.eup %6310 }
 0x6aa   : > { %4437 = vrot.lane.b32.xlu1 %v8986_v45, %s6396_s2  ;;  %4423 = vrot.lane.b32.xlu0 %v8990_v4, %s6395_s15  ;;  %v9069_v31 = vpop.eup %6312 }
 0x6ab   : > { %v9075_v55 = vpop.eup %6314 }
 0x6ae   : > { %4453 = vrot.lane.b32.xlu1 %v8986_v45, %s6397_s27  ;;  %4439 = vrot.lane.b32.xlu0 %v8990_v4, %s6396_s2 }
 0x6b2   : > { %4469 = vrot.lane.b32.xlu1 %v8986_v45, %s9629_s20  ;;  %4455 = vrot.lane.b32.xlu0 %v8990_v4, %s6397_s27 }
 0x6b6   : > { %4205 = vrot.lane.b32.xlu1 %v9040_v60, %s6395_s15  ;;  %4471 = vrot.lane.b32.xlu0 %v8990_v4, %s9629_s20 }
 0x6ba   : > { %4485 = vrot.lane.b32.xlu1 %v8986_v45, %s9632_s16  ;;  %4207 = vrot.lane.b32.xlu0 %v9046_v11, %s6395_s15 }
 0x6be   : > { %4501 = vrot.lane.b32.xlu1 %v8986_v45, %s6398_s24  ;;  %4487 = vrot.lane.b32.xlu0 %v8990_v4, %s9632_s16 }
 0x6c2   : > { %4517 = vrot.lane.b32.xlu1 %v8986_v45, %s6399_s25  ;;  %4503 = vrot.lane.b32.xlu0 %v8990_v4, %s6398_s24 }
 0x6c6   : > { %4533 = vrot.lane.b32.xlu1 %v8986_v45, %s9649_s30  ;;  %4519 = vrot.lane.b32.xlu0 %v8990_v4, %s6399_s25 }
 0x6ca   : > { %4209 = vrot.lane.b32.xlu1 %v9069_v31, %s6395_s15  ;;  %4535 = vrot.lane.b32.xlu0 %v8990_v4, %s9649_s30 }
 0x6ce   : > { %4221 = vrot.lane.b32.xlu1 %v9040_v60, %s6396_s2  ;;  %4211 = vrot.lane.b32.xlu0 %v9075_v55, %s6395_s15  ;;  %s6401_s15 = smov 64  }
 0x6d2   : > { %4225 = vrot.lane.b32.xlu1 %v9069_v31, %s6396_s2  ;;  %4223 = vrot.lane.b32.xlu0 %v9046_v11, %s6396_s2 }
 0x6d6   : > { %4237 = vrot.lane.b32.xlu1 %v9040_v60, %s6397_s27  ;;  %4227 = vrot.lane.b32.xlu0 %v9075_v55, %s6396_s2  ;;  %s5053_s2 = sshll.u32 %s499_s29, 4 }
 0x6da   : > { %4241 = vrot.lane.b32.xlu1 %v9069_v31, %s6397_s27  ;;  %4239 = vrot.lane.b32.xlu0 %v9046_v11, %s6397_s27 }
 0x6de   : > { %4253 = vrot.lane.b32.xlu1 %v9040_v60, %s9629_s20  ;;  %4243 = vrot.lane.b32.xlu0 %v9075_v55, %s6397_s27  ;;  %s554_s27 = scalar_lea.vmem [#allocation3], %s5053_s2 }
 0x6e2   : > { %4257 = vrot.lane.b32.xlu1 %v9069_v31, %s9629_s20  ;;  %4255 = vrot.lane.b32.xlu0 %v9046_v11, %s9629_s20 }
 0x6e6   : > { %4269 = vrot.lane.b32.xlu1 %v9040_v60, %s9632_s16  ;;  %4259 = vrot.lane.b32.xlu0 %v9075_v55, %s9629_s20  ;;  %s5052_s20 = sshll.u32 %s499_s29, 6 }
 0x6ea   : > { %4273 = vrot.lane.b32.xlu1 %v9069_v31, %s9632_s16  ;;  %4271 = vrot.lane.b32.xlu0 %v9046_v11, %s9632_s16 }
 0x6ee   : > { %4285 = vrot.lane.b32.xlu1 %v9040_v60, %s6398_s24  ;;  %4275 = vrot.lane.b32.xlu0 %v9075_v55, %s9632_s16  ;;  %s9513_s16 = scalar_lea.vmem [#allocation2], %s5052_s20 }
 0x6f2   : > { %4289 = vrot.lane.b32.xlu1 %v9069_v31, %s6398_s24  ;;  %4287 = vrot.lane.b32.xlu0 %v9046_v11, %s6398_s24 }
 0x6f6   : > { %4301 = vrot.lane.b32.xlu1 %v9040_v60, %s6399_s25  ;;  %4291 = vrot.lane.b32.xlu0 %v9075_v55, %s6398_s24  ;;  %s5089_s24 = sshll.u32 (%p6513_p5), %s6498_s21, 3 }
 0x6f7   : > { %s4927_s18 = scalar_lea.vmem (%p6513_p5), %s9650_s22, %s5089_s24 }
 0x6f8   : > { %v4418_v54 = vpop.permute.xlu1 %4417 }
 0x6fa   : > { %4305 = vrot.lane.b32.xlu1 %v9069_v31, %s6399_s25  ;;  %4303 = vrot.lane.b32.xlu0 %v9046_v11, %s6399_s25 }
 0x6fc   : > { %v4434_v49 = vpop.permute.xlu1 %4433  ;;  %v4420_v2 = vpop.permute.xlu0 %4419 }
 0x6fe   : > { %4317 = vrot.lane.b32.xlu1 %v9040_v60, %s9649_s30  ;;  %4307 = vrot.lane.b32.xlu0 %v9075_v55, %s6399_s25 }
 0x700   : > { %v4450_v30 = vpop.permute.xlu1 %4449  ;;  %v4436_v61 = vpop.permute.xlu0 %4435 }
 0x702   : > { %4321 = vrot.lane.b32.xlu1 %v9069_v31, %s9649_s30  ;;  %4319 = vrot.lane.b32.xlu0 %v9046_v11, %s9649_s30 }
 0x704   : > { %v4466_v46 = vpop.permute.xlu1 %4465  ;;  %v4452_v22 = vpop.permute.xlu0 %4451 }
 0x706   : > { %4624 = vperm.xlu1 %6171, %v4203_v20   ;;  %4323 = vrot.lane.b32.xlu0 %v9075_v55, %s9649_s30 }
 0x708   : > { %v9141_v23 = vpop.permute.xlu1 %4481  ;;  %v4468_v29 = vpop.permute.xlu0 %4467 }
 0x70a   : > { %4629 = vperm.xlu0 %6170, %v4204_v40  }
 0x70c   : > { %v9143_v0 = vpop.permute.xlu1 %4497  ;;  %v9145_v53 = vpop.permute.xlu0 %4483 }
 0x710   : > { %v9147_v7 = vpop.permute.xlu1 %4513  ;;  %v9149_v50 = vpop.permute.xlu0 %4499 }
 0x714   : > { %v9151_v37 = vpop.permute.xlu1 %4529  ;;  %v9153_v15 = vpop.permute.xlu0 %4515 }
 0x718   : > { %v4422_v17 = vpop.permute.xlu1 %4421  ;;  %v9155_v6 = vpop.permute.xlu0 %4531 }
 0x719   : > { %v4425_v47 = vsel %vm3819_vm9, %v4418_v54, %v4422_v17  ;;  %v4427_v16 = vsel %vm3819_vm9, %v4422_v17, %v4418_v54 }
 0x71a   : > { %v4429_v58 = vmul.f32 %v4427_v16, %v8810_v56  ;;  %v4430_v52 = vmul.f32 %v4425_v47, %v8813_v19 }
 0x71c   : > { %v4438_v25 = vpop.permute.xlu1 %4437  ;;  %v4424_v34 = vpop.permute.xlu0 %4423 }
 0x71d   : > { %v4426_v8 = vsel %vm3819_vm9, %v4420_v2, %v4424_v34  ;;  %v4428_v26 = vsel %vm3819_vm9, %v4424_v34, %v4420_v2  ;;  %v4441_v18 = vsel %vm3836_vm10, %v4434_v49, %v4438_v25  ;;  %v4443_v32 = vsel %vm3836_vm10, %v4438_v25, %v4434_v49 }
 0x71e   : > { %v4431_v63 = vmul.f32 %v4428_v26, %v8810_v56  ;;  %v4432_v42 = vmul.f32 %v4426_v8, %v8813_v19  ;;  %v4445_v54 = vmul.f32 %v4443_v32, %v8817_v35  ;;  %v4446_v2 = vmul.f32 %v4441_v18, %v8820_v27 }
 0x720   : > { %v6031_v5 = vpack.c.bf16 %v4431_v63, %v4429_v58  ;;  %v4454_v9 = vpop.permute.xlu1 %4453  ;;  %v4440_v48 = vpop.permute.xlu0 %4439  ;;  %v6029_v24 = vpack.c.bf16 %v4432_v42, %v4430_v52 }
 0x721   : > { %v4442_v36 = vsel %vm3836_vm10, %v4436_v61, %v4440_v48  ;;  %v4444_v33 = vsel %vm3836_vm10, %v4440_v48, %v4436_v61  ;;  %v4457_v49 = vsel %vm3853_vm11, %v4450_v30, %v4454_v9  ;;  %v4459_v17 = vsel %vm3853_vm11, %v4454_v9, %v4450_v30 }
 0x722   : > { %v4447_v20 = vmul.f32 %v4444_v33, %v8817_v35  ;;  %v4448_v40 = vmul.f32 %v4442_v36, %v8820_v27  ;;  %6030 = vmatprep.subr.bf16.mxu1 %v6029_v24  ;;  %v4461_v26 = vmul.f32 %v4459_v17, %v8836_v57  ;;  %v4462_v58 = vmul.f32 %v4457_v49, %v8839_v44 }
 0x723   : > { %6032 = vmatpush1.bf16.msra.mxu1 %v6031_v5 }
 0x724   : > { %v6035_v47 = vpack.c.bf16 %v4447_v20, %v4445_v54  ;;  %v4470_v16 = vpop.permute.xlu1 %4469  ;;  %v4456_v25 = vpop.permute.xlu0 %4455  ;;  %v6033_v61 = vpack.c.bf16 %v4448_v40, %v4446_v2 }
 0x725   : > { %v4458_v34 = vsel %vm3853_vm11, %v4452_v22, %v4456_v25  ;;  %v4460_v8 = vsel %vm3853_vm11, %v4456_v25, %v4452_v22  ;;  %v4473_v30 = vsel %vm707_vm3, %v4466_v46, %v4470_v16  ;;  %v4475_v42 = vsel %vm707_vm3, %v4470_v16, %v4466_v46 }
 0x726   : > { %v4463_v52 = vmul.f32 %v4460_v8, %v8836_v57  ;;  %v4464_v63 = vmul.f32 %v4458_v34, %v8839_v44  ;;  %6034 = vmatprep.subr.bf16.mxu1 %v6033_v61  ;;  %v4477_v24 = vmul.f32 %v4475_v42, %v8842_v43  ;;  %v4478_v36 = vmul.f32 %v4473_v30, %v8845_v12 }
 0x727   : > { %6036 = vmatpush1.bf16.msra.mxu1 %v6035_v47 }
 0x728   : > { %v6039_v18 = vpack.c.bf16 %v4463_v52, %v4461_v26  ;;  %v9197_v32 = vpop.permute.xlu1 %4205  ;;  %v4472_v22 = vpop.permute.xlu0 %4471  ;;  %v6037_v5 = vpack.c.bf16 %v4464_v63, %v4462_v58 }
 0x729   : > { %v4474_v9 = vsel %vm707_vm3, %v4468_v29, %v4472_v22  ;;  %v4476_v48 = vsel %vm707_vm3, %v4472_v22, %v4468_v29 }
 0x72a   : > { %v4479_v33 = vmul.f32 %v4476_v48, %v8842_v43  ;;  %v4480_v46 = vmul.f32 %v4474_v9, %v8845_v12  ;;  %6038 = vmatprep.subr.bf16.mxu1 %v6037_v5 }
 0x72b   : > { %6040 = vmatpush1.bf16.msra.mxu1 %v6039_v18 }
 0x72c   : > { %v6043_v54 = vpack.c.bf16 %v4479_v33, %v4477_v24  ;;  %v4486_v2 = vpop.permute.xlu1 %4485  ;;  %v9207_v20 = vpop.permute.xlu0 %4207  ;;  %v6041_v40 = vpack.c.bf16 %v4480_v46, %v4478_v36 }
 0x72d   : > { %v4489_v29 = vsel %vm740_vm4, %v9141_v23, %v4486_v2  ;;  %v4491_v49 = vsel %vm740_vm4, %v4486_v2, %v9141_v23 }
 0x72e   : > { %6042 = vmatprep.subr.bf16.mxu1 %v6041_v40  ;;  %v4493_v61 = vmul.f32 %v4489_v29, %v8856_v39  ;;  %v4494_v34 = vmul.f32 %v4491_v49, %v8859_v51 }
 0x72f   : > { %6044 = vmatpush1.bf16.msra.mxu1 %v6043_v54 }
 0x730   : > { %v4502_v17 = vpop.permute.xlu1 %4501  ;;  %6046 = vmatprep.subr.bf16.mxu1 %v6045_v14  ;;  %v4488_v47 = vpop.permute.xlu0 %4487 }
 0x731   : > { %v4490_v16 = vsel %vm740_vm4, %v9145_v53, %v4488_v47  ;;  %v4492_v25 = vsel %vm740_vm4, %v4488_v47, %v9145_v53  ;;  %v4505_v45 = vsel %vm3902_vm12, %v9143_v0, %v4502_v17  ;;  %v4507_v4 = vsel %vm3902_vm12, %v4502_v17, %v9143_v0  ;;  %v4672_v47 = vld [vmem:[%s9567_s14 + $0x80] sm:$0xff] }
 0x732   : > { %v4495_v23 = vmul.f32 %v4490_v16, %v8856_v39  ;;  %v4496_v8 = vmul.f32 %v4492_v25, %v8859_v51  ;;  %v4509_v30 = vmul.f32 %v4505_v45, %v8875_v10  ;;  %v4510_v0 = vmul.f32 %v4507_v4, %v8878_v41 }
 0x733   : > { %6048 = vmatpush1.bf16.msra.mxu1 %v6047_v13 }
 0x734   : > { %v6051_v14 = vpack.c.bf16 %v4495_v23, %v4493_v61  ;;  %v4518_v53 = vpop.permute.xlu1 %4517  ;;  %v4504_v26 = vpop.permute.xlu0 %4503  ;;  %v6049_v58 = vpack.c.bf16 %v4496_v8, %v4494_v34 }
 0x735   : > { %v4506_v52 = vsel %vm3902_vm12, %v9149_v50, %v4504_v26  ;;  %v4508_v63 = vsel %vm3902_vm12, %v4504_v26, %v9149_v50  ;;  %v4521_v1 = vsel %vm3919_vm13, %v9147_v7, %v4518_v53  ;;  %v4523_v13 = vsel %vm3919_vm13, %v4518_v53, %v9147_v7 }
 0x736   : > { %v4511_v42 = vmul.f32 %v4506_v52, %v8875_v10  ;;  %v4512_v3 = vmul.f32 %v4508_v63, %v8878_v41  ;;  %6050 = vmatprep.subr.bf16.mxu1 %v6049_v58  ;;  %v4525_v24 = vmul.f32 %v4521_v1, %v8882_v62  ;;  %v4526_v36 = vmul.f32 %v4523_v13, %v8885_v28  ;;  %v4656_v52 = vld [vmem:[%s9567_s14] sm:$0xff] }
 0x737   : > { %6052 = vmatpush1.bf16.msra.mxu1 %v6051_v14 }
 0x738   : > { %v6055_v18 = vpack.c.bf16 %v4511_v42, %v4509_v30  ;;  %v4534_v50 = vpop.permute.xlu1 %4533  ;;  %v4520_v22 = vpop.permute.xlu0 %4519  ;;  %v6053_v5 = vpack.c.bf16 %v4512_v3, %v4510_v0 }
 0x739   : > { %v4522_v9 = vsel %vm3919_vm13, %v9153_v15, %v4520_v22  ;;  %v4524_v48 = vsel %vm3919_vm13, %v4520_v22, %v9153_v15  ;;  %v4537_v46 = vsel %vm3936_vm14, %v9151_v37, %v4534_v50  ;;  %v4539_v54 = vsel %vm3936_vm14, %v4534_v50, %v9151_v37  ;;  %v4673_v37 = vld [vmem:[%s9567_s14 + $0x88] sm:$0xff]  ;;  %v9317_v50 = vld [vmem:[%s9562_s9 + $0x18] sm:$0xff] }
 0x73a   : > { %v4527_v33 = vmul.f32 %v4522_v9, %v8882_v62  ;;  %v4528_v7 = vmul.f32 %v4524_v48, %v8885_v28  ;;  %6054 = vmatprep.subr.bf16.mxu1 %v6053_v5  ;;  %v4541_v16 = vmul.f32 %v8910_v59, %v4537_v46  ;;  %v4542_v25 = vmul.f32 %v8903_v38, %v4539_v54  ;;  %v9332_v5 = vld [vmem:[%s9562_s9 + $0x10] sm:$0xff] }
 0x73b   : > { %6056 = vmatpush1.bf16.msra.mxu1 %v6055_v18  ;;  %v9291_v53 = vpack.c.bf16 %v4673_v37, %v4672_v47 }
 0x73c   : > { %v6059_v2 = vpack.c.bf16 %v4527_v33, %v4525_v24  ;;  %v4210_v15 = vpop.permute.xlu1 %4209  ;;  %v4536_v40 = vpop.permute.xlu0 %4535  ;;  %v6057_v29 = vpack.c.bf16 %v4528_v7, %v4526_v36 }
 0x73d   : > { %v4538_v49 = vsel %vm3936_vm14, %v9155_v6, %v4536_v40  ;;  %v4540_v17 = vsel %vm3936_vm14, %v4536_v40, %v9155_v6  ;;  %v4213_v6 = vsel %vm3819_vm9, %v9197_v32, %v4210_v15  ;;  %v4215_v23 = vsel %vm3819_vm9, %v4210_v15, %v9197_v32  ;;  %v4657_v32 = vld [vmem:[%s9567_s14 + $0x8] sm:$0xff] }
 0x73e   : > { %v4543_v61 = vmul.f32 %v8910_v59, %v4538_v49  ;;  %v4544_v34 = vmul.f32 %v8903_v38, %v4540_v17  ;;  %6058 = vmatprep.subr.bf16.mxu1 %v6057_v29  ;;  %v4217_v63 = vmul.f32 %v4215_v23, %v8810_v56  ;;  %v4218_v30 = vmul.f32 %v4213_v6, %v8813_v19 }
 0x73f   : > { %6060 = vmatpush1.bf16.msra.mxu1 %v6059_v2 }
 0x740   : > { %v6063_v8 = vpack.c.bf16 %v4543_v61, %v4541_v16  ;;  %v4222_v45 = vpop.permute.xlu1 %4221  ;;  %v4212_v4 = vpop.permute.xlu0 %4211  ;;  %v6061_v14 = vpack.c.bf16 %v4544_v34, %v4542_v25 }
 0x741   : > { %v4214_v26 = vsel %vm3819_vm9, %v9207_v20, %v4212_v4  ;;  %v4216_v58 = vsel %vm3819_vm9, %v4212_v4, %v9207_v20  ;;  %v9312_v20 = vld [vmem:[%s9562_s9] sm:$0xff] }
 0x742   : > { %v4219_v0 = vmul.f32 %v4216_v58, %v8810_v56  ;;  %v4220_v42 = vmul.f32 %v4214_v26, %v8813_v19  ;;  %6062 = vmatprep.subr.bf16.mxu1 %v6061_v14  ;;  %v9320_v56 = vpack.c.bf16 %v4657_v32, %v4656_v52 }
 0x743   : > { %6064 = vmatpush1.bf16.msra.mxu1 %v6063_v8 }
 0x744   : > { %v5995_v3 = vpack.c.bf16 %v4219_v0, %v4217_v63  ;;  %v4226_v1 = vpop.permute.xlu1 %4225  ;;  %v4224_v13 = vpop.permute.xlu0 %4223  ;;  %v5993_v18 = vpack.c.bf16 %v4220_v42, %v4218_v30  ;;  %6098 = vmatprep.subr.bf16.mxu1 %v9291_v53 }
 0x745   : > { %v4229_v19 = vsel %vm3836_vm10, %v4222_v45, %v4226_v1  ;;  %v4231_v22 = vsel %vm3836_vm10, %v4226_v1, %v4222_v45 }
 0x746   : > { %5994 = vmatprep.subr.bf16.mxu0 %v5993_v18  ;;  %4610 = vmatmul.mubr.f32.vlgmr.msra.gmra.mrb[28].mxu1 %v9312_v20  ;;  %v4233_v33 = vmul.f32 %v4231_v22, %v8817_v35  ;;  %v4234_v7 = vmul.f32 %v4229_v19, %v8820_v27 }
 0x747   : > { %5996 = vmatpush1.bf16.msra.mxu0 %v5995_v3  ;;  %5087 = vmatprep.mubr.msk.f32.mxu1 %vm4333_vm15, %v9317_v50 }
 0x748   : > { %v4238_v9 = vpop.permute.xlu1 %4237  ;;  %v4228_v48 = vpop.permute.xlu0 %4227  ;;  %6100 = vmatpush3.bf16.msra.mxu1 %v9320_v56 }
 0x749   : > { %v4230_v24 = vsel %vm3836_vm10, %v4224_v13, %v4228_v48  ;;  %v4232_v36 = vsel %vm3836_vm10, %v4228_v48, %v4224_v13  ;;  %v6009_v13 = vpack.c.bf16 %v9075_v55, %v9069_v31  ;;  %v6011_v48 = vpack.c.bf16 %v9046_v11, %v9040_v60 }
 0x74a   : > { %v4235_v46 = vmul.f32 %v4232_v36, %v8817_v35  ;;  %v4236_v54 = vmul.f32 %v4230_v24, %v8820_v27  ;;  %4616 = vmatmul.mubr.f32.gmra.mrb[30].mxu1 %v9332_v5 }
 0x74c   : > { %v5999_v2 = vpack.c.bf16 %v4235_v46, %v4233_v33  ;;  %v4242_v15 = vpop.permute.xlu1 %4241  ;;  %v4240_v40 = vpop.permute.xlu0 %4239  ;;  %v5997_v29 = vpack.c.bf16 %v4236_v54, %v4234_v7 }
 0x74d   : > { %v4245_v49 = vsel %vm3853_vm11, %v4238_v9, %v4242_v15  ;;  %v4247_v17 = vsel %vm3853_vm11, %v4242_v15, %v4238_v9 }
 0x74e   : > { %5998 = vmatprep.subr.bf16.mxu0 %v5997_v29  ;;  %v4249_v16 = vmul.f32 %v4247_v17, %v8836_v57  ;;  %v4250_v25 = vmul.f32 %v4245_v49, %v8839_v44 }
 0x74f   : > { %6000 = vmatpush1.bf16.msra.mxu0 %v5999_v2 }
 0x750   : > { %v4254_v47 = vpop.permute.xlu1 %4253  ;;  %v4244_v37 = vpop.permute.xlu0 %4243 }
 0x751   : > { %v4246_v35 = vsel %vm3853_vm11, %v4240_v40, %v4244_v37  ;;  %v4248_v27 = vsel %vm3853_vm11, %v4244_v37, %v4240_v40 }
 0x752   : > { %v4251_v61 = vmul.f32 %v4248_v27, %v8836_v57  ;;  %v4252_v34 = vmul.f32 %v4246_v35, %v8839_v44 }
 0x754   : > { %v6003_v6 = vpack.c.bf16 %v4251_v61, %v4249_v16  ;;  %v4258_v23 = vpop.permute.xlu1 %4257  ;;  %v4256_v8 = vpop.permute.xlu0 %4255  ;;  %v6001_v45 = vpack.c.bf16 %v4252_v34, %v4250_v25 }
 0x755   : > { %v4261_v4 = vsel %vm707_vm3, %v4254_v47, %v4258_v23  ;;  %v4263_v14 = vsel %vm707_vm3, %v4258_v23, %v4254_v47 }
 0x756   : > { %6002 = vmatprep.subr.bf16.mxu0 %v6001_v45  ;;  %v4265_v44 = vmul.f32 %v4263_v14, %v8842_v43  ;;  %v4266_v32 = vmul.f32 %v4261_v4, %v8845_v12 }
 0x757   : > { %6004 = vmatpush1.bf16.msra.mxu0 %v6003_v6 }
 0x758   : > { %v4270_v26 = vpop.permute.xlu1 %4269  ;;  %v4260_v58 = vpop.permute.xlu0 %4259 }
 0x759   : > { %v4262_v52 = vsel %vm707_vm3, %v4256_v8, %v4260_v58  ;;  %v4264_v57 = vsel %vm707_vm3, %v4260_v58, %v4256_v8 }
 0x75a   : > { %v4267_v63 = vmul.f32 %v4264_v57, %v8842_v43  ;;  %v4268_v30 = vmul.f32 %v4262_v52, %v8845_v12 }
 0x75c   : > { %v6007_v0 = vpack.c.bf16 %v4267_v63, %v4265_v44  ;;  %v4274_v42 = vpop.permute.xlu1 %4273  ;;  %v4272_v3 = vpop.permute.xlu0 %4271  ;;  %v6005_v1 = vpack.c.bf16 %v4268_v30, %v4266_v32 }
 0x75d   : > { %v4277_v18 = vsel %vm740_vm4, %v4270_v26, %v4274_v42  ;;  %v4279_v19 = vsel %vm740_vm4, %v4274_v42, %v4270_v26 }
 0x75e   : > { %6006 = vmatprep.subr.bf16.mxu0 %v6005_v1  ;;  %v4281_v31 = vmul.f32 %v4277_v18, %v8856_v39  ;;  %v4282_v55 = vmul.f32 %v4279_v19, %v8859_v51  ;;  %v4661_v18 = vld [vmem:[%s9567_s14 + $0x28] sm:$0xff] }
 0x75f   : > { %6008 = vmatpush1.bf16.msra.mxu0 %v6007_v0 }
 0x760   : > { %v4286_v22 = vpop.permute.xlu1 %4285  ;;  %6010 = vmatprep.subr.bf16.mxu0 %v6009_v13  ;;  %v4276_v43 = vpop.permute.xlu0 %4275  ;;  %v4660_v13 = vld [vmem:[%s9567_s14 + $0x20] sm:$0xff] }
 0x761   : > { %v4278_v12 = vsel %vm740_vm4, %v4272_v3, %v4276_v43  ;;  %v4280_v9 = vsel %vm740_vm4, %v4276_v43, %v4272_v3  ;;  %v6075_v19 = vpack.c.bf16 %v4661_v18, %v4660_v13  ;;  %v4679_v43 = vld [vmem:[%s9567_s14 + $0xb8] sm:$0xff] }
 0x762   : > { %v4283_v24 = vmul.f32 %v4278_v12, %v8856_v39  ;;  %v4284_v36 = vmul.f32 %v4280_v9, %v8859_v51  ;;  %v4662_v9 = vld [vmem:[%s9567_s14 + $0x30] sm:$0xff] }
 0x763   : > { %6012 = vmatpush1.bf16.msra.mxu0 %v6011_v48  ;;  %v4663_v48 = vld [vmem:[%s9567_s14 + $0x38] sm:$0xff] }
 0x764   : > { %v6015_v33 = vpack.c.bf16 %v4283_v24, %v4281_v31  ;;  %v4290_v7 = vpop.permute.xlu1 %4289  ;;  %v4288_v46 = vpop.permute.xlu0 %4287  ;;  %v6013_v54 = vpack.c.bf16 %v4284_v36, %v4282_v55  ;;  %v6079_v31 = vpack.c.bf16 %v4663_v48, %v4662_v9  ;;  %v4680_v55 = vld [vmem:[%s9567_s14 + $0xc0] sm:$0xff]  ;;  %v4681_v24 = vld [vmem:[%s9567_s14 + $0xc8] sm:$0xff] }
 0x765   : > { %v4293_v2 = vsel %vm3902_vm12, %v4286_v22, %v4290_v7  ;;  %v4295_v60 = vsel %vm3902_vm12, %v4290_v7, %v4286_v22  ;;  %v4678_v22 = vld [vmem:[%s9567_s14 + $0xb0] sm:$0xff]  ;;  %v6081_v36 = vpack.c.bf16 %v4681_v24, %v4680_v55  ;;  %v4665_v7 = vld [vmem:[%s9567_s14 + $0x48] sm:$0xff] }
 0x766   : > { %6014 = vmatprep.subr.bf16.mxu0 %v6013_v54  ;;  %v4297_v40 = vmul.f32 %v4293_v2, %v8875_v10  ;;  %v4298_v29 = vmul.f32 %v4295_v60, %v8878_v41  ;;  %v6077_v12 = vpack.c.bf16 %v4679_v43, %v4678_v22  ;;  %v4682_v54 = vld [vmem:[%s9567_s14 + $0xd0] sm:$0xff]  ;;  %v4683_v2 = vld [vmem:[%s9567_s14 + $0xd8] sm:$0xff] }
 0x767   : > { %6016 = vmatpush1.bf16.msra.mxu0 %v6015_v33  ;;  %v4664_v33 = vld [vmem:[%s9567_s14 + $0x40] sm:$0xff]  ;;  %v6085_v60 = vpack.c.bf16 %v4683_v2, %v4682_v54 }
 0x768   : > { %v4302_v11 = vpop.permute.xlu1 %4301  ;;  %v4292_v15 = vpop.permute.xlu0 %4291  ;;  %v4648_v2 = vld [vmem:[%s9513_s16] sm:$0xff] }
 0x769   : > { %v4294_v39 = vsel %vm3902_vm12, %v4288_v46, %v4292_v15  ;;  %v4296_v51 = vsel %vm3902_vm12, %v4292_v15, %v4288_v46  ;;  %v6083_v46 = vpack.c.bf16 %v4665_v7, %v4664_v33  ;;  %v4667_v15 = vld [vmem:[%s9567_s14 + $0x58] sm:$0xff] }
 0x76a   : > { %v4299_v49 = vmul.f32 %v4294_v39, %v8875_v10  ;;  %v4300_v17 = vmul.f32 %v4296_v51, %v8878_v41  ;;  %v4684_v51 = vld [vmem:[%s9567_s14 + $0xe0] sm:$0xff] }
 0x76c   : > { %v6019_v47 = vpack.c.bf16 %v4299_v49, %v4297_v40  ;;  %v4306_v37 = vpop.permute.xlu1 %4305  ;;  %v4304_v35 = vpop.permute.xlu0 %4303  ;;  %v6017_v27 = vpack.c.bf16 %v4300_v17, %v4298_v29  ;;  %v4685_v40 = vld [vmem:[%s9567_s14 + $0xe8] sm:$0xff]  ;;  %v4668_v49 = vld [vmem:[%s9567_s14 + $0x60] sm:$0xff] }
 0x76d   : > { %v4309_v16 = vsel %vm3919_vm13, %v4302_v11, %v4306_v37  ;;  %v4311_v25 = vsel %vm3919_vm13, %v4306_v37, %v4302_v11  ;;  %v4666_v11 = vld [vmem:[%s9567_s14 + $0x50] sm:$0xff]  ;;  %v6089_v29 = vpack.c.bf16 %v4685_v40, %v4684_v51  ;;  %v4669_v17 = vld [vmem:[%s9567_s14 + $0x68] sm:$0xff]  ;;  %v4688_v51 = vmul.f32 %v4648_v2, %v4648_v2 }
 0x76e   : > { %6018 = vmatprep.subr.bf16.mxu0 %v6017_v27  ;;  %v4313_v41 = vmul.f32 %v4309_v16, %v8882_v62  ;;  %v4314_v23 = vmul.f32 %v4311_v25, %v8885_v28  ;;  %v6087_v39 = vpack.c.bf16 %v4667_v15, %v4666_v11  ;;  %v4686_v37 = vld [vmem:[%s9567_s14 + $0xf0] sm:$0xff]  ;;  %v4671_v25 = vld [vmem:[%s9567_s14 + $0x78] sm:$0xff]  ;;  %v4649_v15 = vld [vmem:[%s9513_s16 + $0x8] sm:$0xff] }
 0x76f   : > { %6020 = vmatpush1.bf16.msra.mxu0 %v6019_v47  ;;  %v6091_v47 = vpack.c.bf16 %v4669_v17, %v4668_v49  ;;  %v4670_v27 = vld [vmem:[%s9567_s14 + $0x70] sm:$0xff] }
 0x770   : > { %v4318_v61 = vpop.permute.xlu1 %4317  ;;  %v4308_v34 = vpop.permute.xlu0 %4307 }
 0x771   : > { %v4310_v6 = vsel %vm3919_vm13, %v4304_v35, %v4308_v34  ;;  %v4312_v10 = vsel %vm3919_vm13, %v4308_v34, %v4304_v35  ;;  %v4687_v35 = vld [vmem:[%s9567_s14 + $0xf8] sm:$0xff]  ;;  %v4650_v34 = vld [vmem:[%s9513_s16 + $0x10] sm:$0xff] }
 0x772   : > { %v4315_v8 = vmul.f32 %v4310_v6, %v8882_v62  ;;  %v4316_v45 = vmul.f32 %v4312_v10, %v8885_v28  ;;  %v6093_v16 = vpack.c.bf16 %v4687_v35, %v4686_v37  ;;  %v4654_v6 = vld [vmem:[%s9513_s16 + $0x30] sm:$0xff]  ;;  %v4651_v10 = vld [vmem:[%s9513_s16 + $0x18] sm:$0xff] }
 0x774   : > { %v6023_v4 = vpack.c.bf16 %v4315_v8, %v4313_v41  ;;  %v4322_v14 = vpop.permute.xlu1 %4321  ;;  %v4320_v26 = vpop.permute.xlu0 %4319  ;;  %v6021_v58 = vpack.c.bf16 %v4316_v45, %v4314_v23  ;;  %v4655_v41 = vld [vmem:[%s9513_s16 + $0x38] sm:$0xff]  ;;  %v4690_v23 = vmul.f32 %v4650_v34, %v4650_v34  ;;  %v4694_v8 = vmul.f32 %v4654_v6, %v4654_v6 }
 0x775   : > { %v4325_v52 = vsel %vm3936_vm14, %v4318_v61, %v4322_v14  ;;  %v4327_v57 = vsel %vm3936_vm14, %v4322_v14, %v4318_v61  ;;  %v6095_v61 = vpack.c.bf16 %v4671_v25, %v4670_v27  ;;  %v4691_v45 = vmul.f32 %v4651_v10, %v4651_v10 }
 0x776   : > { %6022 = vmatprep.subr.bf16.mxu0 %v6021_v58  ;;  %v4329_v28 = vmul.f32 %v8910_v59, %v4325_v52  ;;  %v4330_v63 = vmul.f32 %v8903_v38, %v4327_v57  ;;  %v4710_v14 = vadd.f32 %v4694_v8, %v4690_v23 }
 0x777   : > { %6024 = vmatpush1.bf16.msra.mxu0 %v6023_v4  ;;  %v4695_v4 = vmul.f32 %v4655_v41, %v4655_v41 }
 0x778   : > { %v4324_v44 = vpop.permute.xlu0 %4323  ;;  %v4711_v58 = vrot.slane %v4710_v14, 4 }
 0x779   : > { %v4326_v32 = vsel %vm3936_vm14, %v4320_v26, %v4324_v44  ;;  %v4328_v62 = vsel %vm3936_vm14, %v4324_v44, %v4320_v26  ;;  %v4717_v26 = vadd.f32 %v4695_v4, %v4691_v45 }
 0x77a   : > { %v4331_v30 = vmul.f32 %v8910_v59, %v4326_v32  ;;  %v4332_v0 = vmul.f32 %v8903_v38, %v4328_v62  ;;  %v4675_v38 = vld [vmem:[%s9567_s14 + $0x98] sm:$0xff]  ;;  %v4712_v57 = vadd.f32 %v4711_v58, %v4710_v14 }
 0x77b   : > { %v6069_v59 = vpack.c.bf16 %v4675_v38, %v4674_v21  ;;  %v4718_v52 = vrot.slane %v4717_v26, 4 }
 0x77c   : > { %v6027_v42 = vpack.c.bf16 %v4331_v30, %v4329_v28  ;;  %v6025_v3 = vpack.c.bf16 %v4332_v0, %v4330_v63  ;;  %v4713_v32 = vrot.slane %v4712_v57, 2 }
 0x77d   : > { %6102 = vmatprep.subr.bf16.mxu1 %v6069_v59  ;;  %v4719_v44 = vadd.f32 %v4718_v52, %v4717_v26 }
 0x77e   : > { %6026 = vmatprep.subr.bf16.mxu0 %v6025_v3  ;;  %v4714_v28 = vadd.f32 %v4713_v32, %v4712_v57 }
 0x77f   : > { %6028 = vmatpush1.bf16.msra.mxu0 %v6027_v42  ;;  %v4720_v62 = vrot.slane %v4719_v44, 2 }
 0x780   : > { %6066 = vmatprep.subr.bf16.mxu0 %v9291_v53  ;;  %v4658_v53 = vld [vmem:[%s9567_s14 + $0x10] sm:$0xff]  ;;  %v4715_v30 = vrot.slane %v4714_v28, 1 }
 0x781   : > { %v4721_v63 = vadd.f32 %v4720_v62, %v4719_v44 }
 0x782   : > { %4405 = vmatmul.mubr.f32.vlgmr.msra.gmra.mrb[28].mxu0 %v9312_v20  ;;  %v4659_v20 = vld [vmem:[%s9567_s14 + $0x18] sm:$0xff]  ;;  %v4716_v42 = vadd.f32 %v4715_v30, %v4714_v28 }
 0x783   : > { %5085 = vmatprep.mubr.msk.f32.mxu0 %vm4333_vm15, %v9317_v50  ;;  %6068 = vmatpush3.bf16.msra.mxu0 %v9320_v56  ;;  %v6071_v50 = vpack.c.bf16 %v4659_v20, %v4658_v53  ;;  %v4676_v56 = vld [vmem:[%s9567_s14 + $0xa0] sm:$0xff]  ;;  %v4722_v0 = vrot.slane %v4721_v63, 1 }
 0x784   : > { %6070 = vmatprep.subr.bf16.mxu0 %v6069_v59  ;;  %v4726_v21 = vmax.f32 %v4716_v42, 1e-24 }
 0x785   : > { %6104 = vmatpush3.bf16.msra.mxu1 %v6071_v50  ;;  %v4723_v3 = vadd.f32 %v4722_v0, %v4721_v63  ;;  %v9519_v59 = vpop.permute.xlu1 %4624 }
 0x786   : > { %4411 = vmatmul.mubr.f32.gmra.mrb[30].mxu0 %v9332_v5  ;;  %v4677_v5 = vld [vmem:[%s9567_s14 + $0xa8] sm:$0xff]  ;;  %6316 = vrsqrt.f32 %v4726_v21 }
 0x787   : > { %6072 = vmatpush3.bf16.msra.mxu0 %v6071_v50  ;;  %v6073_v1 = vpack.c.bf16 %v4677_v5, %v4676_v56  ;;  %v4727_v38 = vmax.f32 %v4723_v3, 1e-24 }
 0x789   : > { %6106 = vmatprep.subr.bf16.mxu1 %v6073_v1  ;;  %6074 = vmatprep.subr.bf16.mxu0 %v6073_v1  ;;  %6318 = vrsqrt.f32 %v4727_v38  ;;  %v9523_v5 = vpop.permute.xlu0 %4629 }
 0x78a   : > { %6108 = vmatpush3.bf16.msra.mxu1 %v6075_v19 }
 0x78b   : > { %6076 = vmatpush3.bf16.msra.mxu0 %v6075_v19  ;;  %6110 = vmatprep.subr.bf16.mxu1 %v6077_v12 }
 0x78c   : > { %6078 = vmatprep.subr.bf16.mxu0 %v6077_v12 }
 0x78e   : > { %6112 = vmatpush3.bf16.msra.mxu1 %v6079_v31 }
 0x78f   : > { %6080 = vmatpush3.bf16.msra.mxu0 %v6079_v31  ;;  %6114 = vmatprep.subr.bf16.mxu1 %v6081_v36 }
 0x790   : > { %6082 = vmatprep.subr.bf16.mxu0 %v6081_v36  ;;  %v6317_v22 = vpop.eup %6316 }
 0x791   : > { %v4734_v12 = vmul.f32 %v6317_v22, %v4650_v34  ;;  %v4738_v24 = vmul.f32 %v6317_v22, %v4654_v6 }
 0x792   : > { %6116 = vmatpush3.bf16.msra.mxu1 %v6083_v46 }
 0x793   : > { %6084 = vmatpush3.bf16.msra.mxu0 %v6083_v46  ;;  %6118 = vmatprep.subr.bf16.mxu1 %v6085_v60  ;;  %v6319_v43 = vpop.eup %6318 }
 0x794   : > { %6086 = vmatprep.subr.bf16.mxu0 %v6085_v60  ;;  %v4735_v9 = vmul.f32 %v6319_v43, %v4651_v10  ;;  %v4739_v33 = vmul.f32 %v6319_v43, %v4655_v41  ;;  %v4652_v60 = vld [vmem:[%s9513_s16 + $0x20] sm:$0xff] }
 0x795   : > { %v4692_v40 = vmul.f32 %v4652_v60, %v4652_v60 }
 0x796   : > { %6120 = vmatpush3.bf16.msra.mxu1 %v6087_v39 }
 0x797   : > { %6088 = vmatpush3.bf16.msra.mxu0 %v6087_v39  ;;  %6122 = vmatprep.subr.bf16.mxu1 %v6089_v29  ;;  %v4653_v39 = vld [vmem:[%s9513_s16 + $0x28] sm:$0xff]  ;;  %v4696_v17 = vadd.f32 %v4692_v40, %v4688_v51 }
 0x798   : > { %6090 = vmatprep.subr.bf16.mxu0 %v6089_v29  ;;  %v4689_v29 = vmul.f32 %v4649_v15, %v4649_v15  ;;  %v4693_v49 = vmul.f32 %v4653_v39, %v4653_v39 }
 0x799   : > { %v4697_v27 = vrot.slane %v4696_v17, 4 }
 0x79a   : > { %6124 = vmatpush3.bf16.msra.mxu1 %v6091_v47 }
 0x79b   : > { %6092 = vmatpush3.bf16.msra.mxu0 %v6091_v47  ;;  %6126 = vmatprep.subr.bf16.mxu1 %v6093_v16  ;;  %v4703_v47 = vadd.f32 %v4693_v49, %v4689_v29  ;;  %v4698_v34 = vadd.f32 %v4697_v27, %v4696_v17 }
 0x79c   : > { %6094 = vmatprep.subr.bf16.mxu0 %v6093_v16 }
 0x79d   : > { %v4704_v16 = vrot.slane %v4703_v47, 4  ;;  %v4699_v10 = vrot.slane %v4698_v34, 2 }
 0x79e   : > { %6128 = vmatpush3.bf16.msra.mxu1 %v6095_v61 }
 0x79f   : > { %6096 = vmatpush3.bf16.msra.mxu0 %v6095_v61  ;;  %v4705_v6 = vadd.f32 %v4704_v16, %v4703_v47  ;;  %v4700_v23 = vadd.f32 %v4699_v10, %v4698_v34 }
 0x7a1   : > { %v4706_v41 = vrot.slane %v4705_v6, 2  ;;  %v4701_v45 = vrot.slane %v4700_v23, 1 }
 0x7a3   : > { %v4707_v8 = vadd.f32 %v4706_v41, %v4705_v6  ;;  %v4702_v14 = vadd.f32 %v4701_v45, %v4700_v23 }
 0x7a5   : > { %v4708_v4 = vrot.slane %v4707_v8, 1  ;;  %v4724_v58 = vmax.f32 %v4702_v14, 1e-24 }
 0x7a7   : > { %v4709_v26 = vadd.f32 %v4708_v4, %v4707_v8 }
 0x7a9   : > { %v4725_v52 = vmax.f32 %v4709_v26, 1e-24 }
 0x819   : > { %v4611_v53 = vpop.f32.mrb[28].mxu1 }
 0x81a   : > { %v4634_v20 = vadd.f32 %v9519_v59, %v4611_v53  ;;  %v4613_v50 = vpop.f32.mrb[29].mxu1 }
 0x81b   : > { %v4635_v56 = vadd.f32 %v9519_v59, %v4613_v50 }
 0x81c   : > { %6320 = vtanh.f32 %v4634_v20 }
 0x81d   : > { %6322 = vtanh.f32 %v4635_v56  ;;  %v4617_v1 = vpop.f32.mrb[30].mxu1 }
 0x81e   : > { %v4638_v13 = vadd.f32 %v9523_v5, %v4617_v1  ;;  %v4619_v18 = vpop.f32.mrb[31].mxu1 }
 0x81f   : > { %v4639_v19 = vadd.f32 %v9523_v5, %v4619_v18 }
 0x820   : > { %6324 = vtanh.f32 %v4638_v13 }
 0x821   : > { %6326 = vtanh.f32 %v4639_v19 }
 0x826   : > { %v6321_v48 = vpop.eup %6320 }
 0x827   : > { %v6323_v31 = vpop.eup %6322  ;;  %v4742_v55 = vmul.f32 %v6321_v48, %v4734_v12 }
 0x828   : > { %v4743_v36 = vmul.f32 %v6323_v31, %v4735_v9 }
 0x82a   : > { %v6325_v7 = vpop.eup %6324  ;;  %6328 = vtanh.f32 %v4743_v36 }
 0x82b   : > { %v6327_v46 = vpop.eup %6326  ;;  %6330 = vtanh.f32 %v4742_v55  ;;  %v4746_v54 = vmul.f32 %v6325_v7, %v4738_v24 }
 0x82c   : > { %v4747_v11 = vmul.f32 %v6327_v46, %v4739_v33 }
 0x82e   : > { %6332 = vtanh.f32 %v4747_v11 }
 0x82f   : > { %6334 = vtanh.f32 %v4746_v54 }
 0x830   : > { %6336 = vrsqrt.f32 %v4724_v58 }
 0x831   : > { %6338 = vrsqrt.f32 %v4725_v52 }
 0x834   : > { %v6329_v37 = vpop.eup %6328 }
 0x835   : > { %v6331_v35 = vpop.eup %6330  ;;  %4895 = vmatprep.mubr.f32.mxu1 %v6329_v37 }
 0x836   : > { %4896 = vmatmul.mubr.f32.vlgmr.msra.gmra.mrb[32].mxu1 %v6331_v35 }
 0x838   : > { %v6333_v25 = vpop.eup %6332 }
 0x839   : > { %v6335_v61 = vpop.eup %6334  ;;  %4900 = vmatprep.mubr.f32.mxu1 %v6333_v25 }
 0x83a   : > { %4901 = vmatmul.mubr.f32.gmra.mrb[34].mxu1 %v6335_v61  ;;  %v6337_v42 = vpop.eup %6336 }
 0x83b   : > { %v6339_v3 = vpop.eup %6338  ;;  %v4732_v21 = vmul.f32 %v6337_v42, %v4648_v2  ;;  %v4736_v56 = vmul.f32 %v6337_v42, %v4652_v60 }
 0x83c   : > { %v4733_v38 = vmul.f32 %v6339_v3, %v4649_v15 }
 0x855   : > { %v4406_v57 = vpop.f32.mrb[28].mxu0 }
 0x856   : > { %v4632_v44 = vadd.f32 %v9519_v59, %v4406_v57  ;;  %v4408_v32 = vpop.f32.mrb[29].mxu0 }
 0x857   : > { %v4633_v62 = vadd.f32 %v9519_v59, %v4408_v32  ;;  %v4737_v59 = vmul.f32 %v6339_v3, %v4653_v39 }
 0x858   : > { %6340 = vtanh.f32 %v4632_v44 }
 0x859   : > { %6342 = vtanh.f32 %v4633_v62  ;;  %v4412_v28 = vpop.f32.mrb[30].mxu0 }
 0x85a   : > { %v4636_v63 = vadd.f32 %v9523_v5, %v4412_v28  ;;  %v4414_v30 = vpop.f32.mrb[31].mxu0 }
 0x85b   : > { %v4637_v0 = vadd.f32 %v9523_v5, %v4414_v30 }
 0x85c   : > { %6344 = vtanh.f32 %v4636_v63 }
 0x85d   : > { %6346 = vtanh.f32 %v4637_v0 }
 0x862   : > { %v6341_v53 = vpop.eup %6340 }
 0x863   : > { %v6343_v20 = vpop.eup %6342  ;;  %v4740_v50 = vmul.f32 %v6341_v53, %v4732_v21 }
 0x864   : > { %v4741_v1 = vmul.f32 %v6343_v20, %v4733_v38 }
 0x866   : > { %v6345_v13 = vpop.eup %6344  ;;  %6348 = vtanh.f32 %v4741_v1 }
 0x867   : > { %v6347_v18 = vpop.eup %6346  ;;  %6350 = vtanh.f32 %v4740_v50  ;;  %v4744_v19 = vmul.f32 %v6345_v13, %v4736_v56 }
 0x868   : > { %v4745_v22 = vmul.f32 %v6347_v18, %v4737_v59 }
 0x86a   : > { %6352 = vtanh.f32 %v4745_v22 }
 0x86b   : > { %6354 = vtanh.f32 %v4744_v19 }
 0x870   : > { %v6349_v5 = vpop.eup %6348 }
 0x871   : > { %v6351_v43 = vpop.eup %6350  ;;  %4820 = vmatprep.mubr.f32.mxu0 %v6349_v5 }
 0x872   : > { %4821 = vmatmul.mubr.f32.vlgmr.msra.gmra.mrb[32].mxu0 %v6351_v43 }
 0x874   : > { %v6353_v12 = vpop.eup %6352 }
 0x875   : > { %v6355_v9 = vpop.eup %6354  ;;  %4825 = vmatprep.mubr.f32.mxu0 %v6353_v12 }
 0x876   : > { %4826 = vmatmul.mubr.f32.gmra.mrb[34].mxu0 %v6355_v9 }
 0x909   : > { %v5443_v48 = vpop.f32.mrb[32].mxu1 }
 0x90a   : > { %v5444_v31 = vpop.f32.mrb[33].mxu1 }
 0x90b   : > { %v5445_v55 = vadd.f32 %v5444_v31, %v5443_v48 }
 0x90d   : > { %v5446_v24 = vpop.f32.mrb[34].mxu1  ;;  %4908 = vrot.lane.b32.xlu1 %v5445_v55, %s6401_s15 }
 0x90e   : > { %v5447_v36 = vpop.f32.mrb[35].mxu1 }
 0x90f   : > { %v5448_v33 = vadd.f32 %v5447_v36, %v5446_v24 }
 0x911   : > { %4910 = vrot.lane.b32.xlu0 %v5448_v33, %s6401_s15 }
 0x945   : > { %v5405_v7 = vpop.f32.mrb[32].mxu0 }
 0x946   : > { %v5406_v46 = vpop.f32.mrb[33].mxu0 }
 0x947   : > { %v5407_v54 = vadd.f32 %v5406_v46, %v5405_v7 }
 0x949   : > { %v5408_v2 = vpop.f32.mrb[34].mxu0 }
 0x94a   : > { %v5409_v60 = vpop.f32.mrb[35].mxu0 }
 0x94b   : > { %v5410_v11 = vadd.f32 %v5409_v60, %v5408_v2 }
 0x97f   : > { %v4909_v15 = vpop.permute.xlu1 %4908  ;;  %4925 = sbr.rel (!%p6513_p5) target bundleno = 2446 (0x98e), region = 107 }
 0x980   : > { %v4915_v39 = vsel %vm4914_vm0, %v5407_v54, %v4909_v15 }
 0x981   : > { %4917 = vst [vmem:[%s554_s27] sm:$0xff] %v4915_v39 }
 0x983   : > { %v4911_v51 = vpop.permute.xlu0 %4910 }
 0x984   : > { %v4916_v40 = vsel %vm4914_vm0, %v5410_v11, %v4911_v51 }
 0x985   : > { %4918 = vst [vmem:[%s554_s27 + $0x8] sm:$0xff] %v4916_v40 }
 0x988   : > { %v4957_v29 = vld [vmem:[%s554_s27] sm:$0xff] }
 0x989   : > { %4958 = vst [vmem:[%s4927_s18] sm:$0xff] %v4957_v29 }
 0x98c   : > { %v4959_v49 = vld [vmem:[%s554_s27 + $0x8] sm:$0xff] }
 0x98d   : > { %4960 = vst [vmem:[%s4927_s18 + $0x10] sm:$0xff] %v4959_v49 }
 0x98e PF: > { %s9651_s20 = sld [smem:[#allocation5_spill]]  ;;  %s9652_s18 = sld [smem:[#allocation4_spill]] }
 0x98f   : > { %s9653_s19 = sld [smem:[#allocation6_spill]] }
 0x994   : > { %p22_p11 = scmp.ge.s32.totalorder %s9651_s20, 4  }
 0x996   :  { %24 = sbr.rel (!%p22_p11) target bundleno = 6 (0x6), region = 182 }

// kernel: motion_model_2d_forward.1
= control target key start
LH: loop header
LB: loop body
LE: loop exit
PB: predicated region body
PF: predicated region fallthrough
CT: control target
= control target key end

     0   :  { %s9553_s0 = inlined_call_operand.vmem [shape: f32[8,4096], index: 0, kind: input, shape index: {}]   ;;  %s9554_s1 = inlined_call_operand.vmem [shape: f32[8,4096], index: 1, kind: input, shape index: {}]   ;;  %s9555_s2 = inlined_call_operand.vmem [shape: f32[16,1024], index: 2, kind: input, shape index: {}]   ;;  %s9556_s3 = inlined_call_operand.vmem [shape: f32[8,72], index: 3, kind: input, shape index: {}]   ;;  %s9557_s4 = inlined_call_operand.vmem [shape: f32[8,1], index: 4, kind: input, shape index: {}]   ;;  %s9558_s5 = inlined_call_operand.vmem [shape: f32[8,72], index: 5, kind: input, shape index: {}]   ;;  %s9559_s6 = inlined_call_operand.vmem [shape: f32[8,1], index: 6, kind: input, shape index: {}]   ;;  %s9560_s7 = inlined_call_operand.vmem [shape: f32[16,72], index: 7, kind: input, shape index: {}]   ;;  %s9561_s8 = inlined_call_operand.vmem [shape: f32[16,1], index: 8, kind: input, shape index: {}]   ;;  %s9562_s9 = inlined_call_operand.vmem [shape: f32[16,144], index: 9, kind: input, shape index: {}]   ;;  %s9563_s10 = inlined_call_operand.vmem [shape: f32[16,1], index: 10, kind: input, shape index: {}]   ;;  %s9564_s11 = inlined_call_operand.vmem [shape: f32[9,512], index: 11, kind: input, shape index: {}]   ;;  %s9565_s12 = inlined_call_operand.vmem [shape: f32[9,256], index: 12, kind: input, shape index: {}]   ;;  %s9566_s13 = inlined_call_operand.vmem [shape: f32[512,128], index: 13, kind: input, shape index: {}]   ;;  %s9567_s14 = inlined_call_operand.vmem [shape: f32[256,64], index: 14, kind: input, shape index: {}]   ;;  %s9568_s15 = inlined_call_operand.vmem [shape: f32[16,256], index: 15, kind: output, shape index: {}]  }
   0x1   :  { %9610 = sst [smem:[#allocation17_spill]] %s9553_s0 }
   0x2   :  { %9611 = sst [smem:[#allocation18_spill]] %s9555_s2 }
   0x3   :  { %9612 = sst [smem:[#allocation19_spill]] %s9568_s15 }
   0x4   :  { %s6482_s18 = smov 0   ;;  %s6484_s19 = smov 0  }
   0x5   :  { %s6486_s20 = smov 0  }
   0x6 LB: > { %9613 = sst [smem:[#allocation4_spill]] %s6379_s19  ;;  %s6498_s21 = sadd.s32 4294967295, %s6383_s20   ;;  %s6383_s20 = sphi %s6486_s20, %s9651_s20   ;;  %s6379_s19 = sphi %s6484_s19, %s9653_s19   ;;  %s6375_s18 = sphi %s6482_s18, %s9652_s18  }
   0x7   : > { %s6501_s22 = sadd.s32 1, %s6383_s20   ;;  %s84_s24 = sadd.s32 1, %s6379_s19 }
   0x8   : > { %9614 = sst [smem:[#allocation5_spill]] %s6501_s22  ;;  %s81_s23 = ssub.s32 %s6383_s20, %s6501_s22 }
   0x9   : > { %p82_p0 = scmp.eq.s32.totalorder %s81_s23, 0  ;;  %p91_p1 = scmp.ne.s32.totalorder %s6379_s19, %s6375_s18 }
   0xa   : > { %p92_p2 = scmp.eq.s32.totalorder %s6383_s20, 0  ;;  %p373_p3 = scmp.eq.s32.totalorder %s6498_s21, 1 }
   0xb   : > { %s6511_s25 = scalar_select %p82_p0, %s6379_s19, %s84_s24  }
   0xc   : > { %p93_p4 = por %p92_p2, %p91_p1  ;;  %p6513_p5 = por %p373_p3, %p91_p1 }
   0xd   : > { %9615 = sst [smem:[#allocation6_spill]] %s6511_s25  ;;  %p5047_p6 = scmp.ge.s32.totalorder %s6383_s20, 2 }
   0xf   : > { %431 = sbr.rel (%p5047_p6) target bundleno = 36 (0x24), region = 64 }
  0x16   : > { %452 = sbr.rel (!%p93_p4) target bundleno = 36 (0x24), region = 76  ;;  %s454_s27 = sand.u32 (%p93_p4), 1, %s6379_s19  }
  0x17   : > { %s5092_s28 = sshll.u32 (%p93_p4), %s6383_s20, 5  ;;  %s5048_s29 = sshll.u32 (%p93_p4), %s454_s27, 6 }
  0x18   : > { %s9617_s2 = sld [smem:[#allocation18_spill]] (%p93_p4)  ;;  %s456_s23 = scalar_lea.vmem (%p93_p4), [#allocation2], %s5048_s29 }
  0x1e   : > { %s459_s17 = scalar_lea.vmem %s9617_s2, %s5092_s28 }
  0x1f   : > { %v472_v0 = vld [vmem:[%s459_s17] sm:$0xff]  ;;  %v474_v1 = vld [vmem:[%s459_s17 + $0x8] sm:$0xff]  ;;  %v476_v2 = vld [vmem:[%s459_s17 + $0x10] sm:$0xff] }
  0x20   : > { %473 = vst [vmem:[%s456_s23] sm:$0xff] %v472_v0  ;;  %475 = vst [vmem:[%s456_s23 + $0x8] sm:$0xff] %v474_v1  ;;  %v478_v3 = vld [vmem:[%s459_s17 + $0x18] sm:$0xff]  ;;  %v480_v4 = vld [vmem:[%s459_s17 + $0x40] sm:$0xff] }
  0x21   : > { %477 = vst [vmem:[%s456_s23 + $0x10] sm:$0xff] %v476_v2  ;;  %v482_v5 = vld [vmem:[%s459_s17 + $0x48] sm:$0xff]  ;;  %479 = vst [vmem:[%s456_s23 + $0x18] sm:$0xff] %v478_v3  ;;  %v484_v6 = vld [vmem:[%s459_s17 + $0x50] sm:$0xff] }
  0x22   : > { %481 = vst [vmem:[%s456_s23 + $0x20] sm:$0xff] %v480_v4  ;;  %483 = vst [vmem:[%s456_s23 + $0x28] sm:$0xff] %v482_v5  ;;  %v486_v7 = vld [vmem:[%s459_s17 + $0x58] sm:$0xff] }
  0x23   : > { %485 = vst [vmem:[%s456_s23 + $0x30] sm:$0xff] %v484_v6  ;;  %487 = vst [vmem:[%s456_s23 + $0x38] sm:$0xff] %v486_v7 }
  0x24 PF: > { %p5051_p7 = scmp.ge.s32.totalorder %s6383_s20, 1  ;;  %p492_p8 = scmp.lt.s32.totalorder %s6383_s20, 3 }
  0x26   : > { %p493_p9 = pnand %p5051_p7, %p492_p8 }
  0x28   : > { %496 = sbr.rel (%p493_p9) target bundleno = 2446 (0x98e), region = 99 }
  0x2f   : > { %s5054_s24 = sshll.u32 %s6498_s21, 4  ;;  %s9618_s0 = sld [smem:[#allocation17_spill]]  ;;  %v9589_v12 = vmov 0.0   ;;  %v606_v17 = vlaneseq  ;;  %v6695_v24 = vld [vmem:[%s9564_s11 + $0x8] sm:$0xff]  ;;  %v6701_v27 = vld [vmem:[%s9564_s11] sm:$0xff]  ;;  %v6706_v28 = vld [vmem:[%s9564_s11 + $0x18] sm:$0xff] }
  0x30   : > { %p556_p10 = scmp.lt.s32.totalorder %s5054_s24, 31  ;;  %s9580_s20 = smov 17   ;;  %932 = vmatprep.mubr.f32.mxu0 %v9589_v12  ;;  %1003 = vmatprep.mubr.f32.mxu1 %v9589_v12  ;;  %v6711_v29 = vld [vmem:[%s9564_s11 + $0x10] sm:$0xff]  ;;  %vm864_vm8 = vcmask 588800   ;;  %vm4333_vm15 = vcmask 130048  }
  0x31   : > { %s9578_s16 = smov 16   ;;  %s9572_s17 = smov 15   ;;  %v6678_v18 = vshrl.u32 %v606_v17, 7  ;;  %v6680_v21 = vand.u32 127, %v606_v17 }
  0x32   : > { %s9655_s24 = smov (!%p556_p10, %s5054_s24), 31  ;;  %s9576_s23 = smov 1  }
  0x33   : > { %s9569_s27 = sshll.u32 %s9655_s24, 3  ;;  %s9574_s28 = smov 127   ;;  %v6687_v22 = vsub.s32 0, %v6678_v18  ;;  %v6690_v23 = vsub.s32 1, %v6678_v18  ;;  %vm608_vm0 = vcmp.lt.s32.totalorder %v6680_v21, 17  ;;  %vm641_vm1 = vcmp.lt.s32.totalorder %v6680_v21, 16 }
  0x34   : > { %s9570_s29 = smov 113   ;;  %v6795_v4 = vsub.s32 2, %v6678_v18  ;;  %v6802_v5 = vsub.s32 3, %v6678_v18  ;;  %vm674_vm2 = vcmp.lt.s32.totalorder %v6680_v21, 15  ;;  %vm707_vm3 = vcmp.lt.s32.totalorder %v6680_v21, 1  ;;  %s9626_s2 = smov 16  }
  0x35   : > { %s6534_s30 = scalar_lea.vmem %s9618_s0, %s9569_s27  ;;  %s9582_s27 = smov 112   ;;  %9620 = vst [vmem:[#allocation7_spill] sm:$0xff] %v6687_v22  ;;  %9621 = vst [vmem:[#allocation8_spill] sm:$0xff] %v6690_v23  ;;  %v6720_v30 = vrot.slane %v6695_v24, %v6687_v22  ;;  %v6724_v31 = vrot.slane %v6695_v24, %v6690_v23  ;;  %v6730_v33 = vrot.slane %v6701_v27, %v6687_v22  ;;  %vm740_vm4 = vcmp.lt.s32.totalorder %v6680_v21, 127 }
  0x36   : > { %v6537_v8 = vld [vmem:[%s6534_s30 + $0x10] sm:$0xff]  ;;  %v6540_v9 = vld [vmem:[%s6534_s30] sm:$0xff]  ;;  %v6547_v10 = vld [vmem:[%s6534_s30 + $0x18] sm:$0xff]  ;;  %v6734_v36 = vrot.slane %v6701_v27, %v6690_v23  ;;  %v6738_v37 = vrot.slane %v6706_v28, %v6687_v22  ;;  %v6742_v38 = vrot.slane %v6706_v28, %v6690_v23  ;;  %v6746_v39 = vrot.slane %v6711_v29, %v6687_v22  ;;  %s9623_s0 = smov 17   ;;  %9624 = vst [vmem:[#allocation9_spill] sm:$0xff] %v6795_v4  ;;  %s9633_s15 = smov 112  }
  0x37   : > { %602 = vrot.lane.b32.xlu1 %v6537_v8, %s9580_s20  ;;  %598 = vrot.lane.b32.xlu0 %v6540_v9, %s9580_s20  ;;  %v6550_v11 = vld [vmem:[%s6534_s30 + $0x8] sm:$0xff]  ;;  %v6618_v14 = vld [vmem:[%s6534_s30 + $0x20] sm:$0xff]  ;;  %v6756_v43 = vrot.slane %v6711_v29, %v6690_v23  ;;  %9625 = vst [vmem:[#allocation10_spill] sm:$0xff] %v6802_v5  ;;  %v6808_v17 = vrot.slane %v6695_v24, %v6795_v4  ;;  %vm773_vm5 = vcmp.lt.s32.totalorder %v6680_v21, 113  ;;  %vm806_vm6 = vcmp.lt.s32.totalorder %v6680_v21, 112  ;;  %s6399_s25 = smov 120  }
  0x38   : > { %v6615_v13 = vld [vmem:[%s6534_s30 + $0x28] sm:$0xff]  ;;  %v6625_v15 = vld [vmem:[%s6534_s30 + $0x38] sm:$0xff]  ;;  %v6628_v16 = vld [vmem:[%s6534_s30 + $0x30] sm:$0xff]  ;;  %vm839_vm7 = vcmp.lt.s32.totalorder %v6680_v21, 111  ;;  %vm3819_vm9 = vcmp.lt.s32.totalorder %v6680_v21, 9  ;;  %vm3836_vm10 = vcmp.lt.s32.totalorder %v6680_v21, 8 }
  0x39   : > { %v6767_v47 = vld [vmem:[%s6534_s30 + $0x48] sm:$0xff]  ;;  %v6770_v48 = vld [vmem:[%s6534_s30 + $0x40] sm:$0xff]  ;;  %v6789_v61 = vld [vmem:[%s6534_s30 + $0x58] sm:$0xff]  ;;  %vm3853_vm11 = vcmp.lt.s32.totalorder %v6680_v21, 7  ;;  %vm3902_vm12 = vcmp.lt.s32.totalorder %v6680_v21, 121  ;;  %vm3919_vm13 = vcmp.lt.s32.totalorder %v6680_v21, 120 }
  0x3a   : > { %v6792_v62 = vld [vmem:[%s6534_s30 + $0x50] sm:$0xff]  ;;  %vm3936_vm14 = vcmp.lt.s32.totalorder %v6680_v21, 119  ;;  %s9650_s22 = sld [smem:[#allocation19_spill]] (%p6513_p5) }
  0x3b   : > { %604 = vrot.lane.b32.xlu1 %v6547_v10, %s9580_s20  ;;  %600 = vrot.lane.b32.xlu0 %v6550_v11, %s9580_s20  ;;  %v4674_v21 = vld [vmem:[%s9567_s14 + $0x90] sm:$0xff] }
  0x3f   : > { %635 = vrot.lane.b32.xlu1 %v6550_v11, %s9578_s16  ;;  %633 = vrot.lane.b32.xlu0 %v6540_v9, %s9578_s16 }
  0x43   : > { %639 = vrot.lane.b32.xlu1 %v6547_v10, %s9578_s16  ;;  %637 = vrot.lane.b32.xlu0 %v6537_v8, %s9578_s16 }
  0x47   : > { %668 = vrot.lane.b32.xlu1 %v6550_v11, %s9572_s17  ;;  %666 = vrot.lane.b32.xlu0 %v6540_v9, %s9572_s17 }
  0x4b   : > { %672 = vrot.lane.b32.xlu1 %v6547_v10, %s9572_s17  ;;  %670 = vrot.lane.b32.xlu0 %v6537_v8, %s9572_s17 }
  0x4f   : > { %701 = vrot.lane.b32.xlu1 %v6550_v11, %s9576_s23  ;;  %699 = vrot.lane.b32.xlu0 %v6540_v9, %s9576_s23 }
  0x53   : > { %705 = vrot.lane.b32.xlu1 %v6547_v10, %s9576_s23  ;;  %703 = vrot.lane.b32.xlu0 %v6537_v8, %s9576_s23 }
  0x57   : > { %734 = vrot.lane.b32.xlu1 %v6550_v11, %s9574_s28  ;;  %732 = vrot.lane.b32.xlu0 %v6540_v9, %s9574_s28 }
  0x5b   : > { %738 = vrot.lane.b32.xlu1 %v6547_v10, %s9574_s28  ;;  %736 = vrot.lane.b32.xlu0 %v6537_v8, %s9574_s28 }
  0x5f   : > { %767 = vrot.lane.b32.xlu1 %v6550_v11, %s9570_s29  ;;  %765 = vrot.lane.b32.xlu0 %v6540_v9, %s9570_s29 }
  0x63   : > { %771 = vrot.lane.b32.xlu1 %v6547_v10, %s9570_s29  ;;  %769 = vrot.lane.b32.xlu0 %v6537_v8, %s9570_s29  ;;  %s9584_s29 = smov 111  }
  0x67   : > { %800 = vrot.lane.b32.xlu1 %v6550_v11, %s9582_s27  ;;  %798 = vrot.lane.b32.xlu0 %v6540_v9, %s9582_s27 }
  0x6b   : > { %804 = vrot.lane.b32.xlu1 %v6547_v10, %s9582_s27  ;;  %802 = vrot.lane.b32.xlu0 %v6537_v8, %s9582_s27 }
  0x6f   : > { %833 = vrot.lane.b32.xlu1 %v6550_v11, %s9584_s29  ;;  %831 = vrot.lane.b32.xlu0 %v6540_v9, %s9584_s29 }
  0x73   : > { %837 = vrot.lane.b32.xlu1 %v6547_v10, %s9584_s29  ;;  %835 = vrot.lane.b32.xlu0 %v6537_v8, %s9584_s29  ;;  %s499_s29 = sand.u32 1, %s6375_s18  }
  0x77   : > { %1012 = vrot.lane.b32.xlu1 %v6615_v13, %s9580_s20  ;;  %1010 = vrot.lane.b32.xlu0 %v6618_v14, %s9580_s20 }
  0x7b   : > { %1016 = vrot.lane.b32.xlu1 %v6625_v15, %s9580_s20  ;;  %1014 = vrot.lane.b32.xlu0 %v6628_v16, %s9580_s20  ;;  %s9629_s20 = smov 1  }
  0x7f   : > { %1028 = vrot.lane.b32.xlu1 %v6615_v13, %s9578_s16  ;;  %1026 = vrot.lane.b32.xlu0 %v6618_v14, %s9578_s16 }
  0x83   : > { %1032 = vrot.lane.b32.xlu1 %v6625_v15, %s9578_s16  ;;  %1030 = vrot.lane.b32.xlu0 %v6628_v16, %s9578_s16  ;;  %s9632_s16 = smov 127  }
  0x87   : > { %1044 = vrot.lane.b32.xlu1 %v6615_v13, %s9572_s17  ;;  %1042 = vrot.lane.b32.xlu0 %v6618_v14, %s9572_s17 }
  0x8b   : > { %1048 = vrot.lane.b32.xlu1 %v6625_v15, %s9572_s17  ;;  %1046 = vrot.lane.b32.xlu0 %v6628_v16, %s9572_s17  ;;  %s9619_s17 = smov 113  }
  0x8f   : > { %1060 = vrot.lane.b32.xlu1 %v6615_v13, %s9576_s23  ;;  %1058 = vrot.lane.b32.xlu0 %v6618_v14, %s9576_s23 }
  0x93   : > { %1064 = vrot.lane.b32.xlu1 %v6625_v15, %s9576_s23  ;;  %1062 = vrot.lane.b32.xlu0 %v6628_v16, %s9576_s23  ;;  %s9622_s23 = smov 111  }
  0x97   : > { %1076 = vrot.lane.b32.xlu1 %v6615_v13, %s9574_s28  ;;  %1074 = vrot.lane.b32.xlu0 %v6618_v14, %s9574_s28 }
  0x9b   : > { %1080 = vrot.lane.b32.xlu1 %v6625_v15, %s9574_s28  ;;  %1078 = vrot.lane.b32.xlu0 %v6628_v16, %s9574_s28 }
  0x9f   : > { %1092 = vrot.lane.b32.xlu1 %v6615_v13, %s9619_s17  ;;  %1090 = vrot.lane.b32.xlu0 %v6618_v14, %s9619_s17 }
  0xa3   : > { %1096 = vrot.lane.b32.xlu1 %v6625_v15, %s9619_s17  ;;  %1094 = vrot.lane.b32.xlu0 %v6628_v16, %s9619_s17 }
  0xa7   : > { %1108 = vrot.lane.b32.xlu1 %v6615_v13, %s9582_s27  ;;  %1106 = vrot.lane.b32.xlu0 %v6618_v14, %s9582_s27 }
  0xa9   : > { %v603_v19 = vpop.permute.xlu1 %602  ;;  %v599_v20 = vpop.permute.xlu0 %598 }
  0xab   : > { %1112 = vrot.lane.b32.xlu1 %v6625_v15, %s9582_s27  ;;  %1110 = vrot.lane.b32.xlu0 %v6628_v16, %s9582_s27  ;;  %s9628_s27 = smov 15  }
  0xad   : > { %v605_v25 = vpop.permute.xlu1 %604  ;;  %v601_v26 = vpop.permute.xlu0 %600 }
  0xae   : > { %v611_v32 = vsel %vm608_vm0, %v599_v20, %v601_v26  ;;  %v612_v40 = vsel %vm608_vm0, %v605_v25, %v599_v20  ;;  %v609_v42 = vsel %vm608_vm0, %v603_v19, %v605_v25  ;;  %v610_v44 = vsel %vm608_vm0, %v601_v26, %v603_v19 }
  0xaf   : > { %1124 = vrot.lane.b32.xlu1 %v6615_v13, %s9622_s23  ;;  %1122 = vrot.lane.b32.xlu0 %v6618_v14, %s9622_s23  ;;  %v630_v45 = vmul.f32 %v6720_v30, %v611_v32  ;;  %v629_v52 = vmul.f32 %v6730_v33, %v612_v40  ;;  %v632_v53 = vmul.f32 %v6738_v37, %v609_v42  ;;  %v6394_v26 = vmov 0  }
  0xb0   : > { %v631_v57 = vmul.f32 %v6746_v39, %v610_v44  ;;  %v6816_v19 = vrot.slane %v6695_v24, %v6802_v5  ;;  %v6822_v25 = vrot.slane %v6701_v27, %v6795_v4  ;;  %6170 = vset.pattern.permute.xlu0 %v6394_v26  ;;  %6171 = vset.pattern.permute.xlu1 %v6394_v26 }
  0xb1   : > { %v636_v34 = vpop.permute.xlu1 %635  ;;  %v634_v35 = vpop.permute.xlu0 %633  ;;  %v6826_v32 = vrot.slane %v6711_v29, %v6795_v4  ;;  %v6838_v42 = vrot.slane %v6711_v29, %v6802_v5 }
  0xb2   : > { %v644_v41 = vsel %vm641_vm1, %v634_v35, %v636_v34 }
  0xb3   : > { %1128 = vrot.lane.b32.xlu1 %v6625_v15, %s9622_s23  ;;  %1126 = vrot.lane.b32.xlu0 %v6628_v16, %s9622_s23  ;;  %v663_v46 = vmul.f32 %v6724_v31, %v644_v41  ;;  %v6834_v41 = vrot.slane %v6701_v27, %v6802_v5 }
  0xb5   : > { %v640_v49 = vpop.permute.xlu1 %639  ;;  %v638_v50 = vpop.permute.xlu0 %637  ;;  %v5449_v51 = vpack.c.bf16 %v663_v46, %v630_v45 }
  0xb6   : > { %v645_v54 = vsel %vm641_vm1, %v640_v49, %v634_v35  ;;  %v643_v55 = vsel %vm641_vm1, %v636_v34, %v638_v50  ;;  %v642_v56 = vsel %vm641_vm1, %v638_v50, %v640_v49  ;;  %v6830_v34 = vrot.slane %v6706_v28, %v6795_v4 }
  0xb7   : > { %1282 = vrot.lane.b32.xlu1 %v6767_v47, %s9623_s0  ;;  %1280 = vrot.lane.b32.xlu0 %v6770_v48, %s9623_s0  ;;  %v662_v58 = vmul.f32 %v6734_v36, %v645_v54  ;;  %v665_v59 = vmul.f32 %v6742_v38, %v642_v56  ;;  %v664_v60 = vmul.f32 %v6756_v43, %v643_v55 }
  0xb8   : > { %5450 = vmatprep.subr.bf16.mxu0 %v5449_v51  ;;  %v6848_v49 = vrot.slane %v6706_v28, %v6802_v5 }
  0xb9   : > { %v669_v63 = vpop.permute.xlu1 %668  ;;  %v667_v0 = vpop.permute.xlu0 %666  ;;  %v5451_v1 = vpack.c.bf16 %v662_v58, %v629_v52  ;;  %v5465_v2 = vpack.c.bf16 %v665_v59, %v632_v53  ;;  %v5467_v3 = vpack.c.bf16 %v664_v60, %v631_v57  ;;  %v6861_v58 = vsub.s32 5, %v6678_v18 }
  0xba   : > { %v677_v20 = vsel %vm674_vm2, %v667_v0, %v669_v63 }
  0xbb   : > { %1286 = vrot.lane.b32.xlu1 %v6789_v61, %s9623_s0  ;;  %1284 = vrot.lane.b32.xlu0 %v6792_v62, %s9623_s0  ;;  %v696_v50 = vmul.f32 %v6808_v17, %v677_v20  ;;  %9627 = vst [vmem:[#allocation11_spill] sm:$0xff] %v6861_v58 }
  0xbc   : > { %5452 = vmatpush1.bf16.msra.mxu0 %v5451_v1  ;;  %5466 = vmatprep.subr.bf16.mxu1 %v5465_v2 }
  0xbd   : > { %5468 = vmatpush1.bf16.msra.mxu1 %v5467_v3  ;;  %v673_v6 = vpop.permute.xlu1 %672  ;;  %v671_v7 = vpop.permute.xlu0 %670 }
  0xbe   : > { %v678_v44 = vsel %vm674_vm2, %v673_v6, %v667_v0  ;;  %v676_v45 = vsel %vm674_vm2, %v669_v63, %v671_v7  ;;  %v675_v51 = vsel %vm674_vm2, %v671_v7, %v673_v6 }
  0xbf   : > { %1298 = vrot.lane.b32.xlu1 %v6767_v47, %s9626_s2  ;;  %1296 = vrot.lane.b32.xlu0 %v6770_v48, %s9626_s2  ;;  %v695_v53 = vmul.f32 %v6822_v25, %v678_v44  ;;  %v697_v54 = vmul.f32 %v6826_v32, %v676_v45  ;;  %v698_v59 = vmul.f32 %v6830_v34, %v675_v51 }
  0xc0   : > { %v6884_v44 = vrot.slane %v6706_v28, %v6861_v58 }
  0xc1   : > { %v702_v35 = vpop.permute.xlu1 %701  ;;  %v700_v40 = vpop.permute.xlu0 %699 }
  0xc2   : > { %v710_v46 = vsel %vm707_vm3, %v700_v40, %v702_v35 }
  0xc3   : > { %v729_v52 = vmul.f32 %v6816_v19, %v710_v46  ;;  %1302 = vrot.lane.b32.xlu1 %v6789_v61, %s9626_s2  ;;  %1300 = vrot.lane.b32.xlu0 %v6792_v62, %s9626_s2  ;;  %v6894_v46 = vrot.slane %v6695_v24, %v6861_v58 }
  0xc5   : > { %v706_v55 = vpop.permute.xlu1 %705  ;;  %v704_v56 = vpop.permute.xlu0 %703  ;;  %v5453_v57 = vpack.c.bf16 %v729_v52, %v696_v50  ;;  %v6898_v50 = vrot.slane %v6711_v29, %v6861_v58 }
  0xc6   : > { %v711_v60 = vsel %vm707_vm3, %v706_v55, %v700_v40  ;;  %v708_v63 = vsel %vm707_vm3, %v704_v56, %v706_v55  ;;  %v709_v0 = vsel %vm707_vm3, %v702_v35, %v704_v56  ;;  %v6880_v40 = vrot.slane %v6701_v27, %v6861_v58 }
  0xc7   : > { %v728_v1 = vmul.f32 %v6834_v41, %v711_v60  ;;  %v730_v2 = vmul.f32 %v6838_v42, %v709_v0  ;;  %v731_v3 = vmul.f32 %v6848_v49, %v708_v63  ;;  %1314 = vrot.lane.b32.xlu1 %v6767_v47, %s9628_s27  ;;  %1312 = vrot.lane.b32.xlu0 %v6770_v48, %s9628_s27 }
  0xc8   : > { %5454 = vmatprep.subr.bf16.mxu0 %v5453_v57 }
  0xc9   : > { %v735_v6 = vpop.permute.xlu1 %734  ;;  %v733_v7 = vpop.permute.xlu0 %732  ;;  %v5455_v20 = vpack.c.bf16 %v728_v1, %v695_v53  ;;  %v5469_v26 = vpack.c.bf16 %v731_v3, %v698_v59  ;;  %v5471_v35 = vpack.c.bf16 %v730_v2, %v697_v54 }
  0xca   : > { %v743_v45 = vsel %vm740_vm4, %v733_v7, %v735_v6 }
  0xcb   : > { %1318 = vrot.lane.b32.xlu1 %v6789_v61, %s9628_s27  ;;  %1316 = vrot.lane.b32.xlu0 %v6792_v62, %s9628_s27  ;;  %v761_v53 = vmul.f32 %v6880_v40, %v743_v45 }
  0xcc   : > { %5456 = vmatpush1.bf16.msra.mxu0 %v5455_v20  ;;  %5470 = vmatprep.subr.bf16.mxu1 %v5469_v26 }
  0xcd   : > { %5472 = vmatpush1.bf16.msra.mxu1 %v5471_v35  ;;  %v739_v51 = vpop.permute.xlu1 %738  ;;  %v737_v52 = vpop.permute.xlu0 %736 }
  0xce   : > { %v744_v54 = vsel %vm740_vm4, %v739_v51, %v733_v7  ;;  %v741_v55 = vsel %vm740_vm4, %v737_v52, %v739_v51  ;;  %v742_v56 = vsel %vm740_vm4, %v735_v6, %v737_v52  ;;  %v5459_v6 = vpack.c.bf16 %v761_v53, %v6540_v9 }
  0xcf   : > { %v764_v57 = vmul.f32 %v6884_v44, %v744_v54  ;;  %v762_v59 = vmul.f32 %v6894_v46, %v742_v56  ;;  %v763_v60 = vmul.f32 %v6898_v50, %v741_v55  ;;  %1330 = vrot.lane.b32.xlu1 %v6767_v47, %s9629_s20  ;;  %1328 = vrot.lane.b32.xlu0 %v6770_v48, %s9629_s20 }
  0xd1   : > { %v768_v63 = vpop.permute.xlu1 %767  ;;  %v766_v0 = vpop.permute.xlu0 %765  ;;  %v5457_v1 = vpack.c.bf16 %v762_v59, %v6550_v11  ;;  %v5473_v2 = vpack.c.bf16 %v764_v57, %v6547_v10  ;;  %v5475_v3 = vpack.c.bf16 %v763_v60, %v6537_v8  ;;  %v6923_v11 = vsub.s32 7, %v6678_v18 }
  0xd2   : > { %v6926_v10 = vsub.s32 6, %v6678_v18  ;;  %v776_v59 = vsel %vm773_vm5, %v766_v0, %v768_v63 }
  0xd3   : > { %1334 = vrot.lane.b32.xlu1 %v6789_v61, %s9629_s20  ;;  %1332 = vrot.lane.b32.xlu0 %v6792_v62, %s9629_s20  ;;  %9630 = vst [vmem:[#allocation12_spill] sm:$0xff] %v6923_v11  ;;  %v6948_v35 = vrot.slane %v6701_v27, %v6923_v11  ;;  %v6958_v54 = vrot.slane %v6706_v28, %v6923_v11 }
  0xd4   : > { %5458 = vmatprep.subr.bf16.mxu0 %v5457_v1  ;;  %5474 = vmatprep.subr.bf16.mxu1 %v5473_v2  ;;  %9631 = vst [vmem:[#allocation13_spill] sm:$0xff] %v6926_v10  ;;  %v6936_v8 = vrot.slane %v6706_v28, %v6926_v10  ;;  %v6940_v9 = vrot.slane %v6695_v24, %v6926_v10 }
  0xd5   : > { %5460 = vmatpush1.bf16.msra.mxu0 %v5459_v6  ;;  %5476 = vmatpush1.bf16.msra.mxu1 %v5475_v3  ;;  %v772_v7 = vpop.permute.xlu1 %771  ;;  %v770_v20 = vpop.permute.xlu0 %769  ;;  %v6944_v18 = vrot.slane %v6711_v29, %v6926_v10  ;;  %v6968_v56 = vrot.slane %v6695_v24, %v6923_v11  ;;  %v6972_v57 = vrot.slane %v6711_v29, %v6923_v11 }
  0xd6   : > { %v777_v51 = vsel %vm773_vm5, %v772_v7, %v766_v0  ;;  %v774_v52 = vsel %vm773_vm5, %v770_v20, %v772_v7  ;;  %v775_v53 = vsel %vm773_vm5, %v768_v63, %v770_v20  ;;  %v6976_v28 = vrot.slane %v6701_v27, %v6926_v10 }
  0xd7   : > { %1346 = vrot.lane.b32.xlu1 %v6767_v47, %s9632_s16  ;;  %1344 = vrot.lane.b32.xlu0 %v6770_v48, %s9632_s16  ;;  %v797_v60 = vmul.f32 %v6936_v8, %v777_v51  ;;  %v795_v1 = vmul.f32 %v6940_v9, %v775_v53  ;;  %v796_v2 = vmul.f32 %v6944_v18, %v774_v52 }
  0xd9   : > { %v801_v26 = vpop.permute.xlu1 %800  ;;  %v799_v45 = vpop.permute.xlu0 %798 }
  0xda   : > { %v809_v55 = vsel %vm806_vm6, %v799_v45, %v801_v26 }
  0xdb   : > { %1350 = vrot.lane.b32.xlu1 %v6789_v61, %s9632_s16  ;;  %1348 = vrot.lane.b32.xlu0 %v6792_v62, %s9632_s16  ;;  %v827_v6 = vmul.f32 %v6948_v35, %v809_v55 }
  0xdd   : > { %v805_v3 = vpop.permute.xlu1 %804  ;;  %v803_v24 = vpop.permute.xlu0 %802 }
  0xde   : > { %v810_v29 = vsel %vm806_vm6, %v805_v3, %v799_v45  ;;  %v807_v27 = vsel %vm806_vm6, %v803_v24, %v805_v3  ;;  %v808_v7 = vsel %vm806_vm6, %v801_v26, %v803_v24  ;;  %v794_v45 = vmul.f32 %v6976_v28, %v776_v59  ;;  %v7006_v59 = vld [vmem:[%s9564_s11 + $0x28] ss:$0 sm:$0xff] }
  0xdf   : > { %v830_v63 = vmul.f32 %v6958_v54, %v810_v29  ;;  %v828_v0 = vmul.f32 %v6968_v56, %v808_v7  ;;  %v829_v20 = vmul.f32 %v6972_v57, %v807_v27  ;;  %1362 = vrot.lane.b32.xlu1 %v6767_v47, %s9619_s17  ;;  %1360 = vrot.lane.b32.xlu0 %v6770_v48, %s9619_s17  ;;  %v7023_v29 = vld [vmem:[%s9564_s11 + $0x20] ss:$0 sm:$0xff] }
  0xe0   : > { %v5463_v26 = vpack.c.bf16 %v827_v6, %v794_v45 }
  0xe1   : > { %v834_v51 = vpop.permute.xlu1 %833  ;;  %v832_v52 = vpop.permute.xlu0 %831  ;;  %v5461_v53 = vpack.c.bf16 %v828_v0, %v795_v1  ;;  %v5477_v55 = vpack.c.bf16 %v830_v63, %v797_v60  ;;  %v5479_v3 = vpack.c.bf16 %v829_v20, %v796_v2  ;;  %v7011_v60 = vld [vmem:[%s9564_s11 + $0x38] ss:$0 sm:$0xff]  ;;  %v7016_v1 = vld [vmem:[%s9564_s11 + $0x30] ss:$0 sm:$0xff] }
  0xe2   : > { %v842_v2 = vsel %vm839_vm7, %v832_v52, %v834_v51 }
  0xe3   : > { %1366 = vrot.lane.b32.xlu1 %v6789_v61, %s9619_s17  ;;  %1364 = vrot.lane.b32.xlu0 %v6792_v62, %s9619_s17 }
  0xe4   : > { %5462 = vmatprep.subr.bf16.mxu0 %v5461_v53  ;;  %5478 = vmatprep.subr.bf16.mxu1 %v5477_v55 }
  0xe5   : > { %5464 = vmatpush1.bf16.msra.mxu0 %v5463_v26  ;;  %5480 = vmatpush1.bf16.msra.mxu1 %v5479_v3  ;;  %v838_v24 = vpop.permute.xlu1 %837  ;;  %v836_v6 = vpop.permute.xlu0 %835 }
  0xe6   : > { %v843_v27 = vsel %vm839_vm7, %v838_v24, %v832_v52  ;;  %v840_v7 = vsel %vm839_vm7, %v836_v6, %v838_v24  ;;  %v841_v63 = vsel %vm839_vm7, %v834_v51, %v836_v6  ;;  %v860_v52 = vmul.f32 %v7023_v29, %v842_v2  ;;  %v7042_v51 = vld [vmem:[%s9556_s3] sm:$0xff] }
  0xe7   : > { %1378 = vrot.lane.b32.xlu1 %v6767_v47, %s9633_s15  ;;  %1376 = vrot.lane.b32.xlu0 %v6770_v48, %s9633_s15  ;;  %v861_v0 = vmul.f32 %v7006_v59, %v841_v63  ;;  %v863_v20 = vmul.f32 %v7011_v60, %v843_v27  ;;  %v862_v45 = vmul.f32 %v7016_v1, %v840_v7 }
  0xe9   : > { %v1013_v53 = vpop.permute.xlu1 %1012  ;;  %884 = vmatprep.subr.mxu0 %v861_v0  ;;  %955 = vmatprep.subr.mxu1 %v863_v20  ;;  %v1011_v55 = vpop.permute.xlu0 %1010 }
  0xea   : > { %885 = vmatpush1.msra.mxu0 %v860_v52  ;;  %956 = vmatpush1.msra.mxu1 %v862_v45  ;;  %v1020_v2 = vsel %vm608_vm0, %v1011_v55, %v1013_v53  ;;  %v7075_v52 = vld [vmem:[%s6534_s30 + $0x68] sm:$0xff] }
  0xeb   : > { %1382 = vrot.lane.b32.xlu1 %v6789_v61, %s9633_s15  ;;  %1380 = vrot.lane.b32.xlu0 %v6792_v62, %s9633_s15  ;;  %v1023_v0 = vmul.f32 %v1020_v2, %v6720_v30 }
  0xec   : > { %5062 = vmatmul.mubr.msk.f32.vlgmr.msra.gmra.mrb[0].mxu0 %vm864_vm8, %v7042_v51  ;;  %5063 = vmatmul.mubr.msk.f32.vlgmr.msra.gmra.mrb[0].mxu1 %vm864_vm8, %v7042_v51 }
  0xed   : > { %v1017_v3 = vpop.permute.xlu1 %1016  ;;  %v1015_v26 = vpop.permute.xlu0 %1014  ;;  %1202 = vmatprep.mubr.f32.mxu0 %v9589_v12  ;;  %1273 = vmatprep.mubr.f32.mxu1 %v9589_v12 }
  0xee   : > { %v1021_v27 = vsel %vm608_vm0, %v1017_v3, %v1011_v55  ;;  %v1019_v7 = vsel %vm608_vm0, %v1013_v53, %v1015_v26  ;;  %v1018_v20 = vsel %vm608_vm0, %v1015_v26, %v1017_v3  ;;  %v7078_v55 = vld [vmem:[%s6534_s30 + $0x60] sm:$0xff] }
  0xef   : > { %1394 = vrot.lane.b32.xlu1 %v6767_v47, %s9622_s23  ;;  %1392 = vrot.lane.b32.xlu0 %v6770_v48, %s9622_s23  ;;  %v1022_v53 = vmul.f32 %v1021_v27, %v6730_v33  ;;  %v1024_v2 = vmul.f32 %v1019_v7, %v6746_v39 }
  0xf1   : > { %v1029_v24 = vpop.permute.xlu1 %1028  ;;  %v1027_v6 = vpop.permute.xlu0 %1026 }
  0xf2   : > { %v1036_v63 = vsel %vm641_vm1, %v1027_v6, %v1029_v24 }
  0xf3   : > { %v1039_v45 = vmul.f32 %v1036_v63, %v6724_v31  ;;  %1398 = vrot.lane.b32.xlu1 %v6789_v61, %s9622_s23  ;;  %1396 = vrot.lane.b32.xlu0 %v6792_v62, %s9622_s23  ;;  %v1025_v63 = vmul.f32 %v1018_v20, %v6738_v37 }
  0xf5   : > { %v1033_v12 = vpop.permute.xlu1 %1032  ;;  %v1031_v3 = vpop.permute.xlu0 %1030  ;;  %v5481_v26 = vpack.c.bf16 %v1039_v45, %v1023_v0  ;;  %v7100_v0 = vld [vmem:[%s6534_s30 + $0x70] sm:$0xff] }
  0xf6   : > { %v1037_v11 = vsel %vm641_vm1, %v1033_v12, %v1027_v6  ;;  %v1034_v10 = vsel %vm641_vm1, %v1031_v3, %v1033_v12  ;;  %v1035_v58 = vsel %vm641_vm1, %v1029_v24, %v1031_v3  ;;  %v7097_v6 = vld [vmem:[%s6534_s30 + $0x78] sm:$0xff]  ;;  %s9608_s30 = smov 119  }
  0xf7   : > { %v1038_v5 = vmul.f32 %v1037_v11, %v6734_v36  ;;  %v1040_v27 = vmul.f32 %v1035_v58, %v6756_v43  ;;  %v1041_v7 = vmul.f32 %v1034_v10, %v6742_v38  ;;  %1552 = vrot.lane.b32.xlu1 %v7075_v52, %s9623_s0  ;;  %1550 = vrot.lane.b32.xlu0 %v7078_v55, %s9623_s0 }
  0xf8   : > { %5482 = vmatprep.subr.bf16.mxu0 %v5481_v26 }
  0xf9   : > { %v5483_v12 = vpack.c.bf16 %v1038_v5, %v1022_v53  ;;  %v5499_v20 = vpack.c.bf16 %v1040_v27, %v1024_v2  ;;  %v1045_v24 = vpop.permute.xlu1 %1044  ;;  %v1043_v45 = vpop.permute.xlu0 %1042  ;;  %v5497_v11 = vpack.c.bf16 %v1041_v7, %v1025_v63 }
  0xfa   : > { %v1052_v5 = vsel %vm674_vm2, %v1043_v45, %v1045_v24 }
  0xfb   : > { %1556 = vrot.lane.b32.xlu1 %v7097_v6, %s9623_s0  ;;  %1554 = vrot.lane.b32.xlu0 %v7100_v0, %s9623_s0  ;;  %v1055_v27 = vmul.f32 %v1052_v5, %v6808_v17 }
  0xfc   : > { %5484 = vmatpush1.bf16.msra.mxu0 %v5483_v12  ;;  %5498 = vmatprep.subr.bf16.mxu1 %v5497_v11 }
  0xfd   : > { %5500 = vmatpush1.bf16.msra.mxu1 %v5499_v20  ;;  %v1049_v58 = vpop.permute.xlu1 %1048  ;;  %v1047_v10 = vpop.permute.xlu0 %1046 }
  0xfe   : > { %v1053_v3 = vsel %vm674_vm2, %v1049_v58, %v1043_v45  ;;  %v1051_v26 = vsel %vm674_vm2, %v1045_v24, %v1047_v10  ;;  %v1050_v7 = vsel %vm674_vm2, %v1047_v10, %v1049_v58 }
  0xff   : > { %1568 = vrot.lane.b32.xlu1 %v7075_v52, %s9626_s2  ;;  %1566 = vrot.lane.b32.xlu0 %v7078_v55, %s9626_s2  ;;  %v1054_v20 = vmul.f32 %v1053_v3, %v6822_v25  ;;  %v1056_v24 = vmul.f32 %v1051_v26, %v6826_v32  ;;  %v1057_v5 = vmul.f32 %v1050_v7, %v6830_v34 }
 0x101   : > { %v1061_v53 = vpop.permute.xlu1 %1060  ;;  %v1059_v2 = vpop.permute.xlu0 %1058 }
 0x102   : > { %v1068_v63 = vsel %vm707_vm3, %v1059_v2, %v1061_v53 }
 0x103   : > { %v1071_v12 = vmul.f32 %v1068_v63, %v6816_v19  ;;  %1572 = vrot.lane.b32.xlu1 %v7097_v6, %s9626_s2  ;;  %1570 = vrot.lane.b32.xlu0 %v7100_v0, %s9626_s2 }
 0x105   : > { %v1065_v45 = vpop.permute.xlu1 %1064  ;;  %v1063_v11 = vpop.permute.xlu0 %1062  ;;  %v5485_v4 = vpack.c.bf16 %v1071_v12, %v1055_v27 }
 0x106   : > { %v1069_v58 = vsel %vm707_vm3, %v1065_v45, %v1059_v2  ;;  %v1066_v10 = vsel %vm707_vm3, %v1063_v11, %v1065_v45  ;;  %v1067_v63 = vsel %vm707_vm3, %v1061_v53, %v1063_v11 }
 0x107   : > { %v1070_v23 = vmul.f32 %v1069_v58, %v6834_v41  ;;  %v1072_v3 = vmul.f32 %v1067_v63, %v6838_v42  ;;  %v1073_v26 = vmul.f32 %v1066_v10, %v6848_v49  ;;  %1584 = vrot.lane.b32.xlu1 %v7075_v52, %s9628_s27  ;;  %1582 = vrot.lane.b32.xlu0 %v7078_v55, %s9628_s27 }
 0x108   : > { %5486 = vmatprep.subr.bf16.mxu0 %v5485_v4 }
 0x109   : > { %v5487_v2 = vpack.c.bf16 %v1070_v23, %v1054_v20  ;;  %v5503_v27 = vpack.c.bf16 %v1072_v3, %v1056_v24  ;;  %v1077_v7 = vpop.permute.xlu1 %1076  ;;  %v1075_v12 = vpop.permute.xlu0 %1074  ;;  %v5501_v45 = vpack.c.bf16 %v1073_v26, %v1057_v5 }
 0x10a   : > { %v1084_v53 = vsel %vm740_vm4, %v1075_v12, %v1077_v7 }
 0x10b   : > { %1588 = vrot.lane.b32.xlu1 %v7097_v6, %s9628_s27  ;;  %1586 = vrot.lane.b32.xlu0 %v7100_v0, %s9628_s27  ;;  %v1086_v23 = vmul.f32 %v1084_v53, %v6880_v40 }
 0x10c   : > { %5488 = vmatpush1.bf16.msra.mxu0 %v5487_v2  ;;  %5502 = vmatprep.subr.bf16.mxu1 %v5501_v45 }
 0x10d   : > { %5504 = vmatpush1.bf16.msra.mxu1 %v5503_v27  ;;  %v1081_v11 = vpop.permute.xlu1 %1080  ;;  %v1079_v58 = vpop.permute.xlu0 %1078 }
 0x10e   : > { %v1085_v4 = vsel %vm740_vm4, %v1081_v11, %v1075_v12  ;;  %v1082_v20 = vsel %vm740_vm4, %v1079_v58, %v1081_v11  ;;  %v1083_v24 = vsel %vm740_vm4, %v1077_v7, %v1079_v58  ;;  %v5491_v12 = vpack.c.bf16 %v1086_v23, %v6618_v14 }
 0x10f   : > { %v1089_v5 = vmul.f32 %v1085_v4, %v6884_v44  ;;  %v1087_v10 = vmul.f32 %v1083_v24, %v6894_v46  ;;  %v1088_v63 = vmul.f32 %v1082_v20, %v6898_v50  ;;  %1600 = vrot.lane.b32.xlu1 %v7075_v52, %s9629_s20  ;;  %1598 = vrot.lane.b32.xlu0 %v7078_v55, %s9629_s20 }
 0x111   : > { %v5507_v3 = vpack.c.bf16 %v1088_v63, %v6628_v16  ;;  %v1093_v26 = vpop.permute.xlu1 %1092  ;;  %v1091_v2 = vpop.permute.xlu0 %1090  ;;  %v5489_v27 = vpack.c.bf16 %v1087_v10, %v6615_v13  ;;  %v5505_v7 = vpack.c.bf16 %v1089_v5, %v6625_v15 }
 0x112   : > { %v1100_v23 = vsel %vm773_vm5, %v1091_v2, %v1093_v26 }
 0x113   : > { %1604 = vrot.lane.b32.xlu1 %v7097_v6, %s9629_s20  ;;  %1602 = vrot.lane.b32.xlu0 %v7100_v0, %s9629_s20 }
 0x114   : > { %5490 = vmatprep.subr.bf16.mxu0 %v5489_v27  ;;  %5506 = vmatprep.subr.bf16.mxu1 %v5505_v7 }
 0x115   : > { %5492 = vmatpush1.bf16.msra.mxu0 %v5491_v12  ;;  %v1097_v45 = vpop.permute.xlu1 %1096  ;;  %v1095_v53 = vpop.permute.xlu0 %1094  ;;  %5508 = vmatpush1.bf16.msra.mxu1 %v5507_v3 }
 0x116   : > { %v1101_v15 = vsel %vm773_vm5, %v1097_v45, %v1091_v2  ;;  %v1098_v16 = vsel %vm773_vm5, %v1095_v53, %v1097_v45  ;;  %v1099_v11 = vsel %vm773_vm5, %v1093_v26, %v1095_v53  ;;  %v1102_v45 = vmul.f32 %v1100_v23, %v6976_v28 }
 0x117   : > { %1616 = vrot.lane.b32.xlu1 %v7075_v52, %s9632_s16  ;;  %1614 = vrot.lane.b32.xlu0 %v7078_v55, %s9632_s16  ;;  %v1105_v4 = vmul.f32 %v1101_v15, %v6936_v8  ;;  %v1103_v20 = vmul.f32 %v1099_v11, %v6940_v9  ;;  %v1104_v24 = vmul.f32 %v1098_v16, %v6944_v18 }
 0x119   : > { %v1109_v13 = vpop.permute.xlu1 %1108  ;;  %v1107_v14 = vpop.permute.xlu0 %1106 }
 0x11a   : > { %v1116_v58 = vsel %vm806_vm6, %v1107_v14, %v1109_v13 }
 0x11b   : > { %1620 = vrot.lane.b32.xlu1 %v7097_v6, %s9632_s16  ;;  %1618 = vrot.lane.b32.xlu0 %v7100_v0, %s9632_s16  ;;  %v1118_v63 = vmul.f32 %v1116_v58, %v6948_v35 }
 0x11d   : > { %v1113_v5 = vpop.permute.xlu1 %1112  ;;  %v1111_v10 = vpop.permute.xlu0 %1110 }
 0x11e   : > { %v1117_v3 = vsel %vm806_vm6, %v1113_v5, %v1107_v14  ;;  %v1114_v27 = vsel %vm806_vm6, %v1111_v10, %v1113_v5  ;;  %v1115_v7 = vsel %vm806_vm6, %v1109_v13, %v1111_v10  ;;  %v5495_v13 = vpack.c.bf16 %v1118_v63, %v1102_v45 }
 0x11f   : > { %v1121_v26 = vmul.f32 %v1117_v3, %v6958_v54  ;;  %v1119_v2 = vmul.f32 %v1115_v7, %v6968_v56  ;;  %v1120_v12 = vmul.f32 %v1114_v27, %v6972_v57  ;;  %1632 = vrot.lane.b32.xlu1 %v7075_v52, %s9619_s17  ;;  %1630 = vrot.lane.b32.xlu0 %v7078_v55, %s9619_s17  ;;  %v9634_v45 = vmov 0.0  }
 0x121   : > { %v5511_v53 = vpack.c.bf16 %v1120_v12, %v1104_v24  ;;  %v1125_v14 = vpop.permute.xlu1 %1124  ;;  %v1123_v15 = vpop.permute.xlu0 %1122  ;;  %v5493_v16 = vpack.c.bf16 %v1119_v2, %v1103_v20  ;;  %v5509_v11 = vpack.c.bf16 %v1121_v26, %v1105_v4 }
 0x122   : > { %v1132_v58 = vsel %vm839_vm7, %v1123_v15, %v1125_v14 }
 0x123   : > { %1636 = vrot.lane.b32.xlu1 %v7097_v6, %s9619_s17  ;;  %1634 = vrot.lane.b32.xlu0 %v7100_v0, %s9619_s17  ;;  %v1134_v27 = vmul.f32 %v7023_v29, %v1132_v58 }
 0x124   : > { %5494 = vmatprep.subr.bf16.mxu0 %v5493_v16  ;;  %5510 = vmatprep.subr.bf16.mxu1 %v5509_v11 }
 0x125   : > { %5496 = vmatpush1.bf16.msra.mxu0 %v5495_v13  ;;  %5512 = vmatpush1.bf16.msra.mxu1 %v5511_v53  ;;  %v1129_v23 = vpop.permute.xlu1 %1128  ;;  %v1127_v24 = vpop.permute.xlu0 %1126 }
 0x126   : > { %v1133_v20 = vsel %vm839_vm7, %v1129_v23, %v1123_v15  ;;  %v1130_v4 = vsel %vm839_vm7, %v1127_v24, %v1129_v23  ;;  %v1131_v5 = vsel %vm839_vm7, %v1125_v14, %v1127_v24 }
 0x127   : > { %v1136_v10 = vmul.f32 %v7016_v1, %v1130_v4  ;;  %1648 = vrot.lane.b32.xlu1 %v7075_v52, %s9633_s15  ;;  %1646 = vrot.lane.b32.xlu0 %v7078_v55, %s9633_s15  ;;  %v1135_v63 = vmul.f32 %v7006_v59, %v1131_v5  ;;  %v1137_v3 = vmul.f32 %v7011_v60, %v1133_v20  ;;  %v597_v20 = vld [vmem:[%s9557_s4] sm:$0xff] }
 0x129   : > { %v1283_v7 = vpop.permute.xlu1 %1282  ;;  %1154 = vmatprep.subr.mxu0 %v1135_v63  ;;  %1225 = vmatprep.subr.mxu1 %v1137_v3  ;;  %v1281_v26 = vpop.permute.xlu0 %1280 }
 0x12a   : > { %1155 = vmatpush1.msra.mxu0 %v1134_v27  ;;  %1226 = vmatpush1.msra.mxu1 %v1136_v10  ;;  %v1290_v53 = vsel %vm608_vm0, %v1281_v26, %v1283_v7 }
 0x12b   : > { %1652 = vrot.lane.b32.xlu1 %v7097_v6, %s9633_s15  ;;  %1650 = vrot.lane.b32.xlu0 %v7100_v0, %s9633_s15  ;;  %v1293_v58 = vmul.f32 %v1290_v53, %v6720_v30 }
 0x12c   : > { %5064 = vmatmul.mubr.msk.f32.vlgmr.msra.gmra.mrb[2].mxu0 %vm864_vm8, %v7042_v51  ;;  %5065 = vmatmul.mubr.msk.f32.vlgmr.msra.gmra.mrb[2].mxu1 %vm864_vm8, %v7042_v51 }
 0x12d   : > { %v1287_v2 = vpop.permute.xlu1 %1286  ;;  %v1285_v12 = vpop.permute.xlu0 %1284  ;;  %1472 = vmatprep.mubr.f32.mxu0 %v9634_v45  ;;  %1543 = vmatprep.mubr.f32.mxu1 %v9634_v45 }
 0x12e   : > { %v1291_v16 = vsel %vm608_vm0, %v1287_v2, %v1281_v26  ;;  %v1289_v11 = vsel %vm608_vm0, %v1283_v7, %v1285_v12  ;;  %v1288_v23 = vsel %vm608_vm0, %v1285_v12, %v1287_v2 }
 0x12f   : > { %1664 = vrot.lane.b32.xlu1 %v7075_v52, %s9622_s23  ;;  %1662 = vrot.lane.b32.xlu0 %v7078_v55, %s9622_s23  ;;  %v1292_v4 = vmul.f32 %v1291_v16, %v6730_v33  ;;  %v1294_v5 = vmul.f32 %v1289_v11, %v6746_v39  ;;  %v1295_v27 = vmul.f32 %v1288_v23, %v6738_v37 }
 0x131   : > { %v1299_v14 = vpop.permute.xlu1 %1298  ;;  %v1297_v15 = vpop.permute.xlu0 %1296 }
 0x132   : > { %v1306_v13 = vsel %vm641_vm1, %v1297_v15, %v1299_v14 }
 0x133   : > { %v1309_v24 = vmul.f32 %v1306_v13, %v6724_v31  ;;  %1668 = vrot.lane.b32.xlu1 %v7097_v6, %s9622_s23  ;;  %1666 = vrot.lane.b32.xlu0 %v7100_v0, %s9622_s23 }
 0x135   : > { %v1303_v10 = vpop.permute.xlu1 %1302  ;;  %v1301_v63 = vpop.permute.xlu0 %1300  ;;  %v5513_v3 = vpack.c.bf16 %v1309_v24, %v1293_v58 }
 0x136   : > { %v1307_v7 = vsel %vm641_vm1, %v1303_v10, %v1297_v15  ;;  %v1304_v26 = vsel %vm641_vm1, %v1301_v63, %v1303_v10  ;;  %v1305_v2 = vsel %vm641_vm1, %v1299_v14, %v1301_v63 }
 0x137   : > { %v1308_v12 = vmul.f32 %v1307_v7, %v6734_v36  ;;  %v1310_v53 = vmul.f32 %v1305_v2, %v6756_v43  ;;  %v1311_v16 = vmul.f32 %v1304_v26, %v6742_v38  ;;  %5514 = vmatprep.subr.bf16.mxu0 %v5513_v3  ;;  %1822 = vperm.xlu0 %6170, %v597_v20  }
 0x139   : > { %v5515_v11 = vpack.c.bf16 %v1308_v12, %v1292_v4  ;;  %v5531_v13 = vpack.c.bf16 %v1310_v53, %v1294_v5  ;;  %v1315_v58 = vpop.permute.xlu1 %1314  ;;  %v1313_v23 = vpop.permute.xlu0 %1312  ;;  %v5529_v24 = vpack.c.bf16 %v1311_v16, %v1295_v27 }
 0x13a   : > { %v1322_v14 = vsel %vm674_vm2, %v1313_v23, %v1315_v58 }
 0x13b   : > { %5516 = vmatpush1.bf16.msra.mxu0 %v5515_v11  ;;  %5530 = vmatprep.subr.bf16.mxu1 %v5529_v24  ;;  %v1325_v4 = vmul.f32 %v1322_v14, %v6808_v17 }
 0x13c   : > { %5532 = vmatpush1.bf16.msra.mxu1 %v5531_v13 }
 0x13d   : > { %v1319_v15 = vpop.permute.xlu1 %1318  ;;  %v1317_v10 = vpop.permute.xlu0 %1316 }
 0x13e   : > { %v1323_v26 = vsel %vm674_vm2, %v1319_v15, %v1313_v23  ;;  %v1321_v5 = vsel %vm674_vm2, %v1315_v58, %v1317_v10  ;;  %v1320_v27 = vsel %vm674_vm2, %v1317_v10, %v1319_v15 }
 0x13f   : > { %v1324_v2 = vmul.f32 %v1323_v26, %v6822_v25  ;;  %v1326_v11 = vmul.f32 %v1321_v5, %v6826_v32  ;;  %v1327_v24 = vmul.f32 %v1320_v27, %v6830_v34 }
 0x141   : > { %v1331_v63 = vpop.permute.xlu1 %1330  ;;  %v1329_v7 = vpop.permute.xlu0 %1328 }
 0x142   : > { %v1338_v20 = vsel %vm707_vm3, %v1329_v7, %v1331_v63 }
 0x143   : > { %v1341_v3 = vmul.f32 %v1338_v20, %v6816_v19 }
 0x145   : > { %v1335_v12 = vpop.permute.xlu1 %1334  ;;  %v1333_v53 = vpop.permute.xlu0 %1332  ;;  %v5517_v16 = vpack.c.bf16 %v1341_v3, %v1325_v4 }
 0x146   : > { %v1339_v13 = vsel %vm707_vm3, %v1335_v12, %v1329_v7  ;;  %v1336_v23 = vsel %vm707_vm3, %v1333_v53, %v1335_v12  ;;  %v1337_v58 = vsel %vm707_vm3, %v1331_v63, %v1333_v53 }
 0x147   : > { %v1340_v15 = vmul.f32 %v1339_v13, %v6834_v41  ;;  %v1342_v10 = vmul.f32 %v1337_v58, %v6838_v42  ;;  %v1343_v14 = vmul.f32 %v1336_v23, %v6848_v49  ;;  %5518 = vmatprep.subr.bf16.mxu0 %v5517_v16 }
 0x149   : > { %v5519_v26 = vpack.c.bf16 %v1340_v15, %v1324_v2  ;;  %v5535_v20 = vpack.c.bf16 %v1342_v10, %v1326_v11  ;;  %v1347_v4 = vpop.permute.xlu1 %1346  ;;  %v1345_v5 = vpop.permute.xlu0 %1344  ;;  %v5533_v7 = vpack.c.bf16 %v1343_v14, %v1327_v24 }
 0x14a   : > { %v1354_v3 = vsel %vm740_vm4, %v1345_v5, %v1347_v4 }
 0x14b   : > { %5520 = vmatpush1.bf16.msra.mxu0 %v5519_v26  ;;  %5534 = vmatprep.subr.bf16.mxu1 %v5533_v7  ;;  %v1356_v12 = vmul.f32 %v1354_v3, %v6880_v40 }
 0x14c   : > { %5536 = vmatpush1.bf16.msra.mxu1 %v5535_v20 }
 0x14d   : > { %v1351_v63 = vpop.permute.xlu1 %1350  ;;  %v1349_v27 = vpop.permute.xlu0 %1348  ;;  %v5523_v26 = vpack.c.bf16 %v1356_v12, %v6770_v48 }
 0x14e   : > { %v1355_v53 = vsel %vm740_vm4, %v1351_v63, %v1345_v5  ;;  %v1352_v2 = vsel %vm740_vm4, %v1349_v27, %v1351_v63  ;;  %v1353_v16 = vsel %vm740_vm4, %v1347_v4, %v1349_v27 }
 0x14f   : > { %v1359_v11 = vmul.f32 %v1355_v53, %v6884_v44  ;;  %v1357_v13 = vmul.f32 %v1353_v16, %v6894_v46  ;;  %v1358_v23 = vmul.f32 %v1352_v2, %v6898_v50 }
 0x151   : > { %v5539_v58 = vpack.c.bf16 %v1358_v23, %v6792_v62  ;;  %v1363_v24 = vpop.permute.xlu1 %1362  ;;  %v1361_v15 = vpop.permute.xlu0 %1360  ;;  %v5521_v10 = vpack.c.bf16 %v1357_v13, %v6767_v47  ;;  %v5537_v14 = vpack.c.bf16 %v1359_v11, %v6789_v61 }
 0x152   : > { %v1370_v61 = vsel %vm773_vm5, %v1361_v15, %v1363_v24 }
 0x153   : > { %5522 = vmatprep.subr.bf16.mxu0 %v5521_v10  ;;  %5538 = vmatprep.subr.bf16.mxu1 %v5537_v14  ;;  %v1372_v10 = vmul.f32 %v1370_v61, %v6976_v28 }
 0x154   : > { %5524 = vmatpush1.bf16.msra.mxu0 %v5523_v26  ;;  %5540 = vmatpush1.bf16.msra.mxu1 %v5539_v58 }
 0x155   : > { %v1367_v20 = vpop.permute.xlu1 %1366  ;;  %v1365_v4 = vpop.permute.xlu0 %1364 }
 0x156   : > { %v1371_v3 = vsel %vm773_vm5, %v1367_v20, %v1361_v15  ;;  %v1369_v62 = vsel %vm773_vm5, %v1363_v24, %v1365_v4  ;;  %v1368_v48 = vsel %vm773_vm5, %v1365_v4, %v1367_v20 }
 0x157   : > { %v1375_v63 = vmul.f32 %v1371_v3, %v6936_v8  ;;  %v1373_v27 = vmul.f32 %v1369_v62, %v6940_v9  ;;  %v1374_v23 = vmul.f32 %v1368_v48, %v6944_v18 }
 0x159   : > { %v1379_v5 = vpop.permute.xlu1 %1378  ;;  %v1377_v7 = vpop.permute.xlu0 %1376 }
 0x15a   : > { %v1386_v47 = vsel %vm806_vm6, %v1377_v7, %v1379_v5 }
 0x15b   : > { %v1388_v2 = vmul.f32 %v1386_v47, %v6948_v35 }
 0x15d   : > { %v1383_v12 = vpop.permute.xlu1 %1382  ;;  %v1381_v53 = vpop.permute.xlu0 %1380  ;;  %v5527_v3 = vpack.c.bf16 %v1388_v2, %v1372_v10 }
 0x15e   : > { %v1387_v16 = vsel %vm806_vm6, %v1383_v12, %v1377_v7  ;;  %v1384_v11 = vsel %vm806_vm6, %v1381_v53, %v1383_v12  ;;  %v1385_v13 = vsel %vm806_vm6, %v1379_v5, %v1381_v53 }
 0x15f   : > { %v1391_v58 = vmul.f32 %v1387_v16, %v6958_v54  ;;  %v1389_v24 = vmul.f32 %v1385_v13, %v6968_v56  ;;  %v1390_v15 = vmul.f32 %v1384_v11, %v6972_v57 }
 0x161   : > { %v5543_v14 = vpack.c.bf16 %v1390_v15, %v1374_v23  ;;  %v1395_v26 = vpop.permute.xlu1 %1394  ;;  %v1393_v20 = vpop.permute.xlu0 %1392  ;;  %v5525_v4 = vpack.c.bf16 %v1389_v24, %v1373_v27  ;;  %v5541_v7 = vpack.c.bf16 %v1391_v58, %v1375_v63 }
 0x162   : > { %v1402_v5 = vsel %vm839_vm7, %v1393_v20, %v1395_v26 }
 0x163   : > { %5526 = vmatprep.subr.bf16.mxu0 %v5525_v4  ;;  %5542 = vmatprep.subr.bf16.mxu1 %v5541_v7  ;;  %v1404_v2 = vmul.f32 %v7023_v29, %v1402_v5 }
 0x164   : > { %5528 = vmatpush1.bf16.msra.mxu0 %v5527_v3  ;;  %5544 = vmatpush1.bf16.msra.mxu1 %v5543_v14 }
 0x165   : > { %v1399_v62 = vpop.permute.xlu1 %1398  ;;  %v1397_v47 = vpop.permute.xlu0 %1396 }
 0x166   : > { %v1403_v48 = vsel %vm839_vm7, %v1399_v62, %v1393_v20  ;;  %v1400_v61 = vsel %vm839_vm7, %v1397_v47, %v1399_v62  ;;  %v1401_v27 = vsel %vm839_vm7, %v1395_v26, %v1397_v47 }
 0x167   : > { %v1406_v63 = vmul.f32 %v7016_v1, %v1400_v61  ;;  %v1405_v12 = vmul.f32 %v7006_v59, %v1401_v27  ;;  %v1407_v53 = vmul.f32 %v7011_v60, %v1403_v48 }
 0x169   : > { %v1553_v16 = vpop.permute.xlu1 %1552  ;;  %1424 = vmatprep.subr.mxu0 %v1405_v12  ;;  %1495 = vmatprep.subr.mxu1 %v1407_v53  ;;  %v1551_v11 = vpop.permute.xlu0 %1550 }
 0x16a   : > { %1425 = vmatpush1.msra.mxu0 %v1404_v2  ;;  %1496 = vmatpush1.msra.mxu1 %v1406_v63  ;;  %v1560_v58 = vsel %vm608_vm0, %v1551_v11, %v1553_v16 }
 0x16b   : > { %5066 = vmatmul.mubr.msk.f32.vlgmr.msra.gmra.mrb[4].mxu0 %vm864_vm8, %v7042_v51  ;;  %5067 = vmatmul.mubr.msk.f32.vlgmr.msra.gmra.mrb[4].mxu1 %vm864_vm8, %v7042_v51  ;;  %v1563_v26 = vmul.f32 %v1560_v58, %v6720_v30 }
 0x16c   : > { %1742 = vmatprep.mubr.f32.mxu0 %v9634_v45  ;;  %1813 = vmatprep.mubr.f32.mxu1 %v9634_v45 }
 0x16d   : > { %v1557_v13 = vpop.permute.xlu1 %1556  ;;  %v1555_v23 = vpop.permute.xlu0 %1554 }
 0x16e   : > { %v1561_v10 = vsel %vm608_vm0, %v1557_v13, %v1551_v11  ;;  %v1559_v20 = vsel %vm608_vm0, %v1553_v16, %v1555_v23  ;;  %v1558_v7 = vsel %vm608_vm0, %v1555_v23, %v1557_v13 }
 0x16f   : > { %v1562_v3 = vmul.f32 %v1561_v10, %v6730_v33  ;;  %v1564_v48 = vmul.f32 %v1559_v20, %v6746_v39  ;;  %v1565_v12 = vmul.f32 %v1558_v7, %v6738_v37 }
 0x171   : > { %v1569_v24 = vpop.permute.xlu1 %1568  ;;  %v1567_v15 = vpop.permute.xlu0 %1566 }
 0x172   : > { %v1576_v14 = vsel %vm641_vm1, %v1567_v15, %v1569_v24 }
 0x173   : > { %v1579_v4 = vmul.f32 %v1576_v14, %v6724_v31 }
 0x175   : > { %v1573_v5 = vpop.permute.xlu1 %1572  ;;  %v1571_v62 = vpop.permute.xlu0 %1570  ;;  %v5545_v47 = vpack.c.bf16 %v1579_v4, %v1563_v26 }
 0x176   : > { %v1577_v61 = vsel %vm641_vm1, %v1573_v5, %v1567_v15  ;;  %v1574_v27 = vsel %vm641_vm1, %v1571_v62, %v1573_v5  ;;  %v1575_v63 = vsel %vm641_vm1, %v1569_v24, %v1571_v62 }
 0x177   : > { %v1578_v53 = vmul.f32 %v1577_v61, %v6734_v36  ;;  %v1580_v2 = vmul.f32 %v1575_v63, %v6756_v43  ;;  %v1581_v16 = vmul.f32 %v1574_v27, %v6742_v38  ;;  %5546 = vmatprep.subr.bf16.mxu0 %v5545_v47 }
 0x179   : > { %v5547_v11 = vpack.c.bf16 %v1578_v53, %v1562_v3  ;;  %v5563_v13 = vpack.c.bf16 %v1580_v2, %v1564_v48  ;;  %v1585_v23 = vpop.permute.xlu1 %1584  ;;  %v1583_v58 = vpop.permute.xlu0 %1582  ;;  %v5561_v15 = vpack.c.bf16 %v1581_v16, %v1565_v12 }
 0x17a   : > { %v1592_v24 = vsel %vm674_vm2, %v1583_v58, %v1585_v23 }
 0x17b   : > { %5548 = vmatpush1.bf16.msra.mxu0 %v5547_v11  ;;  %5562 = vmatprep.subr.bf16.mxu1 %v5561_v15  ;;  %v1595_v3 = vmul.f32 %v1592_v24, %v6808_v17 }
 0x17c   : > { %5564 = vmatpush1.bf16.msra.mxu1 %v5563_v13 }
 0x17d   : > { %v1589_v10 = vpop.permute.xlu1 %1588  ;;  %v1587_v14 = vpop.permute.xlu0 %1586 }
 0x17e   : > { %v1593_v4 = vsel %vm674_vm2, %v1589_v10, %v1583_v58  ;;  %v1591_v5 = vsel %vm674_vm2, %v1585_v23, %v1587_v14  ;;  %v1590_v47 = vsel %vm674_vm2, %v1587_v14, %v1589_v10 }
 0x17f   : > { %v1594_v48 = vmul.f32 %v1593_v4, %v6822_v25  ;;  %v1596_v12 = vmul.f32 %v1591_v5, %v6826_v32  ;;  %v1597_v11 = vmul.f32 %v1590_v47, %v6830_v34 }
 0x181   : > { %v1601_v26 = vpop.permute.xlu1 %1600  ;;  %v1599_v20 = vpop.permute.xlu0 %1598 }
 0x182   : > { %v1608_v7 = vsel %vm707_vm3, %v1599_v20, %v1601_v26 }
 0x183   : > { %v1611_v62 = vmul.f32 %v1608_v7, %v6816_v19 }
 0x185   : > { %v1605_v61 = vpop.permute.xlu1 %1604  ;;  %v1603_v27 = vpop.permute.xlu0 %1602  ;;  %v5549_v63 = vpack.c.bf16 %v1611_v62, %v1595_v3 }
 0x186   : > { %v1609_v53 = vsel %vm707_vm3, %v1605_v61, %v1599_v20  ;;  %v1606_v2 = vsel %vm707_vm3, %v1603_v27, %v1605_v61  ;;  %v1607_v16 = vsel %vm707_vm3, %v1601_v26, %v1603_v27 }
 0x187   : > { %v1610_v13 = vmul.f32 %v1609_v53, %v6834_v41  ;;  %v1612_v23 = vmul.f32 %v1607_v16, %v6838_v42  ;;  %v1613_v58 = vmul.f32 %v1606_v2, %v6848_v49  ;;  %5550 = vmatprep.subr.bf16.mxu0 %v5549_v63 }
 0x189   : > { %v5551_v15 = vpack.c.bf16 %v1610_v13, %v1594_v48  ;;  %v5567_v10 = vpack.c.bf16 %v1612_v23, %v1596_v12  ;;  %v1617_v14 = vpop.permute.xlu1 %1616  ;;  %v1615_v24 = vpop.permute.xlu0 %1614  ;;  %v5565_v20 = vpack.c.bf16 %v1613_v58, %v1597_v11 }
 0x18a   : > { %v1624_v4 = vsel %vm740_vm4, %v1615_v24, %v1617_v14 }
 0x18b   : > { %5552 = vmatpush1.bf16.msra.mxu0 %v5551_v15  ;;  %5566 = vmatprep.subr.bf16.mxu1 %v5565_v20  ;;  %v1626_v3 = vmul.f32 %v1624_v4, %v6880_v40 }
 0x18c   : > { %5568 = vmatpush1.bf16.msra.mxu1 %v5567_v10 }
 0x18d   : > { %v1621_v26 = vpop.permute.xlu1 %1620  ;;  %v1619_v7 = vpop.permute.xlu0 %1618  ;;  %v5555_v11 = vpack.c.bf16 %v1626_v3, %v7078_v55 }
 0x18e   : > { %v1625_v5 = vsel %vm740_vm4, %v1621_v26, %v1615_v24  ;;  %v1622_v62 = vsel %vm740_vm4, %v1619_v7, %v1621_v26  ;;  %v1623_v47 = vsel %vm740_vm4, %v1617_v14, %v1619_v7 }
 0x18f   : > { %v1629_v48 = vmul.f32 %v1625_v5, %v6884_v44  ;;  %v1627_v61 = vmul.f32 %v1623_v47, %v6894_v46  ;;  %v1628_v27 = vmul.f32 %v1622_v62, %v6898_v50 }
 0x191   : > { %v5571_v63 = vpack.c.bf16 %v1628_v27, %v7100_v0  ;;  %v1633_v12 = vpop.permute.xlu1 %1632  ;;  %v1631_v53 = vpop.permute.xlu0 %1630  ;;  %v5553_v2 = vpack.c.bf16 %v1627_v61, %v7075_v52  ;;  %v5569_v16 = vpack.c.bf16 %v1629_v48, %v7097_v6 }
 0x192   : > { %v1640_v6 = vsel %vm773_vm5, %v1631_v53, %v1633_v12 }
 0x193   : > { %5554 = vmatprep.subr.bf16.mxu0 %v5553_v2  ;;  %5570 = vmatprep.subr.bf16.mxu1 %v5569_v16  ;;  %v1642_v27 = vmul.f32 %v1640_v6, %v6976_v28 }
 0x194   : > { %5556 = vmatpush1.bf16.msra.mxu0 %v5555_v11  ;;  %5572 = vmatpush1.bf16.msra.mxu1 %v5571_v63 }
 0x195   : > { %v1637_v13 = vpop.permute.xlu1 %1636  ;;  %v1635_v23 = vpop.permute.xlu0 %1634 }
 0x196   : > { %v1641_v10 = vsel %vm773_vm5, %v1637_v13, %v1631_v53  ;;  %v1639_v0 = vsel %vm773_vm5, %v1633_v12, %v1635_v23  ;;  %v1638_v55 = vsel %vm773_vm5, %v1635_v23, %v1637_v13 }
 0x197   : > { %v1645_v14 = vmul.f32 %v1641_v10, %v6936_v8  ;;  %v1643_v24 = vmul.f32 %v1639_v0, %v6940_v9  ;;  %v1644_v62 = vmul.f32 %v1638_v55, %v6944_v18 }
 0x199   : > { %v1649_v58 = vpop.permute.xlu1 %1648  ;;  %v1647_v15 = vpop.permute.xlu0 %1646 }
 0x19a   : > { %v1656_v52 = vsel %vm806_vm6, %v1647_v15, %v1649_v58 }
 0x19b   : > { %v1658_v26 = vmul.f32 %v1656_v52, %v6948_v35 }
 0x19d   : > { %v1653_v20 = vpop.permute.xlu1 %1652  ;;  %v1651_v4 = vpop.permute.xlu0 %1650  ;;  %v5559_v11 = vpack.c.bf16 %v1658_v26, %v1642_v27 }
 0x19e   : > { %v1657_v7 = vsel %vm806_vm6, %v1653_v20, %v1647_v15  ;;  %v1654_v3 = vsel %vm806_vm6, %v1651_v4, %v1653_v20  ;;  %v1655_v5 = vsel %vm806_vm6, %v1649_v58, %v1651_v4 }
 0x19f   : > { %v1661_v47 = vmul.f32 %v1657_v7, %v6958_v54  ;;  %v1659_v48 = vmul.f32 %v1655_v5, %v6968_v56  ;;  %v1660_v61 = vmul.f32 %v1654_v3, %v6972_v57 }
 0x1a1   : > { %v5575_v63 = vpack.c.bf16 %v1660_v61, %v1644_v62  ;;  %v1665_v12 = vpop.permute.xlu1 %1664  ;;  %v1663_v53 = vpop.permute.xlu0 %1662  ;;  %v5557_v2 = vpack.c.bf16 %v1659_v48, %v1643_v24  ;;  %v5573_v16 = vpack.c.bf16 %v1661_v47, %v1645_v14 }
 0x1a2   : > { %v1672_v13 = vsel %vm839_vm7, %v1663_v53, %v1665_v12 }
 0x1a3   : > { %5558 = vmatprep.subr.bf16.mxu0 %v5557_v2  ;;  %5574 = vmatprep.subr.bf16.mxu1 %v5573_v16  ;;  %v1674_v14 = vmul.f32 %v7023_v29, %v1672_v13 }
 0x1a4   : > { %5560 = vmatpush1.bf16.msra.mxu0 %v5559_v11  ;;  %5576 = vmatpush1.bf16.msra.mxu1 %v5575_v63 }
 0x1a5   : > { %v1669_v23 = vpop.permute.xlu1 %1668  ;;  %v1667_v58 = vpop.permute.xlu0 %1666 }
 0x1a6   : > { %v1673_v15 = vsel %vm839_vm7, %v1669_v23, %v1663_v53  ;;  %v1670_v10 = vsel %vm839_vm7, %v1667_v58, %v1669_v23  ;;  %v1671_v0 = vsel %vm839_vm7, %v1665_v12, %v1667_v58 }
 0x1a7   : > { %v1676_v52 = vmul.f32 %v7016_v1, %v1670_v10  ;;  %v1675_v55 = vmul.f32 %v7006_v59, %v1671_v0  ;;  %v1677_v6 = vmul.f32 %v7011_v60, %v1673_v15 }
 0x1a9   : > { %1694 = vmatprep.subr.mxu0 %v1675_v55  ;;  %1765 = vmatprep.subr.mxu1 %v1677_v6 }
 0x1aa   : > { %1695 = vmatpush1.msra.mxu0 %v1674_v14  ;;  %1766 = vmatpush1.msra.mxu1 %v1676_v52 }
 0x1ab   : > { %5068 = vmatmul.mubr.msk.f32.vlgmr.msra.gmra.mrb[6].mxu0 %vm864_vm8, %v7042_v51  ;;  %5069 = vmatmul.mubr.msk.f32.vlgmr.msra.gmra.mrb[6].mxu1 %vm864_vm8, %v7042_v51 }
 0x1ac   : > { %2054 = vmatprep.mubr.f32.mxu0 %v9634_v45  ;;  %2125 = vmatprep.mubr.f32.mxu1 %v9634_v45 }
 0x1b6   : > { %v7459_v1 = vpop.permute.xlu0 %1822 }
 0x1bf   : > { %v934_v59 = vpop.f32.mrb[0].mxu0  ;;  %v1005_v60 = vpop.f32.mrb[0].mxu1 }
 0x1c0   : > { %v1825_v29 = vadd.f32 %v7459_v1, %v934_v59  ;;  %v1827_v24 = vadd.f32 %v7459_v1, %v1005_v60  ;;  %v936_v20 = vpop.f32.mrb[1].mxu0  ;;  %v1007_v4 = vpop.f32.mrb[1].mxu1 }
 0x1c1   : > { %v1826_v26 = vadd.f32 %v7459_v1, %v936_v20  ;;  %v1828_v51 = vadd.f32 %v7459_v1, %v1007_v4 }
 0x1c2   : > { %6172 = vtanh.f32 %v1825_v29 }
 0x1c3   : > { %6174 = vtanh.f32 %v1827_v24 }
 0x1c4   : > { %6176 = vtanh.f32 %v1826_v26 }
 0x1c5   : > { %6178 = vtanh.f32 %v1828_v51 }
 0x1cc   : > { %v7465_v7 = vpop.eup %6172 }
 0x1cd   : > { %v7467_v3 = vpop.eup %6174  ;;  %1859 = vrot.lane.b32.xlu1 %v7465_v7, %s9623_s0 }
 0x1ce   : > { %1863 = vrot.lane.b32.xlu0 %v7467_v3, %s9623_s0  ;;  %v7473_v5 = vpop.eup %6176 }
 0x1cf   : > { %v7479_v62 = vpop.eup %6178 }
 0x1d1   : > { %1861 = vrot.lane.b32.xlu1 %v7473_v5, %s9623_s0 }
 0x1d2   : > { %1875 = vrot.lane.b32.xlu0 %v7465_v7, %s9626_s2 }
 0x1d5   : > { %1865 = vrot.lane.b32.xlu1 %v7479_v62, %s9623_s0 }
 0x1d6   : > { %1879 = vrot.lane.b32.xlu0 %v7467_v3, %s9626_s2 }
 0x1d9   : > { %1877 = vrot.lane.b32.xlu1 %v7473_v5, %s9626_s2 }
 0x1da   : > { %1891 = vrot.lane.b32.xlu0 %v7465_v7, %s9628_s27 }
 0x1dd   : > { %1881 = vrot.lane.b32.xlu1 %v7479_v62, %s9626_s2 }
 0x1de   : > { %1895 = vrot.lane.b32.xlu0 %v7467_v3, %s9628_s27 }
 0x1e1   : > { %1893 = vrot.lane.b32.xlu1 %v7473_v5, %s9628_s27 }
 0x1e2   : > { %1907 = vrot.lane.b32.xlu0 %v7465_v7, %s9629_s20 }
 0x1e5   : > { %1897 = vrot.lane.b32.xlu1 %v7479_v62, %s9628_s27 }
 0x1e6   : > { %1911 = vrot.lane.b32.xlu0 %v7467_v3, %s9629_s20 }
 0x1e9   : > { %1909 = vrot.lane.b32.xlu1 %v7473_v5, %s9629_s20 }
 0x1ea   : > { %1923 = vrot.lane.b32.xlu0 %v7465_v7, %s9632_s16 }
 0x1ed   : > { %1913 = vrot.lane.b32.xlu1 %v7479_v62, %s9629_s20 }
 0x1ee   : > { %1927 = vrot.lane.b32.xlu0 %v7467_v3, %s9632_s16 }
 0x1f1   : > { %1925 = vrot.lane.b32.xlu1 %v7473_v5, %s9632_s16 }
 0x1f2   : > { %1939 = vrot.lane.b32.xlu0 %v7465_v7, %s9619_s17 }
 0x1f5   : > { %1929 = vrot.lane.b32.xlu1 %v7479_v62, %s9632_s16 }
 0x1f6   : > { %1943 = vrot.lane.b32.xlu0 %v7467_v3, %s9619_s17 }
 0x1f9   : > { %1941 = vrot.lane.b32.xlu1 %v7473_v5, %s9619_s17 }
 0x1fa   : > { %1955 = vrot.lane.b32.xlu0 %v7465_v7, %s9633_s15 }
 0x1fd   : > { %1945 = vrot.lane.b32.xlu1 %v7479_v62, %s9619_s17 }
 0x1fe   : > { %1959 = vrot.lane.b32.xlu0 %v7467_v3, %s9633_s15 }
 0x1ff   : > { %v1204_v47 = vpop.f32.mrb[2].mxu0  ;;  %v1275_v48 = vpop.f32.mrb[2].mxu1 }
 0x200   : > { %v1829_v61 = vadd.f32 %v7459_v1, %v1204_v47  ;;  %v1206_v27 = vpop.f32.mrb[3].mxu0  ;;  %v1277_v63 = vpop.f32.mrb[3].mxu1  ;;  %v1831_v12 = vadd.f32 %v7459_v1, %v1275_v48 }
 0x201   : > { %1957 = vrot.lane.b32.xlu1 %v7473_v5, %s9633_s15  ;;  %v1830_v53 = vadd.f32 %v7459_v1, %v1206_v27  ;;  %v1832_v2 = vadd.f32 %v7459_v1, %v1277_v63 }
 0x202   : > { %6180 = vtanh.f32 %v1829_v61  ;;  %1971 = vrot.lane.b32.xlu0 %v7465_v7, %s9622_s23 }
 0x203   : > { %6182 = vtanh.f32 %v1831_v12 }
 0x204   : > { %6184 = vtanh.f32 %v1830_v53 }
 0x205   : > { %1961 = vrot.lane.b32.xlu1 %v7479_v62, %s9633_s15  ;;  %6186 = vtanh.f32 %v1832_v2 }
 0x206   : > { %1975 = vrot.lane.b32.xlu0 %v7467_v3, %s9622_s23 }
 0x209   : > { %1973 = vrot.lane.b32.xlu1 %v7473_v5, %s9622_s23 }
 0x20c   : > { %v7539_v16 = vpop.eup %6180 }
 0x20d   : > { %2132 = vrot.lane.b32.xlu0 %v7539_v16, %s9623_s0  ;;  %1977 = vrot.lane.b32.xlu1 %v7479_v62, %s9622_s23  ;;  %v7545_v11 = vpop.eup %6182 }
 0x20e   : > { %v7547_v13 = vpop.eup %6184 }
 0x20f   : > { %v7553_v23 = vpop.eup %6186 }
 0x211   : > { %2136 = vrot.lane.b32.xlu0 %v7545_v11, %s9623_s0  ;;  %2134 = vrot.lane.b32.xlu1 %v7547_v13, %s9623_s0 }
 0x215   : > { %2148 = vrot.lane.b32.xlu0 %v7539_v16, %s9626_s2  ;;  %2138 = vrot.lane.b32.xlu1 %v7553_v23, %s9623_s0 }
 0x219   : > { %2152 = vrot.lane.b32.xlu0 %v7545_v11, %s9626_s2  ;;  %2150 = vrot.lane.b32.xlu1 %v7547_v13, %s9626_s2 }
 0x21d   : > { %2164 = vrot.lane.b32.xlu0 %v7539_v16, %s9628_s27  ;;  %2154 = vrot.lane.b32.xlu1 %v7553_v23, %s9626_s2 }
 0x221   : > { %2168 = vrot.lane.b32.xlu0 %v7545_v11, %s9628_s27  ;;  %2166 = vrot.lane.b32.xlu1 %v7547_v13, %s9628_s27 }
 0x225   : > { %2180 = vrot.lane.b32.xlu0 %v7539_v16, %s9629_s20  ;;  %2170 = vrot.lane.b32.xlu1 %v7553_v23, %s9628_s27 }
 0x229   : > { %2184 = vrot.lane.b32.xlu0 %v7545_v11, %s9629_s20  ;;  %2182 = vrot.lane.b32.xlu1 %v7547_v13, %s9629_s20 }
 0x22d   : > { %2196 = vrot.lane.b32.xlu0 %v7539_v16, %s9632_s16  ;;  %2186 = vrot.lane.b32.xlu1 %v7553_v23, %s9629_s20 }
 0x231   : > { %2200 = vrot.lane.b32.xlu0 %v7545_v11, %s9632_s16  ;;  %2198 = vrot.lane.b32.xlu1 %v7547_v13, %s9632_s16 }
 0x235   : > { %2212 = vrot.lane.b32.xlu0 %v7539_v16, %s9619_s17  ;;  %2202 = vrot.lane.b32.xlu1 %v7553_v23, %s9632_s16 }
 0x239   : > { %2216 = vrot.lane.b32.xlu0 %v7545_v11, %s9619_s17  ;;  %2214 = vrot.lane.b32.xlu1 %v7547_v13, %s9619_s17 }
 0x23d   : > { %2228 = vrot.lane.b32.xlu0 %v7539_v16, %s9633_s15  ;;  %2218 = vrot.lane.b32.xlu1 %v7553_v23, %s9619_s17 }
 0x23e   : > { %v1474_v58 = vpop.f32.mrb[4].mxu0  ;;  %v1545_v15 = vpop.f32.mrb[4].mxu1 }
 0x23f   : > { %v1833_v10 = vadd.f32 %v7459_v1, %v1474_v58  ;;  %v1860_v0 = vpop.permute.xlu1 %1859  ;;  %v1476_v52 = vpop.f32.mrb[5].mxu0  ;;  %v1835_v14 = vadd.f32 %v7459_v1, %v1545_v15 }
 0x240   : > { %v1864_v55 = vpop.permute.xlu0 %1863  ;;  %v1547_v6 = vpop.f32.mrb[5].mxu1  ;;  %v1834_v59 = vadd.f32 %v7459_v1, %v1476_v52 }
 0x241   : > { %6188 = vtanh.f32 %v1833_v10  ;;  %2232 = vrot.lane.b32.xlu0 %v7545_v11, %s9633_s15  ;;  %2230 = vrot.lane.b32.xlu1 %v7547_v13, %s9633_s15  ;;  %v1836_v24 = vadd.f32 %v7459_v1, %v1547_v6 }
 0x242   : > { %6190 = vtanh.f32 %v1835_v14 }
 0x243   : > { %v1862_v60 = vpop.permute.xlu1 %1861  ;;  %6192 = vtanh.f32 %v1834_v59 }
 0x244   : > { %v1876_v29 = vpop.permute.xlu0 %1875  ;;  %v1869_v26 = vsel %vm608_vm0, %v1860_v0, %v1862_v60  ;;  %6194 = vtanh.f32 %v1836_v24  ;;  %v1868_v15 = vsel %vm608_vm0, %v1862_v60, %v1864_v55 }
 0x245   : > { %2244 = vrot.lane.b32.xlu0 %v7539_v16, %s9622_s23  ;;  %2234 = vrot.lane.b32.xlu1 %v7553_v23, %s9633_s15  ;;  %v1872_v48 = vmul.f32 %v1869_v26, %v6720_v30  ;;  %v1873_v60 = vmul.f32 %v1868_v15, %v6746_v39 }
 0x247   : > { %v1866_v20 = vpop.permute.xlu1 %1865 }
 0x248   : > { %v1880_v4 = vpop.permute.xlu0 %1879  ;;  %v1867_v63 = vsel %vm608_vm0, %v1864_v55, %v1866_v20  ;;  %v1870_v12 = vsel %vm608_vm0, %v1866_v20, %v1860_v0 }
 0x249   : > { %2248 = vrot.lane.b32.xlu0 %v7545_v11, %s9622_s23  ;;  %2246 = vrot.lane.b32.xlu1 %v7547_v13, %s9622_s23  ;;  %v1871_v0 = vmul.f32 %v1870_v12, %v6730_v33  ;;  %v1874_v14 = vmul.f32 %v1867_v63, %v6738_v37 }
 0x24b   : > { %v7617_v51 = vpop.eup %6188  ;;  %v1878_v47 = vpop.permute.xlu1 %1877 }
 0x24c   : > { %v1892_v61 = vpop.permute.xlu0 %1891  ;;  %v1885_v27 = vsel %vm641_vm1, %v1876_v29, %v1878_v47  ;;  %v1884_v2 = vsel %vm641_vm1, %v1878_v47, %v1880_v4  ;;  %v7633_v58 = vpop.eup %6190 }
 0x24d   : > { %v1888_v53 = vmul.f32 %v1885_v27, %v6724_v31  ;;  %2402 = vrot.lane.b32.xlu0 %v7617_v51, %s9623_s0  ;;  %2250 = vrot.lane.b32.xlu1 %v7553_v23, %s9622_s23  ;;  %9635 = vst [vmem:[#allocation14_spill] sm:$0xff] %v7633_v58  ;;  %v7637_v6 = vpop.eup %6192  ;;  %v1889_v26 = vmul.f32 %v1884_v2, %v6756_v43 }
 0x24e   : > { %9636 = vst [vmem:[#allocation15_spill] sm:$0xff] %v7637_v6  ;;  %v7653_v63 = vpop.eup %6194 }
 0x24f   : > { %v1882_v10 = vpop.permute.xlu1 %1881  ;;  %v5577_v52 = vpack.c.bf16 %v1888_v53, %v1872_v48  ;;  %9637 = vst [vmem:[#allocation16_spill] sm:$0xff] %v7653_v63  ;;  %v5595_v12 = vpack.c.bf16 %v1889_v26, %v1873_v60 }
 0x250   : > { %v1896_v59 = vpop.permute.xlu0 %1895  ;;  %v1883_v24 = vsel %vm641_vm1, %v1880_v4, %v1882_v10  ;;  %v1886_v20 = vsel %vm641_vm1, %v1882_v10, %v1876_v29 }
 0x251   : > { %v1887_v47 = vmul.f32 %v1886_v20, %v6734_v36  ;;  %v1890_v55 = vmul.f32 %v1883_v24, %v6742_v38  ;;  %2406 = vrot.lane.b32.xlu0 %v7633_v58, %s9623_s0  ;;  %2404 = vrot.lane.b32.xlu1 %v7637_v6, %s9623_s0 }
 0x252   : > { %5578 = vmatprep.subr.bf16.mxu0 %v5577_v52 }
 0x253   : > { %v5579_v48 = vpack.c.bf16 %v1887_v47, %v1871_v0  ;;  %v1894_v4 = vpop.permute.xlu1 %1893  ;;  %v5593_v27 = vpack.c.bf16 %v1890_v55, %v1874_v14 }
 0x254   : > { %v1908_v29 = vpop.permute.xlu0 %1907  ;;  %v1901_v15 = vsel %vm674_vm2, %v1892_v61, %v1894_v4  ;;  %v1900_v55 = vsel %vm674_vm2, %v1894_v4, %v1896_v59 }
 0x255   : > { %2418 = vrot.lane.b32.xlu0 %v7617_v51, %s9626_s2  ;;  %2408 = vrot.lane.b32.xlu1 %v7653_v63, %s9623_s0  ;;  %v1904_v52 = vmul.f32 %v1901_v15, %v6808_v17 }
 0x256   : > { %5580 = vmatpush1.bf16.msra.mxu0 %v5579_v48  ;;  %5594 = vmatprep.subr.bf16.mxu1 %v5593_v27 }
 0x257   : > { %5596 = vmatpush1.bf16.msra.mxu1 %v5595_v12  ;;  %v1898_v53 = vpop.permute.xlu1 %1897 }
 0x258   : > { %v1912_v2 = vpop.permute.xlu0 %1911  ;;  %v1899_v24 = vsel %vm674_vm2, %v1896_v59, %v1898_v53  ;;  %v1902_v20 = vsel %vm674_vm2, %v1898_v53, %v1892_v61  ;;  %v1905_v59 = vmul.f32 %v1900_v55, %v6826_v32 }
 0x259   : > { %2422 = vrot.lane.b32.xlu0 %v7633_v58, %s9626_s2  ;;  %2420 = vrot.lane.b32.xlu1 %v7637_v6, %s9626_s2  ;;  %v1903_v27 = vmul.f32 %v1902_v20, %v6822_v25  ;;  %v1906_v61 = vmul.f32 %v1899_v24, %v6830_v34 }
 0x25b   : > { %v1910_v10 = vpop.permute.xlu1 %1909 }
 0x25c   : > { %v1924_v0 = vpop.permute.xlu0 %1923  ;;  %v1917_v14 = vsel %vm707_vm3, %v1908_v29, %v1910_v10  ;;  %v1916_v47 = vsel %vm707_vm3, %v1910_v10, %v1912_v2 }
 0x25d   : > { %v1920_v26 = vmul.f32 %v1917_v14, %v6816_v19  ;;  %2434 = vrot.lane.b32.xlu0 %v7617_v51, %s9628_s27  ;;  %2424 = vrot.lane.b32.xlu1 %v7653_v63, %s9626_s2  ;;  %v1921_v14 = vmul.f32 %v1916_v47, %v6838_v42 }
 0x25f   : > { %v1914_v60 = vpop.permute.xlu1 %1913  ;;  %v5581_v48 = vpack.c.bf16 %v1920_v26, %v1904_v52  ;;  %v5599_v26 = vpack.c.bf16 %v1921_v14, %v1905_v59 }
 0x260   : > { %v1928_v12 = vpop.permute.xlu0 %1927  ;;  %v1915_v53 = vsel %vm707_vm3, %v1912_v2, %v1914_v60  ;;  %v1918_v15 = vsel %vm707_vm3, %v1914_v60, %v1908_v29 }
 0x261   : > { %v1919_v10 = vmul.f32 %v1918_v15, %v6834_v41  ;;  %v1922_v22 = vmul.f32 %v1915_v53, %v6848_v49  ;;  %2438 = vrot.lane.b32.xlu0 %v7633_v58, %s9628_s27  ;;  %2436 = vrot.lane.b32.xlu1 %v7637_v6, %s9628_s27 }
 0x262   : > { %5582 = vmatprep.subr.bf16.mxu0 %v5581_v48 }
 0x263   : > { %v5583_v4 = vpack.c.bf16 %v1919_v10, %v1903_v27  ;;  %v1926_v2 = vpop.permute.xlu1 %1925  ;;  %v5597_v52 = vpack.c.bf16 %v1922_v22, %v1906_v61 }
 0x264   : > { %v1940_v24 = vpop.permute.xlu0 %1939  ;;  %v1932_v29 = vsel %vm740_vm4, %v1926_v2, %v1928_v12  ;;  %v1933_v20 = vsel %vm740_vm4, %v1924_v0, %v1926_v2 }
 0x265   : > { %v1935_v47 = vmul.f32 %v1933_v20, %v6880_v40  ;;  %v1936_v60 = vmul.f32 %v1932_v29, %v6894_v46  ;;  %2450 = vrot.lane.b32.xlu0 %v7617_v51, %s9629_s20  ;;  %2440 = vrot.lane.b32.xlu1 %v7653_v63, %s9628_s27 }
 0x266   : > { %5584 = vmatpush1.bf16.msra.mxu0 %v5583_v4  ;;  %5598 = vmatprep.subr.bf16.mxu1 %v5597_v52 }
 0x267   : > { %v5587_v22 = vpack.c.bf16 %v1935_v47, %v7465_v7  ;;  %5600 = vmatpush1.bf16.msra.mxu1 %v5599_v26  ;;  %v1930_v55 = vpop.permute.xlu1 %1929  ;;  %v5585_v48 = vpack.c.bf16 %v1936_v60, %v7473_v5 }
 0x268   : > { %v1944_v27 = vpop.permute.xlu0 %1943  ;;  %v1931_v61 = vsel %vm740_vm4, %v1928_v12, %v1930_v55  ;;  %v1934_v53 = vsel %vm740_vm4, %v1930_v55, %v1924_v0 }
 0x269   : > { %v1937_v15 = vmul.f32 %v1931_v61, %v6898_v50  ;;  %v1938_v14 = vmul.f32 %v1934_v53, %v6884_v44  ;;  %2454 = vrot.lane.b32.xlu0 %v7633_v58, %s9629_s20  ;;  %2452 = vrot.lane.b32.xlu1 %v7637_v6, %s9629_s20 }
 0x26a   : > { %5586 = vmatprep.subr.bf16.mxu0 %v5585_v48 }
 0x26b   : > { %v5603_v7 = vpack.c.bf16 %v1937_v15, %v7467_v3  ;;  %5588 = vmatpush1.bf16.msra.mxu0 %v5587_v22  ;;  %v1942_v5 = vpop.permute.xlu1 %1941  ;;  %v5601_v12 = vpack.c.bf16 %v1938_v14, %v7479_v62 }
 0x26c   : > { %v1956_v10 = vpop.permute.xlu0 %1955  ;;  %v1948_v4 = vsel %vm773_vm5, %v1942_v5, %v1944_v27  ;;  %v1949_v3 = vsel %vm773_vm5, %v1940_v24, %v1942_v5 }
 0x26d   : > { %2466 = vrot.lane.b32.xlu0 %v7617_v51, %s9632_s16  ;;  %2456 = vrot.lane.b32.xlu1 %v7653_v63, %s9629_s20  ;;  %v1951_v2 = vmul.f32 %v1949_v3, %v6976_v28  ;;  %v1952_v52 = vmul.f32 %v1948_v4, %v6940_v9 }
 0x26e   : > { %5602 = vmatprep.subr.bf16.mxu1 %v5601_v12 }
 0x26f   : > { %5604 = vmatpush1.bf16.msra.mxu1 %v5603_v7  ;;  %v1946_v0 = vpop.permute.xlu1 %1945 }
 0x270   : > { %v1960_v59 = vpop.permute.xlu0 %1959  ;;  %v1947_v26 = vsel %vm773_vm5, %v1944_v27, %v1946_v0  ;;  %v1950_v55 = vsel %vm773_vm5, %v1946_v0, %v1940_v24 }
 0x271   : > { %2470 = vrot.lane.b32.xlu0 %v7633_v58, %s9632_s16  ;;  %2468 = vrot.lane.b32.xlu1 %v7637_v6, %s9632_s16  ;;  %v1953_v15 = vmul.f32 %v1947_v26, %v6944_v18  ;;  %v1954_v7 = vmul.f32 %v1950_v55, %v6936_v8 }
 0x273   : > { %v1958_v62 = vpop.permute.xlu1 %1957 }
 0x274   : > { %v1964_v29 = vsel %vm806_vm6, %v1958_v62, %v1960_v59  ;;  %v1965_v20 = vsel %vm806_vm6, %v1956_v10, %v1958_v62  ;;  %v1972_v47 = vpop.permute.xlu0 %1971  ;;  %v7766_v62 = vld [vmem:[%s9564_s11 + $0x20] ss:$0 sm:$0xff] }
 0x275   : > { %v1967_v60 = vmul.f32 %v1965_v20, %v6948_v35  ;;  %v1968_v22 = vmul.f32 %v1964_v29, %v6968_v56  ;;  %2482 = vrot.lane.b32.xlu0 %v7617_v51, %s9619_s17  ;;  %2472 = vrot.lane.b32.xlu1 %v7653_v63, %s9632_s16 }
 0x277   : > { %v5591_v48 = vpack.c.bf16 %v1967_v60, %v1951_v2  ;;  %v1962_v61 = vpop.permute.xlu1 %1961  ;;  %v5589_v53 = vpack.c.bf16 %v1968_v22, %v1952_v52  ;;  %v7776_v52 = vld [vmem:[%s9564_s11 + $0x28] ss:$0 sm:$0xff] }
 0x278   : > { %v1963_v27 = vsel %vm806_vm6, %v1960_v59, %v1962_v61  ;;  %v1966_v14 = vsel %vm806_vm6, %v1962_v61, %v1956_v10  ;;  %v1976_v24 = vpop.permute.xlu0 %1975 }
 0x279   : > { %v1969_v5 = vmul.f32 %v1963_v27, %v6972_v57  ;;  %v1970_v12 = vmul.f32 %v1966_v14, %v6958_v54  ;;  %2486 = vrot.lane.b32.xlu0 %v7633_v58, %s9619_s17  ;;  %2484 = vrot.lane.b32.xlu1 %v7637_v6, %s9619_s17  ;;  %v7792_v14 = vld [vmem:[%s9564_s11 + $0x30] ss:$0 sm:$0xff] }
 0x27a   : > { %5590 = vmatprep.subr.bf16.mxu0 %v5589_v53 }
 0x27b   : > { %v5607_v0 = vpack.c.bf16 %v1969_v5, %v1953_v15  ;;  %5592 = vmatpush1.bf16.msra.mxu0 %v5591_v48  ;;  %v1974_v59 = vpop.permute.xlu1 %1973  ;;  %v5605_v4 = vpack.c.bf16 %v1970_v12, %v1954_v7  ;;  %v7783_v48 = vld [vmem:[%s9558_s5] sm:$0xff] }
 0x27c   : > { %v1980_v10 = vsel %vm839_vm7, %v1974_v59, %v1976_v24  ;;  %v1981_v3 = vsel %vm839_vm7, %v1972_v47, %v1974_v59 }
 0x27d   : > { %v1983_v2 = vmul.f32 %v7766_v62, %v1981_v3  ;;  %2498 = vrot.lane.b32.xlu0 %v7617_v51, %s9633_s15  ;;  %2488 = vrot.lane.b32.xlu1 %v7653_v63, %s9619_s17  ;;  %v1984_v29 = vmul.f32 %v7776_v52, %v1980_v10 }
 0x27e   : > { %5606 = vmatprep.subr.bf16.mxu1 %v5605_v4  ;;  %v1744_v20 = vpop.f32.mrb[6].mxu0  ;;  %v1815_v26 = vpop.f32.mrb[6].mxu1 }
 0x27f   : > { %5608 = vmatpush1.bf16.msra.mxu1 %v5607_v0  ;;  %v1837_v60 = vadd.f32 %v7459_v1, %v1744_v20  ;;  %v2133_v22 = vpop.permute.xlu0 %2132  ;;  %2006 = vmatprep.subr.mxu0 %v1984_v29  ;;  %v1978_v55 = vpop.permute.xlu1 %1977  ;;  %v1839_v5 = vadd.f32 %v7459_v1, %v1815_v26 }
 0x280   : > { %v1979_v61 = vsel %vm839_vm7, %v1976_v24, %v1978_v55  ;;  %v1982_v53 = vsel %vm839_vm7, %v1978_v55, %v1972_v47  ;;  %v1746_v15 = vpop.f32.mrb[7].mxu0  ;;  %v1817_v27 = vpop.f32.mrb[7].mxu1  ;;  %2007 = vmatpush1.msra.mxu0 %v1983_v2  ;;  %v7805_v47 = vld [vmem:[%s9564_s11 + $0x38] ss:$0 sm:$0xff] }
 0x281   : > { %6196 = vtanh.f32 %v1837_v60  ;;  %v1985_v7 = vmul.f32 %v7792_v14, %v1979_v61  ;;  %2502 = vrot.lane.b32.xlu0 %v7633_v58, %s9633_s15  ;;  %2500 = vrot.lane.b32.xlu1 %v7637_v6, %s9633_s15  ;;  %v1986_v12 = vmul.f32 %v7805_v47, %v1982_v53  ;;  %v1838_v24 = vadd.f32 %v7459_v1, %v1746_v15 }
 0x282   : > { %5070 = vmatmul.mubr.msk.f32.vlgmr.msra.gmra.mrb[8].mxu0 %vm864_vm8, %v7783_v48  ;;  %6198 = vtanh.f32 %v1839_v5  ;;  %v1840_v4 = vadd.f32 %v7459_v1, %v1817_v27 }
 0x283   : > { %v2137_v0 = vpop.permute.xlu0 %2136  ;;  %v2135_v59 = vpop.permute.xlu1 %2134  ;;  %2324 = vmatprep.mubr.f32.mxu0 %v9634_v45  ;;  %2077 = vmatprep.subr.mxu1 %v1986_v12  ;;  %6200 = vtanh.f32 %v1838_v24 }
 0x284   : > { %2078 = vmatpush1.msra.mxu1 %v1985_v7  ;;  %v2142_v2 = vsel %vm608_vm0, %v2133_v22, %v2135_v59  ;;  %6202 = vtanh.f32 %v1840_v4  ;;  %v2141_v27 = vsel %vm608_vm0, %v2135_v59, %v2137_v0 }
 0x285   : > { %2514 = vrot.lane.b32.xlu0 %v7617_v51, %s9622_s23  ;;  %2504 = vrot.lane.b32.xlu1 %v7653_v63, %s9633_s15  ;;  %v2145_v60 = vmul.f32 %v2142_v2, %v6720_v30 }
 0x286   : > { %5071 = vmatmul.mubr.msk.f32.vlgmr.msra.gmra.mrb[8].mxu1 %vm864_vm8, %v7783_v48 }
 0x287   : > { %v2149_v10 = vpop.permute.xlu0 %2148  ;;  %v2139_v3 = vpop.permute.xlu1 %2138  ;;  %2395 = vmatprep.mubr.f32.mxu1 %v9634_v45 }
 0x288   : > { %v2140_v55 = vsel %vm608_vm0, %v2137_v0, %v2139_v3  ;;  %v2143_v61 = vsel %vm608_vm0, %v2139_v3, %v2133_v22 }
 0x289   : > { %2518 = vrot.lane.b32.xlu0 %v7633_v58, %s9622_s23  ;;  %2516 = vrot.lane.b32.xlu1 %v7637_v6, %s9622_s23  ;;  %v2144_v22 = vmul.f32 %v2143_v61, %v6730_v33  ;;  %v2147_v4 = vmul.f32 %v2140_v55, %v6738_v37 }
 0x28b   : > { %v7824_v29 = vpop.eup %6196  ;;  %v2153_v20 = vpop.permute.xlu0 %2152 }
 0x28c   : > { %v2151_v26 = vpop.permute.xlu1 %2150  ;;  %v7842_v24 = vpop.eup %6198 }
 0x28d   : > { %v2158_v1 = vsel %vm641_vm1, %v2149_v10, %v2151_v26  ;;  %2672 = vrot.lane.b32.xlu0 %v7824_v29, %s9623_s0  ;;  %v2157_v15 = vsel %vm641_vm1, %v2151_v26, %v2153_v20  ;;  %2520 = vrot.lane.b32.xlu1 %v7653_v63, %s9622_s23  ;;  %v7850_v26 = vpop.eup %6200 }
 0x28e   : > { %v2161_v53 = vmul.f32 %v2158_v1, %v6724_v31  ;;  %v2162_v1 = vmul.f32 %v2157_v15, %v6756_v43 }
 0x28f   : > { %v2165_v7 = vpop.permute.xlu0 %2164 }
 0x290   : > { %v2155_v5 = vpop.permute.xlu1 %2154  ;;  %v5609_v12 = vpack.c.bf16 %v2161_v53, %v2145_v60  ;;  %v7860_v53 = vpop.eup %6202 }
 0x291   : > { %v2156_v3 = vsel %vm641_vm1, %v2153_v20, %v2155_v5  ;;  %v2159_v2 = vsel %vm641_vm1, %v2155_v5, %v2149_v10  ;;  %2676 = vrot.lane.b32.xlu0 %v7842_v24, %s9623_s0  ;;  %2674 = vrot.lane.b32.xlu1 %v7850_v26, %s9623_s0  ;;  %v2146_v20 = vmul.f32 %v2141_v27, %v6746_v39 }
 0x292   : > { %v2160_v0 = vmul.f32 %v2159_v2, %v6734_v36  ;;  %v2163_v59 = vmul.f32 %v2156_v3, %v6742_v38  ;;  %5610 = vmatprep.subr.bf16.mxu0 %v5609_v12 }
 0x293   : > { %v2169_v55 = vpop.permute.xlu0 %2168  ;;  %v5627_v15 = vpack.c.bf16 %v2162_v1, %v2146_v20 }
 0x294   : > { %v5611_v60 = vpack.c.bf16 %v2160_v0, %v2144_v22  ;;  %v2167_v10 = vpop.permute.xlu1 %2166  ;;  %v5625_v61 = vpack.c.bf16 %v2163_v59, %v2147_v4 }
 0x295   : > { %2688 = vrot.lane.b32.xlu0 %v7824_v29, %s9626_s2  ;;  %2678 = vrot.lane.b32.xlu1 %v7860_v53, %s9623_s0  ;;  %v2174_v27 = vsel %vm674_vm2, %v2165_v7, %v2167_v10 }
 0x296   : > { %5612 = vmatpush1.bf16.msra.mxu0 %v5611_v60  ;;  %5626 = vmatprep.subr.bf16.mxu1 %v5625_v61  ;;  %v2177_v2 = vmul.f32 %v2174_v27, %v6808_v17  ;;  %v2173_v60 = vsel %vm674_vm2, %v2167_v10, %v2169_v55 }
 0x297   : > { %5628 = vmatpush1.bf16.msra.mxu1 %v5627_v15  ;;  %v2181_v5 = vpop.permute.xlu0 %2180 }
 0x298   : > { %v2171_v12 = vpop.permute.xlu1 %2170 }
 0x299   : > { %2692 = vrot.lane.b32.xlu0 %v7842_v24, %s9626_s2  ;;  %2690 = vrot.lane.b32.xlu1 %v7850_v26, %s9626_s2  ;;  %v2172_v1 = vsel %vm674_vm2, %v2169_v55, %v2171_v12  ;;  %v2175_v0 = vsel %vm674_vm2, %v2171_v12, %v2165_v7  ;;  %v2178_v55 = vmul.f32 %v2173_v60, %v6826_v32 }
 0x29a   : > { %v2176_v63 = vmul.f32 %v2175_v0, %v6822_v25  ;;  %v2179_v7 = vmul.f32 %v2172_v1, %v6830_v34 }
 0x29b   : > { %v2185_v22 = vpop.permute.xlu0 %2184 }
 0x29c   : > { %v2183_v4 = vpop.permute.xlu1 %2182 }
 0x29d   : > { %v2190_v3 = vsel %vm707_vm3, %v2181_v5, %v2183_v4  ;;  %2704 = vrot.lane.b32.xlu0 %v7824_v29, %s9628_s27  ;;  %v2189_v20 = vsel %vm707_vm3, %v2183_v4, %v2185_v22  ;;  %2694 = vrot.lane.b32.xlu1 %v7860_v53, %s9626_s2  ;;  %s6396_s2 = smov 8  }
 0x29e   : > { %v2193_v59 = vmul.f32 %v2190_v3, %v6816_v19  ;;  %v2194_v4 = vmul.f32 %v2189_v20, %v6838_v42 }
 0x29f   : > { %v2197_v61 = vpop.permute.xlu0 %2196 }
 0x2a0   : > { %v2187_v15 = vpop.permute.xlu1 %2186  ;;  %v5613_v27 = vpack.c.bf16 %v2193_v59, %v2177_v2  ;;  %v5631_v59 = vpack.c.bf16 %v2194_v4, %v2178_v55 }
 0x2a1   : > { %v2188_v12 = vsel %vm707_vm3, %v2185_v22, %v2187_v15  ;;  %v2191_v3 = vsel %vm707_vm3, %v2187_v15, %v2181_v5  ;;  %2708 = vrot.lane.b32.xlu0 %v7842_v24, %s9628_s27  ;;  %2706 = vrot.lane.b32.xlu1 %v7850_v26, %s9628_s27 }
 0x2a2   : > { %v2192_v58 = vmul.f32 %v2191_v3, %v6834_v41  ;;  %v2195_v6 = vmul.f32 %v2188_v12, %v6848_v49  ;;  %5614 = vmatprep.subr.bf16.mxu0 %v5613_v27 }
 0x2a3   : > { %v2201_v22 = vpop.permute.xlu0 %2200 }
 0x2a4   : > { %v5615_v10 = vpack.c.bf16 %v2192_v58, %v2176_v63  ;;  %v2199_v2 = vpop.permute.xlu1 %2198  ;;  %v5629_v1 = vpack.c.bf16 %v2195_v6, %v2179_v7 }
 0x2a5   : > { %v2205_v5 = vsel %vm740_vm4, %v2199_v2, %v2201_v22  ;;  %v2206_v0 = vsel %vm740_vm4, %v2197_v61, %v2199_v2  ;;  %2720 = vrot.lane.b32.xlu0 %v7824_v29, %s9629_s20  ;;  %2710 = vrot.lane.b32.xlu1 %v7860_v53, %s9628_s27  ;;  %s6397_s27 = smov 7  }
 0x2a6   : > { %v2208_v20 = vmul.f32 %v2206_v0, %v6880_v40  ;;  %v2209_v15 = vmul.f32 %v2205_v5, %v6894_v46  ;;  %5616 = vmatpush1.bf16.msra.mxu0 %v5615_v10  ;;  %5630 = vmatprep.subr.bf16.mxu1 %v5629_v1 }
 0x2a7   : > { %5632 = vmatpush1.bf16.msra.mxu1 %v5631_v59  ;;  %v2213_v6 = vpop.permute.xlu0 %2212 }
 0x2a8   : > { %v5619_v58 = vpack.c.bf16 %v2208_v20, %v7539_v16  ;;  %v2203_v63 = vpop.permute.xlu1 %2202  ;;  %v5617_v60 = vpack.c.bf16 %v2209_v15, %v7547_v13 }
 0x2a9   : > { %v2204_v27 = vsel %vm740_vm4, %v2201_v22, %v2203_v63  ;;  %v2207_v7 = vsel %vm740_vm4, %v2203_v63, %v2197_v61  ;;  %2724 = vrot.lane.b32.xlu0 %v7842_v24, %s9629_s20  ;;  %2722 = vrot.lane.b32.xlu1 %v7850_v26, %s9629_s20 }
 0x2aa   : > { %v2210_v12 = vmul.f32 %v2204_v27, %v6898_v50  ;;  %v2211_v3 = vmul.f32 %v2207_v7, %v6884_v44  ;;  %5618 = vmatprep.subr.bf16.mxu0 %v5617_v60 }
 0x2ab   : > { %5620 = vmatpush1.bf16.msra.mxu0 %v5619_v58  ;;  %v2217_v13 = vpop.permute.xlu0 %2216 }
 0x2ac   : > { %v5635_v16 = vpack.c.bf16 %v2210_v12, %v7545_v11  ;;  %v2215_v4 = vpop.permute.xlu1 %2214  ;;  %v5633_v55 = vpack.c.bf16 %v2211_v3, %v7553_v23 }
 0x2ad   : > { %2736 = vrot.lane.b32.xlu0 %v7824_v29, %s9632_s16  ;;  %2726 = vrot.lane.b32.xlu1 %v7860_v53, %s9629_s20  ;;  %v2222_v22 = vsel %vm773_vm5, %v2213_v6, %v2215_v4  ;;  %v2221_v11 = vsel %vm773_vm5, %v2215_v4, %v2217_v13 }
 0x2ae   : > { %5634 = vmatprep.subr.bf16.mxu1 %v5633_v55  ;;  %v2224_v1 = vmul.f32 %v2222_v22, %v6976_v28  ;;  %v2225_v59 = vmul.f32 %v2221_v11, %v6940_v9 }
 0x2af   : > { %5636 = vmatpush1.bf16.msra.mxu1 %v5635_v16  ;;  %v2229_v61 = vpop.permute.xlu0 %2228 }
 0x2b0   : > { %v2219_v10 = vpop.permute.xlu1 %2218 }
 0x2b1   : > { %2740 = vrot.lane.b32.xlu0 %v7842_v24, %s9632_s16  ;;  %2738 = vrot.lane.b32.xlu1 %v7850_v26, %s9632_s16  ;;  %v2220_v20 = vsel %vm773_vm5, %v2217_v13, %v2219_v10  ;;  %v2223_v63 = vsel %vm773_vm5, %v2219_v10, %v2213_v6 }
 0x2b2   : > { %v2226_v3 = vmul.f32 %v2220_v20, %v6944_v18  ;;  %v2227_v4 = vmul.f32 %v2223_v63, %v6936_v8 }
 0x2b3   : > { %v2233_v23 = vpop.permute.xlu0 %2232 }
 0x2b4   : > { %v2231_v2 = vpop.permute.xlu1 %2230 }
 0x2b5   : > { %v2237_v5 = vsel %vm806_vm6, %v2231_v2, %v2233_v23  ;;  %v2238_v0 = vsel %vm806_vm6, %v2229_v61, %v2231_v2  ;;  %2752 = vrot.lane.b32.xlu0 %v7824_v29, %s9619_s17  ;;  %2742 = vrot.lane.b32.xlu1 %v7860_v53, %s9632_s16 }
 0x2b6   : > { %v2240_v15 = vmul.f32 %v2238_v0, %v6948_v35  ;;  %v2241_v58 = vmul.f32 %v2237_v5, %v6968_v56 }
 0x2b7   : > { %v2245_v27 = vpop.permute.xlu0 %2244 }
 0x2b8   : > { %v5623_v60 = vpack.c.bf16 %v2240_v15, %v2224_v1  ;;  %v2235_v7 = vpop.permute.xlu1 %2234  ;;  %v5621_v12 = vpack.c.bf16 %v2241_v58, %v2225_v59 }
 0x2b9   : > { %v2236_v16 = vsel %vm806_vm6, %v2233_v23, %v2235_v7  ;;  %v2239_v13 = vsel %vm806_vm6, %v2235_v7, %v2229_v61  ;;  %2756 = vrot.lane.b32.xlu0 %v7842_v24, %s9619_s17  ;;  %2754 = vrot.lane.b32.xlu1 %v7850_v26, %s9619_s17 }
 0x2ba   : > { %v2242_v55 = vmul.f32 %v2236_v16, %v6972_v57  ;;  %v2243_v6 = vmul.f32 %v2239_v13, %v6958_v54  ;;  %5622 = vmatprep.subr.bf16.mxu0 %v5621_v12  ;;  %v1858_v16 = vld [vmem:[%s9559_s6] sm:$0xff] }
 0x2bb   : > { %5624 = vmatpush1.bf16.msra.mxu0 %v5623_v60  ;;  %v2249_v22 = vpop.permute.xlu0 %2248 }
 0x2bc   : > { %v5639_v10 = vpack.c.bf16 %v2242_v55, %v2226_v3  ;;  %v2247_v11 = vpop.permute.xlu1 %2246  ;;  %v5637_v23 = vpack.c.bf16 %v2243_v6, %v2227_v4 }
 0x2bd   : > { %v2253_v61 = vsel %vm839_vm7, %v2247_v11, %v2249_v22  ;;  %v2254_v2 = vsel %vm839_vm7, %v2245_v27, %v2247_v11  ;;  %2768 = vrot.lane.b32.xlu0 %v7824_v29, %s9633_s15  ;;  %2758 = vrot.lane.b32.xlu1 %v7860_v53, %s9619_s17 }
 0x2be   : > { %v2256_v1 = vmul.f32 %v7766_v62, %v2254_v2  ;;  %5638 = vmatprep.subr.bf16.mxu1 %v5637_v23  ;;  %v2257_v5 = vmul.f32 %v7776_v52, %v2253_v61 }
 0x2bf   : > { %5640 = vmatpush1.bf16.msra.mxu1 %v5639_v10  ;;  %v2403_v0 = vpop.permute.xlu0 %2402 }
 0x2c0   : > { %2276 = vmatprep.subr.mxu0 %v2257_v5  ;;  %v2251_v59 = vpop.permute.xlu1 %2250 }
 0x2c1   : > { %v2252_v20 = vsel %vm839_vm7, %v2249_v22, %v2251_v59  ;;  %v2255_v15 = vsel %vm839_vm7, %v2251_v59, %v2245_v27  ;;  %2277 = vmatpush1.msra.mxu0 %v2256_v1  ;;  %2772 = vrot.lane.b32.xlu0 %v7842_v24, %s9633_s15 }
 0x2c2   : > { %v2258_v58 = vmul.f32 %v7792_v14, %v2252_v20  ;;  %5072 = vmatmul.mubr.msk.f32.vlgmr.msra.gmra.mrb[10].mxu0 %vm864_vm8, %v7783_v48  ;;  %v2259_v63 = vmul.f32 %v7805_v47, %v2255_v15  ;;  %2770 = vrot.lane.b32.xlu1 %v7850_v26, %s9633_s15 }
 0x2c3   : > { %2594 = vmatprep.mubr.f32.mxu0 %v9634_v45  ;;  %v2407_v60 = vpop.permute.xlu0 %2406 }
 0x2c4   : > { %2347 = vmatprep.subr.mxu1 %v2259_v63  ;;  %v2405_v7 = vpop.permute.xlu1 %2404 }
 0x2c5   : > { %2348 = vmatpush1.msra.mxu1 %v2258_v58  ;;  %2784 = vrot.lane.b32.xlu0 %v7824_v29, %s9622_s23  ;;  %v2412_v3 = vsel %vm608_vm0, %v2403_v0, %v2405_v7  ;;  %v2411_v61 = vsel %vm608_vm0, %v2405_v7, %v2407_v60 }
 0x2c6   : > { %5073 = vmatmul.mubr.msk.f32.vlgmr.msra.gmra.mrb[10].mxu1 %vm864_vm8, %v7783_v48  ;;  %2774 = vrot.lane.b32.xlu1 %v7860_v53, %s9633_s15  ;;  %v2415_v6 = vmul.f32 %v2412_v3, %v6720_v30 }
 0x2c7   : > { %2665 = vmatprep.mubr.f32.mxu1 %v9634_v45  ;;  %v2419_v27 = vpop.permute.xlu0 %2418 }
 0x2c8   : > { %v2409_v12 = vpop.permute.xlu1 %2408 }
 0x2c9   : > { %2788 = vrot.lane.b32.xlu0 %v7842_v24, %s9622_s23  ;;  %v2410_v11 = vsel %vm608_vm0, %v2407_v60, %v2409_v12  ;;  %v2413_v23 = vsel %vm608_vm0, %v2409_v12, %v2403_v0  ;;  %v2416_v60 = vmul.f32 %v2411_v61, %v6746_v39 }
 0x2ca   : > { %2786 = vrot.lane.b32.xlu1 %v7850_v26, %s9622_s23  ;;  %v2414_v58 = vmul.f32 %v2413_v23, %v6730_v33  ;;  %v2417_v0 = vmul.f32 %v2410_v11, %v6738_v37 }
 0x2cb   : > { %v2423_v13 = vpop.permute.xlu0 %2422 }
 0x2cc   : > { %v2421_v4 = vpop.permute.xlu1 %2420 }
 0x2cd   : > { %v2428_v55 = vsel %vm641_vm1, %v2419_v27, %v2421_v4  ;;  %v2427_v10 = vsel %vm641_vm1, %v2421_v4, %v2423_v13  ;;  %2944 = vperm.xlu0 %6170, %v1858_v16  }
 0x2ce   : > { %v2431_v22 = vmul.f32 %v2428_v55, %v6724_v31  ;;  %2790 = vrot.lane.b32.xlu1 %v7860_v53, %s9622_s23  ;;  %v2432_v59 = vmul.f32 %v2427_v10, %v6756_v43  ;;  %s9641_s23 = sshll.u32 %s9655_s24, 3  ;;  %s6398_s24 = smov 121  }
 0x2cf   : > { %v2435_v2 = vpop.permute.xlu0 %2434  ;;  %s8178_s15 = scalar_lea.vmem %s9554_s1, %s9641_s23 }
 0x2d0   : > { %v2425_v1 = vpop.permute.xlu1 %2424  ;;  %v5641_v5 = vpack.c.bf16 %v2431_v22, %v2415_v6  ;;  %v5659_v55 = vpack.c.bf16 %v2432_v59, %v2416_v60 }
 0x2d1   : > { %v2426_v20 = vsel %vm641_vm1, %v2423_v13, %v2425_v1  ;;  %v2429_v15 = vsel %vm641_vm1, %v2425_v1, %v2419_v27 }
 0x2d2   : > { %v2430_v63 = vmul.f32 %v2429_v15, %v6734_v36  ;;  %v2433_v12 = vmul.f32 %v2426_v20, %v6742_v38  ;;  %5642 = vmatprep.subr.bf16.mxu0 %v5641_v5 }
 0x2d3   : > { %v2439_v3 = vpop.permute.xlu0 %2438 }
 0x2d4   : > { %v5643_v7 = vpack.c.bf16 %v2430_v63, %v2414_v58  ;;  %v2437_v16 = vpop.permute.xlu1 %2436  ;;  %v5657_v4 = vpack.c.bf16 %v2433_v12, %v2417_v0 }
 0x2d5   : > { %v2444_v6 = vsel %vm674_vm2, %v2435_v2, %v2437_v16  ;;  %v2443_v20 = vsel %vm674_vm2, %v2437_v16, %v2439_v3 }
 0x2d6   : > { %5644 = vmatpush1.bf16.msra.mxu0 %v5643_v7  ;;  %5658 = vmatprep.subr.bf16.mxu1 %v5657_v4  ;;  %v2447_v23 = vmul.f32 %v2444_v6, %v6808_v17 }
 0x2d7   : > { %5660 = vmatpush1.bf16.msra.mxu1 %v5659_v55  ;;  %v2451_v27 = vpop.permute.xlu0 %2450 }
 0x2d8   : > { %v2441_v13 = vpop.permute.xlu1 %2440 }
 0x2d9   : > { %v2442_v5 = vsel %vm674_vm2, %v2439_v3, %v2441_v13  ;;  %v2445_v59 = vsel %vm674_vm2, %v2441_v13, %v2435_v2  ;;  %v2448_v3 = vmul.f32 %v2443_v20, %v6826_v32  ;;  %v9638_v20 = vld [vmem:[#allocation15_spill] sm:$0xff] }
 0x2da   : > { %v2446_v7 = vmul.f32 %v2445_v59, %v6822_v25  ;;  %v2449_v4 = vmul.f32 %v2442_v5, %v6830_v34 }
 0x2db   : > { %v2455_v10 = vpop.permute.xlu0 %2454 }
 0x2dc   : > { %v2453_v22 = vpop.permute.xlu1 %2452 }
 0x2dd   : > { %v2460_v11 = vsel %vm707_vm3, %v2451_v27, %v2453_v22  ;;  %v2459_v61 = vsel %vm707_vm3, %v2453_v22, %v2455_v10 }
 0x2de   : > { %v2463_v1 = vmul.f32 %v2460_v11, %v6816_v19  ;;  %v2464_v63 = vmul.f32 %v2459_v61, %v6838_v42 }
 0x2df   : > { %v2467_v15 = vpop.permute.xlu0 %2466 }
 0x2e0   : > { %v2457_v58 = vpop.permute.xlu1 %2456  ;;  %v5645_v0 = vpack.c.bf16 %v2463_v1, %v2447_v23  ;;  %v5663_v11 = vpack.c.bf16 %v2464_v63, %v2448_v3 }
 0x2e1   : > { %v2458_v12 = vsel %vm707_vm3, %v2455_v10, %v2457_v58  ;;  %v2461_v60 = vsel %vm707_vm3, %v2457_v58, %v2451_v27 }
 0x2e2   : > { %v2462_v2 = vmul.f32 %v2461_v60, %v6834_v41  ;;  %v2465_v55 = vmul.f32 %v2458_v12, %v6848_v49  ;;  %5646 = vmatprep.subr.bf16.mxu0 %v5645_v0 }
 0x2e3   : > { %v2471_v13 = vpop.permute.xlu0 %2470 }
 0x2e4   : > { %v5647_v16 = vpack.c.bf16 %v2462_v2, %v2446_v7  ;;  %v2469_v6 = vpop.permute.xlu1 %2468  ;;  %v5661_v22 = vpack.c.bf16 %v2465_v55, %v2449_v4  ;;  %v9639_v7 = vld [vmem:[#allocation14_spill] sm:$0xff]  ;;  %v9640_v55 = vld [vmem:[#allocation16_spill] sm:$0xff] }
 0x2e5   : > { %v2475_v10 = vsel %vm740_vm4, %v2469_v6, %v2471_v13  ;;  %v2476_v27 = vsel %vm740_vm4, %v2467_v15, %v2469_v6 }
 0x2e6   : > { %v2478_v23 = vmul.f32 %v2476_v27, %v6880_v40  ;;  %v2479_v61 = vmul.f32 %v2475_v10, %v6894_v46  ;;  %5648 = vmatpush1.bf16.msra.mxu0 %v5647_v16  ;;  %5662 = vmatprep.subr.bf16.mxu1 %v5661_v22 }
 0x2e7   : > { %5664 = vmatpush1.bf16.msra.mxu1 %v5663_v11  ;;  %v2483_v5 = vpop.permute.xlu0 %2482 }
 0x2e8   : > { %v5651_v1 = vpack.c.bf16 %v2478_v23, %v7617_v51  ;;  %v2473_v59 = vpop.permute.xlu1 %2472  ;;  %v5649_v58 = vpack.c.bf16 %v2479_v61, %v9638_v20 }
 0x2e9   : > { %v2474_v0 = vsel %vm740_vm4, %v2471_v13, %v2473_v59  ;;  %v2477_v63 = vsel %vm740_vm4, %v2473_v59, %v2467_v15 }
 0x2ea   : > { %v2480_v12 = vmul.f32 %v2474_v0, %v6898_v50  ;;  %v2481_v60 = vmul.f32 %v2477_v63, %v6884_v44  ;;  %5650 = vmatprep.subr.bf16.mxu0 %v5649_v58 }
 0x2eb   : > { %5652 = vmatpush1.bf16.msra.mxu0 %v5651_v1  ;;  %v2487_v2 = vpop.permute.xlu0 %2486 }
 0x2ec   : > { %v5667_v4 = vpack.c.bf16 %v2480_v12, %v9639_v7  ;;  %v2485_v51 = vpop.permute.xlu1 %2484  ;;  %v5665_v3 = vpack.c.bf16 %v2481_v60, %v9640_v55 }
 0x2ed   : > { %v2491_v13 = vsel %vm773_vm5, %v2485_v51, %v2487_v2  ;;  %v2492_v15 = vsel %vm773_vm5, %v2483_v5, %v2485_v51 }
 0x2ee   : > { %5666 = vmatprep.subr.bf16.mxu1 %v5665_v3  ;;  %v2494_v23 = vmul.f32 %v2492_v15, %v6976_v28  ;;  %v2495_v61 = vmul.f32 %v2491_v13, %v6940_v9 }
 0x2ef   : > { %5668 = vmatpush1.bf16.msra.mxu1 %v5667_v4  ;;  %v2499_v16 = vpop.permute.xlu0 %2498 }
 0x2f0   : > { %v2489_v6 = vpop.permute.xlu1 %2488 }
 0x2f1   : > { %v2490_v20 = vsel %vm773_vm5, %v2487_v2, %v2489_v6  ;;  %v2493_v58 = vsel %vm773_vm5, %v2489_v6, %v2483_v5 }
 0x2f2   : > { %v2496_v51 = vmul.f32 %v2490_v20, %v6944_v18  ;;  %v2497_v55 = vmul.f32 %v2493_v58, %v6936_v8 }
 0x2f3   : > { %v2503_v22 = vpop.permute.xlu0 %2502 }
 0x2f4   : > { %v2501_v11 = vpop.permute.xlu1 %2500 }
 0x2f5   : > { %v2507_v10 = vsel %vm806_vm6, %v2501_v11, %v2503_v22  ;;  %v2508_v27 = vsel %vm806_vm6, %v2499_v16, %v2501_v11 }
 0x2f6   : > { %v2510_v1 = vmul.f32 %v2508_v27, %v6948_v35  ;;  %v2511_v59 = vmul.f32 %v2507_v10, %v6968_v56 }
 0x2f7   : > { %v2515_v63 = vpop.permute.xlu0 %2514 }
 0x2f8   : > { %v5655_v0 = vpack.c.bf16 %v2510_v1, %v2494_v23  ;;  %v5653_v12 = vpack.c.bf16 %v2511_v59, %v2495_v61  ;;  %v2505_v60 = vpop.permute.xlu1 %2504 }
 0x2f9   : > { %v2506_v7 = vsel %vm806_vm6, %v2503_v22, %v2505_v60  ;;  %v2509_v4 = vsel %vm806_vm6, %v2505_v60, %v2499_v16 }
 0x2fa   : > { %5654 = vmatprep.subr.bf16.mxu0 %v5653_v12  ;;  %v2512_v2 = vmul.f32 %v2506_v7, %v6972_v57  ;;  %v2513_v3 = vmul.f32 %v2509_v4, %v6958_v54 }
 0x2fb   : > { %5656 = vmatpush1.bf16.msra.mxu0 %v5655_v0  ;;  %v2519_v5 = vpop.permute.xlu0 %2518 }
 0x2fc   : > { %v5671_v6 = vpack.c.bf16 %v2512_v2, %v2496_v51  ;;  %v2517_v13 = vpop.permute.xlu1 %2516  ;;  %v5669_v15 = vpack.c.bf16 %v2513_v3, %v2497_v55 }
 0x2fd   : > { %v2523_v22 = vsel %vm839_vm7, %v2517_v13, %v2519_v5  ;;  %v2524_v16 = vsel %vm839_vm7, %v2515_v63, %v2517_v13 }
 0x2fe   : > { %v2526_v11 = vmul.f32 %v7766_v62, %v2524_v16  ;;  %5670 = vmatprep.subr.bf16.mxu1 %v5669_v15  ;;  %v2527_v10 = vmul.f32 %v7776_v52, %v2523_v22 }
 0x2ff   : > { %5672 = vmatpush1.bf16.msra.mxu1 %v5671_v6  ;;  %v2673_v27 = vpop.permute.xlu0 %2672 }
 0x300   : > { %2546 = vmatprep.subr.mxu0 %v2527_v10  ;;  %v2521_v23 = vpop.permute.xlu1 %2520 }
 0x301   : > { %v2522_v61 = vsel %vm839_vm7, %v2519_v5, %v2521_v23  ;;  %v2525_v1 = vsel %vm839_vm7, %v2521_v23, %v2515_v63  ;;  %2547 = vmatpush1.msra.mxu0 %v2526_v11 }
 0x302   : > { %v2528_v59 = vmul.f32 %v7792_v14, %v2522_v61  ;;  %5074 = vmatmul.mubr.msk.f32.vlgmr.msra.gmra.mrb[12].mxu0 %vm864_vm8, %v7783_v48  ;;  %v2529_v20 = vmul.f32 %v7805_v47, %v2525_v1 }
 0x303   : > { %v2677_v58 = vpop.permute.xlu0 %2676  ;;  %2864 = vmatprep.mubr.f32.mxu0 %v9634_v45 }
 0x304   : > { %2617 = vmatprep.subr.mxu1 %v2529_v20  ;;  %v2675_v0 = vpop.permute.xlu1 %2674 }
 0x305   : > { %2618 = vmatpush1.msra.mxu1 %v2528_v59  ;;  %v2682_v60 = vsel %vm608_vm0, %v2673_v27, %v2675_v0  ;;  %v2681_v15 = vsel %vm608_vm0, %v2675_v0, %v2677_v58 }
 0x306   : > { %5075 = vmatmul.mubr.msk.f32.vlgmr.msra.gmra.mrb[12].mxu1 %vm864_vm8, %v7783_v48  ;;  %v2685_v55 = vmul.f32 %v2682_v60, %v6720_v30  ;;  %v2686_v1 = vmul.f32 %v2681_v15, %v6746_v39 }
 0x307   : > { %v2689_v12 = vpop.permute.xlu0 %2688  ;;  %2935 = vmatprep.mubr.f32.mxu1 %v9634_v45 }
 0x308   : > { %v2679_v63 = vpop.permute.xlu1 %2678 }
 0x309   : > { %v2680_v5 = vsel %vm608_vm0, %v2677_v58, %v2679_v63  ;;  %v2683_v6 = vsel %vm608_vm0, %v2679_v63, %v2673_v27  ;;  %vm4914_vm0 = vcmask 523264  }
 0x30a   : > { %v2684_v10 = vmul.f32 %v2683_v6, %v6730_v33  ;;  %v2687_v23 = vmul.f32 %v2680_v5, %v6738_v37 }
 0x30b   : > { %v2693_v7 = vpop.permute.xlu0 %2692 }
 0x30c   : > { %v2691_v4 = vpop.permute.xlu1 %2690 }
 0x30d   : > { %v2698_v51 = vsel %vm641_vm1, %v2689_v12, %v2691_v4  ;;  %v2697_v2 = vsel %vm641_vm1, %v2691_v4, %v2693_v7 }
 0x30e   : > { %v2701_v3 = vmul.f32 %v2698_v51, %v6724_v31  ;;  %v2702_v11 = vmul.f32 %v2697_v2, %v6756_v43 }
 0x30f   : > { %v2705_v13 = vpop.permute.xlu0 %2704 }
 0x310   : > { %v2695_v22 = vpop.permute.xlu1 %2694  ;;  %v5673_v16 = vpack.c.bf16 %v2701_v3, %v2685_v55  ;;  %v5691_v0 = vpack.c.bf16 %v2702_v11, %v2686_v1 }
 0x311   : > { %v2696_v30 = vsel %vm641_vm1, %v2693_v7, %v2695_v22  ;;  %v2699_v31 = vsel %vm641_vm1, %v2695_v22, %v2689_v12 }
 0x312   : > { %v2700_v27 = vmul.f32 %v2699_v31, %v6734_v36  ;;  %v2703_v61 = vmul.f32 %v2696_v30, %v6742_v38  ;;  %5674 = vmatprep.subr.bf16.mxu0 %v5673_v16 }
 0x313   : > { %v2709_v59 = vpop.permute.xlu0 %2708 }
 0x314   : > { %v5675_v20 = vpack.c.bf16 %v2700_v27, %v2684_v10  ;;  %v2707_v43 = vpop.permute.xlu1 %2706  ;;  %v5689_v58 = vpack.c.bf16 %v2703_v61, %v2687_v23 }
 0x315   : > { %v2714_v33 = vsel %vm674_vm2, %v2705_v13, %v2707_v43  ;;  %v2713_v2 = vsel %vm674_vm2, %v2707_v43, %v2709_v59 }
 0x316   : > { %5676 = vmatpush1.bf16.msra.mxu0 %v5675_v20  ;;  %5690 = vmatprep.subr.bf16.mxu1 %v5689_v58  ;;  %v2717_v39 = vmul.f32 %v2714_v33, %v6808_v17  ;;  %v2718_v11 = vmul.f32 %v2713_v2, %v6826_v32  ;;  %v8191_v33 = vld [vmem:[%s8178_s15 + $0x10] sm:$0xff] }
 0x317   : > { %5692 = vmatpush1.bf16.msra.mxu1 %v5691_v0  ;;  %v2721_v12 = vpop.permute.xlu0 %2720 }
 0x318   : > { %v2711_v63 = vpop.permute.xlu1 %2710 }
 0x319   : > { %v2712_v4 = vsel %vm674_vm2, %v2709_v59, %v2711_v63  ;;  %v2715_v51 = vsel %vm674_vm2, %v2711_v63, %v2705_v13 }
 0x31a   : > { %v2716_v15 = vmul.f32 %v2715_v51, %v6822_v25  ;;  %v2719_v22 = vmul.f32 %v2712_v4, %v6830_v34  ;;  %v3061_v51 = vmul.f32 %v8191_v33, %v8191_v33 }
 0x31b   : > { %v2725_v37 = vpop.permute.xlu0 %2724 }
 0x31c   : > { %v2723_v36 = vpop.permute.xlu1 %2722 }
 0x31d   : > { %v2730_v38 = vsel %vm707_vm3, %v2721_v12, %v2723_v36  ;;  %v2729_v60 = vsel %vm707_vm3, %v2723_v36, %v2725_v37 }
 0x31e   : > { %v2733_v7 = vmul.f32 %v2730_v38, %v6816_v19  ;;  %v2734_v6 = vmul.f32 %v2729_v60, %v6838_v42 }
 0x31f   : > { %v2737_v55 = vpop.permute.xlu0 %2736 }
 0x320   : > { %v2727_v3 = vpop.permute.xlu1 %2726  ;;  %v5677_v5 = vpack.c.bf16 %v2733_v7, %v2717_v39  ;;  %v5695_v23 = vpack.c.bf16 %v2734_v6, %v2718_v11  ;;  %v8200_v39 = vld [vmem:[%s8178_s15 + $0x18] sm:$0xff]  ;;  %v3087_v11 = vrot.slane %v3061_v51, 4 }
 0x321   : > { %v2728_v17 = vsel %vm707_vm3, %v2725_v37, %v2727_v3  ;;  %v2731_v19 = vsel %vm707_vm3, %v2727_v3, %v2721_v12  ;;  %v8186_v12 = vld [vmem:[%s8178_s15 + $0x8] sm:$0xff] }
 0x322   : > { %v2732_v13 = vmul.f32 %v2731_v19, %v6834_v41  ;;  %v2735_v16 = vmul.f32 %v2728_v17, %v6848_v49  ;;  %5678 = vmatprep.subr.bf16.mxu0 %v5677_v5  ;;  %v3060_v36 = vmul.f32 %v8186_v12, %v8186_v12 }
 0x323   : > { %v2741_v30 = vpop.permute.xlu0 %2740 }
 0x324   : > { %v5679_v31 = vpack.c.bf16 %v2732_v13, %v2716_v15  ;;  %v2739_v42 = vpop.permute.xlu1 %2738  ;;  %v5693_v10 = vpack.c.bf16 %v2735_v16, %v2719_v22  ;;  %v3081_v15 = vrot.slane %v3060_v36, 4  ;;  %v3062_v22 = vmul.f32 %v8200_v39, %v8200_v39 }
 0x325   : > { %v2745_v27 = vsel %vm740_vm4, %v2739_v42, %v2741_v30  ;;  %v2746_v25 = vsel %vm740_vm4, %v2737_v55, %v2739_v42 }
 0x326   : > { %v2748_v34 = vmul.f32 %v2746_v25, %v6880_v40  ;;  %v2749_v41 = vmul.f32 %v2745_v27, %v6894_v46  ;;  %5680 = vmatpush1.bf16.msra.mxu0 %v5679_v31  ;;  %5694 = vmatprep.subr.bf16.mxu1 %v5693_v10  ;;  %v3011_v27 = vld [vmem:[%s9566_s13 + $0x80] sm:$0xff]  ;;  %v3012_v25 = vld [vmem:[%s9566_s13 + $0x88] sm:$0xff] }
 0x327   : > { %5696 = vmatpush1.bf16.msra.mxu1 %v5695_v23  ;;  %v2753_v32 = vpop.permute.xlu0 %2752 }
 0x328   : > { %v5683_v49 = vpack.c.bf16 %v2748_v34, %v7824_v29  ;;  %v2743_v61 = vpop.permute.xlu1 %2742  ;;  %v5681_v1 = vpack.c.bf16 %v2749_v41, %v7850_v26  ;;  %v3082_v34 = vadd.f32 %v3081_v15, %v3060_v36  ;;  %v3093_v41 = vrot.slane %v3062_v22, 4  ;;  %v3028_v36 = vld [vmem:[%s9566_s13 + $0x108] sm:$0xff] }
 0x329   : > { %v2744_v59 = vsel %vm740_vm4, %v2741_v30, %v2743_v61  ;;  %v2747_v20 = vsel %vm740_vm4, %v2743_v61, %v2737_v55 }
 0x32a   : > { %v2750_v40 = vmul.f32 %v2744_v59, %v6898_v50  ;;  %v2751_v43 = vmul.f32 %v2747_v20, %v6884_v44  ;;  %5682 = vmatprep.subr.bf16.mxu0 %v5681_v1  ;;  %v8183_v44 = vld [vmem:[%s8178_s15] sm:$0xff]  ;;  %v3013_v59 = vld [vmem:[%s9566_s13 + $0x90] sm:$0xff]  ;;  %v3014_v20 = vld [vmem:[%s9566_s13 + $0x98] sm:$0xff] }
 0x32b   : > { %5684 = vmatpush1.bf16.msra.mxu0 %v5683_v49  ;;  %v2757_v46 = vpop.permute.xlu0 %2756  ;;  %v3059_v63 = vmul.f32 %v8183_v44, %v8183_v44 }
 0x32c   : > { %v5699_v29 = vpack.c.bf16 %v2750_v40, %v7842_v24  ;;  %v2755_v26 = vpop.permute.xlu1 %2754  ;;  %v5697_v50 = vpack.c.bf16 %v2751_v43, %v7860_v53 }
 0x32d   : > { %v2761_v24 = vsel %vm773_vm5, %v2755_v26, %v2757_v46  ;;  %v2762_v37 = vsel %vm773_vm5, %v2753_v32, %v2755_v26  ;;  %v3075_v4 = vrot.slane %v3059_v63, 4  ;;  %v3088_v26 = vadd.f32 %v3087_v11, %v3061_v51  ;;  %v3016_v51 = vld [vmem:[%s9566_s13 + $0xa8] sm:$0xff]  ;;  %v3047_v11 = vld [vmem:[%s9566_s13 + $0x1a0] sm:$0xff] }
 0x32e   : > { %5698 = vmatprep.subr.bf16.mxu1 %v5697_v50  ;;  %v2764_v55 = vmul.f32 %v2762_v37, %v6976_v28  ;;  %v2765_v2 = vmul.f32 %v2761_v24, %v6940_v9  ;;  %v8266_v37 = vpack.c.bf16 %v3014_v20, %v3013_v59  ;;  %v3050_v59 = vld [vmem:[%s9566_s13 + $0x1b8] sm:$0xff] }
 0x32f   : > { %5700 = vmatpush1.bf16.msra.mxu1 %v5699_v29  ;;  %v2769_v58 = vpop.permute.xlu0 %2768  ;;  %v3043_v29 = vld [vmem:[%s9566_s13 + $0x180] sm:$0xff] }
 0x330   : > { %v2759_v0 = vpop.permute.xlu1 %2758 }
 0x331   : > { %v2760_v6 = vsel %vm773_vm5, %v2757_v46, %v2759_v0  ;;  %v2763_v17 = vsel %vm773_vm5, %v2759_v0, %v2753_v32  ;;  %v8250_v46 = vpack.c.bf16 %v3012_v25, %v3011_v27  ;;  %v3044_v0 = vld [vmem:[%s9566_s13 + $0x188] sm:$0xff] }
 0x332   : > { %v2766_v30 = vmul.f32 %v2760_v6, %v6944_v18  ;;  %v2767_v31 = vmul.f32 %v2763_v17, %v6936_v8  ;;  %v8295_v6 = vpack.c.bf16 %v3044_v0, %v3043_v29  ;;  %v3089_v17 = vrot.slane %v3088_v26, 2  ;;  %v3003_v0 = vld [vmem:[%s9566_s13 + $0x40] sm:$0xff] }
 0x333   : > { %v2773_v53 = vpop.permute.xlu0 %2772 }
 0x334   : > { %v2771_v38 = vpop.permute.xlu1 %2770 }
 0x335   : > { %v2777_v60 = vsel %vm806_vm6, %v2771_v38, %v2773_v53  ;;  %v2778_v7 = vsel %vm806_vm6, %v2769_v58, %v2771_v38  ;;  %v3015_v38 = vld [vmem:[%s9566_s13 + $0xa0] sm:$0xff] }
 0x336   : > { %v2780_v3 = vmul.f32 %v2778_v7, %v6948_v35  ;;  %v2781_v5 = vmul.f32 %v2777_v60, %v6968_v56  ;;  %v3076_v56 = vadd.f32 %v3075_v4, %v3059_v63  ;;  %v3094_v63 = vadd.f32 %v3093_v41, %v3062_v22  ;;  %v3001_v41 = vld [vmem:[%s9566_s13 + $0x30] sm:$0xff] }
 0x337   : > { %v2785_v19 = vpop.permute.xlu0 %2784 }
 0x338   : > { %v5687_v13 = vpack.c.bf16 %v2780_v3, %v2764_v55  ;;  %v2775_v16 = vpop.permute.xlu1 %2774  ;;  %v5685_v28 = vpack.c.bf16 %v2781_v5, %v2765_v2  ;;  %v3077_v1 = vrot.slane %v3076_v56, 2  ;;  %v3045_v55 = vld [vmem:[%s9566_s13 + $0x190] sm:$0xff]  ;;  %v3046_v2 = vld [vmem:[%s9566_s13 + $0x198] sm:$0xff] }
 0x339   : > { %v2776_v9 = vsel %vm806_vm6, %v2773_v53, %v2775_v16  ;;  %v2779_v35 = vsel %vm806_vm6, %v2775_v16, %v2769_v58  ;;  %v3083_v58 = vrot.slane %v3082_v34, 2  ;;  %v3027_v53 = vld [vmem:[%s9566_s13 + $0x100] sm:$0xff]  ;;  %v8311_v16 = vpack.c.bf16 %v3046_v2, %v3045_v55 }
 0x33a   : > { %v2782_v42 = vmul.f32 %v2776_v9, %v6972_v57  ;;  %v2783_v10 = vmul.f32 %v2779_v35, %v6958_v54  ;;  %5686 = vmatprep.subr.bf16.mxu0 %v5685_v28  ;;  %v2995_v54 = vld [vmem:[%s9566_s13] sm:$0xff]  ;;  %v2996_v57 = vld [vmem:[%s9566_s13 + $0x8] sm:$0xff]  ;;  %v3078_v4 = vadd.f32 %v3077_v1, %v3076_v56  ;;  %v8300_v22 = vpack.c.bf16 %v3028_v36, %v3027_v53  ;;  %v3029_v28 = vld [vmem:[%s9566_s13 + $0x110] sm:$0xff] }
 0x33b   : > { %5688 = vmatpush1.bf16.msra.mxu0 %v5687_v13  ;;  %v2789_v23 = vpop.permute.xlu0 %2788  ;;  %v8255_v50 = vpack.c.bf16 %v2996_v57, %v2995_v54  ;;  %v3095_v13 = vrot.slane %v3094_v63, 2  ;;  %v3030_v9 = vld [vmem:[%s9566_s13 + $0x118] sm:$0xff]  ;;  %v3017_v35 = vld [vmem:[%s9566_s13 + $0xb0] sm:$0xff]  ;;  %v3031_v54 = vld [vmem:[%s9566_s13 + $0x120] sm:$0xff] }
 0x33c   : > { %v5703_v18 = vpack.c.bf16 %v2782_v42, %v2766_v30  ;;  %v2787_v32 = vpop.permute.xlu1 %2786  ;;  %v5701_v8 = vpack.c.bf16 %v2783_v10, %v2767_v31  ;;  %v3018_v56 = vld [vmem:[%s9566_s13 + $0xb8] sm:$0xff]  ;;  %v3048_v30 = vld [vmem:[%s9566_s13 + $0x1a8] sm:$0xff]  ;;  %v6360_v31 = vld [vmem:[%s9558_s5] sm:$0xff]  ;;  %v3079_v42 = vrot.slane %v3078_v4, 1  ;;  %v3090_v10 = vadd.f32 %v3089_v17, %v3088_v26 }
 0x33d   : > { %v2793_v49 = vsel %vm839_vm7, %v2787_v32, %v2789_v23  ;;  %v2794_v61 = vsel %vm839_vm7, %v2785_v19, %v2787_v32  ;;  %v3096_v27 = vadd.f32 %v3095_v13, %v3094_v63  ;;  %v8350_v32 = vpack.c.bf16 %v3018_v56, %v3017_v35  ;;  %v3032_v57 = vld [vmem:[%s9566_s13 + $0x128] sm:$0xff]  ;;  %v3049_v1 = vld [vmem:[%s9566_s13 + $0x1b0] sm:$0xff]  ;;  %v3034_v53 = vld [vmem:[%s9566_s13 + $0x138] sm:$0xff] }
 0x33e   : > { %v2796_v40 = vmul.f32 %v7766_v62, %v2794_v61  ;;  %5702 = vmatprep.subr.bf16.mxu1 %v5701_v8  ;;  %v2797_v43 = vmul.f32 %v7776_v52, %v2793_v49  ;;  %v2997_v62 = vld [vmem:[%s9566_s13 + $0x10] sm:$0xff]  ;;  %v2998_v52 = vld [vmem:[%s9566_s13 + $0x18] sm:$0xff]  ;;  %v8352_v8 = vpack.c.bf16 %v3048_v30, %v3047_v11  ;;  %v3019_v49 = vld [vmem:[%s9566_s13 + $0xc0] sm:$0xff]  ;;  %v3080_v20 = vadd.f32 %v3079_v42, %v3078_v4 }
 0x33f   : > { %5704 = vmatpush1.bf16.msra.mxu1 %v5703_v18  ;;  %v8298_v15 = vpack.c.bf16 %v2998_v52, %v2997_v62  ;;  %v3002_v18 = vld [vmem:[%s9566_s13 + $0x38] sm:$0xff]  ;;  %v3020_v61 = vld [vmem:[%s9566_s13 + $0xc8] sm:$0xff]  ;;  %v3097_v29 = vrot.slane %v3096_v27, 1  ;;  %v8388_v63 = vpack.c.bf16 %v3050_v59, %v3049_v1  ;;  %v3021_v36 = vld [vmem:[%s9566_s13 + $0xd0] sm:$0xff] }
 0x340   : > { %2816 = vmatprep.subr.mxu0 %v2797_v43  ;;  %v2791_v24 = vpop.permute.xlu1 %2790  ;;  %v8374_v26 = vpack.c.bf16 %v3002_v18, %v3001_v41  ;;  %v3004_v62 = vld [vmem:[%s9566_s13 + $0x48] sm:$0xff]  ;;  %v8386_v52 = vpack.c.bf16 %v3020_v61, %v3019_v49  ;;  %v3171_v4 = vmax.f32 %v3080_v20, 1e-24  ;;  %v3005_v17 = vld [vmem:[%s9566_s13 + $0x50] sm:$0xff]  ;;  %v3054_v11 = vld [vmem:[%s9566_s13 + $0x1d8] sm:$0xff] }
 0x341   : > { %v2792_v60 = vsel %vm839_vm7, %v2789_v23, %v2791_v24  ;;  %v2795_v7 = vsel %vm839_vm7, %v2791_v24, %v2785_v19  ;;  %2817 = vmatpush1.msra.mxu0 %v2796_v40  ;;  %v3084_v19 = vadd.f32 %v3083_v58, %v3082_v34  ;;  %v8340_v34 = vpack.c.bf16 %v3030_v9, %v3029_v28  ;;  %v3033_v24 = vld [vmem:[%s9566_s13 + $0x130] sm:$0xff]  ;;  %v3036_v28 = vld [vmem:[%s9566_s13 + $0x148] sm:$0xff]  ;;  %v3023_v9 = vld [vmem:[%s9566_s13 + $0xe0] sm:$0xff] }
 0x342   : > { %v2798_v3 = vmul.f32 %v7792_v14, %v2792_v60  ;;  %5076 = vmatmul.mubr.msk.f32.vlgmr.msra.gmra.mrb[14].mxu0 %vm864_vm8, %v7783_v48  ;;  %v2799_v5 = vmul.f32 %v7805_v47, %v2795_v7  ;;  %5706 = vmatprep.subr.bf16.mxu0 %v8250_v46  ;;  %v2999_v14 = vld [vmem:[%s9566_s13 + $0x20] sm:$0xff]  ;;  %v3000_v48 = vld [vmem:[%s9566_s13 + $0x28] sm:$0xff]  ;;  %v8309_v47 = vpack.c.bf16 %v3016_v51, %v3015_v38  ;;  %v3091_v40 = vrot.slane %v3090_v10, 1  ;;  %v3022_v38 = vld [vmem:[%s9566_s13 + $0xd8] sm:$0xff] }
 0x343   : > { %5708 = vmatpush3.bf16.msra.mxu0 %v8255_v50  ;;  %v3085_v23 = vrot.slane %v3084_v19, 1  ;;  %v8338_v25 = vpack.c.bf16 %v3000_v48, %v2999_v14  ;;  %v8376_v58 = vpack.c.bf16 %v3032_v57, %v3031_v54  ;;  %v3051_v60 = vld [vmem:[%s9566_s13 + $0x1c0] sm:$0xff]  ;;  %v3052_v7 = vld [vmem:[%s9566_s13 + $0x1c8] sm:$0xff]  ;;  %v3098_v2 = vadd.f32 %v3097_v29, %v3096_v27  ;;  %v3053_v56 = vld [vmem:[%s9566_s13 + $0x1d0] sm:$0xff] }
 0x344   : > { %2887 = vmatprep.subr.mxu1 %v2799_v5  ;;  %5710 = vmatprep.subr.bf16.mxu0 %v8266_v37  ;;  %v3092_v51 = vadd.f32 %v3091_v40, %v3090_v10  ;;  %v8412_v5 = vpack.c.bf16 %v3034_v53, %v3033_v24  ;;  %v8422_v13 = vpack.c.bf16 %v3022_v38, %v3021_v36  ;;  %v3035_v48 = vld [vmem:[%s9566_s13 + $0x140] sm:$0xff]  ;;  %v3024_v35 = vld [vmem:[%s9566_s13 + $0xe8] sm:$0xff]  ;;  %6204 = vrsqrt.f32 %v3171_v4  ;;  %v3037_v54 = vld [vmem:[%s9566_s13 + $0x150] sm:$0xff] }
 0x345   : > { %2888 = vmatpush1.msra.mxu1 %v2798_v3  ;;  %v3086_v43 = vadd.f32 %v3085_v23, %v3084_v19  ;;  %v8410_v3 = vpack.c.bf16 %v3004_v62, %v3003_v0  ;;  %v3006_v19 = vld [vmem:[%s9566_s13 + $0x58] sm:$0xff]  ;;  %v8424_v14 = vpack.c.bf16 %v3052_v7, %v3051_v60  ;;  %v8448_v10 = vpack.c.bf16 %v3036_v28, %v3035_v48  ;;  %v3007_v23 = vld [vmem:[%s9566_s13 + $0x60] sm:$0xff]  ;;  %v3008_v27 = vld [vmem:[%s9566_s13 + $0x68] sm:$0xff] }
 0x346   : > { %5077 = vmatmul.mubr.msk.f32.vlgmr.msra.gmra.mrb[14].mxu1 %vm864_vm8, %v6360_v31  ;;  %5738 = vmatprep.subr.bf16.mxu1 %v8295_v6  ;;  %v3173_v30 = vmax.f32 %v3092_v51, 1e-24  ;;  %v3174_v31 = vmax.f32 %v3098_v2, 1e-24  ;;  %v8446_v42 = vpack.c.bf16 %v3006_v19, %v3005_v17  ;;  %v8458_v41 = vpack.c.bf16 %v3024_v35, %v3023_v9  ;;  %v3038_v57 = vld [vmem:[%s9566_s13 + $0x158] sm:$0xff]  ;;  %v3025_v49 = vld [vmem:[%s9566_s13 + $0xf0] sm:$0xff] }
 0x347   : > { %5712 = vmatpush3.bf16.msra.mxu0 %v8298_v15  ;;  %5740 = vmatpush3.bf16.msra.mxu1 %v8300_v22  ;;  %v3172_v55 = vmax.f32 %v3086_v43, 1e-24  ;;  %v8460_v18 = vpack.c.bf16 %v3054_v11, %v3053_v56  ;;  %v3026_v59 = vld [vmem:[%s9566_s13 + $0xf8] sm:$0xff]  ;;  %v3055_v20 = vld [vmem:[%s9566_s13 + $0x1e0] sm:$0xff]  ;;  %v3056_v40 = vld [vmem:[%s9566_s13 + $0x1e8] sm:$0xff]  ;;  %v8486_v62 = vpack.c.bf16 %v3008_v27, %v3007_v23  ;;  %v8488_v24 = vpack.c.bf16 %v3038_v57, %v3037_v54 }
 0x348   : > { %5714 = vmatprep.subr.bf16.mxu0 %v8309_v47  ;;  %5742 = vmatprep.subr.bf16.mxu1 %v8311_v16  ;;  %v3009_v53 = vld [vmem:[%s9566_s13 + $0x70] sm:$0xff]  ;;  %v8495_v36 = vpack.c.bf16 %v3026_v59, %v3025_v49  ;;  %v8497_v38 = vpack.c.bf16 %v3056_v40, %v3055_v20  ;;  %v3010_v60 = vld [vmem:[%s9566_s13 + $0x78] sm:$0xff]  ;;  %v3039_v7 = vld [vmem:[%s9566_s13 + $0x160] sm:$0xff] }
 0x349   : > { %6206 = vrsqrt.f32 %v3172_v55  ;;  %v3040_v4 = vld [vmem:[%s9566_s13 + $0x168] sm:$0xff]  ;;  %v3057_v55 = vld [vmem:[%s9566_s13 + $0x1f0] sm:$0xff]  ;;  %v3058_v2 = vld [vmem:[%s9566_s13 + $0x1f8] sm:$0xff]  ;;  %v8518_v28 = vpack.c.bf16 %v3010_v60, %v3009_v53 }
 0x34a   : > { %6208 = vrsqrt.f32 %v3173_v30  ;;  %v8520_v9 = vpack.c.bf16 %v3040_v4, %v3039_v7  ;;  %v8524_v56 = vpack.c.bf16 %v3058_v2, %v3057_v55  ;;  %v3041_v11 = vld [vmem:[%s9566_s13 + $0x170] sm:$0xff]  ;;  %v3042_v30 = vld [vmem:[%s9566_s13 + $0x178] sm:$0xff]  ;;  %v8545_v60 = vld [vmem:[%s8178_s15 + $0x20] sm:$0xff] }
 0x34b   : > { %5716 = vmatpush3.bf16.msra.mxu0 %v8338_v25  ;;  %5744 = vmatpush3.bf16.msra.mxu1 %v8340_v34  ;;  %6210 = vrsqrt.f32 %v3174_v31  ;;  %v8535_v27 = vpack.c.bf16 %v3042_v30, %v3041_v11  ;;  %v8555_v55 = vld [vmem:[%s8178_s15 + $0x30] sm:$0xff]  ;;  %v8559_v2 = vld [vmem:[%s8178_s15 + $0x38] sm:$0xff] }
 0x34c   : > { %5718 = vmatprep.subr.bf16.mxu0 %v8350_v32  ;;  %5746 = vmatprep.subr.bf16.mxu1 %v8352_v8  ;;  %v8471_v61 = vpop.permute.xlu0 %2944  ;;  %v3066_v30 = vmul.f32 %v8559_v2, %v8559_v2 }
 0x34e   : > { %v6205_v35 = vpop.eup %6204 }
 0x34f   : > { %5720 = vmatpush3.bf16.msra.mxu0 %v8374_v26  ;;  %5748 = vmatpush3.bf16.msra.mxu1 %v8376_v58  ;;  %v3203_v23 = vmul.f32 %v6205_v35, %v8183_v44  ;;  %v3065_v35 = vmul.f32 %v8555_v55, %v8555_v55 }
 0x350   : > { %5722 = vmatprep.subr.bf16.mxu0 %v8386_v52  ;;  %5750 = vmatprep.subr.bf16.mxu1 %v8388_v63 }
 0x353   : > { %5724 = vmatpush3.bf16.msra.mxu0 %v8410_v3  ;;  %5752 = vmatpush3.bf16.msra.mxu1 %v8412_v5  ;;  %v6207_v31 = vpop.eup %6206 }
 0x354   : > { %5726 = vmatprep.subr.bf16.mxu0 %v8422_v13  ;;  %5754 = vmatprep.subr.bf16.mxu1 %v8424_v14  ;;  %v6209_v54 = vpop.eup %6208  ;;  %v3204_v57 = vmul.f32 %v6207_v31, %v8186_v12 }
 0x355   : > { %v2056_v1 = vpop.f32.mrb[8].mxu0  ;;  %v6211_v49 = vpop.eup %6210  ;;  %v3205_v44 = vmul.f32 %v6209_v54, %v8191_v33  ;;  %v8548_v33 = vld [vmem:[%s8178_s15 + $0x28] sm:$0xff] }
 0x356   : > { %v2947_v43 = vadd.f32 %v8471_v61, %v2056_v1  ;;  %v2058_v29 = vpop.f32.mrb[9].mxu0 }
 0x357   : > { %v2948_v0 = vadd.f32 %v8471_v61, %v2058_v29  ;;  %5728 = vmatpush3.bf16.msra.mxu0 %v8446_v42  ;;  %5756 = vmatpush3.bf16.msra.mxu1 %v8448_v10 }
 0x358   : > { %6212 = vtanh.f32 %v2947_v43  ;;  %5730 = vmatprep.subr.bf16.mxu0 %v8458_v41  ;;  %5758 = vmatprep.subr.bf16.mxu1 %v8460_v18  ;;  %v3206_v43 = vmul.f32 %v6211_v49, %v8200_v39  ;;  %v3063_v39 = vmul.f32 %v8545_v60, %v8545_v60 }
 0x359   : > { %6214 = vtanh.f32 %v2948_v0  ;;  %v2127_v51 = vpop.f32.mrb[8].mxu1 }
 0x35a   : > { %v2949_v17 = vadd.f32 %v8471_v61, %v2127_v51  ;;  %v2129_v19 = vpop.f32.mrb[9].mxu1  ;;  %v3064_v51 = vmul.f32 %v8548_v33, %v8548_v33 }
 0x35b   : > { %v2950_v48 = vadd.f32 %v8471_v61, %v2129_v19  ;;  %5732 = vmatpush3.bf16.msra.mxu0 %v8486_v62  ;;  %5760 = vmatpush3.bf16.msra.mxu1 %v8488_v24 }
 0x35c   : > { %6216 = vtanh.f32 %v2949_v17  ;;  %5734 = vmatprep.subr.bf16.mxu0 %v8495_v36  ;;  %5762 = vmatprep.subr.bf16.mxu1 %v8497_v38  ;;  %v3105_v11 = vrot.slane %v3064_v51, 4 }
 0x35d   : > { %6218 = vtanh.f32 %v2950_v48  ;;  %v3099_v48 = vrot.slane %v3063_v39, 4 }
 0x35e   : > { %v3106_v54 = vadd.f32 %v3105_v11, %v3064_v51 }
 0x35f   : > { %5736 = vmatpush3.bf16.msra.mxu0 %v8518_v28  ;;  %5764 = vmatpush3.bf16.msra.mxu1 %v8520_v9  ;;  %v3100_v31 = vadd.f32 %v3099_v48, %v3063_v39 }
 0x360   : > { %5766 = vmatprep.subr.bf16.mxu1 %v8524_v56  ;;  %5770 = vmatprep.subr.bf16.mxu0 %v8250_v46 }
 0x361   : > { %v3101_v49 = vrot.slane %v3100_v31, 2 }
 0x362   : > { %v6213_v1 = vpop.eup %6212 }
 0x363   : > { %v6215_v59 = vpop.eup %6214  ;;  %v3219_v20 = vmul.f32 %v6213_v1, %v3203_v23  ;;  %5768 = vmatpush3.bf16.msra.mxu1 %v8535_v27  ;;  %v3111_v23 = vrot.slane %v3065_v35, 4 }
 0x364   : > { %v3220_v40 = vmul.f32 %v6215_v59, %v3204_v57  ;;  %5802 = vmatprep.subr.bf16.mxu1 %v8295_v6  ;;  %v3117_v57 = vrot.slane %v3066_v30, 4  ;;  %v3107_v59 = vrot.slane %v3106_v54, 2 }
 0x365   : > { %v3112_v1 = vadd.f32 %v3111_v23, %v3065_v35 }
 0x366   : > { %v6217_v12 = vpop.eup %6216  ;;  %6220 = vtanh.f32 %v3220_v40 }
 0x367   : > { %v6219_v29 = vpop.eup %6218  ;;  %6222 = vtanh.f32 %v3219_v20  ;;  %v3221_v0 = vmul.f32 %v6217_v12, %v3205_v44  ;;  %v3118_v20 = vadd.f32 %v3117_v57, %v3066_v30  ;;  %v3102_v44 = vadd.f32 %v3101_v49, %v3100_v31 }
 0x368   : > { %v3222_v53 = vmul.f32 %v6219_v29, %v3206_v43  ;;  %v3113_v40 = vrot.slane %v3112_v1, 2  ;;  %v3108_v43 = vadd.f32 %v3107_v59, %v3106_v54 }
 0x369   : > { %v3119_v12 = vrot.slane %v3118_v20, 2  ;;  %v3103_v29 = vrot.slane %v3102_v44, 1 }
 0x36a   : > { %6224 = vtanh.f32 %v3222_v53  ;;  %v3109_v53 = vrot.slane %v3108_v43, 1 }
 0x36b   : > { %6226 = vtanh.f32 %v3221_v0  ;;  %v3114_v0 = vadd.f32 %v3113_v40, %v3112_v1 }
 0x36c   : > { %v3110_v51 = vadd.f32 %v3109_v53, %v3108_v43 }
 0x36d   : > { %v3115_v39 = vrot.slane %v3114_v0, 1 }
 0x36e   : > { %v3176_v35 = vmax.f32 %v3110_v51, 1e-24 }
 0x36f   : > { %v3116_v48 = vadd.f32 %v3115_v39, %v3114_v0 }
 0x370   : > { %v6221_v7 = vpop.eup %6220 }
 0x371   : > { %v6223_v4 = vpop.eup %6222  ;;  %3315 = vmatprep.mubr.f32.mxu0 %v6221_v7  ;;  %v3120_v7 = vadd.f32 %v3119_v12, %v3118_v20  ;;  %v3177_v30 = vmax.f32 %v3116_v48, 1e-24 }
 0x372   : > { %3316 = vmatmul.mubr.f32.vlgmr.msra.gmra.mrb[16].mxu0 %v6223_v4  ;;  %v3104_v4 = vadd.f32 %v3103_v29, %v3102_v44 }
 0x373   : > { %5772 = vmatpush3.bf16.msra.mxu0 %v8255_v50 }
 0x374   : > { %v6225_v17 = vpop.eup %6224  ;;  %5774 = vmatprep.subr.bf16.mxu0 %v8266_v37 }
 0x375   : > { %v6227_v19 = vpop.eup %6226  ;;  %3385 = vmatprep.mubr.f32.mxu1 %v6225_v17  ;;  %v3121_v17 = vrot.slane %v3120_v7, 1 }
 0x376   : > { %3386 = vmatmul.mubr.f32.vlgmr.msra.gmra.mrb[16].mxu1 %v6227_v19  ;;  %v3175_v19 = vmax.f32 %v3104_v4, 1e-24 }
 0x377   : > { %5776 = vmatpush3.bf16.msra.mxu0 %v8298_v15  ;;  %5804 = vmatpush3.bf16.msra.mxu1 %v8300_v22  ;;  %v3122_v11 = vadd.f32 %v3121_v17, %v3120_v7 }
 0x378   : > { %5778 = vmatprep.subr.bf16.mxu0 %v8309_v47  ;;  %5806 = vmatprep.subr.bf16.mxu1 %v8311_v16  ;;  %6228 = vrsqrt.f32 %v3175_v19 }
 0x379   : > { %6230 = vrsqrt.f32 %v3176_v35  ;;  %v3178_v31 = vmax.f32 %v3122_v11, 1e-24 }
 0x37a   : > { %6232 = vrsqrt.f32 %v3177_v30  ;;  %v8605_v30 = vld [vmem:[%s8178_s15 + $0x40] sm:$0xff] }
 0x37b   : > { %5780 = vmatpush3.bf16.msra.mxu0 %v8338_v25  ;;  %5808 = vmatpush3.bf16.msra.mxu1 %v8340_v34  ;;  %6234 = vrsqrt.f32 %v3178_v31 }
 0x37c   : > { %5782 = vmatprep.subr.bf16.mxu0 %v8350_v32  ;;  %5810 = vmatprep.subr.bf16.mxu1 %v8352_v8 }
 0x37f   : > { %5784 = vmatpush3.bf16.msra.mxu0 %v8374_v26  ;;  %5812 = vmatpush3.bf16.msra.mxu1 %v8376_v58 }
 0x380   : > { %5786 = vmatprep.subr.bf16.mxu0 %v8386_v52  ;;  %5814 = vmatprep.subr.bf16.mxu1 %v8388_v63 }
 0x382   : > { %v6229_v40 = vpop.eup %6228 }
 0x383   : > { %5788 = vmatpush3.bf16.msra.mxu0 %v8410_v3  ;;  %5816 = vmatpush3.bf16.msra.mxu1 %v8412_v5  ;;  %v6231_v43 = vpop.eup %6230  ;;  %v3207_v12 = vmul.f32 %v6229_v40, %v8545_v60 }
 0x384   : > { %5790 = vmatprep.subr.bf16.mxu0 %v8422_v13  ;;  %5818 = vmatprep.subr.bf16.mxu1 %v8424_v14  ;;  %v6233_v29 = vpop.eup %6232  ;;  %v3208_v0 = vmul.f32 %v6231_v43, %v8548_v33 }
 0x385   : > { %v6235_v53 = vpop.eup %6234  ;;  %v3209_v51 = vmul.f32 %v6233_v29, %v8555_v55  ;;  %v3067_v55 = vmul.f32 %v8605_v30, %v8605_v30 }
 0x386   : > { %v3210_v19 = vmul.f32 %v6235_v53, %v8559_v2 }
 0x387   : > { %5792 = vmatpush3.bf16.msra.mxu0 %v8446_v42  ;;  %5820 = vmatpush3.bf16.msra.mxu1 %v8448_v10 }
 0x388   : > { %5794 = vmatprep.subr.bf16.mxu0 %v8458_v41  ;;  %5822 = vmatprep.subr.bf16.mxu1 %v8460_v18 }
 0x38b   : > { %5796 = vmatpush3.bf16.msra.mxu0 %v8486_v62  ;;  %5824 = vmatpush3.bf16.msra.mxu1 %v8488_v24 }
 0x38c   : > { %5798 = vmatprep.subr.bf16.mxu0 %v8495_v36  ;;  %5826 = vmatprep.subr.bf16.mxu1 %v8497_v38 }
 0x38f   : > { %5800 = vmatpush3.bf16.msra.mxu0 %v8518_v28  ;;  %5828 = vmatpush3.bf16.msra.mxu1 %v8520_v9 }
 0x390   : > { %5830 = vmatprep.subr.bf16.mxu1 %v8524_v56  ;;  %5834 = vmatprep.subr.bf16.mxu0 %v8250_v46 }
 0x393   : > { %5832 = vmatpush3.bf16.msra.mxu1 %v8535_v27 }
 0x394   : > { %5866 = vmatprep.subr.bf16.mxu1 %v8295_v6 }
 0x395   : > { %v2326_v23 = vpop.f32.mrb[10].mxu0 }
 0x396   : > { %v2951_v54 = vadd.f32 %v8471_v61, %v2326_v23  ;;  %v2328_v57 = vpop.f32.mrb[11].mxu0  ;;  %v8608_v23 = vld [vmem:[%s8178_s15 + $0x48] sm:$0xff] }
 0x397   : > { %v2952_v49 = vadd.f32 %v8471_v61, %v2328_v57  ;;  %v8617_v57 = vld [vmem:[%s8178_s15 + $0x50] sm:$0xff] }
 0x398   : > { %6236 = vtanh.f32 %v2951_v54  ;;  %v3068_v54 = vmul.f32 %v8608_v23, %v8608_v23 }
 0x399   : > { %6238 = vtanh.f32 %v2952_v49  ;;  %v2397_v1 = vpop.f32.mrb[10].mxu1 }
 0x39a   : > { %v2953_v59 = vadd.f32 %v8471_v61, %v2397_v1  ;;  %v2399_v20 = vpop.f32.mrb[11].mxu1  ;;  %v8620_v1 = vld [vmem:[%s8178_s15 + $0x58] sm:$0xff] }
 0x39b   : > { %v2954_v44 = vadd.f32 %v8471_v61, %v2399_v20  ;;  %v3069_v20 = vmul.f32 %v8617_v57, %v8617_v57  ;;  %v3070_v40 = vmul.f32 %v8620_v1, %v8620_v1 }
 0x39c   : > { %6240 = vtanh.f32 %v2953_v59  ;;  %v3123_v59 = vrot.slane %v3067_v55, 4 }
 0x39d   : > { %6242 = vtanh.f32 %v2954_v44  ;;  %v3129_v44 = vrot.slane %v3068_v54, 4 }
 0x39e   : > { %v3124_v43 = vadd.f32 %v3123_v59, %v3067_v55 }
 0x39f   : > { %v3130_v29 = vadd.f32 %v3129_v44, %v3068_v54 }
 0x3a0   : > { %v3125_v53 = vrot.slane %v3124_v43, 2 }
 0x3a2   : > { %v6237_v7 = vpop.eup %6236 }
 0x3a3   : > { %v6239_v4 = vpop.eup %6238  ;;  %v3223_v39 = vmul.f32 %v6237_v7, %v3207_v12  ;;  %v3135_v12 = vrot.slane %v3069_v20, 4 }
 0x3a4   : > { %v3224_v17 = vmul.f32 %v6239_v4, %v3208_v0  ;;  %v3141_v0 = vrot.slane %v3070_v40, 4  ;;  %v3131_v4 = vrot.slane %v3130_v29, 2 }
 0x3a5   : > { %v3136_v7 = vadd.f32 %v3135_v12, %v3069_v20 }
 0x3a6   : > { %v6241_v48 = vpop.eup %6240  ;;  %6244 = vtanh.f32 %v3224_v17 }
 0x3a7   : > { %v6243_v35 = vpop.eup %6242  ;;  %6246 = vtanh.f32 %v3223_v39  ;;  %v3225_v60 = vmul.f32 %v6241_v48, %v3209_v51  ;;  %v3142_v39 = vadd.f32 %v3141_v0, %v3070_v40  ;;  %v3126_v51 = vadd.f32 %v3125_v53, %v3124_v43 }
 0x3a8   : > { %v3226_v11 = vmul.f32 %v6243_v35, %v3210_v19  ;;  %v3137_v17 = vrot.slane %v3136_v7, 2  ;;  %v3132_v19 = vadd.f32 %v3131_v4, %v3130_v29 }
 0x3a9   : > { %v3143_v48 = vrot.slane %v3142_v39, 2  ;;  %v3127_v35 = vrot.slane %v3126_v51, 1 }
 0x3aa   : > { %6248 = vtanh.f32 %v3226_v11  ;;  %v3133_v11 = vrot.slane %v3132_v19, 1 }
 0x3ab   : > { %6250 = vtanh.f32 %v3225_v60  ;;  %v3138_v60 = vadd.f32 %v3137_v17, %v3136_v7 }
 0x3ad   : > { %v3139_v55 = vrot.slane %v3138_v60, 1 }
 0x3af   : > { %v3140_v59 = vadd.f32 %v3139_v55, %v3138_v60 }
 0x3b0   : > { %v6245_v33 = vpop.eup %6244 }
 0x3b1   : > { %v6247_v31 = vpop.eup %6246  ;;  %3455 = vmatprep.mubr.f32.mxu0 %v6245_v33  ;;  %v3144_v33 = vadd.f32 %v3143_v48, %v3142_v39  ;;  %v3181_v40 = vmax.f32 %v3140_v59, 1e-24 }
 0x3b2   : > { %3456 = vmatmul.mubr.f32.vlgmr.msra.gmra.mrb[18].mxu0 %v6247_v31  ;;  %v3128_v31 = vadd.f32 %v3127_v35, %v3126_v51 }
 0x3b3   : > { %5836 = vmatpush3.bf16.msra.mxu0 %v8255_v50  ;;  %v3145_v54 = vrot.slane %v3144_v33, 1 }
 0x3b4   : > { %v6249_v2 = vpop.eup %6248  ;;  %5838 = vmatprep.subr.bf16.mxu0 %v8266_v37 }
 0x3b5   : > { %v6251_v49 = vpop.eup %6250  ;;  %3525 = vmatprep.mubr.f32.mxu1 %v6249_v2  ;;  %v3134_v2 = vadd.f32 %v3133_v11, %v3132_v19  ;;  %v3146_v44 = vadd.f32 %v3145_v54, %v3144_v33 }
 0x3b6   : > { %3526 = vmatmul.mubr.f32.vlgmr.msra.gmra.mrb[18].mxu1 %v6251_v49  ;;  %v3179_v49 = vmax.f32 %v3128_v31, 1e-24 }
 0x3b7   : > { %5840 = vmatpush3.bf16.msra.mxu0 %v8298_v15  ;;  %5868 = vmatpush3.bf16.msra.mxu1 %v8300_v22  ;;  %v3180_v20 = vmax.f32 %v3134_v2, 1e-24  ;;  %v3182_v43 = vmax.f32 %v3146_v44, 1e-24  ;;  %v8668_v44 = vld [vmem:[%s8178_s15 + $0x68] sm:$0xff] }
 0x3b8   : > { %5842 = vmatprep.subr.bf16.mxu0 %v8309_v47  ;;  %5870 = vmatprep.subr.bf16.mxu1 %v8311_v16  ;;  %6252 = vrsqrt.f32 %v3179_v49 }
 0x3b9   : > { %6254 = vrsqrt.f32 %v3180_v20 }
 0x3ba   : > { %6256 = vrsqrt.f32 %v3181_v40 }
 0x3bb   : > { %5844 = vmatpush3.bf16.msra.mxu0 %v8338_v25  ;;  %5872 = vmatpush3.bf16.msra.mxu1 %v8340_v34  ;;  %6258 = vrsqrt.f32 %v3182_v43  ;;  %v8676_v43 = vld [vmem:[%s8178_s15 + $0x70] sm:$0xff] }
 0x3bc   : > { %5846 = vmatprep.subr.bf16.mxu0 %v8350_v32  ;;  %5874 = vmatprep.subr.bf16.mxu1 %v8352_v8 }
 0x3bf   : > { %5848 = vmatpush3.bf16.msra.mxu0 %v8374_v26  ;;  %5876 = vmatpush3.bf16.msra.mxu1 %v8376_v58 }
 0x3c0   : > { %5850 = vmatprep.subr.bf16.mxu0 %v8386_v52  ;;  %5878 = vmatprep.subr.bf16.mxu1 %v8388_v63 }
 0x3c2   : > { %v6253_v51 = vpop.eup %6252 }
 0x3c3   : > { %5852 = vmatpush3.bf16.msra.mxu0 %v8410_v3  ;;  %5880 = vmatpush3.bf16.msra.mxu1 %v8412_v5  ;;  %v6255_v17 = vpop.eup %6254 }
 0x3c4   : > { %5854 = vmatprep.subr.bf16.mxu0 %v8422_v13  ;;  %5882 = vmatprep.subr.bf16.mxu1 %v8424_v14  ;;  %v6257_v19 = vpop.eup %6256  ;;  %v3212_v48 = vmul.f32 %v6255_v17, %v8608_v23  ;;  %v8665_v23 = vld [vmem:[%s8178_s15 + $0x60] sm:$0xff] }
 0x3c5   : > { %v6259_v35 = vpop.eup %6258  ;;  %v3213_v31 = vmul.f32 %v6257_v19, %v8617_v57  ;;  %v3071_v57 = vmul.f32 %v8665_v23, %v8665_v23 }
 0x3c6   : > { %v3214_v2 = vmul.f32 %v6259_v35, %v8620_v1  ;;  %v3072_v1 = vmul.f32 %v8668_v44, %v8668_v44 }
 0x3c7   : > { %5856 = vmatpush3.bf16.msra.mxu0 %v8446_v42  ;;  %5884 = vmatpush3.bf16.msra.mxu1 %v8448_v10 }
 0x3c8   : > { %5858 = vmatprep.subr.bf16.mxu0 %v8458_v41  ;;  %5886 = vmatprep.subr.bf16.mxu1 %v8460_v18 }
 0x3cb   : > { %5860 = vmatpush3.bf16.msra.mxu0 %v8486_v62  ;;  %5888 = vmatpush3.bf16.msra.mxu1 %v8488_v24 }
 0x3cc   : > { %5862 = vmatprep.subr.bf16.mxu0 %v8495_v36  ;;  %5890 = vmatprep.subr.bf16.mxu1 %v8497_v38 }
 0x3cf   : > { %5864 = vmatpush3.bf16.msra.mxu0 %v8518_v28  ;;  %5892 = vmatpush3.bf16.msra.mxu1 %v8520_v9 }
 0x3d0   : > { %5894 = vmatprep.subr.bf16.mxu1 %v8524_v56  ;;  %5898 = vmatprep.subr.bf16.mxu0 %v8250_v46 }
 0x3d3   : > { %5896 = vmatpush3.bf16.msra.mxu1 %v8535_v27 }
 0x3d4   : > { %5930 = vmatprep.subr.bf16.mxu1 %v8295_v6  ;;  %v3211_v6 = vmul.f32 %v6253_v51, %v8605_v30 }
 0x3d5   : > { %v2596_v12 = vpop.f32.mrb[12].mxu0 }
 0x3d6   : > { %v2955_v29 = vadd.f32 %v8471_v61, %v2596_v12  ;;  %v2598_v0 = vpop.f32.mrb[13].mxu0 }
 0x3d7   : > { %v2956_v53 = vadd.f32 %v8471_v61, %v2598_v0 }
 0x3d8   : > { %6260 = vtanh.f32 %v2955_v29  ;;  %v8680_v29 = vld [vmem:[%s8178_s15 + $0x78] sm:$0xff]  ;;  %s6395_s15 = smov 9  }
 0x3d9   : > { %6262 = vtanh.f32 %v2956_v53  ;;  %v2667_v7 = vpop.f32.mrb[12].mxu1  ;;  %v3147_v53 = vrot.slane %v3071_v57, 4 }
 0x3da   : > { %v2957_v46 = vadd.f32 %v8471_v61, %v2667_v7  ;;  %v2669_v4 = vpop.f32.mrb[13].mxu1  ;;  %v3073_v7 = vmul.f32 %v8676_v43, %v8676_v43 }
 0x3db   : > { %v2958_v39 = vadd.f32 %v8471_v61, %v2669_v4 }
 0x3dc   : > { %6264 = vtanh.f32 %v2957_v46  ;;  %v3153_v46 = vrot.slane %v3072_v1, 4  ;;  %v3159_v4 = vrot.slane %v3073_v7, 4 }
 0x3dd   : > { %6266 = vtanh.f32 %v2958_v39 }
 0x3de   : > { %v3154_v39 = vadd.f32 %v3153_v46, %v3072_v1 }
 0x3e0   : > { %v3155_v17 = vrot.slane %v3154_v39, 2 }
 0x3e2   : > { %v6261_v60 = vpop.eup %6260 }
 0x3e3   : > { %v6263_v11 = vpop.eup %6262  ;;  %v3227_v33 = vmul.f32 %v6261_v60, %v3211_v6 }
 0x3e4   : > { %v3228_v55 = vmul.f32 %v6263_v11, %v3212_v48 }
 0x3e6   : > { %v6265_v54 = vpop.eup %6264  ;;  %6268 = vtanh.f32 %v3228_v55 }
 0x3e7   : > { %v6267_v49 = vpop.eup %6266  ;;  %6270 = vtanh.f32 %v3227_v33  ;;  %v3229_v30 = vmul.f32 %v6265_v54, %v3213_v31 }
 0x3e8   : > { %v3230_v59 = vmul.f32 %v6267_v49, %v3214_v2 }
 0x3ea   : > { %6272 = vtanh.f32 %v3230_v59 }
 0x3eb   : > { %6274 = vtanh.f32 %v3229_v30 }
 0x3f0   : > { %v6269_v20 = vpop.eup %6268 }
 0x3f1   : > { %v6271_v40 = vpop.eup %6270  ;;  %3595 = vmatprep.mubr.f32.mxu0 %v6269_v20 }
 0x3f2   : > { %3596 = vmatmul.mubr.f32.vlgmr.msra.gmra.mrb[20].mxu0 %v6271_v40 }
 0x3f3   : > { %5900 = vmatpush3.bf16.msra.mxu0 %v8255_v50  ;;  %v3074_v50 = vmul.f32 %v8680_v29, %v8680_v29 }
 0x3f4   : > { %v6273_v12 = vpop.eup %6272  ;;  %5902 = vmatprep.subr.bf16.mxu0 %v8266_v37  ;;  %v3148_v37 = vadd.f32 %v3147_v53, %v3071_v57 }
 0x3f5   : > { %v6275_v0 = vpop.eup %6274  ;;  %3665 = vmatprep.mubr.f32.mxu1 %v6273_v12  ;;  %v3165_v51 = vrot.slane %v3074_v50, 4 }
 0x3f6   : > { %3666 = vmatmul.mubr.f32.vlgmr.msra.gmra.mrb[20].mxu1 %v6275_v0 }
 0x3f7   : > { %5904 = vmatpush3.bf16.msra.mxu0 %v8298_v15  ;;  %5932 = vmatpush3.bf16.msra.mxu1 %v8300_v22  ;;  %v3149_v15 = vrot.slane %v3148_v37, 2  ;;  %v3160_v22 = vadd.f32 %v3159_v4, %v3073_v7  ;;  %v3166_v6 = vadd.f32 %v3165_v51, %v3074_v50 }
 0x3f8   : > { %5906 = vmatprep.subr.bf16.mxu0 %v8309_v47  ;;  %5934 = vmatprep.subr.bf16.mxu1 %v8311_v16 }
 0x3f9   : > { %v3150_v47 = vadd.f32 %v3149_v15, %v3148_v37  ;;  %v3161_v16 = vrot.slane %v3160_v22, 2 }
 0x3fb   : > { %5908 = vmatpush3.bf16.msra.mxu0 %v8338_v25  ;;  %5936 = vmatpush3.bf16.msra.mxu1 %v8340_v34  ;;  %v3156_v25 = vadd.f32 %v3155_v17, %v3154_v39  ;;  %v3167_v34 = vrot.slane %v3166_v6, 2 }
 0x3fc   : > { %5910 = vmatprep.subr.bf16.mxu0 %v8350_v32  ;;  %5938 = vmatprep.subr.bf16.mxu1 %v8352_v8  ;;  %v3151_v32 = vrot.slane %v3150_v47, 1  ;;  %v3162_v8 = vadd.f32 %v3161_v16, %v3160_v22 }
 0x3ff   : > { %5912 = vmatpush3.bf16.msra.mxu0 %v8374_v26  ;;  %5940 = vmatpush3.bf16.msra.mxu1 %v8376_v58  ;;  %v3157_v26 = vrot.slane %v3156_v25, 1  ;;  %v3168_v58 = vadd.f32 %v3167_v34, %v3166_v6 }
 0x400   : > { %5914 = vmatprep.subr.bf16.mxu0 %v8386_v52  ;;  %5942 = vmatprep.subr.bf16.mxu1 %v8388_v63  ;;  %v3152_v52 = vadd.f32 %v3151_v32, %v3150_v47  ;;  %v3163_v63 = vrot.slane %v3162_v8, 1 }
 0x403   : > { %5916 = vmatpush3.bf16.msra.mxu0 %v8410_v3  ;;  %5944 = vmatpush3.bf16.msra.mxu1 %v8412_v5  ;;  %v3158_v3 = vadd.f32 %v3157_v26, %v3156_v25  ;;  %v3169_v5 = vrot.slane %v3168_v58, 1 }
 0x404   : > { %5918 = vmatprep.subr.bf16.mxu0 %v8422_v13  ;;  %5946 = vmatprep.subr.bf16.mxu1 %v8424_v14  ;;  %v3183_v13 = vmax.f32 %v3152_v52, 1e-24  ;;  %v3164_v14 = vadd.f32 %v3163_v63, %v3162_v8 }
 0x406   : > { %6276 = vrsqrt.f32 %v3183_v13  ;;  %v3814_v13 = vld [vmem:[%s9561_s8 + $0x8] sm:$0xff] }
 0x407   : > { %5920 = vmatpush3.bf16.msra.mxu0 %v8446_v42  ;;  %5948 = vmatpush3.bf16.msra.mxu1 %v8448_v10  ;;  %v3184_v42 = vmax.f32 %v3158_v3, 1e-24  ;;  %v3170_v10 = vadd.f32 %v3169_v5, %v3168_v58 }
 0x408   : > { %5922 = vmatprep.subr.bf16.mxu0 %v8458_v41  ;;  %5950 = vmatprep.subr.bf16.mxu1 %v8460_v18  ;;  %v3185_v41 = vmax.f32 %v3164_v14, 1e-24  ;;  %v3813_v14 = vld [vmem:[%s9561_s8] sm:$0xff] }
 0x409   : > { %6278 = vrsqrt.f32 %v3184_v42  ;;  %v3186_v18 = vmax.f32 %v3170_v10, 1e-24 }
 0x40a   : > { %6280 = vrsqrt.f32 %v3185_v41 }
 0x40b   : > { %5924 = vmatpush3.bf16.msra.mxu0 %v8486_v62  ;;  %5952 = vmatpush3.bf16.msra.mxu1 %v8488_v24  ;;  %6282 = vrsqrt.f32 %v3186_v18 }
 0x40c   : > { %5926 = vmatprep.subr.bf16.mxu0 %v8495_v36  ;;  %5954 = vmatprep.subr.bf16.mxu1 %v8497_v38 }
 0x40f   : > { %5928 = vmatpush3.bf16.msra.mxu0 %v8518_v28  ;;  %5956 = vmatpush3.bf16.msra.mxu1 %v8520_v9 }
 0x410   : > { %5958 = vmatprep.subr.bf16.mxu1 %v8524_v56  ;;  %v6277_v48 = vpop.eup %6276 }
 0x413   : > { %5960 = vmatpush3.bf16.msra.mxu1 %v8535_v27  ;;  %v6279_v35 = vpop.eup %6278  ;;  %v3215_v27 = vmul.f32 %v6277_v48, %v8665_v23  ;;  %v9643_v48 = vld [vmem:[#allocation8_spill] sm:$0xff] }
 0x414   : > { %v6281_v60 = vpop.eup %6280  ;;  %v3216_v11 = vmul.f32 %v6279_v35, %v8668_v44 }
 0x415   : > { %v2866_v62 = vpop.f32.mrb[14].mxu0  ;;  %v6283_v33 = vpop.eup %6282  ;;  %v3217_v54 = vmul.f32 %v6281_v60, %v8676_v43 }
 0x416   : > { %v2959_v24 = vadd.f32 %v8471_v61, %v2866_v62  ;;  %v2868_v36 = vpop.f32.mrb[15].mxu0  ;;  %v3218_v30 = vmul.f32 %v6283_v33, %v8680_v29 }
 0x417   : > { %v2960_v38 = vadd.f32 %v8471_v61, %v2868_v36  ;;  %v577_v36 = vld [vmem:[%s9565_s12 + $0x8] sm:$0xff] }
 0x418   : > { %6284 = vtanh.f32 %v2959_v24  ;;  %v576_v24 = vld [vmem:[%s9565_s12] sm:$0xff] }
 0x419   : > { %6286 = vtanh.f32 %v2960_v38  ;;  %v2937_v28 = vpop.f32.mrb[14].mxu1  ;;  %v8817_v35 = vrot.slane %v576_v24, %v9643_v48 }
 0x41a   : > { %v2961_v9 = vadd.f32 %v8471_v61, %v2937_v28  ;;  %v2939_v56 = vpop.f32.mrb[15].mxu1 }
 0x41b   : > { %v2962_v19 = vadd.f32 %v8471_v61, %v2939_v56 }
 0x41c   : > { %6288 = vtanh.f32 %v2961_v9  ;;  %v9642_v9 = vld [vmem:[#allocation7_spill] sm:$0xff] }
 0x41d   : > { %6290 = vtanh.f32 %v2962_v19  ;;  %v8810_v56 = vrot.slane %v576_v24, %v9642_v9  ;;  %v8813_v19 = vrot.slane %v577_v36, %v9642_v9 }
 0x422   : > { %v6285_v31 = vpop.eup %6284 }
 0x423   : > { %v6287_v55 = vpop.eup %6286  ;;  %v3231_v2 = vmul.f32 %v6285_v31, %v3215_v27  ;;  %v8820_v27 = vrot.slane %v577_v36, %v9643_v48 }
 0x424   : > { %v3232_v49 = vmul.f32 %v6287_v55, %v3216_v11 }
 0x426   : > { %v6289_v59 = vpop.eup %6288  ;;  %6292 = vtanh.f32 %v3232_v49 }
 0x427   : > { %v6291_v61 = vpop.eup %6290  ;;  %6294 = vtanh.f32 %v3231_v2  ;;  %v3233_v20 = vmul.f32 %v6289_v59, %v3217_v54 }
 0x428   : > { %v3234_v40 = vmul.f32 %v6291_v61, %v3218_v30 }
 0x42a   : > { %6296 = vtanh.f32 %v3234_v40 }
 0x42b   : > { %6298 = vtanh.f32 %v3233_v20 }
 0x430   : > { %v6293_v23 = vpop.eup %6292 }
 0x431   : > { %v6295_v57 = vpop.eup %6294  ;;  %3735 = vmatprep.mubr.f32.mxu0 %v6293_v23  ;;  %v9644_v23 = vld [vmem:[#allocation9_spill] sm:$0xff] }
 0x432   : > { %3736 = vmatmul.mubr.f32.vlgmr.msra.gmra.mrb[22].mxu0 %v6295_v57  ;;  %v8836_v57 = vrot.slane %v576_v24, %v9644_v23 }
 0x433   : > { %4019 = vmatprep.mubr.f32.mxu0 %v9634_v45 }
 0x434   : > { %v6297_v44 = vpop.eup %6296 }
 0x435   : > { %v6299_v1 = vpop.eup %6298  ;;  %3805 = vmatprep.mubr.f32.mxu1 %v6297_v44  ;;  %v8839_v44 = vrot.slane %v577_v36, %v9644_v23 }
 0x436   : > { %3806 = vmatmul.mubr.f32.vlgmr.msra.gmra.mrb[22].mxu1 %v6299_v1  ;;  %v9645_v1 = vld [vmem:[#allocation10_spill] sm:$0xff] }
 0x437   : > { %4160 = vmatprep.mubr.f32.mxu1 %v9634_v45 }
 0x445   : > { %v5125_v43 = vpop.f32.mrb[16].mxu0 }
 0x446   : > { %v5126_v12 = vpop.f32.mrb[17].mxu0 }
 0x447   : > { %v5127_v29 = vadd.f32 %v5126_v12, %v5125_v43  ;;  %v8842_v43 = vrot.slane %v576_v24, %v9645_v1  ;;  %v8845_v12 = vrot.slane %v577_v36, %v9645_v1  ;;  %v8919_v1 = vld [vmem:[%s9560_s7] sm:$0xff] }
 0x449   : > { %v5160_v0 = vpop.f32.mrb[16].mxu1 }
 0x44a   : > { %v5161_v53 = vpop.f32.mrb[17].mxu1 }
 0x44b   : > { %v5162_v7 = vadd.f32 %v5161_v53, %v5160_v0 }
 0x44d   : > { %v8724_v46 = vadd.f32 %v5162_v7, %v5127_v29 }
 0x485   : > { %v5195_v50 = vpop.f32.mrb[18].mxu0 }
 0x486   : > { %v5196_v37 = vpop.f32.mrb[19].mxu0 }
 0x487   : > { %v5197_v4 = vadd.f32 %v5196_v37, %v5195_v50 }
 0x489   : > { %v5230_v39 = vpop.f32.mrb[18].mxu1 }
 0x48a   : > { %v5231_v51 = vpop.f32.mrb[19].mxu1 }
 0x48b   : > { %v5232_v15 = vadd.f32 %v5231_v51, %v5230_v39 }
 0x48d   : > { %v8726_v22 = vadd.f32 %v5232_v15, %v5197_v4  ;;  %v9646_v4 = vld [vmem:[#allocation11_spill] sm:$0xff] }
 0x48e   : > { %v8856_v39 = vrot.slane %v576_v24, %v9646_v4  ;;  %v8859_v51 = vrot.slane %v577_v36, %v9646_v4  ;;  %v3812_v4 = vld [vmem:[%s9560_s7 + $0x8] sm:$0xff] }
 0x4c5   : > { %v5265_v17 = vpop.f32.mrb[20].mxu0 }
 0x4c6   : > { %v5266_v6 = vpop.f32.mrb[21].mxu0 }
 0x4c7   : > { %v5267_v47 = vadd.f32 %v5266_v6, %v5265_v17 }
 0x4c9   : > { %v5300_v16 = vpop.f32.mrb[20].mxu1 }
 0x4ca   : > { %v5301_v25 = vpop.f32.mrb[21].mxu1 }
 0x4cb   : > { %v5302_v34 = vadd.f32 %v5301_v25, %v5300_v16 }
 0x4cd   : > { %v8728_v32 = vadd.f32 %v5302_v34, %v5267_v47 }
 0x4cf   : > { %4032 = vrot.lane.b32.xlu1 %v8728_v32, %s6395_s15 }
 0x4d3   : > { %4040 = vrot.lane.b32.xlu1 %v8728_v32, %s6396_s2 }
 0x4d7   : > { %4048 = vrot.lane.b32.xlu1 %v8728_v32, %s6397_s27 }
 0x4db   : > { %4056 = vrot.lane.b32.xlu1 %v8728_v32, %s9629_s20 }
 0x4df   : > { %4064 = vrot.lane.b32.xlu1 %v8728_v32, %s9632_s16 }
 0x4e3   : > { %4072 = vrot.lane.b32.xlu1 %v8728_v32, %s6398_s24 }
 0x4e7   : > { %4080 = vrot.lane.b32.xlu1 %v8728_v32, %s6399_s25 }
 0x4eb   : > { %4088 = vrot.lane.b32.xlu1 %v8728_v32, %s9608_s30 }
 0x4ef   : > { %3815 = vrot.lane.b32.xlu1 %v8724_v46, %s6395_s15 }
 0x4f3   : > { %3832 = vrot.lane.b32.xlu1 %v8724_v46, %s6396_s2 }
 0x4f7   : > { %3849 = vrot.lane.b32.xlu1 %v8724_v46, %s6397_s27 }
 0x4fb   : > { %3866 = vrot.lane.b32.xlu1 %v8724_v46, %s9629_s20 }
 0x4ff   : > { %3882 = vrot.lane.b32.xlu1 %v8724_v46, %s9632_s16 }
 0x503   : > { %3898 = vrot.lane.b32.xlu1 %v8724_v46, %s6398_s24 }
 0x505   : > { %v5335_v8 = vpop.f32.mrb[22].mxu0 }
 0x506   : > { %v5336_v26 = vpop.f32.mrb[23].mxu0 }
 0x507   : > { %v5337_v58 = vadd.f32 %v5336_v26, %v5335_v8  ;;  %3915 = vrot.lane.b32.xlu1 %v8724_v46, %s6399_s25 }
 0x509   : > { %v5370_v52 = vpop.f32.mrb[22].mxu1 }
 0x50a   : > { %v5371_v63 = vpop.f32.mrb[23].mxu1 }
 0x50b   : > { %v5372_v3 = vadd.f32 %v5371_v63, %v5370_v52  ;;  %3932 = vrot.lane.b32.xlu1 %v8724_v46, %s9608_s30 }
 0x50d   : > { %v8762_v5 = vadd.f32 %v5372_v3, %v5337_v58 }
 0x50f   : > { %4034 = vrot.lane.b32.xlu0 %v8762_v5, %s6395_s15  ;;  %4175 = vperm.xlu1 %6171, %v3813_v14  }
 0x513   : > { %4042 = vrot.lane.b32.xlu0 %v8762_v5, %s6396_s2 }
 0x517   : > { %4050 = vrot.lane.b32.xlu0 %v8762_v5, %s6397_s27 }
 0x51b   : > { %4058 = vrot.lane.b32.xlu0 %v8762_v5, %s9629_s20 }
 0x51f   : > { %4066 = vrot.lane.b32.xlu0 %v8762_v5, %s9632_s16 }
 0x523   : > { %4074 = vrot.lane.b32.xlu0 %v8762_v5, %s6398_s24 }
 0x527   : > { %4082 = vrot.lane.b32.xlu0 %v8762_v5, %s6399_s25 }
 0x52b   : > { %4090 = vrot.lane.b32.xlu0 %v8762_v5, %s9608_s30 }
 0x52f   : > { %3817 = vrot.lane.b32.xlu0 %v8726_v22, %s6395_s15 }
 0x533   : > { %3834 = vrot.lane.b32.xlu0 %v8726_v22, %s6396_s2 }
 0x537   : > { %3851 = vrot.lane.b32.xlu0 %v8726_v22, %s6397_s27 }
 0x53b   : > { %3868 = vrot.lane.b32.xlu0 %v8726_v22, %s9629_s20 }
 0x53f   : > { %3884 = vrot.lane.b32.xlu0 %v8726_v22, %s9632_s16 }
 0x541   : > { %v4033_v42 = vpop.permute.xlu1 %4032 }
 0x543   : > { %3900 = vrot.lane.b32.xlu0 %v8726_v22, %s6398_s24 }
 0x545   : > { %v4041_v10 = vpop.permute.xlu1 %4040 }
 0x547   : > { %3917 = vrot.lane.b32.xlu0 %v8726_v22, %s6399_s25 }
 0x549   : > { %v4049_v41 = vpop.permute.xlu1 %4048 }
 0x54b   : > { %3934 = vrot.lane.b32.xlu0 %v8726_v22, %s9608_s30  ;;  %s9649_s30 = smov 119  }
 0x54d   : > { %v4057_v18 = vpop.permute.xlu1 %4056 }
 0x54f   : > { %4180 = vperm.xlu0 %6170, %v3814_v13  }
 0x551   : > { %v4065_v62 = vpop.permute.xlu1 %4064 }
 0x555   : > { %v4073_v38 = vpop.permute.xlu1 %4072 }
 0x559   : > { %v4081_v2 = vpop.permute.xlu1 %4080 }
 0x55d   : > { %v4089_v53 = vpop.permute.xlu1 %4088 }
 0x561   : > { %v3816_v58 = vpop.permute.xlu1 %3815 }
 0x565   : > { %v3833_v9 = vpop.permute.xlu1 %3832 }
 0x581   : > { %v4035_v28 = vpop.permute.xlu0 %4034 }
 0x582   : > { %v4036_v60 = vsel %vm3819_vm9, %v4033_v42, %v4035_v28  ;;  %v4037_v11 = vsel %vm3819_vm9, %v4035_v28, %v4033_v42  ;;  %v9647_v42 = vld [vmem:[#allocation13_spill] sm:$0xff] }
 0x583   : > { %v4038_v54 = vmul.f32 %v4037_v11, %v8810_v56  ;;  %v4039_v49 = vmul.f32 %v4036_v60, %v8813_v19 }
 0x585   : > { %v4043_v33 = vpop.permute.xlu0 %4042 }
 0x586   : > { %v4044_v31 = vsel %vm3836_vm10, %v4041_v10, %v4043_v33  ;;  %v4045_v55 = vsel %vm3836_vm10, %v4043_v33, %v4041_v10  ;;  %v8875_v10 = vrot.slane %v576_v24, %v9647_v42 }
 0x587   : > { %v4046_v30 = vmul.f32 %v4045_v55, %v8817_v35  ;;  %v4047_v59 = vmul.f32 %v4044_v31, %v8820_v27 }
 0x589   : > { %v5979_v61 = vpack.c.bf16 %v4046_v30, %v4038_v54  ;;  %v4051_v20 = vpop.permute.xlu0 %4050  ;;  %v5977_v40 = vpack.c.bf16 %v4047_v59, %v4039_v49  ;;  %v3850_v30 = vpop.permute.xlu1 %3849  ;;  %v8910_v59 = vld [vmem:[%s9565_s12 + $0x10] ss:$0 sm:$0xff] }
 0x58a   : > { %v4052_v29 = vsel %vm3853_vm11, %v4049_v41, %v4051_v20  ;;  %v4053_v0 = vsel %vm3853_vm11, %v4051_v20, %v4049_v41  ;;  %v8878_v41 = vrot.slane %v577_v36, %v9647_v42 }
 0x58b   : > { %5978 = vmatprep.subr.bf16.mxu1 %v5977_v40  ;;  %v4054_v15 = vmul.f32 %v4053_v0, %v8836_v57  ;;  %v4055_v17 = vmul.f32 %v4052_v29, %v8839_v44 }
 0x58c   : > { %5980 = vmatpush1.bf16.msra.mxu1 %v5979_v61 }
 0x58d   : > { %v4059_v7 = vpop.permute.xlu0 %4058 }
 0x58e   : > { %v4060_v50 = vsel %vm707_vm3, %v4057_v18, %v4059_v7  ;;  %v4061_v37 = vsel %vm707_vm3, %v4059_v7, %v4057_v18  ;;  %v9648_v18 = vld [vmem:[#allocation12_spill] sm:$0xff] }
 0x58f   : > { %v4062_v6 = vmul.f32 %v4061_v37, %v8842_v43  ;;  %v4063_v47 = vmul.f32 %v4060_v50, %v8845_v12  ;;  %v8885_v28 = vrot.slane %v577_v36, %v9648_v18 }
 0x591   : > { %v5983_v16 = vpack.c.bf16 %v4062_v6, %v4054_v15  ;;  %v4067_v25 = vpop.permute.xlu0 %4066  ;;  %v5981_v34 = vpack.c.bf16 %v4063_v47, %v4055_v17 }
 0x592   : > { %v4068_v8 = vsel %vm740_vm4, %v4065_v62, %v4067_v25  ;;  %v4069_v26 = vsel %vm740_vm4, %v4067_v25, %v4065_v62  ;;  %v8882_v62 = vrot.slane %v576_v24, %v9648_v18 }
 0x593   : > { %v4070_v52 = vmul.f32 %v4068_v8, %v8856_v39  ;;  %v4071_v63 = vmul.f32 %v4069_v26, %v8859_v51  ;;  %5982 = vmatprep.subr.bf16.mxu1 %v5981_v34 }
 0x594   : > { %5984 = vmatpush1.bf16.msra.mxu1 %v5983_v16 }
 0x595   : > { %v5987_v3 = vpack.c.bf16 %v4070_v52, %v8728_v32  ;;  %v4075_v13 = vpop.permute.xlu0 %4074  ;;  %v5985_v14 = vpack.c.bf16 %v4071_v63, %v8762_v5 }
 0x596   : > { %v4076_v32 = vsel %vm3902_vm12, %v4073_v38, %v4075_v13  ;;  %v4077_v5 = vsel %vm3902_vm12, %v4075_v13, %v4073_v38  ;;  %v8903_v38 = vld [vmem:[%s9565_s12 + $0x18] ss:$0 sm:$0xff] }
 0x597   : > { %5986 = vmatprep.subr.bf16.mxu1 %v5985_v14  ;;  %v4078_v24 = vmul.f32 %v4076_v32, %v8875_v10  ;;  %v4079_v36 = vmul.f32 %v4077_v5, %v8878_v41 }
 0x598   : > { %5988 = vmatpush1.bf16.msra.mxu1 %v5987_v3 }
 0x599   : > { %v4083_v48 = vpop.permute.xlu0 %4082 }
 0x59a   : > { %v4084_v60 = vsel %vm3919_vm13, %v4081_v2, %v4083_v48  ;;  %v4085_v11 = vsel %vm3919_vm13, %v4083_v48, %v4081_v2 }
 0x59b   : > { %v4086_v33 = vmul.f32 %v4084_v60, %v8882_v62  ;;  %v4087_v31 = vmul.f32 %v4085_v11, %v8885_v28 }
 0x59d   : > { %v5991_v55 = vpack.c.bf16 %v4086_v33, %v4078_v24  ;;  %v4091_v54 = vpop.permute.xlu0 %4090  ;;  %v5989_v49 = vpack.c.bf16 %v4087_v31, %v4079_v36 }
 0x59e   : > { %v4093_v2 = vsel %vm3936_vm14, %v4091_v54, %v4089_v53  ;;  %v4092_v61 = vsel %vm3936_vm14, %v4089_v53, %v4091_v54  ;;  %v3867_v53 = vpop.permute.xlu1 %3866 }
 0x59f   : > { %v4095_v20 = vmul.f32 %v8903_v38, %v4093_v2  ;;  %5990 = vmatprep.subr.bf16.mxu1 %v5989_v49  ;;  %v4094_v23 = vmul.f32 %v8910_v59, %v4092_v61 }
 0x5a0   : > { %5992 = vmatpush1.bf16.msra.mxu1 %v5991_v55 }
 0x5a1   : > { %4112 = vmatprep.subr.mxu1 %v4095_v20  ;;  %v3818_v40 = vpop.permute.xlu0 %3817 }
 0x5a2   : > { %v3820_v29 = vsel %vm3819_vm9, %v3816_v58, %v3818_v40  ;;  %v3821_v0 = vsel %vm3819_vm9, %v3818_v40, %v3816_v58  ;;  %v3883_v8 = vpop.permute.xlu1 %3882 }
 0x5a3   : > { %v3830_v15 = vmul.f32 %v8810_v56, %v3821_v0  ;;  %v3831_v17 = vmul.f32 %v8813_v19, %v3820_v29 }
 0x5a4   : > { %4113 = vmatpush1.msra.mxu1 %v4094_v23 }
 0x5a5   : > { %5082 = vmatmul.mubr.msk.f32.vlgmr.msra.gmra.mrb[24].mxu1 %vm864_vm8, %v8919_v1  ;;  %v3835_v7 = vpop.permute.xlu0 %3834 }
 0x5a6   : > { %v3837_v50 = vsel %vm3836_vm10, %v3833_v9, %v3835_v7  ;;  %v3838_v37 = vsel %vm3836_vm10, %v3835_v7, %v3833_v9  ;;  %4166 = vmatprep.mubr.f32.mxu1 %v9634_v45  ;;  %v3899_v32 = vpop.permute.xlu1 %3898 }
 0x5a7   : > { %v3847_v6 = vmul.f32 %v8817_v35, %v3838_v37  ;;  %v3848_v47 = vmul.f32 %v8820_v27, %v3837_v50 }
 0x5a9   : > { %v5963_v16 = vpack.c.bf16 %v3847_v6, %v3830_v15  ;;  %5083 = vmatmul.mubr.msk.f32.gmra.mrb[26].mxu1 %vm864_vm8, %v3812_v4  ;;  %v3852_v25 = vpop.permute.xlu0 %3851  ;;  %v5961_v34 = vpack.c.bf16 %v3848_v47, %v3831_v17 }
 0x5aa   : > { %v3854_v26 = vsel %vm3853_vm11, %v3850_v30, %v3852_v25  ;;  %v3855_v58 = vsel %vm3853_vm11, %v3852_v25, %v3850_v30  ;;  %v3916_v54 = vpop.permute.xlu1 %3915 }
 0x5ab   : > { %5962 = vmatprep.subr.bf16.mxu0 %v5961_v34  ;;  %v3864_v13 = vmul.f32 %v8836_v57, %v3855_v58  ;;  %v3865_v14 = vmul.f32 %v8839_v44, %v3854_v26 }
 0x5ac   : > { %5964 = vmatpush1.bf16.msra.mxu0 %v5963_v16 }
 0x5ad   : > { %v3869_v52 = vpop.permute.xlu0 %3868 }
 0x5ae   : > { %v3870_v63 = vsel %vm707_vm3, %v3867_v53, %v3869_v52  ;;  %v3871_v3 = vsel %vm707_vm3, %v3869_v52, %v3867_v53  ;;  %v3933_v29 = vpop.permute.xlu1 %3932 }
 0x5af   : > { %v3880_v42 = vmul.f32 %v8842_v43, %v3871_v3  ;;  %v3881_v18 = vmul.f32 %v8845_v12, %v3870_v63 }
 0x5b1   : > { %v5967_v5 = vpack.c.bf16 %v3880_v42, %v3864_v13  ;;  %v3885_v9 = vpop.permute.xlu0 %3884  ;;  %v5965_v48 = vpack.c.bf16 %v3881_v18, %v3865_v14 }
 0x5b2   : > { %v3886_v60 = vsel %vm740_vm4, %v3883_v8, %v3885_v9  ;;  %v3887_v11 = vsel %vm740_vm4, %v3885_v9, %v3883_v8  ;;  %v4176_v6 = vpop.permute.xlu1 %4175 }
 0x5b3   : > { %v3896_v24 = vmul.f32 %v8856_v39, %v3886_v60  ;;  %v3897_v36 = vmul.f32 %v8859_v51, %v3887_v11  ;;  %5966 = vmatprep.subr.bf16.mxu0 %v5965_v48 }
 0x5b4   : > { %5968 = vmatpush1.bf16.msra.mxu0 %v5967_v5 }
 0x5b5   : > { %v5971_v33 = vpack.c.bf16 %v3896_v24, %v8724_v46  ;;  %v3901_v31 = vpop.permute.xlu0 %3900  ;;  %v5969_v55 = vpack.c.bf16 %v3897_v36, %v8726_v22 }
 0x5b6   : > { %v3903_v49 = vsel %vm3902_vm12, %v3899_v32, %v3901_v31  ;;  %v3904_v2 = vsel %vm3902_vm12, %v3901_v31, %v3899_v32 }
 0x5b7   : > { %5970 = vmatprep.subr.bf16.mxu0 %v5969_v55  ;;  %v3913_v46 = vmul.f32 %v8875_v10, %v3903_v49  ;;  %v3914_v22 = vmul.f32 %v8878_v41, %v3904_v2 }
 0x5b8   : > { %5972 = vmatpush1.bf16.msra.mxu0 %v5971_v33  ;;  %v4200_v33 = vld [vmem:[%s9562_s9 + $0x8] sm:$0xff] }
 0x5b9   : > { %v3918_v30 = vpop.permute.xlu0 %3917  ;;  %5086 = vmatprep.mubr.msk.f32.mxu1 %vm4333_vm15, %v4200_v33 }
 0x5ba   : > { %v3920_v61 = vsel %vm3919_vm13, %v3916_v54, %v3918_v30  ;;  %v3921_v20 = vsel %vm3919_vm13, %v3918_v30, %v3916_v54 }
 0x5bb   : > { %v3930_v40 = vmul.f32 %v8882_v62, %v3920_v61  ;;  %v3931_v23 = vmul.f32 %v8885_v28, %v3921_v20  ;;  %v4203_v20 = vld [vmem:[%s9563_s10] sm:$0xff] }
 0x5bd   : > { %v5975_v0 = vpack.c.bf16 %v3930_v40, %v3913_v46  ;;  %v3935_v53 = vpop.permute.xlu0 %3934  ;;  %v5973_v7 = vpack.c.bf16 %v3931_v23, %v3914_v22  ;;  %v4204_v40 = vld [vmem:[%s9563_s10 + $0x8] sm:$0xff] }
 0x5be   : > { %v3938_v50 = vsel %vm3936_vm14, %v3935_v53, %v3933_v29  ;;  %v3937_v37 = vsel %vm3936_vm14, %v3933_v29, %v3935_v53 }
 0x5bf   : > { %v3948_v15 = vmul.f32 %v8903_v38, %v3938_v50  ;;  %5974 = vmatprep.subr.bf16.mxu0 %v5973_v7  ;;  %v3947_v17 = vmul.f32 %v8910_v59, %v3937_v37 }
 0x5c0   : > { %5976 = vmatpush1.bf16.msra.mxu0 %v5975_v0 }
 0x5c1   : > { %3971 = vmatprep.subr.mxu0 %v3948_v15 }
 0x5c4   : > { %3972 = vmatpush1.msra.mxu0 %v3947_v17 }
 0x5c5   : > { %5080 = vmatmul.mubr.msk.f32.vlgmr.msra.gmra.mrb[24].mxu0 %vm864_vm8, %v8919_v1 }
 0x5c6   : > { %4025 = vmatprep.mubr.f32.mxu0 %v9634_v45 }
 0x5c9   : > { %5081 = vmatmul.mubr.msk.f32.gmra.mrb[26].mxu0 %vm864_vm8, %v3812_v4 }
 0x5ca   : > { %5084 = vmatprep.mubr.msk.f32.mxu0 %vm4333_vm15, %v4200_v33 }
 0x5ce   : > { %v4181_v8 = vpop.permute.xlu0 %4180 }
 0x678   : > { %v4162_v47 = vpop.f32.mrb[24].mxu1 }
 0x679   : > { %v4185_v16 = vadd.f32 %v4176_v6, %v4162_v47  ;;  %v4164_v25 = vpop.f32.mrb[25].mxu1 }
 0x67a   : > { %v4186_v34 = vadd.f32 %v4176_v6, %v4164_v25 }
 0x67b   : > { %6300 = vtanh.f32 %v4185_v16 }
 0x67c   : > { %v4168_v26 = vpop.f32.mrb[26].mxu1  ;;  %6302 = vtanh.f32 %v4186_v34 }
 0x67d   : > { %v4189_v58 = vadd.f32 %v4181_v8, %v4168_v26  ;;  %v4170_v52 = vpop.f32.mrb[27].mxu1 }
 0x67e   : > { %v4190_v63 = vadd.f32 %v4181_v8, %v4170_v52 }
 0x67f   : > { %6304 = vtanh.f32 %v4189_v58 }
 0x680   : > { %6306 = vtanh.f32 %v4190_v63 }
 0x685   : > { %v8982_v3 = vpop.eup %6300 }
 0x686   : > { %4417 = vrot.lane.b32.xlu1 %v8982_v3, %s6395_s15  ;;  %v8986_v45 = vpop.eup %6302 }
 0x689   : > { %v8988_v1 = vpop.eup %6304 }
 0x68a   : > { %v8990_v4 = vpop.eup %6306  ;;  %4433 = vrot.lane.b32.xlu1 %v8982_v3, %s6396_s2  ;;  %4419 = vrot.lane.b32.xlu0 %v8988_v1, %s6395_s15  ;;  %v6047_v13 = vpack.c.bf16 %v8988_v1, %v8982_v3 }
 0x68b   : > { %v6045_v14 = vpack.c.bf16 %v8990_v4, %v8986_v45 }
 0x68e   : > { %4449 = vrot.lane.b32.xlu1 %v8982_v3, %s6397_s27  ;;  %4435 = vrot.lane.b32.xlu0 %v8988_v1, %s6396_s2 }
 0x692   : > { %4465 = vrot.lane.b32.xlu1 %v8982_v3, %s9629_s20  ;;  %4451 = vrot.lane.b32.xlu0 %v8988_v1, %s6397_s27 }
 0x696   : > { %4481 = vrot.lane.b32.xlu1 %v8982_v3, %s9632_s16  ;;  %4467 = vrot.lane.b32.xlu0 %v8988_v1, %s9629_s20 }
 0x698   : > { %v4021_v42 = vpop.f32.mrb[24].mxu0 }
 0x699   : > { %v4023_v18 = vpop.f32.mrb[25].mxu0  ;;  %v4183_v9 = vadd.f32 %v4176_v6, %v4021_v42 }
 0x69a   : > { %4497 = vrot.lane.b32.xlu1 %v8982_v3, %s6398_s24  ;;  %4483 = vrot.lane.b32.xlu0 %v8988_v1, %s9632_s16  ;;  %v4184_v24 = vadd.f32 %v4176_v6, %v4023_v18 }
 0x69b   : > { %6308 = vtanh.f32 %v4183_v9 }
 0x69c   : > { %v4027_v32 = vpop.f32.mrb[26].mxu0 }
 0x69d   : > { %v4029_v5 = vpop.f32.mrb[27].mxu0  ;;  %v4187_v48 = vadd.f32 %v4181_v8, %v4027_v32 }
 0x69e   : > { %4513 = vrot.lane.b32.xlu1 %v8982_v3, %s6399_s25  ;;  %4499 = vrot.lane.b32.xlu0 %v8988_v1, %s6398_s24  ;;  %v4188_v36 = vadd.f32 %v4181_v8, %v4029_v5 }
 0x69f   : > { %6310 = vtanh.f32 %v4187_v48 }
 0x6a0   : > { %6312 = vtanh.f32 %v4184_v24 }
 0x6a1   : > { %6314 = vtanh.f32 %v4188_v36 }
 0x6a2   : > { %4529 = vrot.lane.b32.xlu1 %v8982_v3, %s9649_s30  ;;  %4515 = vrot.lane.b32.xlu0 %v8988_v1, %s6399_s25 }
 0x6a5   : > { %v9040_v60 = vpop.eup %6308 }
 0x6a6   : > { %4421 = vrot.lane.b32.xlu1 %v8986_v45, %s6395_s15  ;;  %4531 = vrot.lane.b32.xlu0 %v8988_v1, %s9649_s30 }
 0x6a9   : > { %v9046_v11 = vpop.eup %6310 }
 0x6aa   : > { %4437 = vrot.lane.b32.xlu1 %v8986_v45, %s6396_s2  ;;  %4423 = vrot.lane.b32.xlu0 %v8990_v4, %s6395_s15  ;;  %v9069_v31 = vpop.eup %6312 }
 0x6ab   : > { %v9075_v55 = vpop.eup %6314 }
 0x6ae   : > { %4453 = vrot.lane.b32.xlu1 %v8986_v45, %s6397_s27  ;;  %4439 = vrot.lane.b32.xlu0 %v8990_v4, %s6396_s2 }
 0x6b2   : > { %4469 = vrot.lane.b32.xlu1 %v8986_v45, %s9629_s20  ;;  %4455 = vrot.lane.b32.xlu0 %v8990_v4, %s6397_s27 }
 0x6b6   : > { %4205 = vrot.lane.b32.xlu1 %v9040_v60, %s6395_s15  ;;  %4471 = vrot.lane.b32.xlu0 %v8990_v4, %s9629_s20 }
 0x6ba   : > { %4485 = vrot.lane.b32.xlu1 %v8986_v45, %s9632_s16  ;;  %4207 = vrot.lane.b32.xlu0 %v9046_v11, %s6395_s15 }
 0x6be   : > { %4501 = vrot.lane.b32.xlu1 %v8986_v45, %s6398_s24  ;;  %4487 = vrot.lane.b32.xlu0 %v8990_v4, %s9632_s16 }
 0x6c2   : > { %4517 = vrot.lane.b32.xlu1 %v8986_v45, %s6399_s25  ;;  %4503 = vrot.lane.b32.xlu0 %v8990_v4, %s6398_s24 }
 0x6c6   : > { %4533 = vrot.lane.b32.xlu1 %v8986_v45, %s9649_s30  ;;  %4519 = vrot.lane.b32.xlu0 %v8990_v4, %s6399_s25 }
 0x6ca   : > { %4209 = vrot.lane.b32.xlu1 %v9069_v31, %s6395_s15  ;;  %4535 = vrot.lane.b32.xlu0 %v8990_v4, %s9649_s30 }
 0x6ce   : > { %4221 = vrot.lane.b32.xlu1 %v9040_v60, %s6396_s2  ;;  %4211 = vrot.lane.b32.xlu0 %v9075_v55, %s6395_s15  ;;  %s6401_s15 = smov 64  }
 0x6d2   : > { %4225 = vrot.lane.b32.xlu1 %v9069_v31, %s6396_s2  ;;  %4223 = vrot.lane.b32.xlu0 %v9046_v11, %s6396_s2 }
 0x6d6   : > { %4237 = vrot.lane.b32.xlu1 %v9040_v60, %s6397_s27  ;;  %4227 = vrot.lane.b32.xlu0 %v9075_v55, %s6396_s2  ;;  %s5053_s2 = sshll.u32 %s499_s29, 4 }
 0x6da   : > { %4241 = vrot.lane.b32.xlu1 %v9069_v31, %s6397_s27  ;;  %4239 = vrot.lane.b32.xlu0 %v9046_v11, %s6397_s27 }
 0x6de   : > { %4253 = vrot.lane.b32.xlu1 %v9040_v60, %s9629_s20  ;;  %4243 = vrot.lane.b32.xlu0 %v9075_v55, %s6397_s27  ;;  %s554_s27 = scalar_lea.vmem [#allocation3], %s5053_s2 }
 0x6e2   : > { %4257 = vrot.lane.b32.xlu1 %v9069_v31, %s9629_s20  ;;  %4255 = vrot.lane.b32.xlu0 %v9046_v11, %s9629_s20 }
 0x6e6   : > { %4269 = vrot.lane.b32.xlu1 %v9040_v60, %s9632_s16  ;;  %4259 = vrot.lane.b32.xlu0 %v9075_v55, %s9629_s20  ;;  %s5052_s20 = sshll.u32 %s499_s29, 6 }
 0x6ea   : > { %4273 = vrot.lane.b32.xlu1 %v9069_v31, %s9632_s16  ;;  %4271 = vrot.lane.b32.xlu0 %v9046_v11, %s9632_s16 }
 0x6ee   : > { %4285 = vrot.lane.b32.xlu1 %v9040_v60, %s6398_s24  ;;  %4275 = vrot.lane.b32.xlu0 %v9075_v55, %s9632_s16  ;;  %s9513_s16 = scalar_lea.vmem [#allocation2], %s5052_s20 }
 0x6f2   : > { %4289 = vrot.lane.b32.xlu1 %v9069_v31, %s6398_s24  ;;  %4287 = vrot.lane.b32.xlu0 %v9046_v11, %s6398_s24 }
 0x6f6   : > { %4301 = vrot.lane.b32.xlu1 %v9040_v60, %s6399_s25  ;;  %4291 = vrot.lane.b32.xlu0 %v9075_v55, %s6398_s24  ;;  %s5089_s24 = sshll.u32 (%p6513_p5), %s6498_s21, 3 }
 0x6f7   : > { %s4927_s18 = scalar_lea.vmem (%p6513_p5), %s9650_s22, %s5089_s24 }
 0x6f8   : > { %v4418_v54 = vpop.permute.xlu1 %4417 }
 0x6fa   : > { %4305 = vrot.lane.b32.xlu1 %v9069_v31, %s6399_s25  ;;  %4303 = vrot.lane.b32.xlu0 %v9046_v11, %s6399_s25 }
 0x6fc   : > { %v4434_v49 = vpop.permute.xlu1 %4433  ;;  %v4420_v2 = vpop.permute.xlu0 %4419 }
 0x6fe   : > { %4317 = vrot.lane.b32.xlu1 %v9040_v60, %s9649_s30  ;;  %4307 = vrot.lane.b32.xlu0 %v9075_v55, %s6399_s25 }
 0x700   : > { %v4450_v30 = vpop.permute.xlu1 %4449  ;;  %v4436_v61 = vpop.permute.xlu0 %4435 }
 0x702   : > { %4321 = vrot.lane.b32.xlu1 %v9069_v31, %s9649_s30  ;;  %4319 = vrot.lane.b32.xlu0 %v9046_v11, %s9649_s30 }
 0x704   : > { %v4466_v46 = vpop.permute.xlu1 %4465  ;;  %v4452_v22 = vpop.permute.xlu0 %4451 }
 0x706   : > { %4624 = vperm.xlu1 %6171, %v4203_v20   ;;  %4323 = vrot.lane.b32.xlu0 %v9075_v55, %s9649_s30 }
 0x708   : > { %v9141_v23 = vpop.permute.xlu1 %4481  ;;  %v4468_v29 = vpop.permute.xlu0 %4467 }
 0x70a   : > { %4629 = vperm.xlu0 %6170, %v4204_v40  }
 0x70c   : > { %v9143_v0 = vpop.permute.xlu1 %4497  ;;  %v9145_v53 = vpop.permute.xlu0 %4483 }
 0x710   : > { %v9147_v7 = vpop.permute.xlu1 %4513  ;;  %v9149_v50 = vpop.permute.xlu0 %4499 }
 0x714   : > { %v9151_v37 = vpop.permute.xlu1 %4529  ;;  %v9153_v15 = vpop.permute.xlu0 %4515 }
 0x718   : > { %v4422_v17 = vpop.permute.xlu1 %4421  ;;  %v9155_v6 = vpop.permute.xlu0 %4531 }
 0x719   : > { %v4425_v47 = vsel %vm3819_vm9, %v4418_v54, %v4422_v17  ;;  %v4427_v16 = vsel %vm3819_vm9, %v4422_v17, %v4418_v54 }
 0x71a   : > { %v4429_v58 = vmul.f32 %v4427_v16, %v8810_v56  ;;  %v4430_v52 = vmul.f32 %v4425_v47, %v8813_v19 }
 0x71c   : > { %v4438_v25 = vpop.permute.xlu1 %4437  ;;  %v4424_v34 = vpop.permute.xlu0 %4423 }
 0x71d   : > { %v4426_v8 = vsel %vm3819_vm9, %v4420_v2, %v4424_v34  ;;  %v4428_v26 = vsel %vm3819_vm9, %v4424_v34, %v4420_v2  ;;  %v4441_v18 = vsel %vm3836_vm10, %v4434_v49, %v4438_v25  ;;  %v4443_v32 = vsel %vm3836_vm10, %v4438_v25, %v4434_v49 }
 0x71e   : > { %v4431_v63 = vmul.f32 %v4428_v26, %v8810_v56  ;;  %v4432_v42 = vmul.f32 %v4426_v8, %v8813_v19  ;;  %v4445_v54 = vmul.f32 %v4443_v32, %v8817_v35  ;;  %v4446_v2 = vmul.f32 %v4441_v18, %v8820_v27 }
 0x720   : > { %v6031_v5 = vpack.c.bf16 %v4431_v63, %v4429_v58  ;;  %v4454_v9 = vpop.permute.xlu1 %4453  ;;  %v4440_v48 = vpop.permute.xlu0 %4439  ;;  %v6029_v24 = vpack.c.bf16 %v4432_v42, %v4430_v52 }
 0x721   : > { %v4442_v36 = vsel %vm3836_vm10, %v4436_v61, %v4440_v48  ;;  %v4444_v33 = vsel %vm3836_vm10, %v4440_v48, %v4436_v61  ;;  %v4457_v49 = vsel %vm3853_vm11, %v4450_v30, %v4454_v9  ;;  %v4459_v17 = vsel %vm3853_vm11, %v4454_v9, %v4450_v30 }
 0x722   : > { %v4447_v20 = vmul.f32 %v4444_v33, %v8817_v35  ;;  %v4448_v40 = vmul.f32 %v4442_v36, %v8820_v27  ;;  %6030 = vmatprep.subr.bf16.mxu1 %v6029_v24  ;;  %v4461_v26 = vmul.f32 %v4459_v17, %v8836_v57  ;;  %v4462_v58 = vmul.f32 %v4457_v49, %v8839_v44 }
 0x723   : > { %6032 = vmatpush1.bf16.msra.mxu1 %v6031_v5 }
 0x724   : > { %v6035_v47 = vpack.c.bf16 %v4447_v20, %v4445_v54  ;;  %v4470_v16 = vpop.permute.xlu1 %4469  ;;  %v4456_v25 = vpop.permute.xlu0 %4455  ;;  %v6033_v61 = vpack.c.bf16 %v4448_v40, %v4446_v2 }
 0x725   : > { %v4458_v34 = vsel %vm3853_vm11, %v4452_v22, %v4456_v25  ;;  %v4460_v8 = vsel %vm3853_vm11, %v4456_v25, %v4452_v22  ;;  %v4473_v30 = vsel %vm707_vm3, %v4466_v46, %v4470_v16  ;;  %v4475_v42 = vsel %vm707_vm3, %v4470_v16, %v4466_v46 }
 0x726   : > { %v4463_v52 = vmul.f32 %v4460_v8, %v8836_v57  ;;  %v4464_v63 = vmul.f32 %v4458_v34, %v8839_v44  ;;  %6034 = vmatprep.subr.bf16.mxu1 %v6033_v61  ;;  %v4477_v24 = vmul.f32 %v4475_v42, %v8842_v43  ;;  %v4478_v36 = vmul.f32 %v4473_v30, %v8845_v12 }
 0x727   : > { %6036 = vmatpush1.bf16.msra.mxu1 %v6035_v47 }
 0x728   : > { %v6039_v18 = vpack.c.bf16 %v4463_v52, %v4461_v26  ;;  %v9197_v32 = vpop.permute.xlu1 %4205  ;;  %v4472_v22 = vpop.permute.xlu0 %4471  ;;  %v6037_v5 = vpack.c.bf16 %v4464_v63, %v4462_v58 }
 0x729   : > { %v4474_v9 = vsel %vm707_vm3, %v4468_v29, %v4472_v22  ;;  %v4476_v48 = vsel %vm707_vm3, %v4472_v22, %v4468_v29 }
 0x72a   : > { %v4479_v33 = vmul.f32 %v4476_v48, %v8842_v43  ;;  %v4480_v46 = vmul.f32 %v4474_v9, %v8845_v12  ;;  %6038 = vmatprep.subr.bf16.mxu1 %v6037_v5 }
 0x72b   : > { %6040 = vmatpush1.bf16.msra.mxu1 %v6039_v18 }
 0x72c   : > { %v6043_v54 = vpack.c.bf16 %v4479_v33, %v4477_v24  ;;  %v4486_v2 = vpop.permute.xlu1 %4485  ;;  %v9207_v20 = vpop.permute.xlu0 %4207  ;;  %v6041_v40 = vpack.c.bf16 %v4480_v46, %v4478_v36 }
 0x72d   : > { %v4489_v29 = vsel %vm740_vm4, %v9141_v23, %v4486_v2  ;;  %v4491_v49 = vsel %vm740_vm4, %v4486_v2, %v9141_v23 }
 0x72e   : > { %6042 = vmatprep.subr.bf16.mxu1 %v6041_v40  ;;  %v4493_v61 = vmul.f32 %v4489_v29, %v8856_v39  ;;  %v4494_v34 = vmul.f32 %v4491_v49, %v8859_v51 }
 0x72f   : > { %6044 = vmatpush1.bf16.msra.mxu1 %v6043_v54 }
 0x730   : > { %v4502_v17 = vpop.permute.xlu1 %4501  ;;  %6046 = vmatprep.subr.bf16.mxu1 %v6045_v14  ;;  %v4488_v47 = vpop.permute.xlu0 %4487 }
 0x731   : > { %v4490_v16 = vsel %vm740_vm4, %v9145_v53, %v4488_v47  ;;  %v4492_v25 = vsel %vm740_vm4, %v4488_v47, %v9145_v53  ;;  %v4505_v45 = vsel %vm3902_vm12, %v9143_v0, %v4502_v17  ;;  %v4507_v4 = vsel %vm3902_vm12, %v4502_v17, %v9143_v0  ;;  %v4672_v47 = vld [vmem:[%s9567_s14 + $0x80] sm:$0xff] }
 0x732   : > { %v4495_v23 = vmul.f32 %v4490_v16, %v8856_v39  ;;  %v4496_v8 = vmul.f32 %v4492_v25, %v8859_v51  ;;  %v4509_v30 = vmul.f32 %v4505_v45, %v8875_v10  ;;  %v4510_v0 = vmul.f32 %v4507_v4, %v8878_v41 }
 0x733   : > { %6048 = vmatpush1.bf16.msra.mxu1 %v6047_v13 }
 0x734   : > { %v6051_v14 = vpack.c.bf16 %v4495_v23, %v4493_v61  ;;  %v4518_v53 = vpop.permute.xlu1 %4517  ;;  %v4504_v26 = vpop.permute.xlu0 %4503  ;;  %v6049_v58 = vpack.c.bf16 %v4496_v8, %v4494_v34 }
 0x735   : > { %v4506_v52 = vsel %vm3902_vm12, %v9149_v50, %v4504_v26  ;;  %v4508_v63 = vsel %vm3902_vm12, %v4504_v26, %v9149_v50  ;;  %v4521_v1 = vsel %vm3919_vm13, %v9147_v7, %v4518_v53  ;;  %v4523_v13 = vsel %vm3919_vm13, %v4518_v53, %v9147_v7 }
 0x736   : > { %v4511_v42 = vmul.f32 %v4506_v52, %v8875_v10  ;;  %v4512_v3 = vmul.f32 %v4508_v63, %v8878_v41  ;;  %6050 = vmatprep.subr.bf16.mxu1 %v6049_v58  ;;  %v4525_v24 = vmul.f32 %v4521_v1, %v8882_v62  ;;  %v4526_v36 = vmul.f32 %v4523_v13, %v8885_v28  ;;  %v4656_v52 = vld [vmem:[%s9567_s14] sm:$0xff] }
 0x737   : > { %6052 = vmatpush1.bf16.msra.mxu1 %v6051_v14 }
 0x738   : > { %v6055_v18 = vpack.c.bf16 %v4511_v42, %v4509_v30  ;;  %v4534_v50 = vpop.permute.xlu1 %4533  ;;  %v4520_v22 = vpop.permute.xlu0 %4519  ;;  %v6053_v5 = vpack.c.bf16 %v4512_v3, %v4510_v0 }
 0x739   : > { %v4522_v9 = vsel %vm3919_vm13, %v9153_v15, %v4520_v22  ;;  %v4524_v48 = vsel %vm3919_vm13, %v4520_v22, %v9153_v15  ;;  %v4537_v46 = vsel %vm3936_vm14, %v9151_v37, %v4534_v50  ;;  %v4539_v54 = vsel %vm3936_vm14, %v4534_v50, %v9151_v37  ;;  %v4673_v37 = vld [vmem:[%s9567_s14 + $0x88] sm:$0xff]  ;;  %v9317_v50 = vld [vmem:[%s9562_s9 + $0x18] sm:$0xff] }
 0x73a   : > { %v4527_v33 = vmul.f32 %v4522_v9, %v8882_v62  ;;  %v4528_v7 = vmul.f32 %v4524_v48, %v8885_v28  ;;  %6054 = vmatprep.subr.bf16.mxu1 %v6053_v5  ;;  %v4541_v16 = vmul.f32 %v8910_v59, %v4537_v46  ;;  %v4542_v25 = vmul.f32 %v8903_v38, %v4539_v54  ;;  %v9332_v5 = vld [vmem:[%s9562_s9 + $0x10] sm:$0xff] }
 0x73b   : > { %6056 = vmatpush1.bf16.msra.mxu1 %v6055_v18  ;;  %v9291_v53 = vpack.c.bf16 %v4673_v37, %v4672_v47 }
 0x73c   : > { %v6059_v2 = vpack.c.bf16 %v4527_v33, %v4525_v24  ;;  %v4210_v15 = vpop.permute.xlu1 %4209  ;;  %v4536_v40 = vpop.permute.xlu0 %4535  ;;  %v6057_v29 = vpack.c.bf16 %v4528_v7, %v4526_v36 }
 0x73d   : > { %v4538_v49 = vsel %vm3936_vm14, %v9155_v6, %v4536_v40  ;;  %v4540_v17 = vsel %vm3936_vm14, %v4536_v40, %v9155_v6  ;;  %v4213_v6 = vsel %vm3819_vm9, %v9197_v32, %v4210_v15  ;;  %v4215_v23 = vsel %vm3819_vm9, %v4210_v15, %v9197_v32  ;;  %v4657_v32 = vld [vmem:[%s9567_s14 + $0x8] sm:$0xff] }
 0x73e   : > { %v4543_v61 = vmul.f32 %v8910_v59, %v4538_v49  ;;  %v4544_v34 = vmul.f32 %v8903_v38, %v4540_v17  ;;  %6058 = vmatprep.subr.bf16.mxu1 %v6057_v29  ;;  %v4217_v63 = vmul.f32 %v4215_v23, %v8810_v56  ;;  %v4218_v30 = vmul.f32 %v4213_v6, %v8813_v19 }
 0x73f   : > { %6060 = vmatpush1.bf16.msra.mxu1 %v6059_v2 }
 0x740   : > { %v6063_v8 = vpack.c.bf16 %v4543_v61, %v4541_v16  ;;  %v4222_v45 = vpop.permute.xlu1 %4221  ;;  %v4212_v4 = vpop.permute.xlu0 %4211  ;;  %v6061_v14 = vpack.c.bf16 %v4544_v34, %v4542_v25 }
 0x741   : > { %v4214_v26 = vsel %vm3819_vm9, %v9207_v20, %v4212_v4  ;;  %v4216_v58 = vsel %vm3819_vm9, %v4212_v4, %v9207_v20  ;;  %v9312_v20 = vld [vmem:[%s9562_s9] sm:$0xff] }
 0x742   : > { %v4219_v0 = vmul.f32 %v4216_v58, %v8810_v56  ;;  %v4220_v42 = vmul.f32 %v4214_v26, %v8813_v19  ;;  %6062 = vmatprep.subr.bf16.mxu1 %v6061_v14  ;;  %v9320_v56 = vpack.c.bf16 %v4657_v32, %v4656_v52 }
 0x743   : > { %6064 = vmatpush1.bf16.msra.mxu1 %v6063_v8 }
 0x744   : > { %v5995_v3 = vpack.c.bf16 %v4219_v0, %v4217_v63  ;;  %v4226_v1 = vpop.permute.xlu1 %4225  ;;  %v4224_v13 = vpop.permute.xlu0 %4223  ;;  %v5993_v18 = vpack.c.bf16 %v4220_v42, %v4218_v30  ;;  %6098 = vmatprep.subr.bf16.mxu1 %v9291_v53 }
 0x745   : > { %v4229_v19 = vsel %vm3836_vm10, %v4222_v45, %v4226_v1  ;;  %v4231_v22 = vsel %vm3836_vm10, %v4226_v1, %v4222_v45 }
 0x746   : > { %5994 = vmatprep.subr.bf16.mxu0 %v5993_v18  ;;  %4610 = vmatmul.mubr.f32.vlgmr.msra.gmra.mrb[28].mxu1 %v9312_v20  ;;  %v4233_v33 = vmul.f32 %v4231_v22, %v8817_v35  ;;  %v4234_v7 = vmul.f32 %v4229_v19, %v8820_v27 }
 0x747   : > { %5996 = vmatpush1.bf16.msra.mxu0 %v5995_v3  ;;  %5087 = vmatprep.mubr.msk.f32.mxu1 %vm4333_vm15, %v9317_v50 }
 0x748   : > { %v4238_v9 = vpop.permute.xlu1 %4237  ;;  %v4228_v48 = vpop.permute.xlu0 %4227  ;;  %6100 = vmatpush3.bf16.msra.mxu1 %v9320_v56 }
 0x749   : > { %v4230_v24 = vsel %vm3836_vm10, %v4224_v13, %v4228_v48  ;;  %v4232_v36 = vsel %vm3836_vm10, %v4228_v48, %v4224_v13  ;;  %v6009_v13 = vpack.c.bf16 %v9075_v55, %v9069_v31  ;;  %v6011_v48 = vpack.c.bf16 %v9046_v11, %v9040_v60 }
 0x74a   : > { %v4235_v46 = vmul.f32 %v4232_v36, %v8817_v35  ;;  %v4236_v54 = vmul.f32 %v4230_v24, %v8820_v27  ;;  %4616 = vmatmul.mubr.f32.gmra.mrb[30].mxu1 %v9332_v5 }
 0x74c   : > { %v5999_v2 = vpack.c.bf16 %v4235_v46, %v4233_v33  ;;  %v4242_v15 = vpop.permute.xlu1 %4241  ;;  %v4240_v40 = vpop.permute.xlu0 %4239  ;;  %v5997_v29 = vpack.c.bf16 %v4236_v54, %v4234_v7 }
 0x74d   : > { %v4245_v49 = vsel %vm3853_vm11, %v4238_v9, %v4242_v15  ;;  %v4247_v17 = vsel %vm3853_vm11, %v4242_v15, %v4238_v9 }
 0x74e   : > { %5998 = vmatprep.subr.bf16.mxu0 %v5997_v29  ;;  %v4249_v16 = vmul.f32 %v4247_v17, %v8836_v57  ;;  %v4250_v25 = vmul.f32 %v4245_v49, %v8839_v44 }
 0x74f   : > { %6000 = vmatpush1.bf16.msra.mxu0 %v5999_v2 }
 0x750   : > { %v4254_v47 = vpop.permute.xlu1 %4253  ;;  %v4244_v37 = vpop.permute.xlu0 %4243 }
 0x751   : > { %v4246_v35 = vsel %vm3853_vm11, %v4240_v40, %v4244_v37  ;;  %v4248_v27 = vsel %vm3853_vm11, %v4244_v37, %v4240_v40 }
 0x752   : > { %v4251_v61 = vmul.f32 %v4248_v27, %v8836_v57  ;;  %v4252_v34 = vmul.f32 %v4246_v35, %v8839_v44 }
 0x754   : > { %v6003_v6 = vpack.c.bf16 %v4251_v61, %v4249_v16  ;;  %v4258_v23 = vpop.permute.xlu1 %4257  ;;  %v4256_v8 = vpop.permute.xlu0 %4255  ;;  %v6001_v45 = vpack.c.bf16 %v4252_v34, %v4250_v25 }
 0x755   : > { %v4261_v4 = vsel %vm707_vm3, %v4254_v47, %v4258_v23  ;;  %v4263_v14 = vsel %vm707_vm3, %v4258_v23, %v4254_v47 }
 0x756   : > { %6002 = vmatprep.subr.bf16.mxu0 %v6001_v45  ;;  %v4265_v44 = vmul.f32 %v4263_v14, %v8842_v43  ;;  %v4266_v32 = vmul.f32 %v4261_v4, %v8845_v12 }
 0x757   : > { %6004 = vmatpush1.bf16.msra.mxu0 %v6003_v6 }
 0x758   : > { %v4270_v26 = vpop.permute.xlu1 %4269  ;;  %v4260_v58 = vpop.permute.xlu0 %4259 }
 0x759   : > { %v4262_v52 = vsel %vm707_vm3, %v4256_v8, %v4260_v58  ;;  %v4264_v57 = vsel %vm707_vm3, %v4260_v58, %v4256_v8 }
 0x75a   : > { %v4267_v63 = vmul.f32 %v4264_v57, %v8842_v43  ;;  %v4268_v30 = vmul.f32 %v4262_v52, %v8845_v12 }
 0x75c   : > { %v6007_v0 = vpack.c.bf16 %v4267_v63, %v4265_v44  ;;  %v4274_v42 = vpop.permute.xlu1 %4273  ;;  %v4272_v3 = vpop.permute.xlu0 %4271  ;;  %v6005_v1 = vpack.c.bf16 %v4268_v30, %v4266_v32 }
 0x75d   : > { %v4277_v18 = vsel %vm740_vm4, %v4270_v26, %v4274_v42  ;;  %v4279_v19 = vsel %vm740_vm4, %v4274_v42, %v4270_v26 }
 0x75e   : > { %6006 = vmatprep.subr.bf16.mxu0 %v6005_v1  ;;  %v4281_v31 = vmul.f32 %v4277_v18, %v8856_v39  ;;  %v4282_v55 = vmul.f32 %v4279_v19, %v8859_v51  ;;  %v4661_v18 = vld [vmem:[%s9567_s14 + $0x28] sm:$0xff] }
 0x75f   : > { %6008 = vmatpush1.bf16.msra.mxu0 %v6007_v0 }
 0x760   : > { %v4286_v22 = vpop.permute.xlu1 %4285  ;;  %6010 = vmatprep.subr.bf16.mxu0 %v6009_v13  ;;  %v4276_v43 = vpop.permute.xlu0 %4275  ;;  %v4660_v13 = vld [vmem:[%s9567_s14 + $0x20] sm:$0xff] }
 0x761   : > { %v4278_v12 = vsel %vm740_vm4, %v4272_v3, %v4276_v43  ;;  %v4280_v9 = vsel %vm740_vm4, %v4276_v43, %v4272_v3  ;;  %v6075_v19 = vpack.c.bf16 %v4661_v18, %v4660_v13  ;;  %v4679_v43 = vld [vmem:[%s9567_s14 + $0xb8] sm:$0xff] }
 0x762   : > { %v4283_v24 = vmul.f32 %v4278_v12, %v8856_v39  ;;  %v4284_v36 = vmul.f32 %v4280_v9, %v8859_v51  ;;  %v4662_v9 = vld [vmem:[%s9567_s14 + $0x30] sm:$0xff] }
 0x763   : > { %6012 = vmatpush1.bf16.msra.mxu0 %v6011_v48  ;;  %v4663_v48 = vld [vmem:[%s9567_s14 + $0x38] sm:$0xff] }
 0x764   : > { %v6015_v33 = vpack.c.bf16 %v4283_v24, %v4281_v31  ;;  %v4290_v7 = vpop.permute.xlu1 %4289  ;;  %v4288_v46 = vpop.permute.xlu0 %4287  ;;  %v6013_v54 = vpack.c.bf16 %v4284_v36, %v4282_v55  ;;  %v6079_v31 = vpack.c.bf16 %v4663_v48, %v4662_v9  ;;  %v4680_v55 = vld [vmem:[%s9567_s14 + $0xc0] sm:$0xff]  ;;  %v4681_v24 = vld [vmem:[%s9567_s14 + $0xc8] sm:$0xff] }
 0x765   : > { %v4293_v2 = vsel %vm3902_vm12, %v4286_v22, %v4290_v7  ;;  %v4295_v60 = vsel %vm3902_vm12, %v4290_v7, %v4286_v22  ;;  %v4678_v22 = vld [vmem:[%s9567_s14 + $0xb0] sm:$0xff]  ;;  %v6081_v36 = vpack.c.bf16 %v4681_v24, %v4680_v55  ;;  %v4665_v7 = vld [vmem:[%s9567_s14 + $0x48] sm:$0xff] }
 0x766   : > { %6014 = vmatprep.subr.bf16.mxu0 %v6013_v54  ;;  %v4297_v40 = vmul.f32 %v4293_v2, %v8875_v10  ;;  %v4298_v29 = vmul.f32 %v4295_v60, %v8878_v41  ;;  %v6077_v12 = vpack.c.bf16 %v4679_v43, %v4678_v22  ;;  %v4682_v54 = vld [vmem:[%s9567_s14 + $0xd0] sm:$0xff]  ;;  %v4683_v2 = vld [vmem:[%s9567_s14 + $0xd8] sm:$0xff] }
 0x767   : > { %6016 = vmatpush1.bf16.msra.mxu0 %v6015_v33  ;;  %v4664_v33 = vld [vmem:[%s9567_s14 + $0x40] sm:$0xff]  ;;  %v6085_v60 = vpack.c.bf16 %v4683_v2, %v4682_v54 }
 0x768   : > { %v4302_v11 = vpop.permute.xlu1 %4301  ;;  %v4292_v15 = vpop.permute.xlu0 %4291  ;;  %v4648_v2 = vld [vmem:[%s9513_s16] sm:$0xff] }
 0x769   : > { %v4294_v39 = vsel %vm3902_vm12, %v4288_v46, %v4292_v15  ;;  %v4296_v51 = vsel %vm3902_vm12, %v4292_v15, %v4288_v46  ;;  %v6083_v46 = vpack.c.bf16 %v4665_v7, %v4664_v33  ;;  %v4667_v15 = vld [vmem:[%s9567_s14 + $0x58] sm:$0xff] }
 0x76a   : > { %v4299_v49 = vmul.f32 %v4294_v39, %v8875_v10  ;;  %v4300_v17 = vmul.f32 %v4296_v51, %v8878_v41  ;;  %v4684_v51 = vld [vmem:[%s9567_s14 + $0xe0] sm:$0xff] }
 0x76c   : > { %v6019_v47 = vpack.c.bf16 %v4299_v49, %v4297_v40  ;;  %v4306_v37 = vpop.permute.xlu1 %4305  ;;  %v4304_v35 = vpop.permute.xlu0 %4303  ;;  %v6017_v27 = vpack.c.bf16 %v4300_v17, %v4298_v29  ;;  %v4685_v40 = vld [vmem:[%s9567_s14 + $0xe8] sm:$0xff]  ;;  %v4668_v49 = vld [vmem:[%s9567_s14 + $0x60] sm:$0xff] }
 0x76d   : > { %v4309_v16 = vsel %vm3919_vm13, %v4302_v11, %v4306_v37  ;;  %v4311_v25 = vsel %vm3919_vm13, %v4306_v37, %v4302_v11  ;;  %v4666_v11 = vld [vmem:[%s9567_s14 + $0x50] sm:$0xff]  ;;  %v6089_v29 = vpack.c.bf16 %v4685_v40, %v4684_v51  ;;  %v4669_v17 = vld [vmem:[%s9567_s14 + $0x68] sm:$0xff]  ;;  %v4688_v51 = vmul.f32 %v4648_v2, %v4648_v2 }
 0x76e   : > { %6018 = vmatprep.subr.bf16.mxu0 %v6017_v27  ;;  %v4313_v41 = vmul.f32 %v4309_v16, %v8882_v62  ;;  %v4314_v23 = vmul.f32 %v4311_v25, %v8885_v28  ;;  %v6087_v39 = vpack.c.bf16 %v4667_v15, %v4666_v11  ;;  %v4686_v37 = vld [vmem:[%s9567_s14 + $0xf0] sm:$0xff]  ;;  %v4671_v25 = vld [vmem:[%s9567_s14 + $0x78] sm:$0xff]  ;;  %v4649_v15 = vld [vmem:[%s9513_s16 + $0x8] sm:$0xff] }
 0x76f   : > { %6020 = vmatpush1.bf16.msra.mxu0 %v6019_v47  ;;  %v6091_v47 = vpack.c.bf16 %v4669_v17, %v4668_v49  ;;  %v4670_v27 = vld [vmem:[%s9567_s14 + $0x70] sm:$0xff] }
 0x770   : > { %v4318_v61 = vpop.permute.xlu1 %4317  ;;  %v4308_v34 = vpop.permute.xlu0 %4307 }
 0x771   : > { %v4310_v6 = vsel %vm3919_vm13, %v4304_v35, %v4308_v34  ;;  %v4312_v10 = vsel %vm3919_vm13, %v4308_v34, %v4304_v35  ;;  %v4687_v35 = vld [vmem:[%s9567_s14 + $0xf8] sm:$0xff]  ;;  %v4650_v34 = vld [vmem:[%s9513_s16 + $0x10] sm:$0xff] }
 0x772   : > { %v4315_v8 = vmul.f32 %v4310_v6, %v8882_v62  ;;  %v4316_v45 = vmul.f32 %v4312_v10, %v8885_v28  ;;  %v6093_v16 = vpack.c.bf16 %v4687_v35, %v4686_v37  ;;  %v4654_v6 = vld [vmem:[%s9513_s16 + $0x30] sm:$0xff]  ;;  %v4651_v10 = vld [vmem:[%s9513_s16 + $0x18] sm:$0xff] }
 0x774   : > { %v6023_v4 = vpack.c.bf16 %v4315_v8, %v4313_v41  ;;  %v4322_v14 = vpop.permute.xlu1 %4321  ;;  %v4320_v26 = vpop.permute.xlu0 %4319  ;;  %v6021_v58 = vpack.c.bf16 %v4316_v45, %v4314_v23  ;;  %v4655_v41 = vld [vmem:[%s9513_s16 + $0x38] sm:$0xff]  ;;  %v4690_v23 = vmul.f32 %v4650_v34, %v4650_v34  ;;  %v4694_v8 = vmul.f32 %v4654_v6, %v4654_v6 }
 0x775   : > { %v4325_v52 = vsel %vm3936_vm14, %v4318_v61, %v4322_v14  ;;  %v4327_v57 = vsel %vm3936_vm14, %v4322_v14, %v4318_v61  ;;  %v6095_v61 = vpack.c.bf16 %v4671_v25, %v4670_v27  ;;  %v4691_v45 = vmul.f32 %v4651_v10, %v4651_v10 }
 0x776   : > { %6022 = vmatprep.subr.bf16.mxu0 %v6021_v58  ;;  %v4329_v28 = vmul.f32 %v8910_v59, %v4325_v52  ;;  %v4330_v63 = vmul.f32 %v8903_v38, %v4327_v57  ;;  %v4710_v14 = vadd.f32 %v4694_v8, %v4690_v23 }
 0x777   : > { %6024 = vmatpush1.bf16.msra.mxu0 %v6023_v4  ;;  %v4695_v4 = vmul.f32 %v4655_v41, %v4655_v41 }
 0x778   : > { %v4324_v44 = vpop.permute.xlu0 %4323  ;;  %v4711_v58 = vrot.slane %v4710_v14, 4 }
 0x779   : > { %v4326_v32 = vsel %vm3936_vm14, %v4320_v26, %v4324_v44  ;;  %v4328_v62 = vsel %vm3936_vm14, %v4324_v44, %v4320_v26  ;;  %v4717_v26 = vadd.f32 %v4695_v4, %v4691_v45 }
 0x77a   : > { %v4331_v30 = vmul.f32 %v8910_v59, %v4326_v32  ;;  %v4332_v0 = vmul.f32 %v8903_v38, %v4328_v62  ;;  %v4675_v38 = vld [vmem:[%s9567_s14 + $0x98] sm:$0xff]  ;;  %v4712_v57 = vadd.f32 %v4711_v58, %v4710_v14 }
 0x77b   : > { %v6069_v59 = vpack.c.bf16 %v4675_v38, %v4674_v21  ;;  %v4718_v52 = vrot.slane %v4717_v26, 4 }
 0x77c   : > { %v6027_v42 = vpack.c.bf16 %v4331_v30, %v4329_v28  ;;  %v6025_v3 = vpack.c.bf16 %v4332_v0, %v4330_v63  ;;  %v4713_v32 = vrot.slane %v4712_v57, 2 }
 0x77d   : > { %6102 = vmatprep.subr.bf16.mxu1 %v6069_v59  ;;  %v4719_v44 = vadd.f32 %v4718_v52, %v4717_v26 }
 0x77e   : > { %6026 = vmatprep.subr.bf16.mxu0 %v6025_v3  ;;  %v4714_v28 = vadd.f32 %v4713_v32, %v4712_v57 }
 0x77f   : > { %6028 = vmatpush1.bf16.msra.mxu0 %v6027_v42  ;;  %v4720_v62 = vrot.slane %v4719_v44, 2 }
 0x780   : > { %6066 = vmatprep.subr.bf16.mxu0 %v9291_v53  ;;  %v4658_v53 = vld [vmem:[%s9567_s14 + $0x10] sm:$0xff]  ;;  %v4715_v30 = vrot.slane %v4714_v28, 1 }
 0x781   : > { %v4721_v63 = vadd.f32 %v4720_v62, %v4719_v44 }
 0x782   : > { %4405 = vmatmul.mubr.f32.vlgmr.msra.gmra.mrb[28].mxu0 %v9312_v20  ;;  %v4659_v20 = vld [vmem:[%s9567_s14 + $0x18] sm:$0xff]  ;;  %v4716_v42 = vadd.f32 %v4715_v30, %v4714_v28 }
 0x783   : > { %5085 = vmatprep.mubr.msk.f32.mxu0 %vm4333_vm15, %v9317_v50  ;;  %6068 = vmatpush3.bf16.msra.mxu0 %v9320_v56  ;;  %v6071_v50 = vpack.c.bf16 %v4659_v20, %v4658_v53  ;;  %v4676_v56 = vld [vmem:[%s9567_s14 + $0xa0] sm:$0xff]  ;;  %v4722_v0 = vrot.slane %v4721_v63, 1 }
 0x784   : > { %6070 = vmatprep.subr.bf16.mxu0 %v6069_v59  ;;  %v4726_v21 = vmax.f32 %v4716_v42, 1e-24 }
 0x785   : > { %6104 = vmatpush3.bf16.msra.mxu1 %v6071_v50  ;;  %v4723_v3 = vadd.f32 %v4722_v0, %v4721_v63  ;;  %v9519_v59 = vpop.permute.xlu1 %4624 }
 0x786   : > { %4411 = vmatmul.mubr.f32.gmra.mrb[30].mxu0 %v9332_v5  ;;  %v4677_v5 = vld [vmem:[%s9567_s14 + $0xa8] sm:$0xff]  ;;  %6316 = vrsqrt.f32 %v4726_v21 }
 0x787   : > { %6072 = vmatpush3.bf16.msra.mxu0 %v6071_v50  ;;  %v6073_v1 = vpack.c.bf16 %v4677_v5, %v4676_v56  ;;  %v4727_v38 = vmax.f32 %v4723_v3, 1e-24 }
 0x789   : > { %6106 = vmatprep.subr.bf16.mxu1 %v6073_v1  ;;  %6074 = vmatprep.subr.bf16.mxu0 %v6073_v1  ;;  %6318 = vrsqrt.f32 %v4727_v38  ;;  %v9523_v5 = vpop.permute.xlu0 %4629 }
 0x78a   : > { %6108 = vmatpush3.bf16.msra.mxu1 %v6075_v19 }
 0x78b   : > { %6076 = vmatpush3.bf16.msra.mxu0 %v6075_v19  ;;  %6110 = vmatprep.subr.bf16.mxu1 %v6077_v12 }
 0x78c   : > { %6078 = vmatprep.subr.bf16.mxu0 %v6077_v12 }
 0x78e   : > { %6112 = vmatpush3.bf16.msra.mxu1 %v6079_v31 }
 0x78f   : > { %6080 = vmatpush3.bf16.msra.mxu0 %v6079_v31  ;;  %6114 = vmatprep.subr.bf16.mxu1 %v6081_v36 }
 0x790   : > { %6082 = vmatprep.subr.bf16.mxu0 %v6081_v36  ;;  %v6317_v22 = vpop.eup %6316 }
 0x791   : > { %v4734_v12 = vmul.f32 %v6317_v22, %v4650_v34  ;;  %v4738_v24 = vmul.f32 %v6317_v22, %v4654_v6 }
 0x792   : > { %6116 = vmatpush3.bf16.msra.mxu1 %v6083_v46 }
 0x793   : > { %6084 = vmatpush3.bf16.msra.mxu0 %v6083_v46  ;;  %6118 = vmatprep.subr.bf16.mxu1 %v6085_v60  ;;  %v6319_v43 = vpop.eup %6318 }
 0x794   : > { %6086 = vmatprep.subr.bf16.mxu0 %v6085_v60  ;;  %v4735_v9 = vmul.f32 %v6319_v43, %v4651_v10  ;;  %v4739_v33 = vmul.f32 %v6319_v43, %v4655_v41  ;;  %v4652_v60 = vld [vmem:[%s9513_s16 + $0x20] sm:$0xff] }
 0x795   : > { %v4692_v40 = vmul.f32 %v4652_v60, %v4652_v60 }
 0x796   : > { %6120 = vmatpush3.bf16.msra.mxu1 %v6087_v39 }
 0x797   : > { %6088 = vmatpush3.bf16.msra.mxu0 %v6087_v39  ;;  %6122 = vmatprep.subr.bf16.mxu1 %v6089_v29  ;;  %v4653_v39 = vld [vmem:[%s9513_s16 + $0x28] sm:$0xff]  ;;  %v4696_v17 = vadd.f32 %v4692_v40, %v4688_v51 }
 0x798   : > { %6090 = vmatprep.subr.bf16.mxu0 %v6089_v29  ;;  %v4689_v29 = vmul.f32 %v4649_v15, %v4649_v15  ;;  %v4693_v49 = vmul.f32 %v4653_v39, %v4653_v39 }
 0x799   : > { %v4697_v27 = vrot.slane %v4696_v17, 4 }
 0x79a   : > { %6124 = vmatpush3.bf16.msra.mxu1 %v6091_v47 }
 0x79b   : > { %6092 = vmatpush3.bf16.msra.mxu0 %v6091_v47  ;;  %6126 = vmatprep.subr.bf16.mxu1 %v6093_v16  ;;  %v4703_v47 = vadd.f32 %v4693_v49, %v4689_v29  ;;  %v4698_v34 = vadd.f32 %v4697_v27, %v4696_v17 }
 0x79c   : > { %6094 = vmatprep.subr.bf16.mxu0 %v6093_v16 }
 0x79d   : > { %v4704_v16 = vrot.slane %v4703_v47, 4  ;;  %v4699_v10 = vrot.slane %v4698_v34, 2 }
 0x79e   : > { %6128 = vmatpush3.bf16.msra.mxu1 %v6095_v61 }
 0x79f   : > { %6096 = vmatpush3.bf16.msra.mxu0 %v6095_v61  ;;  %v4705_v6 = vadd.f32 %v4704_v16, %v4703_v47  ;;  %v4700_v23 = vadd.f32 %v4699_v10, %v4698_v34 }
 0x7a1   : > { %v4706_v41 = vrot.slane %v4705_v6, 2  ;;  %v4701_v45 = vrot.slane %v4700_v23, 1 }
 0x7a3   : > { %v4707_v8 = vadd.f32 %v4706_v41, %v4705_v6  ;;  %v4702_v14 = vadd.f32 %v4701_v45, %v4700_v23 }
 0x7a5   : > { %v4708_v4 = vrot.slane %v4707_v8, 1  ;;  %v4724_v58 = vmax.f32 %v4702_v14, 1e-24 }
 0x7a7   : > { %v4709_v26 = vadd.f32 %v4708_v4, %v4707_v8 }
 0x7a9   : > { %v4725_v52 = vmax.f32 %v4709_v26, 1e-24 }
 0x819   : > { %v4611_v53 = vpop.f32.mrb[28].mxu1 }
 0x81a   : > { %v4634_v20 = vadd.f32 %v9519_v59, %v4611_v53  ;;  %v4613_v50 = vpop.f32.mrb[29].mxu1 }
 0x81b   : > { %v4635_v56 = vadd.f32 %v9519_v59, %v4613_v50 }
 0x81c   : > { %6320 = vtanh.f32 %v4634_v20 }
 0x81d   : > { %6322 = vtanh.f32 %v4635_v56  ;;  %v4617_v1 = vpop.f32.mrb[30].mxu1 }
 0x81e   : > { %v4638_v13 = vadd.f32 %v9523_v5, %v4617_v1  ;;  %v4619_v18 = vpop.f32.mrb[31].mxu1 }
 0x81f   : > { %v4639_v19 = vadd.f32 %v9523_v5, %v4619_v18 }
 0x820   : > { %6324 = vtanh.f32 %v4638_v13 }
 0x821   : > { %6326 = vtanh.f32 %v4639_v19 }
 0x826   : > { %v6321_v48 = vpop.eup %6320 }
 0x827   : > { %v6323_v31 = vpop.eup %6322  ;;  %v4742_v55 = vmul.f32 %v6321_v48, %v4734_v12 }
 0x828   : > { %v4743_v36 = vmul.f32 %v6323_v31, %v4735_v9 }
 0x82a   : > { %v6325_v7 = vpop.eup %6324  ;;  %6328 = vtanh.f32 %v4743_v36 }
 0x82b   : > { %v6327_v46 = vpop.eup %6326  ;;  %6330 = vtanh.f32 %v4742_v55  ;;  %v4746_v54 = vmul.f32 %v6325_v7, %v4738_v24 }
 0x82c   : > { %v4747_v11 = vmul.f32 %v6327_v46, %v4739_v33 }
 0x82e   : > { %6332 = vtanh.f32 %v4747_v11 }
 0x82f   : > { %6334 = vtanh.f32 %v4746_v54 }
 0x830   : > { %6336 = vrsqrt.f32 %v4724_v58 }
 0x831   : > { %6338 = vrsqrt.f32 %v4725_v52 }
 0x834   : > { %v6329_v37 = vpop.eup %6328 }
 0x835   : > { %v6331_v35 = vpop.eup %6330  ;;  %4895 = vmatprep.mubr.f32.mxu1 %v6329_v37 }
 0x836   : > { %4896 = vmatmul.mubr.f32.vlgmr.msra.gmra.mrb[32].mxu1 %v6331_v35 }
 0x838   : > { %v6333_v25 = vpop.eup %6332 }
 0x839   : > { %v6335_v61 = vpop.eup %6334  ;;  %4900 = vmatprep.mubr.f32.mxu1 %v6333_v25 }
 0x83a   : > { %4901 = vmatmul.mubr.f32.gmra.mrb[34].mxu1 %v6335_v61  ;;  %v6337_v42 = vpop.eup %6336 }
 0x83b   : > { %v6339_v3 = vpop.eup %6338  ;;  %v4732_v21 = vmul.f32 %v6337_v42, %v4648_v2  ;;  %v4736_v56 = vmul.f32 %v6337_v42, %v4652_v60 }
 0x83c   : > { %v4733_v38 = vmul.f32 %v6339_v3, %v4649_v15 }
 0x855   : > { %v4406_v57 = vpop.f32.mrb[28].mxu0 }
 0x856   : > { %v4632_v44 = vadd.f32 %v9519_v59, %v4406_v57  ;;  %v4408_v32 = vpop.f32.mrb[29].mxu0 }
 0x857   : > { %v4633_v62 = vadd.f32 %v9519_v59, %v4408_v32  ;;  %v4737_v59 = vmul.f32 %v6339_v3, %v4653_v39 }
 0x858   : > { %6340 = vtanh.f32 %v4632_v44 }
 0x859   : > { %6342 = vtanh.f32 %v4633_v62  ;;  %v4412_v28 = vpop.f32.mrb[30].mxu0 }
 0x85a   : > { %v4636_v63 = vadd.f32 %v9523_v5, %v4412_v28  ;;  %v4414_v30 = vpop.f32.mrb[31].mxu0 }
 0x85b   : > { %v4637_v0 = vadd.f32 %v9523_v5, %v4414_v30 }
 0x85c   : > { %6344 = vtanh.f32 %v4636_v63 }
 0x85d   : > { %6346 = vtanh.f32 %v4637_v0 }
 0x862   : > { %v6341_v53 = vpop.eup %6340 }
 0x863   : > { %v6343_v20 = vpop.eup %6342  ;;  %v4740_v50 = vmul.f32 %v6341_v53, %v4732_v21 }
 0x864   : > { %v4741_v1 = vmul.f32 %v6343_v20, %v4733_v38 }
 0x866   : > { %v6345_v13 = vpop.eup %6344  ;;  %6348 = vtanh.f32 %v4741_v1 }
 0x867   : > { %v6347_v18 = vpop.eup %6346  ;;  %6350 = vtanh.f32 %v4740_v50  ;;  %v4744_v19 = vmul.f32 %v6345_v13, %v4736_v56 }
 0x868   : > { %v4745_v22 = vmul.f32 %v6347_v18, %v4737_v59 }
 0x86a   : > { %6352 = vtanh.f32 %v4745_v22 }
 0x86b   : > { %6354 = vtanh.f32 %v4744_v19 }
 0x870   : > { %v6349_v5 = vpop.eup %6348 }
 0x871   : > { %v6351_v43 = vpop.eup %6350  ;;  %4820 = vmatprep.mubr.f32.mxu0 %v6349_v5 }
 0x872   : > { %4821 = vmatmul.mubr.f32.vlgmr.msra.gmra.mrb[32].mxu0 %v6351_v43 }
 0x874   : > { %v6353_v12 = vpop.eup %6352 }
 0x875   : > { %v6355_v9 = vpop.eup %6354  ;;  %4825 = vmatprep.mubr.f32.mxu0 %v6353_v12 }
 0x876   : > { %4826 = vmatmul.mubr.f32.gmra.mrb[34].mxu0 %v6355_v9 }
 0x909   : > { %v5443_v48 = vpop.f32.mrb[32].mxu1 }
 0x90a   : > { %v5444_v31 = vpop.f32.mrb[33].mxu1 }
 0x90b   : > { %v5445_v55 = vadd.f32 %v5444_v31, %v5443_v48 }
 0x90d   : > { %v5446_v24 = vpop.f32.mrb[34].mxu1  ;;  %4908 = vrot.lane.b32.xlu1 %v5445_v55, %s6401_s15 }
 0x90e   : > { %v5447_v36 = vpop.f32.mrb[35].mxu1 }
 0x90f   : > { %v5448_v33 = vadd.f32 %v5447_v36, %v5446_v24 }
 0x911   : > { %4910 = vrot.lane.b32.xlu0 %v5448_v33, %s6401_s15 }
 0x945   : > { %v5405_v7 = vpop.f32.mrb[32].mxu0 }
 0x946   : > { %v5406_v46 = vpop.f32.mrb[33].mxu0 }
 0x947   : > { %v5407_v54 = vadd.f32 %v5406_v46, %v5405_v7 }
 0x949   : > { %v5408_v2 = vpop.f32.mrb[34].mxu0 }
 0x94a   : > { %v5409_v60 = vpop.f32.mrb[35].mxu0 }
 0x94b   : > { %v5410_v11 = vadd.f32 %v5409_v60, %v5408_v2 }
 0x97f   : > { %v4909_v15 = vpop.permute.xlu1 %4908  ;;  %4925 = sbr.rel (!%p6513_p5) target bundleno = 2446 (0x98e), region = 107 }
 0x980   : > { %v4915_v39 = vsel %vm4914_vm0, %v5407_v54, %v4909_v15 }
 0x981   : > { %4917 = vst [vmem:[%s554_s27] sm:$0xff] %v4915_v39 }
 0x983   : > { %v4911_v51 = vpop.permute.xlu0 %4910 }
 0x984   : > { %v4916_v40 = vsel %vm4914_vm0, %v5410_v11, %v4911_v51 }
 0x985   : > { %4918 = vst [vmem:[%s554_s27 + $0x8] sm:$0xff] %v4916_v40 }
 0x988   : > { %v4957_v29 = vld [vmem:[%s554_s27] sm:$0xff] }
 0x989   : > { %4958 = vst [vmem:[%s4927_s18] sm:$0xff] %v4957_v29 }
 0x98c   : > { %v4959_v49 = vld [vmem:[%s554_s27 + $0x8] sm:$0xff] }
 0x98d   : > { %4960 = vst [vmem:[%s4927_s18 + $0x10] sm:$0xff] %v4959_v49 }
 0x98e PF: > { %s9651_s20 = sld [smem:[#allocation5_spill]]  ;;  %s9652_s18 = sld [smem:[#allocation4_spill]] }
 0x98f   : > { %s9653_s19 = sld [smem:[#allocation6_spill]] }
 0x994   : > { %p22_p11 = scmp.ge.s32.totalorder %s9651_s20, 4  }
 0x996   :  { %24 = sbr.rel (!%p22_p11) target bundleno = 6 (0x6), region = 182 }

</bundles_post_ra>
